<compile_context>
chip_gen: v5e
topology: v5e:2x2
jax: 0.10.0
libtpu: 0.0.40
codegen_flags: <defaults>
</compile_context>

<pallas_src>
import functools
import math

import jax
import jax.numpy as jnp
from jax.experimental import pallas as pl
from jax.experimental.pallas import tpu as pltpu

_LANE = 128


# ---------------------------------------------------------------------------
# small helpers
# ---------------------------------------------------------------------------
def _round_up(n, m):
    return (n + m - 1) // m * m


def _pad_axis(a, axis, mult=_LANE):
    size = a.shape[axis]
    pad = _round_up(size, mult) - size
    if pad == 0:
        return a
    widths = [(0, 0)] * a.ndim
    widths[axis] = (0, pad)
    return jnp.pad(a, widths)


def _pick_tile_rows(H, W, target_rows=1024):
    """Largest power-of-two divisor of H with th*W <= target_rows (sublane tile)."""
    best, t = 1, 1
    while t <= H:
        if H % t == 0 and t * W <= max(target_rows, W):
            best = t
        t *= 2
    th = best
    if (th * W) % 8 != 0 and th * W != H * W:   # keep flattened tile sublane-aligned
        th = H
    return th


# ---------------------------------------------------------------------------
# Pallas kernels
# ---------------------------------------------------------------------------
def _conv3x3_tile(x_ref, sty_ref, w_ref, dcoef_ref, noise_ref, bias_ref,
                  xm_ref, *, th, W, act_gain, clamp):
    """Modulated 3x3 conv (unfused decomposition) + demod + noise + bias +
    lrelu + clamp for one (sample, row-tile) block.  Returns f32 [th*W, Co]."""
    h = pl.program_id(1)
    Ci = w_ref.shape[2]
    Co = w_ref.shape[3]
    # Unfused modconv: scale the activation by the per-sample style ONCE for
    # the whole halo'd row tile (staged through VMEM scratch), instead of once
    # per (dy, dx) window -> ~9x less VPU multiply work.
    xm_ref[...] = x_ref[0, pl.ds(h * th, th + 2), :, :] * sty_ref[0]
    acc = None
    for dy in range(3):
        for dx in range(3):
            # shifted window of the modulated tile: [th, W, Ci] -> [th*W, Ci]
            win = xm_ref[pl.ds(dy, th), pl.ds(dx, W), :].reshape(th * W, Ci)
            part = jnp.dot(win, w_ref[dy, dx],
                           preferred_element_type=jnp.float32)
            acc = part if acc is None else acc + part
    acc = acc * dcoef_ref[0] + noise_ref[0] + bias_ref[0]   # demod + noise + bias
    acc = jnp.maximum(acc, 0.2 * acc) * act_gain            # leaky-relu(0.2) * gain
    return jnp.clip(acc, -clamp, clamp)


def _conv3x3_kernel(x_ref, sty_ref, w_ref, dcoef_ref, noise_ref, bias_ref,
                    out_ref, xm_ref, *, th, W, act_gain, clamp):
    tile = _conv3x3_tile(x_ref, sty_ref, w_ref, dcoef_ref, noise_ref, bias_ref,
                         xm_ref, th=th, W=W, act_gain=act_gain, clamp=clamp)
    out_ref[0] = tile.astype(out_ref.dtype)


def _conv3x3_torgb_kernel(x_ref, sty_ref, w_ref, dcoef_ref, noise_ref, bias_ref,
                          sty_rgb_ref, w_rgb_ref, b_rgb_ref,
                          x_out_ref, y_out_ref, xm_ref, *,
                          th, W, act_gain, clamp, rgb_clamp):
    tile = _conv3x3_tile(x_ref, sty_ref, w_ref, dcoef_ref, noise_ref, bias_ref,
                         xm_ref, th=th, W=W, act_gain=act_gain, clamp=clamp)
    x_out_ref[0] = tile.astype(x_out_ref.dtype)
    # fused ToRGB: 1x1 modulated conv (no demod, no noise, linear act + clamp)
    xr = tile.astype(jnp.bfloat16) * sty_rgb_ref[0]          # [th*W, Co] bf16
    y = jnp.dot(xr, w_rgb_ref[...], preferred_element_type=jnp.float32)
    y = y + b_rgb_ref[0]
    y_out_ref[0] = jnp.clip(y, -rgb_clamp, rgb_clamp).astype(y_out_ref.dtype)


# ---------------------------------------------------------------------------
# pallas_call wrappers
# ---------------------------------------------------------------------------
def _common_specs(H, W, Ci, Co, th):
    return [
        pl.BlockSpec((1, H + 2, W + 2, Ci), lambda n, h: (n, 0, 0, 0)),  # padded x
        pl.BlockSpec((1, 1, Ci), lambda n, h: (n, 0, 0)),                # styles
        pl.BlockSpec((3, 3, Ci, Co), lambda n, h: (0, 0, 0, 0)),         # shared w
        pl.BlockSpec((1, 1, Co), lambda n, h: (n, 0, 0)),                # dcoef
        pl.BlockSpec((1, th * W, 1), lambda n, h: (0, h, 0)),            # noise
        pl.BlockSpec((1, 1, Co), lambda n, h: (0, 0, 0)),                # bias
    ]


def modconv3x3_pallas(x_pad, styles, weight, dcoef, noise, bias, *,
                      H, W, th, act_gain, clamp, out_dtype):
    N = x_pad.shape[0]
    Ci, Co = weight.shape[2], weight.shape[3]
    kernel = functools.partial(_conv3x3_kernel, th=th, W=W,
                               act_gain=float(act_gain), clamp=float(clamp))
    return pl.pallas_call(
        kernel,
        out_shape=jax.ShapeDtypeStruct((N, H * W, Co), out_dtype),
        grid=(N, H // th),
        in_specs=_common_specs(H, W, Ci, Co, th),
        out_specs=pl.BlockSpec((1, th * W, Co), lambda n, h: (n, h, 0)),
        scratch_shapes=[pltpu.VMEM((th + 2, W + 2, Ci), jnp.bfloat16)],
        compiler_params=pltpu.CompilerParams(
            dimension_semantics=("parallel", "parallel")),
    )(x_pad, styles, weight, dcoef, noise, bias)


def modconv3x3_torgb_pallas(x_pad, styles, weight, dcoef, noise, bias,
                            styles_rgb, w_rgb, b_rgb, *,
                            H, W, th, act_gain, clamp, rgb_clamp):
    N = x_pad.shape[0]
    Ci, Co = weight.shape[2], weight.shape[3]
    Crgb = w_rgb.shape[1]
    kernel = functools.partial(_conv3x3_torgb_kernel, th=th, W=W,
                               act_gain=float(act_gain), clamp=float(clamp),
                               rgb_clamp=float(rgb_clamp))
    in_specs = _common_specs(H, W, Ci, Co, th) + [
        pl.BlockSpec((1, 1, Co), lambda n, h: (n, 0, 0)),                # rgb styles
        pl.BlockSpec((Co, Crgb), lambda n, h: (0, 0)),                   # shared rgb w
        pl.BlockSpec((1, 1, Crgb), lambda n, h: (0, 0, 0)),              # rgb bias
    ]
    return pl.pallas_call(
        kernel,
        out_shape=(jax.ShapeDtypeStruct((N, H * W, Co), jnp.float32),
                   jax.ShapeDtypeStruct((N, H * W, Crgb), jnp.float32)),
        grid=(N, H // th),
        in_specs=in_specs,
        out_specs=(pl.BlockSpec((1, th * W, Co), lambda n, h: (n, h, 0)),
                   pl.BlockSpec((1, th * W, Crgb), lambda n, h: (n, h, 0))),
        scratch_shapes=[pltpu.VMEM((th + 2, W + 2, Ci), jnp.bfloat16)],
        compiler_params=pltpu.CompilerParams(
            dimension_semantics=("parallel", "parallel")),
    )(x_pad, styles, weight, dcoef, noise, bias, styles_rgb, w_rgb, b_rgb)


# ---------------------------------------------------------------------------
# Plain-JAX glue (affine styles, demod coef, padding/layout, param prep)
# ---------------------------------------------------------------------------
def _affine(w, aw, ab):
    # FullyConnectedLayer(w_dim, C, bias_init=1): weight_gain = 1/sqrt(w_dim)
    wg = 1.0 / math.sqrt(aw.shape[1])
    return w @ (aw * wg).T + ab                             # [N, C]


def _prep_conv(p, w):
    """Shared weight / per-sample styles + demod / bias / noise for one layer."""
    weight = p["weight"]                                    # [O, Ci, 3, 3]
    styles = _affine(w, p["affine_w"], p["affine_b"])       # [N, Ci] f32
    # demod coefficient (unfused decomposition): rsqrt(sum (w*s)^2 + eps)
    w2 = jnp.sum(weight.astype(jnp.float32) ** 2, axis=(2, 3)).T        # [Ci, O]
    dcoef = jax.lax.rsqrt((styles ** 2) @ w2 + 1e-8)        # [N, O]
    # shared (ky, kx, i, o) weight, lane-padded, bf16
    w_kkio = jnp.transpose(weight, (2, 3, 1, 0))            # [3,3,Ci,O]
    w_kkio = _pad_axis(_pad_axis(w_kkio, 2), 3).astype(jnp.bfloat16)
    styles_p = _pad_axis(styles, 1)[:, None, :].astype(jnp.bfloat16)     # [N,1,Ci_p]
    dcoef_p = _pad_axis(dcoef, 1)[:, None, :].astype(jnp.float32)        # [N,1,Co_p]
    bias_p = _pad_axis(p["bias"], 0)[None, None, :].astype(jnp.float32)  # [1,1,Co_p]
    noise = (p["noise_const"] * p["noise_strength"]).reshape(1, -1, 1)
    return w_kkio, styles_p, dcoef_p, bias_p, noise.astype(jnp.float32)


def _prep_torgb(p, w):
    weight = p["weight"][:, :, 0, 0]                        # [img_ch, Ci]
    img_ch, Ci = weight.shape
    wg = 1.0 / math.sqrt(Ci)                                # weight_gain (1x1)
    styles = _affine(w, p["affine_w"], p["affine_b"]) * wg  # [N, Ci]
    styles_p = _pad_axis(styles, 1)[:, None, :].astype(jnp.bfloat16)     # [N,1,Ci_p]
    w_rgb = _pad_axis(_pad_axis(weight.T, 0), 1).astype(jnp.bfloat16)    # [Ci_p,128]
    b_rgb = _pad_axis(p["bias"], 0)[None, None, :].astype(jnp.float32)   # [1,1,128]
    return styles_p, w_rgb, b_rgb, img_ch


def synthesis_block_no_up_forward(x_nchw, img_nchw, ws, params):
    """forward(x, img, ws) for architecture='skip', in_channels != 0.
    x: [N, Cin, R, R] f32, img: [N, img_ch, R, R] f32 or None, ws: [N, 3, w_dim]."""
    N, _, H, W = x_nchw.shape
    th = _pick_tile_rows(H, W)
    act_gain = math.sqrt(2.0)                               # lrelu def_gain * gain(=1)
    clamp = 256.0                                           # conv_clamp * gain

    # layout: NCHW -> NHWC, lane-pad channels, bf16 MXU operands, 3x3 halo pad
    x = jnp.transpose(x_nchw.astype(jnp.float32), (0, 2, 3, 1))
    x = _pad_axis(x.astype(jnp.bfloat16), 3)
    x_pad = jnp.pad(x, ((0, 0), (1, 1), (1, 1), (0, 0)))

    out_ch = params["conv0"]["weight"].shape[0]
    co_pad = _round_up(out_ch, _LANE)

    # conv0 (internal activation kept bf16)
    w0, s0, d0, b0, n0 = _prep_conv(params["conv0"], ws[:, 0])
    x0 = modconv3x3_pallas(x_pad, s0, w0, d0, n0, b0, H=H, W=W, th=th,
                           act_gain=act_gain, clamp=clamp,
                           out_dtype=jnp.bfloat16)          # [N, H*W, co_pad]
    x0_pad = jnp.pad(x0.reshape(N, H, W, co_pad),
                     ((0, 0), (1, 1), (1, 1), (0, 0)))

    # conv1 + fused torgb (1x1) in one pallas_call
    w1, s1, d1, b1, n1 = _prep_conv(params["conv1"], ws[:, 1])
    srgb, wrgb, brgb, img_ch = _prep_torgb(params["torgb"], ws[:, 2])
    x1, y = modconv3x3_torgb_pallas(x0_pad, s1, w1, d1, n1, b1,
                                    srgb, wrgb, brgb, H=H, W=W, th=th,
                                    act_gain=act_gain, clamp=clamp,
                                    rgb_clamp=256.0)

    x1 = x1.reshape(N, H, W, co_pad)[:, :, :, :out_ch]
    y = y.reshape(N, H, W, wrgb.shape[1])[:, :, :, :img_ch]

    x_out = jnp.transpose(x1, (0, 3, 1, 2)).astype(jnp.float32)
    y_nchw = jnp.transpose(y, (0, 3, 1, 2)).astype(jnp.float32)
    img_out = y_nchw if img_nchw is None else img_nchw.astype(jnp.float32) + y_nchw
    return x_out, img_out


# ---------------------------------------------------------------------------
# Deterministic parameter init (matches the module's __init__ shapes)
# ---------------------------------------------------------------------------
def init_params(key, in_ch, out_ch, w_dim, res, img_ch):
    ks = jax.random.split(key, 10)

    def conv_layer(kw_aff, kw_conv, kw_noise, cin, cout):
        return dict(
            affine_w=jax.random.normal(kw_aff, (cin, w_dim), jnp.float32),
            affine_b=jnp.ones((cin,), jnp.float32),            # bias_init=1
            weight=jax.random.normal(kw_conv, (cout, cin, 3, 3), jnp.float32),
            bias=jnp.zeros((cout,), jnp.float32),
            noise_const=jax.random.normal(kw_noise, (res, res), jnp.float32),
            noise_strength=jnp.zeros((), jnp.float32),
        )

    return dict(
        conv0=conv_layer(ks[0], ks[1], ks[2], in_ch, out_ch),
        conv1=conv_layer(ks[3], ks[4], ks[5], out_ch, out_ch),
        torgb=dict(
            affine_w=jax.random.normal(ks[6], (out_ch, w_dim), jnp.float32),
            affine_b=jnp.ones((out_ch,), jnp.float32),
            weight=jax.random.normal(ks[7], (img_ch, out_ch, 1, 1), jnp.float32),
            bias=jnp.zeros((img_ch,), jnp.float32),
        ),
    )


if __name__ == "__main__":
    in_channels, out_channels = 4, 8
    w_dim, resolution, img_channels = 32, 16, 3
    N = 2

    key = jax.random.PRNGKey(0)
    k_p, k_x, k_img, k_ws = jax.random.split(key, 4)

    params = init_params(k_p, in_channels, out_channels, w_dim,
                         resolution, img_channels)
    x = jax.random.normal(k_x, (N, in_channels, resolution, resolution),
                          jnp.float32)
    img = jax.random.normal(k_img, (N, img_channels, resolution, resolution),
                            jnp.float32)
    # ws: [N, num_conv + num_torgb, w_dim] = [N, 3, w_dim]
    ws = jax.random.normal(k_ws, (N, 3, w_dim), jnp.float32)

    x_out, img_out = jax.jit(synthesis_block_no_up_forward)(x, img, ws, params)
    jax.block_until_ready((x_out, img_out))

    assert x_out.shape == (N, out_channels, resolution, resolution)
    assert img_out.shape == (N, img_channels, resolution, resolution)
    assert x_out.dtype == jnp.float32 and img_out.dtype == jnp.float32
    print("KERNEL_OK")
</pallas_src>

<mosaic_0001>
module attributes {stable_mosaic.version = 11 : i64} {
  func.func @_conv3x3_kernel(%arg0: i32, %arg1: i32, %arg2: memref<1x18x18x128xbf16, #tpu.memory_space<vmem>>, %arg3: memref<1x1x128xbf16, #tpu.memory_space<vmem>>, %arg4: memref<3x3x128x128xbf16, #tpu.memory_space<vmem>>, %arg5: memref<1x1x128xf32, #tpu.memory_space<vmem>>, %arg6: memref<1x256x1xf32, #tpu.memory_space<vmem>>, %arg7: memref<1x1x128xf32, #tpu.memory_space<vmem>>, %arg8: memref<1x256x128xbf16, #tpu.memory_space<vmem>>, %arg9: memref<18x18x128xbf16, #tpu.memory_space<vmem>>) attributes {dimension_semantics = [#tpu.dimension_semantics<parallel>, #tpu.dimension_semantics<parallel>], iteration_bounds = array<i64: 2, 1>, scalar_prefetch = 0 : i64, scratch_operands = 1 : i64, tpu.core_type = #tpu.core_type<tc>, window_params = [{transform_indices = @transform_0, window_bounds = array<i64: 1, 18, 18, 128>}, {transform_indices = @transform_1, window_bounds = array<i64: 1, 1, 128>}, {pipeline_mode = #tpu.pipeline_mode<synchronous>, transform_indices = @transform_2, window_bounds = array<i64: 3, 3, 128, 128>}, {transform_indices = @transform_3, window_bounds = array<i64: 1, 1, 128>}, {transform_indices = @transform_4, window_bounds = array<i64: 1, 256, 1>}, {pipeline_mode = #tpu.pipeline_mode<synchronous>, transform_indices = @transform_5, window_bounds = array<i64: 1, 1, 128>}, {transform_indices = @transform_6, window_bounds = array<i64: 1, 256, 128>}]} {
    %c16_i32 = arith.constant 16 : i32
    %0 = arith.muli %arg1, %c16_i32 : i32
    %c0 = arith.constant 0 : index
    %1 = arith.index_cast %0 : i32 to index
    %c0_0 = arith.constant 0 : index
    %c0_1 = arith.constant 0 : index
    %2 = vector.load %arg2[%c0, %1, %c0_0, %c0_1] : memref<1x18x18x128xbf16, #tpu.memory_space<vmem>>, vector<1x18x18x128xbf16>
    %3 = vector.shape_cast %2 : vector<1x18x18x128xbf16> to vector<18x18x128xbf16>
    %c0_2 = arith.constant 0 : index
    %c0_3 = arith.constant 0 : index
    %c0_4 = arith.constant 0 : index
    %4 = vector.load %arg3[%c0_2, %c0_3, %c0_4] : memref<1x1x128xbf16, #tpu.memory_space<vmem>>, vector<1x1x128xbf16>
    %5 = vector.shape_cast %4 : vector<1x1x128xbf16> to vector<1x128xbf16>
    %6 = vector.shape_cast %5 : vector<1x128xbf16> to vector<1x1x128xbf16>
    %7 = vector.broadcast %6 : vector<1x1x128xbf16> to vector<18x18x128xbf16>
    %8 = arith.mulf %3, %7 : vector<18x18x128xbf16>
    %c0_5 = arith.constant 0 : index
    %c0_6 = arith.constant 0 : index
    %c0_7 = arith.constant 0 : index
    %9 = vector.load %arg9[%c0_5, %c0_6, %c0_7] : memref<18x18x128xbf16, #tpu.memory_space<vmem>>, vector<18x18x128xbf16>
    tpu.vector_store %arg9[%c0_5, %c0_6, %c0_7], %8 {strides = array<i32>} : memref<18x18x128xbf16, #tpu.memory_space<vmem>>, vector<18x18x128xbf16>,
    %c0_8 = arith.constant 0 : index
    %c0_9 = arith.constant 0 : index
    %c0_10 = arith.constant 0 : index
    %10 = vector.load %arg9[%c0_8, %c0_9, %c0_10] : memref<18x18x128xbf16, #tpu.memory_space<vmem>>, vector<16x16x128xbf16>
    %11 = vector.shape_cast %10 : vector<16x16x128xbf16> to vector<256x128xbf16>
    %c0_11 = arith.constant 0 : index
    %c0_12 = arith.constant 0 : index
    %c0_13 = arith.constant 0 : index
    %c0_14 = arith.constant 0 : index
    %12 = vector.load %arg4[%c0_11, %c0_12, %c0_13, %c0_14] : memref<3x3x128x128xbf16, #tpu.memory_space<vmem>>, vector<1x1x128x128xbf16>
    %13 = vector.shape_cast %12 : vector<1x1x128x128xbf16> to vector<128x128xbf16>
    %cst = arith.constant dense<0.000000e+00> : vector<256x128xf32>
    %14 = tpu.matmul %11, %13, %cst {dimension_numbers = #tpu.dot_dimension_numbers<[1], [0], [0], [1], [0, 0, 1, 1], [], []>} : vector<256x128xbf16>, vector<128x128xbf16>, vector<256x128xf32> -> vector<256x128xf32>
    %c0_15 = arith.constant 0 : index
    %c1 = arith.constant 1 : index
    %c0_16 = arith.constant 0 : index
    %15 = vector.load %arg9[%c0_15, %c1, %c0_16] : memref<18x18x128xbf16, #tpu.memory_space<vmem>>, vector<16x16x128xbf16>
    %16 = vector.shape_cast %15 : vector<16x16x128xbf16> to vector<256x128xbf16>
    %c0_17 = arith.constant 0 : index
    %c1_18 = arith.constant 1 : index
    %c0_19 = arith.constant 0 : index
    %c0_20 = arith.constant 0 : index
    %17 = vector.load %arg4[%c0_17, %c1_18, %c0_19, %c0_20] : memref<3x3x128x128xbf16, #tpu.memory_space<vmem>>, vector<1x1x128x128xbf16>
    %18 = vector.shape_cast %17 : vector<1x1x128x128xbf16> to vector<128x128xbf16>
    %cst_21 = arith.constant dense<0.000000e+00> : vector<256x128xf32>
    %19 = tpu.matmul %16, %18, %cst_21 {dimension_numbers = #tpu.dot_dimension_numbers<[1], [0], [0], [1], [0, 0, 1, 1], [], []>} : vector<256x128xbf16>, vector<128x128xbf16>, vector<256x128xf32> -> vector<256x128xf32>
    %20 = arith.addf %14, %19 : vector<256x128xf32>
    %c0_22 = arith.constant 0 : index
    %c2 = arith.constant 2 : index
    %c0_23 = arith.constant 0 : index
    %21 = vector.load %arg9[%c0_22, %c2, %c0_23] : memref<18x18x128xbf16, #tpu.memory_space<vmem>>, vector<16x16x128xbf16>
    %22 = vector.shape_cast %21 : vector<16x16x128xbf16> to vector<256x128xbf16>
    %c0_24 = arith.constant 0 : index
    %c2_25 = arith.constant 2 : index
    %c0_26 = arith.constant 0 : index
    %c0_27 = arith.constant 0 : index
    %23 = vector.load %arg4[%c0_24, %c2_25, %c0_26, %c0_27] : memref<3x3x128x128xbf16, #tpu.memory_space<vmem>>, vector<1x1x128x128xbf16>
    %24 = vector.shape_cast %23 : vector<1x1x128x128xbf16> to vector<128x128xbf16>
    %cst_28 = arith.constant dense<0.000000e+00> : vector<256x128xf32>
    %25 = tpu.matmul %22, %24, %cst_28 {dimension_numbers = #tpu.dot_dimension_numbers<[1], [0], [0], [1], [0, 0, 1, 1], [], []>} : vector<256x128xbf16>, vector<128x128xbf16>, vector<256x128xf32> -> vector<256x128xf32>
    %26 = arith.addf %20, %25 : vector<256x128xf32>
    %c1_29 = arith.constant 1 : index
    %c0_30 = arith.constant 0 : index
    %c0_31 = arith.constant 0 : index
    %27 = vector.load %arg9[%c1_29, %c0_30, %c0_31] : memref<18x18x128xbf16, #tpu.memory_space<vmem>>, vector<16x16x128xbf16>
    %28 = vector.shape_cast %27 : vector<16x16x128xbf16> to vector<256x128xbf16>
    %c1_32 = arith.constant 1 : index
    %c0_33 = arith.constant 0 : index
    %c0_34 = arith.constant 0 : index
    %c0_35 = arith.constant 0 : index
    %29 = vector.load %arg4[%c1_32, %c0_33, %c0_34, %c0_35] : memref<3x3x128x128xbf16, #tpu.memory_space<vmem>>, vector<1x1x128x128xbf16>
    %30 = vector.shape_cast %29 : vector<1x1x128x128xbf16> to vector<128x128xbf16>
    %cst_36 = arith.constant dense<0.000000e+00> : vector<256x128xf32>
    %31 = tpu.matmul %28, %30, %cst_36 {dimension_numbers = #tpu.dot_dimension_numbers<[1], [0], [0], [1], [0, 0, 1, 1], [], []>} : vector<256x128xbf16>, vector<128x128xbf16>, vector<256x128xf32> -> vector<256x128xf32>
    %32 = arith.addf %26, %31 : vector<256x128xf32>
    %c1_37 = arith.constant 1 : index
    %c1_38 = arith.constant 1 : index
    %c0_39 = arith.constant 0 : index
    %33 = vector.load %arg9[%c1_37, %c1_38, %c0_39] : memref<18x18x128xbf16, #tpu.memory_space<vmem>>, vector<16x16x128xbf16>
    %34 = vector.shape_cast %33 : vector<16x16x128xbf16> to vector<256x128xbf16>
    %c1_40 = arith.constant 1 : index
    %c1_41 = arith.constant 1 : index
    %c0_42 = arith.constant 0 : index
    %c0_43 = arith.constant 0 : index
    %35 = vector.load %arg4[%c1_40, %c1_41, %c0_42, %c0_43] : memref<3x3x128x128xbf16, #tpu.memory_space<vmem>>, vector<1x1x128x128xbf16>
    %36 = vector.shape_cast %35 : vector<1x1x128x128xbf16> to vector<128x128xbf16>
    %cst_44 = arith.constant dense<0.000000e+00> : vector<256x128xf32>
    %37 = tpu.matmul %34, %36, %cst_44 {dimension_numbers = #tpu.dot_dimension_numbers<[1], [0], [0], [1], [0, 0, 1, 1], [], []>} : vector<256x128xbf16>, vector<128x128xbf16>, vector<256x128xf32> -> vector<256x128xf32>
    %38 = arith.addf %32, %37 : vector<256x128xf32>
    %c1_45 = arith.constant 1 : index
    %c2_46 = arith.constant 2 : index
    %c0_47 = arith.constant 0 : index
    %39 = vector.load %arg9[%c1_45, %c2_46, %c0_47] : memref<18x18x128xbf16, #tpu.memory_space<vmem>>, vector<16x16x128xbf16>
    %40 = vector.shape_cast %39 : vector<16x16x128xbf16> to vector<256x128xbf16>
    %c1_48 = arith.constant 1 : index
    %c2_49 = arith.constant 2 : index
    %c0_50 = arith.constant 0 : index
    %c0_51 = arith.constant 0 : index
    %41 = vector.load %arg4[%c1_48, %c2_49, %c0_50, %c0_51] : memref<3x3x128x128xbf16, #tpu.memory_space<vmem>>, vector<1x1x128x128xbf16>
    %42 = vector.shape_cast %41 : vector<1x1x128x128xbf16> to vector<128x128xbf16>
    %cst_52 = arith.constant dense<0.000000e+00> : vector<256x128xf32>
    %43 = tpu.matmul %40, %42, %cst_52 {dimension_numbers = #tpu.dot_dimension_numbers<[1], [0], [0], [1], [0, 0, 1, 1], [], []>} : vector<256x128xbf16>, vector<128x128xbf16>, vector<256x128xf32> -> vector<256x128xf32>
    %44 = arith.addf %38, %43 : vector<256x128xf32>
    %c2_53 = arith.constant 2 : index
    %c0_54 = arith.constant 0 : index
    %c0_55 = arith.constant 0 : index
    %45 = vector.load %arg9[%c2_53, %c0_54, %c0_55] : memref<18x18x128xbf16, #tpu.memory_space<vmem>>, vector<16x16x128xbf16>
    %46 = vector.shape_cast %45 : vector<16x16x128xbf16> to vector<256x128xbf16>
    %c2_56 = arith.constant 2 : index
    %c0_57 = arith.constant 0 : index
    %c0_58 = arith.constant 0 : index
    %c0_59 = arith.constant 0 : index
    %47 = vector.load %arg4[%c2_56, %c0_57, %c0_58, %c0_59] : memref<3x3x128x128xbf16, #tpu.memory_space<vmem>>, vector<1x1x128x128xbf16>
    %48 = vector.shape_cast %47 : vector<1x1x128x128xbf16> to vector<128x128xbf16>
    %cst_60 = arith.constant dense<0.000000e+00> : vector<256x128xf32>
    %49 = tpu.matmul %46, %48, %cst_60 {dimension_numbers = #tpu.dot_dimension_numbers<[1], [0], [0], [1], [0, 0, 1, 1], [], []>} : vector<256x128xbf16>, vector<128x128xbf16>, vector<256x128xf32> -> vector<256x128xf32>
    %50 = arith.addf %44, %49 : vector<256x128xf32>
    %c2_61 = arith.constant 2 : index
    %c1_62 = arith.constant 1 : index
    %c0_63 = arith.constant 0 : index
    %51 = vector.load %arg9[%c2_61, %c1_62, %c0_63] : memref<18x18x128xbf16, #tpu.memory_space<vmem>>, vector<16x16x128xbf16>
    %52 = vector.shape_cast %51 : vector<16x16x128xbf16> to vector<256x128xbf16>
    %c2_64 = arith.constant 2 : index
    %c1_65 = arith.constant 1 : index
    %c0_66 = arith.constant 0 : index
    %c0_67 = arith.constant 0 : index
    %53 = vector.load %arg4[%c2_64, %c1_65, %c0_66, %c0_67] : memref<3x3x128x128xbf16, #tpu.memory_space<vmem>>, vector<1x1x128x128xbf16>
    %54 = vector.shape_cast %53 : vector<1x1x128x128xbf16> to vector<128x128xbf16>
    %cst_68 = arith.constant dense<0.000000e+00> : vector<256x128xf32>
    %55 = tpu.matmul %52, %54, %cst_68 {dimension_numbers = #tpu.dot_dimension_numbers<[1], [0], [0], [1], [0, 0, 1, 1], [], []>} : vector<256x128xbf16>, vector<128x128xbf16>, vector<256x128xf32> -> vector<256x128xf32>
    %56 = arith.addf %50, %55 : vector<256x128xf32>
    %c2_69 = arith.constant 2 : index
    %c2_70 = arith.constant 2 : index
    %c0_71 = arith.constant 0 : index
    %57 = vector.load %arg9[%c2_69, %c2_70, %c0_71] : memref<18x18x128xbf16, #tpu.memory_space<vmem>>, vector<16x16x128xbf16>
    %58 = vector.shape_cast %57 : vector<16x16x128xbf16> to vector<256x128xbf16>
    %c2_72 = arith.constant 2 : index
    %c2_73 = arith.constant 2 : index
    %c0_74 = arith.constant 0 : index
    %c0_75 = arith.constant 0 : index
    %59 = vector.load %arg4[%c2_72, %c2_73, %c0_74, %c0_75] : memref<3x3x128x128xbf16, #tpu.memory_space<vmem>>, vector<1x1x128x128xbf16>
    %60 = vector.shape_cast %59 : vector<1x1x128x128xbf16> to vector<128x128xbf16>
    %cst_76 = arith.constant dense<0.000000e+00> : vector<256x128xf32>
    %61 = tpu.matmul %58, %60, %cst_76 {dimension_numbers = #tpu.dot_dimension_numbers<[1], [0], [0], [1], [0, 0, 1, 1], [], []>} : vector<256x128xbf16>, vector<128x128xbf16>, vector<256x128xf32> -> vector<256x128xf32>
    %62 = arith.addf %56, %61 : vector<256x128xf32>
    %c0_77 = arith.constant 0 : index
    %c0_78 = arith.constant 0 : index
    %c0_79 = arith.constant 0 : index
    %63 = vector.load %arg5[%c0_77, %c0_78, %c0_79] : memref<1x1x128xf32, #tpu.memory_space<vmem>>, vector<1x1x128xf32>
    %64 = vector.shape_cast %63 : vector<1x1x128xf32> to vector<1x128xf32>
    %65 = vector.broadcast %64 : vector<1x128xf32> to vector<256x128xf32>
    %66 = arith.mulf %62, %65 : vector<256x128xf32>
    %c0_80 = arith.constant 0 : index
    %c0_81 = arith.constant 0 : index
    %c0_82 = arith.constant 0 : index
    %67 = vector.load %arg6[%c0_80, %c0_81, %c0_82] : memref<1x256x1xf32, #tpu.memory_space<vmem>>, vector<1x256x1xf32>
    %68 = vector.shape_cast %67 : vector<1x256x1xf32> to vector<256x1xf32>
    %69 = vector.broadcast %68 : vector<256x1xf32> to vector<256x128xf32>
    %70 = arith.addf %66, %69 : vector<256x128xf32>
    %c0_83 = arith.constant 0 : index
    %c0_84 = arith.constant 0 : index
    %c0_85 = arith.constant 0 : index
    %71 = vector.load %arg7[%c0_83, %c0_84, %c0_85] : memref<1x1x128xf32, #tpu.memory_space<vmem>>, vector<1x1x128xf32>
    %72 = vector.shape_cast %71 : vector<1x1x128xf32> to vector<1x128xf32>
    %73 = vector.broadcast %72 : vector<1x128xf32> to vector<256x128xf32>
    %74 = arith.addf %70, %73 : vector<256x128xf32>
    %cst_86 = arith.constant 2.000000e-01 : f32
    %75 = vector.broadcast %cst_86 : f32 to vector<256x128xf32>
    %76 = arith.mulf %75, %74 : vector<256x128xf32>
    %77 = arith.maximumf %74, %76 : vector<256x128xf32>
    %cst_87 = arith.constant 1.41421354 : f32
    %78 = vector.broadcast %cst_87 : f32 to vector<256x128xf32>
    %79 = arith.mulf %77, %78 : vector<256x128xf32>
    %cst_88 = arith.constant -2.560000e+02 : f32
    %cst_89 = arith.constant 2.560000e+02 : f32
    %80 = vector.broadcast %cst_88 : f32 to vector<256x128xf32>
    %81 = arith.maximumf %80, %79 : vector<256x128xf32>
    %82 = vector.broadcast %cst_89 : f32 to vector<256x128xf32>
    %83 = arith.minimumf %82, %81 : vector<256x128xf32>
    %84 = arith.truncf %83 : vector<256x128xf32> to vector<256x128xbf16>
    %c0_90 = arith.constant 0 : index
    %c0_91 = arith.constant 0 : index
    %c0_92 = arith.constant 0 : index
    %85 = vector.load %arg8[%c0_90, %c0_91, %c0_92] : memref<1x256x128xbf16, #tpu.memory_space<vmem>>, vector<1x256x128xbf16>
    %86 = vector.shape_cast %85 : vector<1x256x128xbf16> to vector<256x128xbf16>
    %87 = vector.shape_cast %84 : vector<256x128xbf16> to vector<1x256x128xbf16>
    tpu.vector_store %arg8[%c0_90, %c0_91, %c0_92], %87 {strides = array<i32>} : memref<1x256x128xbf16, #tpu.memory_space<vmem>>, vector<1x256x128xbf16>,
    return
  }
  func.func @transform_0(%arg0: i32, %arg1: i32) -> (i32, i32, i32, i32) {
    %c0_i32 = arith.constant 0 : i32
    %c0_i32_0 = arith.constant 0 : i32
    %c0_i32_1 = arith.constant 0 : i32
    %c0_i32_2 = arith.constant 0 : i32
    return %arg0, %c0_i32, %c0_i32_0, %c0_i32_1 : i32, i32, i32, i32
  }
  func.func @transform_1(%arg0: i32, %arg1: i32) -> (i32, i32, i32) {
    %c0_i32 = arith.constant 0 : i32
    %c0_i32_0 = arith.constant 0 : i32
    %c0_i32_1 = arith.constant 0 : i32
    return %arg0, %c0_i32, %c0_i32_0 : i32, i32, i32
  }
  func.func @transform_2(%arg0: i32, %arg1: i32) -> (i32, i32, i32, i32) {
    %c0_i32 = arith.constant 0 : i32
    %c0_i32_0 = arith.constant 0 : i32
    %c0_i32_1 = arith.constant 0 : i32
    %c0_i32_2 = arith.constant 0 : i32
    %c0_i32_3 = arith.constant 0 : i32
    return %c0_i32, %c0_i32_0, %c0_i32_1, %c0_i32_2 : i32, i32, i32, i32
  }
  func.func @transform_3(%arg0: i32, %arg1: i32) -> (i32, i32, i32) {
    %c0_i32 = arith.constant 0 : i32
    %c0_i32_0 = arith.constant 0 : i32
    %c0_i32_1 = arith.constant 0 : i32
    return %arg0, %c0_i32, %c0_i32_0 : i32, i32, i32
  }
  func.func @transform_4(%arg0: i32, %arg1: i32) -> (i32, i32, i32) {
    %c0_i32 = arith.constant 0 : i32
    %c0_i32_0 = arith.constant 0 : i32
    %c0_i32_1 = arith.constant 0 : i32
    return %c0_i32, %arg1, %c0_i32_0 : i32, i32, i32
  }
  func.func @transform_5(%arg0: i32, %arg1: i32) -> (i32, i32, i32) {
    %c0_i32 = arith.constant 0 : i32
    %c0_i32_0 = arith.constant 0 : i32
    %c0_i32_1 = arith.constant 0 : i32
    %c0_i32_2 = arith.constant 0 : i32
    return %c0_i32, %c0_i32_0, %c0_i32_1 : i32, i32, i32
  }
  func.func @transform_6(%arg0: i32, %arg1: i32) -> (i32, i32, i32) {
    %c0_i32 = arith.constant 0 : i32
    %c0_i32_0 = arith.constant 0 : i32
    return %arg0, %arg1, %c0_i32 : i32, i32, i32
  }
}

module attributes {stable_mosaic.version = 11 : i64} {
  func.func @_conv3x3_torgb_kernel(%arg0: i32, %arg1: i32, %arg2: memref<1x18x18x128xbf16, #tpu.memory_space<vmem>>, %arg3: memref<1x1x128xbf16, #tpu.memory_space<vmem>>, %arg4: memref<3x3x128x128xbf16, #tpu.memory_space<vmem>>, %arg5: memref<1x1x128xf32, #tpu.memory_space<vmem>>, %arg6: memref<1x256x1xf32, #tpu.memory_space<vmem>>, %arg7: memref<1x1x128xf32, #tpu.memory_space<vmem>>, %arg8: memref<1x1x128xbf16, #tpu.memory_space<vmem>>, %arg9: memref<128x128xbf16, #tpu.memory_space<vmem>>, %arg10: memref<1x1x128xf32, #tpu.memory_space<vmem>>, %arg11: memref<1x256x128xf32, #tpu.memory_space<vmem>>, %arg12: memref<1x256x128xf32, #tpu.memory_space<vmem>>, %arg13: memref<18x18x128xbf16, #tpu.memory_space<vmem>>) attributes {dimension_semantics = [#tpu.dimension_semantics<parallel>, #tpu.dimension_semantics<parallel>], iteration_bounds = array<i64: 2, 1>, scalar_prefetch = 0 : i64, scratch_operands = 1 : i64, tpu.core_type = #tpu.core_type<tc>, window_params = [{transform_indices = @transform_0, window_bounds = array<i64: 1, 18, 18, 128>}, {transform_indices = @transform_1, window_bounds = array<i64: 1, 1, 128>}, {pipeline_mode = #tpu.pipeline_mode<synchronous>, transform_indices = @transform_2, window_bounds = array<i64: 3, 3, 128, 128>}, {transform_indices = @transform_3, window_bounds = array<i64: 1, 1, 128>}, {transform_indices = @transform_4, window_bounds = array<i64: 1, 256, 1>}, {pipeline_mode = #tpu.pipeline_mode<synchronous>, transform_indices = @transform_5, window_bounds = array<i64: 1, 1, 128>}, {transform_indices = @transform_6, window_bounds = array<i64: 1, 1, 128>}, {pipeline_mode = #tpu.pipeline_mode<synchronous>, transform_indices = @transform_7, window_bounds = array<i64: 128, 128>}, {pipeline_mode = #tpu.pipeline_mode<synchronous>, transform_indices = @transform_8, window_bounds = array<i64: 1, 1, 128>}, {transform_indices = @transform_9, window_bounds = array<i64: 1, 256, 128>}, {transform_indices = @transform_10, window_bounds = array<i64: 1, 256, 128>}]} {
    %c16_i32 = arith.constant 16 : i32
    %0 = arith.muli %arg1, %c16_i32 : i32
    %c0 = arith.constant 0 : index
    %1 = arith.index_cast %0 : i32 to index
    %c0_0 = arith.constant 0 : index
    %c0_1 = arith.constant 0 : index
    %2 = vector.load %arg2[%c0, %1, %c0_0, %c0_1] : memref<1x18x18x128xbf16, #tpu.memory_space<vmem>>, vector<1x18x18x128xbf16>
    %3 = vector.shape_cast %2 : vector<1x18x18x128xbf16> to vector<18x18x128xbf16>
    %c0_2 = arith.constant 0 : index
    %c0_3 = arith.constant 0 : index
    %c0_4 = arith.constant 0 : index
    %4 = vector.load %arg3[%c0_2, %c0_3, %c0_4] : memref<1x1x128xbf16, #tpu.memory_space<vmem>>, vector<1x1x128xbf16>
    %5 = vector.shape_cast %4 : vector<1x1x128xbf16> to vector<1x128xbf16>
    %6 = vector.shape_cast %5 : vector<1x128xbf16> to vector<1x1x128xbf16>
    %7 = vector.broadcast %6 : vector<1x1x128xbf16> to vector<18x18x128xbf16>
    %8 = arith.mulf %3, %7 : vector<18x18x128xbf16>
    %c0_5 = arith.constant 0 : index
    %c0_6 = arith.constant 0 : index
    %c0_7 = arith.constant 0 : index
    %9 = vector.load %arg13[%c0_5, %c0_6, %c0_7] : memref<18x18x128xbf16, #tpu.memory_space<vmem>>, vector<18x18x128xbf16>
    tpu.vector_store %arg13[%c0_5, %c0_6, %c0_7], %8 {strides = array<i32>} : memref<18x18x128xbf16, #tpu.memory_space<vmem>>, vector<18x18x128xbf16>,
    %c0_8 = arith.constant 0 : index
    %c0_9 = arith.constant 0 : index
    %c0_10 = arith.constant 0 : index
    %10 = vector.load %arg13[%c0_8, %c0_9, %c0_10] : memref<18x18x128xbf16, #tpu.memory_space<vmem>>, vector<16x16x128xbf16>
    %11 = vector.shape_cast %10 : vector<16x16x128xbf16> to vector<256x128xbf16>
    %c0_11 = arith.constant 0 : index
    %c0_12 = arith.constant 0 : index
    %c0_13 = arith.constant 0 : index
    %c0_14 = arith.constant 0 : index
    %12 = vector.load %arg4[%c0_11, %c0_12, %c0_13, %c0_14] : memref<3x3x128x128xbf16, #tpu.memory_space<vmem>>, vector<1x1x128x128xbf16>
    %13 = vector.shape_cast %12 : vector<1x1x128x128xbf16> to vector<128x128xbf16>
    %cst = arith.constant dense<0.000000e+00> : vector<256x128xf32>
    %14 = tpu.matmul %11, %13, %cst {dimension_numbers = #tpu.dot_dimension_numbers<[1], [0], [0], [1], [0, 0, 1, 1], [], []>} : vector<256x128xbf16>, vector<128x128xbf16>, vector<256x128xf32> -> vector<256x128xf32>
    %c0_15 = arith.constant 0 : index
    %c1 = arith.constant 1 : index
    %c0_16 = arith.constant 0 : index
    %15 = vector.load %arg13[%c0_15, %c1, %c0_16] : memref<18x18x128xbf16, #tpu.memory_space<vmem>>, vector<16x16x128xbf16>
    %16 = vector.shape_cast %15 : vector<16x16x128xbf16> to vector<256x128xbf16>
    %c0_17 = arith.constant 0 : index
    %c1_18 = arith.constant 1 : index
    %c0_19 = arith.constant 0 : index
    %c0_20 = arith.constant 0 : index
    %17 = vector.load %arg4[%c0_17, %c1_18, %c0_19, %c0_20] : memref<3x3x128x128xbf16, #tpu.memory_space<vmem>>, vector<1x1x128x128xbf16>
    %18 = vector.shape_cast %17 : vector<1x1x128x128xbf16> to vector<128x128xbf16>
    %cst_21 = arith.constant dense<0.000000e+00> : vector<256x128xf32>
    %19 = tpu.matmul %16, %18, %cst_21 {dimension_numbers = #tpu.dot_dimension_numbers<[1], [0], [0], [1], [0, 0, 1, 1], [], []>} : vector<256x128xbf16>, vector<128x128xbf16>, vector<256x128xf32> -> vector<256x128xf32>
    %20 = arith.addf %14, %19 : vector<256x128xf32>
    %c0_22 = arith.constant 0 : index
    %c2 = arith.constant 2 : index
    %c0_23 = arith.constant 0 : index
    %21 = vector.load %arg13[%c0_22, %c2, %c0_23] : memref<18x18x128xbf16, #tpu.memory_space<vmem>>, vector<16x16x128xbf16>
    %22 = vector.shape_cast %21 : vector<16x16x128xbf16> to vector<256x128xbf16>
    %c0_24 = arith.constant 0 : index
    %c2_25 = arith.constant 2 : index
    %c0_26 = arith.constant 0 : index
    %c0_27 = arith.constant 0 : index
    %23 = vector.load %arg4[%c0_24, %c2_25, %c0_26, %c0_27] : memref<3x3x128x128xbf16, #tpu.memory_space<vmem>>, vector<1x1x128x128xbf16>
    %24 = vector.shape_cast %23 : vector<1x1x128x128xbf16> to vector<128x128xbf16>
    %cst_28 = arith.constant dense<0.000000e+00> : vector<256x128xf32>
    %25 = tpu.matmul %22, %24, %cst_28 {dimension_numbers = #tpu.dot_dimension_numbers<[1], [0], [0], [1], [0, 0, 1, 1], [], []>} : vector<256x128xbf16>, vector<128x128xbf16>, vector<256x128xf32> -> vector<256x128xf32>
    %26 = arith.addf %20, %25 : vector<256x128xf32>
    %c1_29 = arith.constant 1 : index
    %c0_30 = arith.constant 0 : index
    %c0_31 = arith.constant 0 : index
    %27 = vector.load %arg13[%c1_29, %c0_30, %c0_31] : memref<18x18x128xbf16, #tpu.memory_space<vmem>>, vector<16x16x128xbf16>
    %28 = vector.shape_cast %27 : vector<16x16x128xbf16> to vector<256x128xbf16>
    %c1_32 = arith.constant 1 : index
    %c0_33 = arith.constant 0 : index
    %c0_34 = arith.constant 0 : index
    %c0_35 = arith.constant 0 : index
    %29 = vector.load %arg4[%c1_32, %c0_33, %c0_34, %c0_35] : memref<3x3x128x128xbf16, #tpu.memory_space<vmem>>, vector<1x1x128x128xbf16>
    %30 = vector.shape_cast %29 : vector<1x1x128x128xbf16> to vector<128x128xbf16>
    %cst_36 = arith.constant dense<0.000000e+00> : vector<256x128xf32>
    %31 = tpu.matmul %28, %30, %cst_36 {dimension_numbers = #tpu.dot_dimension_numbers<[1], [0], [0], [1], [0, 0, 1, 1], [], []>} : vector<256x128xbf16>, vector<128x128xbf16>, vector<256x128xf32> -> vector<256x128xf32>
    %32 = arith.addf %26, %31 : vector<256x128xf32>
    %c1_37 = arith.constant 1 : index
    %c1_38 = arith.constant 1 : index
    %c0_39 = arith.constant 0 : index
    %33 = vector.load %arg13[%c1_37, %c1_38, %c0_39] : memref<18x18x128xbf16, #tpu.memory_space<vmem>>, vector<16x16x128xbf16>
    %34 = vector.shape_cast %33 : vector<16x16x128xbf16> to vector<256x128xbf16>
    %c1_40 = arith.constant 1 : index
    %c1_41 = arith.constant 1 : index
    %c0_42 = arith.constant 0 : index
    %c0_43 = arith.constant 0 : index
    %35 = vector.load %arg4[%c1_40, %c1_41, %c0_42, %c0_43] : memref<3x3x128x128xbf16, #tpu.memory_space<vmem>>, vector<1x1x128x128xbf16>
    %36 = vector.shape_cast %35 : vector<1x1x128x128xbf16> to vector<128x128xbf16>
    %cst_44 = arith.constant dense<0.000000e+00> : vector<256x128xf32>
    %37 = tpu.matmul %34, %36, %cst_44 {dimension_numbers = #tpu.dot_dimension_numbers<[1], [0], [0], [1], [0, 0, 1, 1], [], []>} : vector<256x128xbf16>, vector<128x128xbf16>, vector<256x128xf32> -> vector<256x128xf32>
    %38 = arith.addf %32, %37 : vector<256x128xf32>
    %c1_45 = arith.constant 1 : index
    %c2_46 = arith.constant 2 : index
    %c0_47 = arith.constant 0 : index
    %39 = vector.load %arg13[%c1_45, %c2_46, %c0_47] : memref<18x18x128xbf16, #tpu.memory_space<vmem>>, vector<16x16x128xbf16>
    %40 = vector.shape_cast %39 : vector<16x16x128xbf16> to vector<256x128xbf16>
    %c1_48 = arith.constant 1 : index
    %c2_49 = arith.constant 2 : index
    %c0_50 = arith.constant 0 : index
    %c0_51 = arith.constant 0 : index
    %41 = vector.load %arg4[%c1_48, %c2_49, %c0_50, %c0_51] : memref<3x3x128x128xbf16, #tpu.memory_space<vmem>>, vector<1x1x128x128xbf16>
    %42 = vector.shape_cast %41 : vector<1x1x128x128xbf16> to vector<128x128xbf16>
    %cst_52 = arith.constant dense<0.000000e+00> : vector<256x128xf32>
    %43 = tpu.matmul %40, %42, %cst_52 {dimension_numbers = #tpu.dot_dimension_numbers<[1], [0], [0], [1], [0, 0, 1, 1], [], []>} : vector<256x128xbf16>, vector<128x128xbf16>, vector<256x128xf32> -> vector<256x128xf32>
    %44 = arith.addf %38, %43 : vector<256x128xf32>
    %c2_53 = arith.constant 2 : index
    %c0_54 = arith.constant 0 : index
    %c0_55 = arith.constant 0 : index
    %45 = vector.load %arg13[%c2_53, %c0_54, %c0_55] : memref<18x18x128xbf16, #tpu.memory_space<vmem>>, vector<16x16x128xbf16>
    %46 = vector.shape_cast %45 : vector<16x16x128xbf16> to vector<256x128xbf16>
    %c2_56 = arith.constant 2 : index
    %c0_57 = arith.constant 0 : index
    %c0_58 = arith.constant 0 : index
    %c0_59 = arith.constant 0 : index
    %47 = vector.load %arg4[%c2_56, %c0_57, %c0_58, %c0_59] : memref<3x3x128x128xbf16, #tpu.memory_space<vmem>>, vector<1x1x128x128xbf16>
    %48 = vector.shape_cast %47 : vector<1x1x128x128xbf16> to vector<128x128xbf16>
    %cst_60 = arith.constant dense<0.000000e+00> : vector<256x128xf32>
    %49 = tpu.matmul %46, %48, %cst_60 {dimension_numbers = #tpu.dot_dimension_numbers<[1], [0], [0], [1], [0, 0, 1, 1], [], []>} : vector<256x128xbf16>, vector<128x128xbf16>, vector<256x128xf32> -> vector<256x128xf32>
    %50 = arith.addf %44, %49 : vector<256x128xf32>
    %c2_61 = arith.constant 2 : index
    %c1_62 = arith.constant 1 : index
    %c0_63 = arith.constant 0 : index
    %51 = vector.load %arg13[%c2_61, %c1_62, %c0_63] : memref<18x18x128xbf16, #tpu.memory_space<vmem>>, vector<16x16x128xbf16>
    %52 = vector.shape_cast %51 : vector<16x16x128xbf16> to vector<256x128xbf16>
    %c2_64 = arith.constant 2 : index
    %c1_65 = arith.constant 1 : index
    %c0_66 = arith.constant 0 : index
    %c0_67 = arith.constant 0 : index
    %53 = vector.load %arg4[%c2_64, %c1_65, %c0_66, %c0_67] : memref<3x3x128x128xbf16, #tpu.memory_space<vmem>>, vector<1x1x128x128xbf16>
    %54 = vector.shape_cast %53 : vector<1x1x128x128xbf16> to vector<128x128xbf16>
    %cst_68 = arith.constant dense<0.000000e+00> : vector<256x128xf32>
    %55 = tpu.matmul %52, %54, %cst_68 {dimension_numbers = #tpu.dot_dimension_numbers<[1], [0], [0], [1], [0, 0, 1, 1], [], []>} : vector<256x128xbf16>, vector<128x128xbf16>, vector<256x128xf32> -> vector<256x128xf32>
    %56 = arith.addf %50, %55 : vector<256x128xf32>
    %c2_69 = arith.constant 2 : index
    %c2_70 = arith.constant 2 : index
    %c0_71 = arith.constant 0 : index
    %57 = vector.load %arg13[%c2_69, %c2_70, %c0_71] : memref<18x18x128xbf16, #tpu.memory_space<vmem>>, vector<16x16x128xbf16>
    %58 = vector.shape_cast %57 : vector<16x16x128xbf16> to vector<256x128xbf16>
    %c2_72 = arith.constant 2 : index
    %c2_73 = arith.constant 2 : index
    %c0_74 = arith.constant 0 : index
    %c0_75 = arith.constant 0 : index
    %59 = vector.load %arg4[%c2_72, %c2_73, %c0_74, %c0_75] : memref<3x3x128x128xbf16, #tpu.memory_space<vmem>>, vector<1x1x128x128xbf16>
    %60 = vector.shape_cast %59 : vector<1x1x128x128xbf16> to vector<128x128xbf16>
    %cst_76 = arith.constant dense<0.000000e+00> : vector<256x128xf32>
    %61 = tpu.matmul %58, %60, %cst_76 {dimension_numbers = #tpu.dot_dimension_numbers<[1], [0], [0], [1], [0, 0, 1, 1], [], []>} : vector<256x128xbf16>, vector<128x128xbf16>, vector<256x128xf32> -> vector<256x128xf32>
    %62 = arith.addf %56, %61 : vector<256x128xf32>
    %c0_77 = arith.constant 0 : index
    %c0_78 = arith.constant 0 : index
    %c0_79 = arith.constant 0 : index
    %63 = vector.load %arg5[%c0_77, %c0_78, %c0_79] : memref<1x1x128xf32, #tpu.memory_space<vmem>>, vector<1x1x128xf32>
    %64 = vector.shape_cast %63 : vector<1x1x128xf32> to vector<1x128xf32>
    %65 = vector.broadcast %64 : vector<1x128xf32> to vector<256x128xf32>
    %66 = arith.mulf %62, %65 : vector<256x128xf32>
    %c0_80 = arith.constant 0 : index
    %c0_81 = arith.constant 0 : index
    %c0_82 = arith.constant 0 : index
    %67 = vector.load %arg6[%c0_80, %c0_81, %c0_82] : memref<1x256x1xf32, #tpu.memory_space<vmem>>, vector<1x256x1xf32>
    %68 = vector.shape_cast %67 : vector<1x256x1xf32> to vector<256x1xf32>
    %69 = vector.broadcast %68 : vector<256x1xf32> to vector<256x128xf32>
    %70 = arith.addf %66, %69 : vector<256x128xf32>
    %c0_83 = arith.constant 0 : index
    %c0_84 = arith.constant 0 : index
    %c0_85 = arith.constant 0 : index
    %71 = vector.load %arg7[%c0_83, %c0_84, %c0_85] : memref<1x1x128xf32, #tpu.memory_space<vmem>>, vector<1x1x128xf32>
    %72 = vector.shape_cast %71 : vector<1x1x128xf32> to vector<1x128xf32>
    %73 = vector.broadcast %72 : vector<1x128xf32> to vector<256x128xf32>
    %74 = arith.addf %70, %73 : vector<256x128xf32>
    %cst_86 = arith.constant 2.000000e-01 : f32
    %75 = vector.broadcast %cst_86 : f32 to vector<256x128xf32>
    %76 = arith.mulf %75, %74 : vector<256x128xf32>
    %77 = arith.maximumf %74, %76 : vector<256x128xf32>
    %cst_87 = arith.constant 1.41421354 : f32
    %78 = vector.broadcast %cst_87 : f32 to vector<256x128xf32>
    %79 = arith.mulf %77, %78 : vector<256x128xf32>
    %cst_88 = arith.constant -2.560000e+02 : f32
    %cst_89 = arith.constant 2.560000e+02 : f32
    %80 = vector.broadcast %cst_88 : f32 to vector<256x128xf32>
    %81 = arith.maximumf %80, %79 : vector<256x128xf32>
    %82 = vector.broadcast %cst_89 : f32 to vector<256x128xf32>
    %83 = arith.minimumf %82, %81 : vector<256x128xf32>
    %c0_90 = arith.constant 0 : index
    %c0_91 = arith.constant 0 : index
    %c0_92 = arith.constant 0 : index
    %84 = vector.load %arg11[%c0_90, %c0_91, %c0_92] : memref<1x256x128xf32, #tpu.memory_space<vmem>>, vector<1x256x128xf32>
    %85 = vector.shape_cast %84 : vector<1x256x128xf32> to vector<256x128xf32>
    %86 = vector.shape_cast %83 : vector<256x128xf32> to vector<1x256x128xf32>
    tpu.vector_store %arg11[%c0_90, %c0_91, %c0_92], %86 {strides = array<i32>} : memref<1x256x128xf32, #tpu.memory_space<vmem>>, vector<1x256x128xf32>,
    %87 = arith.truncf %83 : vector<256x128xf32> to vector<256x128xbf16>
    %c0_93 = arith.constant 0 : index
    %c0_94 = arith.constant 0 : index
    %c0_95 = arith.constant 0 : index
    %88 = vector.load %arg8[%c0_93, %c0_94, %c0_95] : memref<1x1x128xbf16, #tpu.memory_space<vmem>>, vector<1x1x128xbf16>
    %89 = vector.shape_cast %88 : vector<1x1x128xbf16> to vector<1x128xbf16>
    %90 = vector.broadcast %89 : vector<1x128xbf16> to vector<256x128xbf16>
    %91 = arith.mulf %87, %90 : vector<256x128xbf16>
    %c0_96 = arith.constant 0 : index
    %c0_97 = arith.constant 0 : index
    %92 = vector.load %arg9[%c0_96, %c0_97] : memref<128x128xbf16, #tpu.memory_space<vmem>>, vector<128x128xbf16>
    %cst_98 = arith.constant dense<0.000000e+00> : vector<256x128xf32>
    %93 = tpu.matmul %91, %92, %cst_98 {dimension_numbers = #tpu.dot_dimension_numbers<[1], [0], [0], [1], [0, 0, 1, 1], [], []>} : vector<256x128xbf16>, vector<128x128xbf16>, vector<256x128xf32> -> vector<256x128xf32>
    %c0_99 = arith.constant 0 : index
    %c0_100 = arith.constant 0 : index
    %c0_101 = arith.constant 0 : index
    %94 = vector.load %arg10[%c0_99, %c0_100, %c0_101] : memref<1x1x128xf32, #tpu.memory_space<vmem>>, vector<1x1x128xf32>
    %95 = vector.shape_cast %94 : vector<1x1x128xf32> to vector<1x128xf32>
    %96 = vector.broadcast %95 : vector<1x128xf32> to vector<256x128xf32>
    %97 = arith.addf %93, %96 : vector<256x128xf32>
    %cst_102 = arith.constant -2.560000e+02 : f32
    %cst_103 = arith.constant 2.560000e+02 : f32
    %98 = vector.broadcast %cst_102 : f32 to vector<256x128xf32>
    %99 = arith.maximumf %98, %97 : vector<256x128xf32>
    %100 = vector.broadcast %cst_103 : f32 to vector<256x128xf32>
    %101 = arith.minimumf %100, %99 : vector<256x128xf32>
    %c0_104 = arith.constant 0 : index
    %c0_105 = arith.constant 0 : index
    %c0_106 = arith.constant 0 : index
    %102 = vector.load %arg12[%c0_104, %c0_105, %c0_106] : memref<1x256x128xf32, #tpu.memory_space<vmem>>, vector<1x256x128xf32>
    %103 = vector.shape_cast %102 : vector<1x256x128xf32> to vector<256x128xf32>
    %104 = vector.shape_cast %101 : vector<256x128xf32> to vector<1x256x128xf32>
    tpu.vector_store %arg12[%c0_104, %c0_105, %c0_106], %104 {strides = array<i32>} : memref<1x256x128xf32, #tpu.memory_space<vmem>>, vector<1x256x128xf32>,
    return
  }
  func.func @transform_0(%arg0: i32, %arg1: i32) -> (i32, i32, i32, i32) {
    %c0_i32 = arith.constant 0 : i32
    %c0_i32_0 = arith.constant 0 : i32
    %c0_i32_1 = arith.constant 0 : i32
    %c0_i32_2 = arith.constant 0 : i32
    return %arg0, %c0_i32, %c0_i32_0, %c0_i32_1 : i32, i32, i32, i32
  }
  func.func @transform_1(%arg0: i32, %arg1: i32) -> (i32, i32, i32) {
    %c0_i32 = arith.constant 0 : i32
    %c0_i32_0 = arith.constant 0 : i32
    %c0_i32_1 = arith.constant 0 : i32
    return %arg0, %c0_i32, %c0_i32_0 : i32, i32, i32
  }
  func.func @transform_2(%arg0: i32, %arg1: i32) -> (i32, i32, i32, i32) {
    %c0_i32 = arith.constant 0 : i32
    %c0_i32_0 = arith.constant 0 : i32
    %c0_i32_1 = arith.constant 0 : i32
    %c0_i32_2 = arith.constant 0 : i32
    %c0_i32_3 = arith.constant 0 : i32
    return %c0_i32, %c0_i32_0, %c0_i32_1, %c0_i32_2 : i32, i32, i32, i32
  }
  func.func @transform_3(%arg0: i32, %arg1: i32) -> (i32, i32, i32) {
    %c0_i32 = arith.constant 0 : i32
    %c0_i32_0 = arith.constant 0 : i32
    %c0_i32_1 = arith.constant 0 : i32
    return %arg0, %c0_i32, %c0_i32_0 : i32, i32, i32
  }
  func.func @transform_4(%arg0: i32, %arg1: i32) -> (i32, i32, i32) {
    %c0_i32 = arith.constant 0 : i32
    %c0_i32_0 = arith.constant 0 : i32
    %c0_i32_1 = arith.constant 0 : i32
    return %c0_i32, %arg1, %c0_i32_0 : i32, i32, i32
  }
  func.func @transform_5(%arg0: i32, %arg1: i32) -> (i32, i32, i32) {
    %c0_i32 = arith.constant 0 : i32
    %c0_i32_0 = arith.constant 0 : i32
    %c0_i32_1 = arith.constant 0 : i32
    %c0_i32_2 = arith.constant 0 : i32
    return %c0_i32, %c0_i32_0, %c0_i32_1 : i32, i32, i32
  }
  func.func @transform_6(%arg0: i32, %arg1: i32) -> (i32, i32, i32) {
    %c0_i32 = arith.constant 0 : i32
    %c0_i32_0 = arith.constant 0 : i32
    %c0_i32_1 = arith.constant 0 : i32
    return %arg0, %c0_i32, %c0_i32_0 : i32, i32, i32
  }
  func.func @transform_7(%arg0: i32, %arg1: i32) -> (i32, i32) {
    %c0_i32 = arith.constant 0 : i32
    %c0_i32_0 = arith.constant 0 : i32
    %c0_i32_1 = arith.constant 0 : i32
    return %c0_i32, %c0_i32_0 : i32, i32
  }
  func.func @transform_8(%arg0: i32, %arg1: i32) -> (i32, i32, i32) {
    %c0_i32 = arith.constant 0 : i32
    %c0_i32_0 = arith.constant 0 : i32
    %c0_i32_1 = arith.constant 0 : i32
    %c0_i32_2 = arith.constant 0 : i32
    return %c0_i32, %c0_i32_0, %c0_i32_1 : i32, i32, i32
  }
  func.func @transform_9(%arg0: i32, %arg1: i32) -> (i32, i32, i32) {
    %c0_i32 = arith.constant 0 : i32
    %c0_i32_0 = arith.constant 0 : i32
    return %arg0, %arg1, %c0_i32 : i32, i32, i32
  }
  func.func @transform_10(%arg0: i32, %arg1: i32) -> (i32, i32, i32) {
    %c0_i32 = arith.constant 0 : i32
    %c0_i32_0 = arith.constant 0 : i32
    return %arg0, %arg1, %c0_i32 : i32, i32, i32
  }
}

</mosaic_0001>

<bundles_post_ra>
// kernel: synthesis_block_no_up_forward.2
= control target key start
LH: loop header
LB: loop body
LE: loop exit
PB: predicated region body
PF: predicated region fallthrough
CT: control target
= control target key end

     0   :  { %s6585_s21 = smov 0   ;;  %s6587_s22 = smov 0   ;;  %s8142_s0 = inlined_call_operand.vmem [shape: bf16[2,18,18,128], index: 0, kind: input, shape index: {}]   ;;  %s8143_s1 = inlined_call_operand.vmem [shape: bf16[2,1,128], index: 1, kind: input, shape index: {}]   ;;  %s8144_s2 = inlined_call_operand.vmem [shape: bf16[3,3,128,128], index: 2, kind: input, shape index: {}]   ;;  %s8145_s3 = inlined_call_operand.vmem [shape: f32[2,1,128], index: 3, kind: input, shape index: {}]   ;;  %s8146_s4 = inlined_call_operand.vmem [shape: f32[1,256,1], index: 4, kind: input, shape index: {}]   ;;  %s8147_s5 = inlined_call_operand.vmem [shape: f32[1,1,128], index: 5, kind: input, shape index: {}]   ;;  %s8148_s6 = inlined_call_operand.vmem [shape: bf16[2,256,128], index: 6, kind: output, shape index: {}]  }
   0x1   :  { %s6589_s23 = smov 0  }
   0x2 LB: > { %s28_s24 = sadd.s32 1, %s6543_s22  ;;  %p5407_p0 = scmp.ge.s32.totalorder %s6547_s23, 1  ;;  %s6547_s23 = sphi %s6589_s23, %s16_s23   ;;  %s6543_s22 = sphi %s6587_s22, %s8168_s22   ;;  %s6539_s21 = sphi %s6585_s21, %s8167_s21  }
   0x3   : > { %p30_p1 = scmp.ge.s32.totalorder %s28_s24, 2  ;;  %p253_p2 = scmp.lt.s32.totalorder %s6547_s23, 3 }
   0x5   : > { %s8170_s24 = smov (%p30_p1, %s28_s24), 0  ;;  %p254_p3 = pnand %p5407_p0, %p253_p2 }
   0x7   : > { %257 = sbr.rel (%p254_p3) target bundleno = 808 (0x328), region = 44 }
   0xc   : > { %v6133_v0 = vld [vmem:[%s8144_s2 + $0x78] sm:$0xff]  ;;  %p298_p4 = scmp.lt.s32.totalorder %s6539_s21, 1  ;;  %v6132_v1 = vld [vmem:[%s8144_s2 + $0x70] sm:$0xff]  ;;  %v6131_v3 = vld [vmem:[%s8144_s2 + $0x68] sm:$0xff]  ;;  %vm669_vm0 = vsmask.f32 3328 }
   0xd   : > { %6414 = vmatpush.bf16.msra.mxu1 %v6133_v0  ;;  %6415 = vmatpush.bf16.msra.mxu2 %v6133_v0  ;;  %v6130_v22 = vld [vmem:[%s8144_s2 + $0x60] sm:$0xff]  ;;  %v6129_v41 = vld [vmem:[%s8144_s2 + $0x58] sm:$0xff]  ;;  %v6128_v60 = vld [vmem:[%s8144_s2 + $0x50] sm:$0xff]  ;;  %vm670_vm1 = vsmask.f32 7440  ;;  %vm1555_vm3 = vcmask 1042432  }
   0xe   : > { %s8172_s21 = smov (!%p298_p4, %s6539_s21), 1  ;;  %6416 = vmatpush.bf16.msra.mxu3 %v6133_v0  ;;  %1185 = vmatpush.bf16.msra.mxu0 %v6133_v0  ;;  %vm6729_vm2 = vmor %vm669_vm0, %vm670_vm1  ;;  %vm1556_vm4 = vcmask 1046532  }
   0xf   : > { %s6438_s29 = smul.u32 216, %s8172_s21  ;;  %s305_s8 = scalar_lea.vmem %s8143_s1, %s8172_s21  ;;  %vm7026_vm5 = vmor %vm1555_vm3, %vm1556_vm4 }
  0x10   : > { %v383_v2 = vld [vmem:[%s305_s8] sm:$0x1]  ;;  %s7458_s7 = scalar_lea.vmem %s8145_s3, %s8172_s21  ;;  %s6101_s15 = sshll.u32 %s8172_s21, 7 }
  0x11   : > { %6417 = vmatpush.bf16.msra.mxu1 %v6132_v1  ;;  %6418 = vmatpush.bf16.msra.mxu2 %v6132_v1  ;;  %s6622_s13 = scalar_lea.vmem %s8142_s0, %s6438_s29  ;;  %v385_v4 = vpack.i.b16 %v383_v2, %v383_v2  ;;  %s7839_s27 = scalar_lea.vmem %s8148_s6, %s6101_s15 }
  0x12   : > { %6419 = vmatpush.bf16.msra.mxu3 %v6132_v1  ;;  %1186 = vmatpush.bf16.msra.mxu0 %v6132_v1  ;;  %v6384_v5 = vld [vmem:[%s6622_s13 + $0x30] sm:$0xff]   ;;  %v343_v6 = vld [vmem:[%s6622_s13 + $0x38] sm:$0x1]  ;;  %v6386_v7 = vld [vmem:[%s6622_s13 + $0x60] sm:$0xff]  }
  0x13   : > { %v6232_v8 = vunpack.c.l.bf16 %v6384_v5  ;;  %v6233_v9 = vunpack.c.h.bf16 %v6384_v5  ;;  %v387_v10 = vperm.slane %v385_v4, 0  ;;  %v402_v11 = vunpack.c.l.bf16 %v343_v6  ;;  %v355_v12 = vld [vmem:[%s6622_s13 + $0x68] sm:$0x1]  ;;  %v6388_v13 = vld [vmem:[%s6622_s13 + $0x90] sm:$0xff]   ;;  %v367_v14 = vld [vmem:[%s6622_s13 + $0x98] sm:$0x1] }
  0x14   : > { %v6240_v15 = vunpack.c.l.bf16 %v6386_v7  ;;  %v6241_v16 = vunpack.c.h.bf16 %v6386_v7  ;;  %v414_v17 = vunpack.c.l.bf16 %v355_v12  ;;  %v6248_v18 = vunpack.c.l.bf16 %v6388_v13  ;;  %v6223_v19 = vld [vmem:[%s6622_s13] sm:$0xff]   ;;  %v331_v20 = vld [vmem:[%s6622_s13 + $0x8] sm:$0x1]  ;;  %v356_v36 = vld [vmem:[%s6622_s13 + $0x6c] sm:$0xff]  }
  0x15   : > { %v344_v21 = vld [vmem:[%s6622_s13 + $0x3c] sm:$0xff]   ;;  %6420 = vmatpush.bf16.msra.mxu1 %v6131_v3  ;;  %6421 = vmatpush.bf16.msra.mxu2 %v6131_v3  ;;  %v6636_v23 = vunpack.c.l.bf16 %v387_v10  ;;  %v6249_v24 = vunpack.c.h.bf16 %v6388_v13  ;;  %v426_v25 = vunpack.c.l.bf16 %v367_v14  ;;  %v6224_v26 = vunpack.c.l.bf16 %v6223_v19  ;;  %v346_v29 = vld [vmem:[%s6622_s13 + $0x44] sm:$0x1]  ;;  %v358_v49 = vld [vmem:[%s6622_s13 + $0x74] sm:$0x1] }
  0x16   : > { %6422 = vmatpush.bf16.msra.mxu3 %v6131_v3  ;;  %1187 = vmatpush.bf16.msra.mxu0 %v6131_v3  ;;  %v6225_v27 = vunpack.c.h.bf16 %v6223_v19  ;;  %v390_v28 = vunpack.c.l.bf16 %v331_v20  ;;  %v403_v30 = vunpack.c.l.bf16 %v344_v21  ;;  %v404_v31 = vunpack.c.h.bf16 %v344_v21  ;;  %v368_v51 = vld [vmem:[%s6622_s13 + $0x9c] sm:$0xff]   ;;  %v370_v0 = vld [vmem:[%s6622_s13 + $0xa4] sm:$0x1]  ;;  %v6671_v2 = vld [vmem:[%s6622_s13 + $0xc] sm:$0xff]  }
  0x17   : > { %8151 = vst [vmem:[#allocation3_spill] sm:$0xff] %v6636_v23  ;;  %v455_v32 = vmul.f32 %v6232_v8, %v6636_v23  ;;  %v456_v33 = vmul.f32 %v6233_v9, %v6636_v23  ;;  %v457_v34 = vmul.f32 %v6636_v23, %v402_v11  ;;  %v467_v35 = vmul.f32 %v6240_v15, %v6636_v23  ;;  %v6127_v14 = vld [vmem:[%s8144_s2 + $0x48] sm:$0xff] }
  0x18   : > { %v468_v37 = vmul.f32 %v6241_v16, %v6636_v23  ;;  %v469_v38 = vmul.f32 %v6636_v23, %v414_v17  ;;  %v479_v39 = vmul.f32 %v6248_v18, %v6636_v23  ;;  %v480_v40 = vmul.f32 %v6249_v24, %v6636_v23  ;;  %v6703_v18 = vld [vmem:[%s6622_s13 + $0x14] sm:$0x1] }
  0x19   : > { %6423 = vmatpush.bf16.msra.mxu1 %v6130_v22  ;;  %6424 = vmatpush.bf16.msra.mxu2 %v6130_v22  ;;  %v511_v42 = vpack.c.bf16 %v457_v34, %v457_v34  ;;  %v6271_v43 = vpack.c.bf16 %v456_v33, %v455_v32  ;;  %v481_v44 = vmul.f32 %v6636_v23, %v426_v25  ;;  %v405_v45 = vunpack.c.l.bf16 %v346_v29 }
  0x1a   : > { %6425 = vmatpush.bf16.msra.mxu3 %v6130_v22  ;;  %1188 = vmatpush.bf16.msra.mxu0 %v6130_v22  ;;  %v523_v46 = vpack.c.bf16 %v469_v38, %v469_v38  ;;  %v6281_v47 = vpack.c.bf16 %v468_v37, %v467_v35  ;;  %v6291_v48 = vpack.c.bf16 %v480_v40, %v479_v39  ;;  %v415_v50 = vunpack.c.l.bf16 %v356_v36 }
  0x1b   : > { %6392 = vst [vmem:[#allocation2 + $0x30] sm:$0xff] %v6271_v43   ;;  %v535_v52 = vpack.c.bf16 %v481_v44, %v481_v44  ;;  %v443_v53 = vmul.f32 %v6224_v26, %v6636_v23  ;;  %v444_v54 = vmul.f32 %v6225_v27, %v6636_v23  ;;  %v445_v55 = vmul.f32 %v6636_v23, %v390_v28 }
  0x1c   : > { %565 = vst [vmem:[#allocation2 + $0x38] sm:$0x1] %v511_v42  ;;  %v6658_v56 = vmul.f32 %v6636_v23, %v403_v30  ;;  %v6661_v57 = vmul.f32 %v6636_v23, %v404_v31  ;;  %v6664_v58 = vmul.f32 %v6636_v23, %v405_v45  ;;  %v416_v59 = vunpack.c.h.bf16 %v356_v36  ;;  %v6126_v30 = vld [vmem:[%s8144_s2 + $0x40] sm:$0xff] }
  0x1d   : > { %6426 = vmatpush.bf16.msra.mxu1 %v6129_v41  ;;  %6427 = vmatpush.bf16.msra.mxu2 %v6129_v41  ;;  %6394 = vst [vmem:[#allocation2 + $0x60] sm:$0xff] %v6281_v47   ;;  %v499_v61 = vpack.c.bf16 %v445_v55, %v445_v55  ;;  %v6261_v62 = vpack.c.bf16 %v444_v54, %v443_v53  ;;  %v417_v63 = vunpack.c.l.bf16 %v358_v49  ;;  %v427_v1 = vunpack.c.l.bf16 %v368_v51  ;;  %v6165_v53 = vld [vmem:[%s8144_s2 + $0xf8] sm:$0xff]  ;;  %v8053_v54 = vld [vmem:[%s7458_s7] ss:$0 sm:$0xff] }
  0x1e   : > { %6428 = vmatpush.bf16.msra.mxu3 %v6129_v41  ;;  %1189 = vmatpush.bf16.msra.mxu0 %v6129_v41  ;;  %577 = vst [vmem:[#allocation2 + $0x68] sm:$0x1] %v523_v46  ;;  %v512_v3 = vpack.c.bf16 %v6658_v56, %v6658_v56  ;;  %v513_v4 = vpack.c.bf16 %v6661_v57, %v6661_v57  ;;  %v428_v9 = vunpack.c.h.bf16 %v368_v51  ;;  %v429_v10 = vunpack.c.l.bf16 %v370_v0  ;;  %v6139_v57 = vld [vmem:[%s8144_s2 + $0xa8] sm:$0xff] }
  0x1f   : > { %v514_v5 = vpack.c.bf16 %v6664_v58, %v6664_v58  ;;  %6396 = vst [vmem:[#allocation2 + $0x90] sm:$0xff] %v6291_v48   ;;  %v6680_v6 = vmul.f32 %v6636_v23, %v415_v50  ;;  %v6683_v7 = vmul.f32 %v6636_v23, %v416_v59  ;;  %v6686_v8 = vmul.f32 %v6636_v23, %v417_v63  ;;  %v6173_v63 = vld [vmem:[%s8144_s2 + $0x138] sm:$0xff] }
  0x20   : > { %589 = vst [vmem:[#allocation2 + $0x98] sm:$0x1] %v535_v52  ;;  %v6689_v11 = vmul.f32 %v6636_v23, %v427_v1  ;;  %v391_v12 = vunpack.c.l.bf16 %v6671_v2  ;;  %v392_v13 = vunpack.c.h.bf16 %v6671_v2  ;;  %v6706_v21 = vmul.f32 %v6636_v23, %v428_v9  ;;  %v6141_v52 = vld [vmem:[%s8144_s2 + $0xb8] sm:$0xff]  ;;  %v349_v2 = vld [vmem:[%s6622_s13 + $0x50] sm:$0x1] }
  0x21   : > { %6429 = vmatpush.bf16.msra.mxu1 %v6128_v60  ;;  %6430 = vmatpush.bf16.msra.mxu2 %v6128_v60  ;;  %6262 = vst [vmem:[#allocation2] sm:$0xff] %v6261_v62   ;;  %v524_v15 = vpack.c.bf16 %v6680_v6, %v6680_v6  ;;  %v525_v16 = vpack.c.bf16 %v6683_v7, %v6683_v7  ;;  %v393_v36 = vunpack.c.l.bf16 %v6703_v18  ;;  %v6125_v62 = vld [vmem:[%s8144_s2 + $0x38] sm:$0xff] }
  0x22   : > { %v526_v17 = vpack.c.bf16 %v6686_v8, %v6686_v8  ;;  %6431 = vmatpush.bf16.msra.mxu3 %v6128_v60  ;;  %1190 = vmatpush.bf16.msra.mxu0 %v6128_v60  ;;  %v613_v19 = vld [vmem:[#allocation2 + $0x30] sm:$0xf]  ;;  %v614_v20 = vld [vmem:[#allocation2 + $0x34] sm:$0xf]  ;;  %553 = vst [vmem:[#allocation2 + $0x8] sm:$0x1] %v499_v61  ;;  %v6709_v22 = vmul.f32 %v6636_v23, %v429_v10 }
  0x23   : > { %v536_v24 = vpack.c.bf16 %v6689_v11, %v6689_v11  ;;  %v657_v25 = vld [vmem:[#allocation2 + $0x38] sm:$0x1]  ;;  %v769_v26 = vshrl.u32 %v613_v19, 16  ;;  %v772_v27 = vshll.u32 %v613_v19, 16  ;;  %v778_v28 = vshll.u32 %v614_v20, 16 }
  0x24   : > { %v782_v29 = vshrl.u32 %v614_v20, 16  ;;  %v788_v31 = vshll.u32 %v657_v25, 16  ;;  %v621_v32 = vld [vmem:[#allocation2 + $0x60] sm:$0xf]  ;;  %v622_v33 = vld [vmem:[#allocation2 + $0x64] sm:$0xf]  ;;  %v537_v34 = vpack.c.bf16 %v6706_v21, %v6706_v21  ;;  %v538_v35 = vpack.c.bf16 %v6709_v22, %v6709_v22 }
  0x25   : > { %6432 = vmatpush.bf16.msra.mxu1 %v6127_v14  ;;  %6433 = vmatpush.bf16.msra.mxu2 %v6127_v14  ;;  %v771_v37 = vrot.slane %v769_v26, 4  ;;  %v774_v38 = vrot.slane %v772_v27, 5  ;;  %v780_v39 = vrot.slane %v778_v28, 5  ;;  %v661_v41 = vld [vmem:[#allocation2 + $0x68] sm:$0x1]  ;;  %v865_v43 = vshrl.u32 %v621_v32, 16 }
  0x26   : > { %v784_v40 = vrot.slane %v782_v29, 4  ;;  %6434 = vmatpush.bf16.msra.mxu3 %v6127_v14  ;;  %1191 = vmatpush.bf16.msra.mxu0 %v6127_v14  ;;  %v790_v42 = vrot.slane %v788_v31, 5  ;;  %v868_v44 = vshll.u32 %v621_v32, 16  ;;  %v874_v45 = vshll.u32 %v622_v33, 16  ;;  %v629_v46 = vld [vmem:[#allocation2 + $0x90] sm:$0xf] }
  0x27   : > { %v775_v47 = vor.u32 %v774_v38, %v771_v37  ;;  %v878_v49 = vshrl.u32 %v622_v33, 16  ;;  %v884_v50 = vshll.u32 %v661_v41, 16  ;;  %v630_v51 = vld [vmem:[#allocation2 + $0x94] sm:$0xf]  ;;  %v867_v55 = vrot.slane %v865_v43, 4 }
  0x28   : > { %v785_v48 = vor.u32 %v784_v40, %v780_v39  ;;  %v870_v59 = vrot.slane %v868_v44, 5  ;;  %v876_v60 = vrot.slane %v874_v45, 5  ;;  %v961_v61 = vshrl.u32 %v629_v46, 16  ;;  %v665_v19 = vld [vmem:[#allocation2 + $0x98] sm:$0x1]  ;;  %v6140_v27 = vld [vmem:[%s8144_s2 + $0xb0] sm:$0xff] }
  0x29   : > { %6435 = vmatpush.bf16.msra.mxu1 %v6126_v30  ;;  %6436 = vmatpush.bf16.msra.mxu2 %v6126_v30  ;;  %v776_v0 = vrot.slane %v775_v47, 4  ;;  %v880_v9 = vrot.slane %v878_v49, 4  ;;  %v886_v10 = vrot.slane %v884_v50, 5  ;;  %v964_v25 = vshll.u32 %v629_v46, 16  ;;  %v605_v33 = vld [vmem:[#allocation2] sm:$0xf] }
  0x2a   : > { %v786_v1 = vrot.slane %v785_v48, 4  ;;  %6437 = vmatpush.bf16.msra.mxu3 %v6126_v30  ;;  %1192 = vmatpush.bf16.msra.mxu0 %v6126_v30  ;;  %v871_v14 = vor.u32 %v870_v59, %v867_v55  ;;  %v963_v20 = vrot.slane %v961_v61, 4  ;;  %v970_v26 = vshll.u32 %v630_v51, 16  ;;  %v6164_v30 = vld [vmem:[%s8144_s2 + $0xf0] sm:$0xff]  ;;  %v6752_v43 = vld [vmem:[#allocation2 + $0x4] sm:$0xf] }
  0x2b   : > { %v781_v28 = vsel %vm6729_vm2, %v776_v0, %v780_v39  ;;  %v881_v31 = vor.u32 %v880_v9, %v876_v60  ;;  %v974_v32 = vshrl.u32 %v630_v51, 16  ;;  %v6124_v37 = vld [vmem:[%s8144_s2 + $0x30] sm:$0xff]  ;;  %v966_v39 = vrot.slane %v964_v25, 5  ;;  %566 = vst [vmem:[#allocation2 + $0x3c] sm:$0xf] %v512_v3 }
  0x2c   : > { %v791_v29 = vsel %vm6729_vm2, %v786_v1, %v790_v42  ;;  %v1081_v38 = vunpack.c.l.b16 %v781_v28  ;;  %v872_v41 = vrot.slane %v871_v14, 4  ;;  %v972_v44 = vrot.slane %v970_v26, 5  ;;  %567 = vst [vmem:[#allocation2 + $0x40] sm:$0xf] %v513_v4  ;;  %v6762_v50 = vld [vmem:[#allocation2 + $0x8] sm:$0x1] }
  0x2d   : > { %1799 = vmatpush.bf16.msrb.mxu2 %v6141_v52  ;;  %v1082_v40 = vunpack.c.l.b16 %v791_v29  ;;  %1418 = vmatpush.bf16.msrb.mxu1 %v6125_v62  ;;  %v882_v42 = vrot.slane %v881_v31, 4  ;;  %v976_v45 = vrot.slane %v974_v32, 4  ;;  %v980_v46 = vshll.u32 %v665_v19, 16  ;;  %568 = vst [vmem:[#allocation2 + $0x44] sm:$0x1] %v514_v5 }
  0x2e   : > { %2114 = vmatpush.bf16.msrb.mxu3 %v6165_v53  ;;  %2796 = vmatpush.bf16.msrb.mxu0 %v6173_v63  ;;  %v877_v48 = vsel %vm6729_vm2, %v872_v41, %v876_v60  ;;  %v967_v49 = vor.u32 %v966_v39, %v963_v20  ;;  %v673_v51 = vshrl.u32 %v605_v33, 16  ;;  %578 = vst [vmem:[#allocation2 + $0x6c] sm:$0xf] %v524_v15  ;;  %v676_v55 = vshll.u32 %v605_v33, 16 }
  0x2f   : > { %v1109_v47 = vpack.c.b16 %v1082_v40, %v1081_v38  ;;  %v887_v56 = vsel %vm6729_vm2, %v882_v42, %v886_v10  ;;  %v1089_v3 = vunpack.c.l.b16 %v877_v48  ;;  %v977_v52 = vor.u32 %v976_v45, %v972_v44  ;;  %579 = vst [vmem:[#allocation2 + $0x70] sm:$0xf] %v525_v16 }
  0x30   : > { %v982_v53 = vrot.slane %v980_v46, 5  ;;  %v1090_v4 = vunpack.c.l.b16 %v887_v56  ;;  %v968_v58 = vrot.slane %v967_v49, 4  ;;  %v675_v5 = vrot.slane %v673_v51, 4  ;;  %580 = vst [vmem:[#allocation2 + $0x74] sm:$0x1] %v526_v17  ;;  %v6163_v56 = vld [vmem:[%s8144_s2 + $0xe8] sm:$0xff] }
  0x31   : > { %1800 = vmatpush.bf16.msrb.mxu2 %v6140_v27  ;;  %1213 = vmatmul.bf16.vlgmr.msra.gmra.mxu1 %v1109_v47  ;;  %v978_v59 = vrot.slane %v977_v52, 4  ;;  %v682_v60 = vshll.u32 %v6752_v43, 16  ;;  %v686_v61 = vshrl.u32 %v6752_v43, 16  ;;  %v692_v6 = vshll.u32 %v6762_v50, 16  ;;  %590 = vst [vmem:[#allocation2 + $0x9c] sm:$0xf] %v536_v24 }
  0x32   : > { %2115 = vmatpush.bf16.msrb.mxu3 %v6164_v30  ;;  %1419 = vmatpush.bf16.msrb.mxu1 %v6124_v37  ;;  %v1113_v15 = vpack.c.b16 %v1090_v4, %v1089_v3  ;;  %v973_v62 = vsel %vm6729_vm2, %v968_v58, %v972_v44  ;;  %v678_v63 = vrot.slane %v676_v55, 5  ;;  %v6792_v7 = vmul.f32 %v6636_v23, %v391_v12  ;;  %v615_v1 = vld [vmem:[#allocation2 + $0x3c] sm:$0xf] }
  0x33   : > { %v983_v16 = vsel %vm6729_vm2, %v978_v59, %v982_v53  ;;  %v1097_v0 = vunpack.c.l.b16 %v973_v62  ;;  %v684_v8 = vrot.slane %v682_v60, 5  ;;  %v688_v17 = vrot.slane %v686_v61, 4  ;;  %591 = vst [vmem:[#allocation2 + $0xa0] sm:$0xf] %v537_v34  ;;  %v616_v10 = vld [vmem:[#allocation2 + $0x40] sm:$0xf] }
  0x34   : > { %1233 = vmatmul.bf16.vlgmr.msra.gmra.mxu2 %v1113_v15  ;;  %v1098_v11 = vunpack.c.l.b16 %v983_v16  ;;  %v679_v24 = vor.u32 %v678_v63, %v675_v5  ;;  %v694_v9 = vrot.slane %v692_v6, 5  ;;  %v793_v14 = vshrl.u32 %v615_v1, 16  ;;  %592 = vst [vmem:[#allocation2 + $0xa4] sm:$0x1] %v538_v35  ;;  %v658_v19 = vld [vmem:[#allocation2 + $0x44] sm:$0x1] }
  0x35   : > { %1801 = vmatpush.bf16.msrb.mxu2 %v6139_v57  ;;  %v689_v12 = vor.u32 %v688_v17, %v684_v8  ;;  %v796_v20 = vshll.u32 %v615_v1, 16  ;;  %v802_v25 = vshll.u32 %v616_v10, 16  ;;  %v806_v26 = vshrl.u32 %v616_v10, 16  ;;  %v623_v29 = vld [vmem:[#allocation2 + $0x6c] sm:$0xf]  ;;  %v6172_v60 = vld [vmem:[%s8144_s2 + $0x130] sm:$0xff] }
  0x36   : > { %v1117_v27 = vpack.c.b16 %v1098_v11, %v1097_v0  ;;  %v680_v28 = vrot.slane %v679_v24, 4  ;;  %v795_v21 = vrot.slane %v793_v14, 4  ;;  %v812_v34 = vshll.u32 %v658_v19, 16  ;;  %v624_v37 = vld [vmem:[#allocation2 + $0x70] sm:$0xf]  ;;  %2116 = vmatpush.bf16.msrb.mxu3 %v6163_v56  ;;  %v6123_v61 = vld [vmem:[%s8144_s2 + $0x28] sm:$0xff]  ;;  %2797 = vmatpush.bf16.msrb.mxu0 %v6172_v60 }
  0x37   : > { %v690_v31 = vrot.slane %v689_v12, 4  ;;  %v798_v32 = vrot.slane %v796_v20, 5  ;;  %v804_v33 = vrot.slane %v802_v25, 5  ;;  %v808_v30 = vrot.slane %v806_v26, 4  ;;  %v662_v38 = vld [vmem:[#allocation2 + $0x74] sm:$0x1]  ;;  %1420 = vmatpush.bf16.msrb.mxu1 %v6123_v61 }
  0x38   : > { %1253 = vmatmul.bf16.vlgmr.msra.gmra.mxu3 %v1117_v27  ;;  %v685_v22 = vsel %vm6729_vm2, %v680_v28, %v684_v8  ;;  %v814_v35 = vrot.slane %v812_v34, 5  ;;  %v889_v40 = vshrl.u32 %v623_v29, 16  ;;  %v892_v41 = vshll.u32 %v623_v29, 16  ;;  %v631_v46 = vld [vmem:[#allocation2 + $0x9c] sm:$0xf]  ;;  %v6138_v6 = vld [vmem:[%s8144_s2 + $0xa0] sm:$0xff] }
  0x39   : > { %v695_v39 = vsel %vm6729_vm2, %v690_v31, %v694_v9  ;;  %v1073_v42 = vunpack.c.l.b16 %v685_v22  ;;  %v799_v44 = vor.u32 %v798_v32, %v795_v21  ;;  %v809_v45 = vor.u32 %v808_v30, %v804_v33  ;;  %v6162_v8 = vld [vmem:[%s8144_s2 + $0xe0] sm:$0xff]  ;;  %1802 = vmatpush.bf16.msrb.mxu2 %v6138_v6  ;;  %v6171_v19 = vld [vmem:[%s8144_s2 + $0x128] sm:$0xff] }
  0x3a   : > { %v1074_v47 = vunpack.c.l.b16 %v695_v39  ;;  %v891_v48 = vrot.slane %v889_v40, 4  ;;  %v894_v49 = vrot.slane %v892_v41, 5  ;;  %v898_v51 = vshll.u32 %v624_v37, 16  ;;  %v632_v4 = vld [vmem:[#allocation2 + $0xa0] sm:$0xf]  ;;  %2117 = vmatpush.bf16.msrb.mxu3 %v6162_v8  ;;  %v6385_v21 = vld [vmem:[%s6622_s13 + $0x48] sm:$0xff]   ;;  %2798 = vmatpush.bf16.msrb.mxu0 %v6171_v19 }
  0x3b   : > { %v800_v3 = vrot.slane %v799_v44, 4  ;;  %v810_v52 = vrot.slane %v809_v45, 4  ;;  %v902_v53 = vshrl.u32 %v624_v37, 16  ;;  %v908_v57 = vshll.u32 %v662_v38, 16  ;;  %v666_v0 = vld [vmem:[#allocation2 + $0xa4] sm:$0x1] }
  0x3c   : > { %v1105_v58 = vpack.c.b16 %v1074_v47, %v1073_v42  ;;  %v895_v5 = vor.u32 %v894_v49, %v891_v48  ;;  %v900_v55 = vrot.slane %v898_v51, 5  ;;  %v985_v59 = vshrl.u32 %v631_v46, 16  ;;  %v6122_v20 = vld [vmem:[%s8144_s2 + $0x20] sm:$0xff] }
  0x3d   : > { %v805_v15 = vsel %vm6729_vm2, %v800_v3, %v804_v33  ;;  %v815_v62 = vsel %vm6729_vm2, %v810_v52, %v814_v35  ;;  %v904_v63 = vrot.slane %v902_v53, 4  ;;  %v910_v16 = vrot.slane %v908_v57, 5  ;;  %v6387_v35 = vld [vmem:[%s6622_s13 + $0x78] sm:$0xff]   ;;  %1421 = vmatpush.bf16.msrb.mxu1 %v6122_v20  ;;  %v6389_v3 = vld [vmem:[%s6622_s13 + $0xa8] sm:$0xff]  }
  0x3e   : > { %1193 = vmatmul.bf16.vlgmr.msra.gmra.mxu0 %v1105_v58  ;;  %v1083_v17 = vunpack.c.l.b16 %v805_v15  ;;  %v1084_v1 = vunpack.c.l.b16 %v815_v62  ;;  %v896_v11 = vrot.slane %v895_v5, 4  ;;  %v987_v24 = vrot.slane %v985_v59, 4  ;;  %v373_v58 = vld [vmem:[%s6622_s13 + $0xb0] sm:$0x1]  ;;  %v6383_v5 = vld [vmem:[%s6622_s13 + $0x18] sm:$0xff]  }
  0x3f   : > { %v905_v9 = vor.u32 %v904_v63, %v900_v55  ;;  %v988_v10 = vshll.u32 %v631_v46, 16  ;;  %v994_v14 = vshll.u32 %v632_v4, 16  ;;  %v998_v12 = vshrl.u32 %v632_v4, 16 }
  0x40   : > { %v1110_v25 = vpack.c.b16 %v1084_v1, %v1083_v17  ;;  %v901_v26 = vsel %vm6729_vm2, %v896_v11, %v900_v55  ;;  %v1004_v27 = vshll.u32 %v666_v0, 16  ;;  %v447_v28 = vmul.f32 %v6636_v23, %v392_v13  ;;  %v6137_v17 = vld [vmem:[%s8144_s2 + $0x98] sm:$0xff]  ;;  %v337_v11 = vld [vmem:[%s6622_s13 + $0x20] sm:$0x1] }
  0x41   : > { %v906_v34 = vrot.slane %v905_v9, 4  ;;  %v1091_v29 = vunpack.c.l.b16 %v901_v26  ;;  %v990_v31 = vrot.slane %v988_v10, 5  ;;  %v996_v32 = vrot.slane %v994_v14, 5  ;;  %1803 = vmatpush.bf16.msrb.mxu2 %v6137_v17 }
  0x42   : > { %1218 = vmatmul.bf16.gmra.mxu1 %v1110_v25  ;;  %v1000_v33 = vrot.slane %v998_v12, 4  ;;  %v1006_v30 = vrot.slane %v1004_v27, 5  ;;  %v448_v37 = vmul.f32 %v6636_v23, %v393_v36  ;;  %v500_v22 = vpack.c.bf16 %v6792_v7, %v6792_v7  ;;  %v361_v36 = vld [vmem:[%s6622_s13 + $0x80] sm:$0x1] }
  0x43   : > { %v911_v13 = vsel %vm6729_vm2, %v906_v34, %v910_v16  ;;  %v991_v38 = vor.u32 %v990_v31, %v987_v24  ;;  %v501_v40 = vpack.c.bf16 %v447_v28, %v447_v28  ;;  %v6236_v41 = vunpack.c.l.bf16 %v6385_v21  ;;  %v6870_v28 = vld [vmem:[%s6622_s13 + $0x54] sm:$0xff]  }
  0x44   : > { %v1092_v39 = vunpack.c.l.b16 %v911_v13  ;;  %v1001_v42 = vor.u32 %v1000_v33, %v996_v32  ;;  %v502_v18 = vpack.c.bf16 %v448_v37, %v448_v37  ;;  %554 = vst [vmem:[#allocation2 + $0xc] sm:$0xf] %v500_v22  ;;  %v6237_v44 = vunpack.c.h.bf16 %v6385_v21  ;;  %v6873_v21 = vld [vmem:[%s6622_s13 + $0x5c] sm:$0x1]  ;;  %v6170_v13 = vld [vmem:[%s8144_s2 + $0x120] sm:$0xff] }
  0x45   : > { %v992_v45 = vrot.slane %v991_v38, 4  ;;  %555 = vst [vmem:[#allocation2 + $0x10] sm:$0xf] %v501_v40  ;;  %v408_v7 = vunpack.c.l.bf16 %v349_v2  ;;  %v461_v46 = vmul.f32 %v6236_v41, %v6636_v23  ;;  %v6244_v47 = vunpack.c.l.bf16 %v6387_v35  ;;  %v6121_v38 = vld [vmem:[%s8144_s2 + $0x18] sm:$0xff]  ;;  %2799 = vmatpush.bf16.msrb.mxu0 %v6170_v13 }
  0x46   : > { %v1114_v48 = vpack.c.b16 %v1092_v39, %v1091_v29  ;;  %v1002_v49 = vrot.slane %v1001_v42, 4  ;;  %556 = vst [vmem:[#allocation2 + $0x14] sm:$0x1] %v502_v18  ;;  %v462_v51 = vmul.f32 %v6237_v44, %v6636_v23  ;;  %v6245_v56 = vunpack.c.h.bf16 %v6387_v35  ;;  %v6161_v35 = vld [vmem:[%s8144_s2 + $0xd8] sm:$0xff]  ;;  %v6136_v18 = vld [vmem:[%s8144_s2 + $0x90] sm:$0xff]  ;;  %1422 = vmatpush.bf16.msrb.mxu1 %v6121_v38 }
  0x47   : > { %v997_v52 = vsel %vm6729_vm2, %v992_v45, %v996_v32  ;;  %v463_v53 = vmul.f32 %v6636_v23, %v408_v7  ;;  %v420_v57 = vunpack.c.l.bf16 %v361_v36  ;;  %v473_v4 = vmul.f32 %v6244_v47, %v6636_v23  ;;  %2118 = vmatpush.bf16.msrb.mxu3 %v6161_v35  ;;  %v6160_v7 = vld [vmem:[%s8144_s2 + $0xd0] sm:$0xff]  ;;  %1804 = vmatpush.bf16.msrb.mxu2 %v6136_v18 }
  0x48   : > { %1238 = vmatmul.bf16.gmra.mxu2 %v1114_v48  ;;  %v1007_v55 = vsel %vm6729_vm2, %v1002_v49, %v1006_v30  ;;  %v1099_v59 = vunpack.c.l.b16 %v997_v52  ;;  %v6276_v60 = vpack.c.bf16 %v462_v51, %v461_v46  ;;  %v474_v61 = vmul.f32 %v6245_v56, %v6636_v23  ;;  %v6169_v46 = vld [vmem:[%s8144_s2 + $0x118] sm:$0xff] }
  0x49   : > { %v1100_v6 = vunpack.c.l.b16 %v1007_v55  ;;  %v517_v15 = vpack.c.bf16 %v463_v53, %v463_v53  ;;  %v475_v62 = vmul.f32 %v6636_v23, %v420_v57  ;;  %v6252_v63 = vunpack.c.l.bf16 %v6389_v3  ;;  %2800 = vmatpush.bf16.msrb.mxu0 %v6169_v46 }
  0x4a   : > { %6393 = vst [vmem:[#allocation2 + $0x48] sm:$0xff] %v6276_v60   ;;  %v6286_v16 = vpack.c.bf16 %v474_v61, %v473_v4  ;;  %v6253_v0 = vunpack.c.h.bf16 %v6389_v3  ;;  %v432_v8 = vunpack.c.l.bf16 %v373_v58  ;;  %v6228_v1 = vunpack.c.l.bf16 %v6383_v5  ;;  %v6120_v3 = vld [vmem:[%s8144_s2 + $0x10] sm:$0xff] }
  0x4b   : > { %v1118_v24 = vpack.c.b16 %v1100_v6, %v1099_v59  ;;  %v607_v9 = vld [vmem:[#allocation2 + $0xc] sm:$0xf]  ;;  %571 = vst [vmem:[#allocation2 + $0x50] sm:$0x1] %v517_v15  ;;  %v529_v10 = vpack.c.bf16 %v475_v62, %v475_v62  ;;  %v485_v14 = vmul.f32 %v6252_v63, %v6636_v23  ;;  %v6229_v12 = vunpack.c.h.bf16 %v6383_v5  ;;  %2119 = vmatpush.bf16.msrb.mxu3 %v6160_v7 }
  0x4c   : > { %v6865_v19 = vld [vmem:[#allocation2 + $0x10] sm:$0xf]  ;;  %v697_v20 = vshrl.u32 %v607_v9, 16  ;;  %v700_v25 = vshll.u32 %v607_v9, 16  ;;  %6395 = vst [vmem:[#allocation2 + $0x78] sm:$0xff] %v6286_v16   ;;  %v486_v26 = vmul.f32 %v6253_v0, %v6636_v23  ;;  %v487_v27 = vmul.f32 %v6636_v23, %v432_v8  ;;  %1423 = vmatpush.bf16.msrb.mxu1 %v6120_v3 }
  0x4d   : > { %1258 = vmatmul.bf16.gmra.mxu3 %v1118_v24  ;;  %v6875_v34 = vld [vmem:[#allocation2 + $0x14] sm:$0x1]  ;;  %v706_v29 = vshll.u32 %v6865_v19, 16  ;;  %v710_v31 = vshrl.u32 %v6865_v19, 16  ;;  %583 = vst [vmem:[#allocation2 + $0x80] sm:$0x1] %v529_v10  ;;  %v396_v32 = vunpack.c.l.bf16 %v337_v11  ;;  %v449_v33 = vmul.f32 %v6228_v1, %v6636_v23 }
  0x4e   : > { %v699_v30 = vrot.slane %v697_v20, 4  ;;  %v702_v37 = vrot.slane %v700_v25, 5  ;;  %v716_v22 = vshll.u32 %v6875_v34, 16  ;;  %v541_v2 = vpack.c.bf16 %v487_v27, %v487_v27 }
  0x4f   : > { %v708_v40 = vrot.slane %v706_v29, 5  ;;  %v712_v41 = vrot.slane %v710_v31, 4  ;;  %v6296_v39 = vpack.c.bf16 %v486_v26, %v485_v14  ;;  %v450_v42 = vmul.f32 %v6229_v12, %v6636_v23 }
  0x50   : > { %v703_v44 = vor.u32 %v702_v37, %v699_v30  ;;  %v718_v36 = vrot.slane %v716_v22, 5  ;;  %595 = vst [vmem:[#allocation2 + $0xb0] sm:$0x1] %v541_v2  ;;  %v451_v45 = vmul.f32 %v6636_v23, %v396_v32  ;;  %v409_v47 = vunpack.c.l.bf16 %v6870_v28 }
  0x51   : > { %v713_v48 = vor.u32 %v712_v41, %v708_v40  ;;  %v617_v49 = vld [vmem:[#allocation2 + $0x48] sm:$0xf]  ;;  %v618_v51 = vld [vmem:[#allocation2 + $0x4c] sm:$0xf]  ;;  %6397 = vst [vmem:[#allocation2 + $0xa8] sm:$0xff] %v6296_v39   ;;  %v6266_v56 = vpack.c.bf16 %v450_v42, %v449_v33  ;;  %v410_v52 = vunpack.c.h.bf16 %v6870_v28  ;;  %v411_v53 = vunpack.c.l.bf16 %v6873_v21 }
  0x52   : > { %v704_v57 = vrot.slane %v703_v44, 4  ;;  %v659_v4 = vld [vmem:[#allocation2 + $0x50] sm:$0x1]  ;;  %v817_v58 = vshrl.u32 %v617_v49, 16  ;;  %v820_v5 = vshll.u32 %v617_v49, 16  ;;  %v826_v55 = vshll.u32 %v618_v51, 16 }
  0x53   : > { %v714_v59 = vrot.slane %v713_v48, 4  ;;  %v830_v60 = vshrl.u32 %v618_v51, 16  ;;  %v836_v61 = vshll.u32 %v659_v4, 16  ;;  %v625_v6 = vld [vmem:[#allocation2 + $0x78] sm:$0xf]  ;;  %v505_v15 = vpack.c.bf16 %v451_v45, %v451_v45  ;;  %6391 = vst [vmem:[#allocation2 + $0x18] sm:$0xff] %v6266_v56  }
  0x54   : > { %v709_v62 = vsel %vm6729_vm2, %v704_v57, %v708_v40  ;;  %v819_v63 = vrot.slane %v817_v58, 4  ;;  %v822_v16 = vrot.slane %v820_v5, 5  ;;  %v828_v0 = vrot.slane %v826_v55, 5  ;;  %v626_v8 = vld [vmem:[#allocation2 + $0x7c] sm:$0xf] }
  0x55   : > { %v719_v17 = vsel %vm6729_vm2, %v714_v59, %v718_v36  ;;  %v1075_v1 = vunpack.c.l.b16 %v709_v62  ;;  %v832_v11 = vrot.slane %v830_v60, 4  ;;  %v838_v24 = vrot.slane %v836_v61, 5  ;;  %v663_v9 = vld [vmem:[#allocation2 + $0x80] sm:$0x1]  ;;  %559 = vst [vmem:[#allocation2 + $0x20] sm:$0x1] %v505_v15 }
  0x56   : > { %v1076_v10 = vunpack.c.l.b16 %v719_v17  ;;  %v823_v14 = vor.u32 %v822_v16, %v819_v63  ;;  %v913_v12 = vshrl.u32 %v625_v6, 16  ;;  %v916_v20 = vshll.u32 %v625_v6, 16 }
  0x57   : > { %v833_v25 = vor.u32 %v832_v11, %v828_v0  ;;  %v922_v26 = vshll.u32 %v626_v8, 16  ;;  %v926_v27 = vshrl.u32 %v626_v8, 16  ;;  %v932_v29 = vshll.u32 %v663_v9, 16  ;;  %v667_v39 = vld [vmem:[#allocation2 + $0xb0] sm:$0x1] }
  0x58   : > { %v1106_v31 = vpack.c.b16 %v1076_v10, %v1075_v1  ;;  %v824_v32 = vrot.slane %v823_v14, 4  ;;  %v915_v33 = vrot.slane %v913_v12, 4  ;;  %v918_v30 = vrot.slane %v916_v20, 5  ;;  %v633_v37 = vld [vmem:[#allocation2 + $0xa8] sm:$0xf] }
  0x59   : > { %v834_v22 = vrot.slane %v833_v25, 4  ;;  %v924_v2 = vrot.slane %v922_v26, 5  ;;  %v928_v35 = vrot.slane %v926_v27, 4  ;;  %v934_v13 = vrot.slane %v932_v29, 5  ;;  %v634_v38 = vld [vmem:[#allocation2 + $0xac] sm:$0xf] }
  0x5a   : > { %1198 = vmatmul.bf16.gmra.mxu0 %v1106_v31  ;;  %v829_v40 = vsel %vm6729_vm2, %v824_v32, %v828_v0  ;;  %v919_v41 = vor.u32 %v918_v30, %v915_v33  ;;  %v1009_v42 = vshrl.u32 %v633_v37, 16  ;;  %v1012_v18 = vshll.u32 %v633_v37, 16  ;;  %v609_v46 = vld [vmem:[#allocation2 + $0x18] sm:$0xf]  ;;  %v6917_v60 = vld [vmem:[#allocation2 + $0x1c] sm:$0xf] }
  0x5b   : > { %v839_v44 = vsel %vm6729_vm2, %v834_v22, %v838_v24  ;;  %v1085_v36 = vunpack.c.l.b16 %v829_v40  ;;  %v929_v45 = vor.u32 %v928_v35, %v924_v2  ;;  %v1018_v7 = vshll.u32 %v634_v38, 16  ;;  %v362_v26 = vld [vmem:[%s6622_s13 + $0x84] sm:$0xff]   ;;  %v374_v40 = vld [vmem:[%s6622_s13 + $0xb4] sm:$0xff]  }
  0x5c   : > { %v1086_v48 = vunpack.c.l.b16 %v839_v44  ;;  %v920_v49 = vrot.slane %v919_v41, 4  ;;  %v1011_v51 = vrot.slane %v1009_v42, 4  ;;  %v1014_v56 = vrot.slane %v1012_v18, 5  ;;  %v6919_v61 = vld [vmem:[#allocation2 + $0x20] sm:$0x1] }
  0x5d   : > { %v930_v3 = vrot.slane %v929_v45, 4  ;;  %v1020_v57 = vrot.slane %v1018_v7, 5  ;;  %v1022_v4 = vshrl.u32 %v634_v38, 16  ;;  %v1028_v58 = vshll.u32 %v667_v39, 16  ;;  %v376_v44 = vld [vmem:[%s6622_s13 + $0xbc] sm:$0x1] }
  0x5e   : > { %v1111_v5 = vpack.c.b16 %v1086_v48, %v1085_v36  ;;  %v925_v55 = vsel %vm6729_vm2, %v920_v49, %v924_v2  ;;  %v1015_v59 = vor.u32 %v1014_v56, %v1011_v51  ;;  %v721_v6 = vshrl.u32 %v609_v46, 16  ;;  %v364_v2 = vld [vmem:[%s6622_s13 + $0x8c] sm:$0x1]  ;;  %v338_v49 = vld [vmem:[%s6622_s13 + $0x24] sm:$0xff]  }
  0x5f   : > { %v935_v15 = vsel %vm6729_vm2, %v930_v3, %v934_v13  ;;  %v1093_v62 = vunpack.c.l.b16 %v925_v55  ;;  %v1024_v63 = vrot.slane %v1022_v4, 4  ;;  %v1030_v16 = vrot.slane %v1028_v58, 5  ;;  %v6135_v36 = vld [vmem:[%s8144_s2 + $0x88] sm:$0xff] }
  0x60   : > { %1223 = vmatmul.bf16.gmra.mxu1 %v1111_v5  ;;  %v1094_v0 = vunpack.c.l.b16 %v935_v15  ;;  %v1016_v8 = vrot.slane %v1015_v59, 4  ;;  %v723_v17 = vrot.slane %v721_v6, 4  ;;  %v724_v1 = vshll.u32 %v609_v46, 16  ;;  %1805 = vmatpush.bf16.msrb.mxu2 %v6135_v36  ;;  %v340_v59 = vld [vmem:[%s6622_s13 + $0x2c] sm:$0x1] }
  0x61   : > { %v1025_v11 = vor.u32 %v1024_v63, %v1020_v57  ;;  %v730_v24 = vshll.u32 %v6917_v60, 16  ;;  %v734_v9 = vshrl.u32 %v6917_v60, 16  ;;  %v740_v10 = vshll.u32 %v6919_v61, 16 }
  0x62   : > { %v1115_v14 = vpack.c.b16 %v1094_v0, %v1093_v62  ;;  %v1021_v12 = vsel %vm6729_vm2, %v1016_v8, %v1020_v57  ;;  %v726_v20 = vrot.slane %v724_v1, 5  ;;  %v464_v25 = vmul.f32 %v6636_v23, %v409_v47  ;;  %v6159_v1 = vld [vmem:[%s8144_s2 + $0xc8] sm:$0xff] }
  0x63   : > { %v1026_v27 = vrot.slane %v1025_v11, 4  ;;  %v1101_v29 = vunpack.c.l.b16 %v1021_v12  ;;  %v732_v31 = vrot.slane %v730_v24, 5  ;;  %v736_v32 = vrot.slane %v734_v9, 4  ;;  %v6168_v11 = vld [vmem:[%s8144_s2 + $0x110] sm:$0xff]  ;;  %v6119_v24 = vld [vmem:[%s8144_s2 + $0x8] sm:$0xff]  ;;  %v6134_v12 = vld [vmem:[%s8144_s2 + $0x80] sm:$0xff]  ;;  %2120 = vmatpush.bf16.msrb.mxu3 %v6159_v1 }
  0x64   : > { %1243 = vmatmul.bf16.gmra.mxu2 %v1115_v14  ;;  %v727_v33 = vor.u32 %v726_v20, %v723_v17  ;;  %v742_v30 = vrot.slane %v740_v10, 5  ;;  %v465_v37 = vmul.f32 %v6636_v23, %v410_v52  ;;  %v466_v22 = vmul.f32 %v6636_v23, %v411_v53  ;;  %v6158_v20 = vld [vmem:[%s8144_s2 + $0xc0] sm:$0xff]  ;;  %2801 = vmatpush.bf16.msrb.mxu0 %v6168_v11 }
  0x65   : > { %v1031_v47 = vsel %vm6729_vm2, %v1026_v27, %v1030_v16  ;;  %v737_v35 = vor.u32 %v736_v32, %v732_v31  ;;  %v518_v13 = vpack.c.bf16 %v464_v25, %v464_v25  ;;  %v421_v38 = vunpack.c.l.bf16 %v362_v26  ;;  %1424 = vmatpush.bf16.msrb.mxu1 %v6119_v24  ;;  %1806 = vmatpush.bf16.msrb.mxu2 %v6134_v12 }
  0x66   : > { %v1102_v41 = vunpack.c.l.b16 %v1031_v47  ;;  %v728_v39 = vrot.slane %v727_v33, 4  ;;  %v519_v42 = vpack.c.bf16 %v465_v37, %v465_v37  ;;  %v520_v28 = vpack.c.bf16 %v466_v22, %v466_v22 }
  0x67   : > { %v738_v18 = vrot.slane %v737_v35, 4  ;;  %572 = vst [vmem:[#allocation2 + $0x54] sm:$0xf] %v518_v13  ;;  %v422_v52 = vunpack.c.h.bf16 %v362_v26  ;;  %v423_v21 = vunpack.c.l.bf16 %v364_v2  ;;  %v476_v53 = vmul.f32 %v6636_v23, %v421_v38  ;;  %2121 = vmatpush.bf16.msrb.mxu3 %v6158_v20 }
  0x68   : > { %v1119_v45 = vpack.c.b16 %v1102_v41, %v1101_v29  ;;  %v733_v7 = vsel %vm6729_vm2, %v728_v39, %v732_v31  ;;  %573 = vst [vmem:[#allocation2 + $0x58] sm:$0xf] %v519_v42  ;;  %v433_v46 = vunpack.c.l.bf16 %v374_v40  ;;  %v434_v48 = vunpack.c.h.bf16 %v374_v40  ;;  %v6167_v29 = vld [vmem:[%s8144_s2 + $0x108] sm:$0xff]  ;;  %v6118_v31 = vld [vmem:[%s8144_s2] sm:$0xff] }
  0x69   : > { %v743_v51 = vsel %vm6729_vm2, %v738_v18, %v742_v30  ;;  %v1077_v56 = vunpack.c.l.b16 %v733_v7  ;;  %574 = vst [vmem:[#allocation2 + $0x5c] sm:$0x1] %v520_v28  ;;  %v477_v3 = vmul.f32 %v6636_v23, %v422_v52  ;;  %v478_v57 = vmul.f32 %v6636_v23, %v423_v21  ;;  %2802 = vmatpush.bf16.msrb.mxu0 %v6167_v29 }
  0x6a   : > { %1263 = vmatmul.bf16.gmra.mxu3 %v1119_v45  ;;  %v1078_v4 = vunpack.c.l.b16 %v743_v51  ;;  %v530_v58 = vpack.c.bf16 %v476_v53, %v476_v53  ;;  %v435_v5 = vunpack.c.l.bf16 %v376_v44  ;;  %v488_v55 = vmul.f32 %v6636_v23, %v433_v46  ;;  %1425 = vmatpush.bf16.msrb.mxu1 %v6118_v31  ;;  %v6166_v53 = vld [vmem:[%s8144_s2 + $0x100] sm:$0xff] }
  0x6b   : > { %v531_v6 = vpack.c.bf16 %v477_v3, %v477_v3  ;;  %v532_v15 = vpack.c.bf16 %v478_v57, %v478_v57  ;;  %v489_v62 = vmul.f32 %v6636_v23, %v434_v48  ;;  %v397_v63 = vunpack.c.l.bf16 %v338_v49 }
  0x6c   : > { %v1107_v16 = vpack.c.b16 %v1078_v4, %v1077_v56  ;;  %584 = vst [vmem:[#allocation2 + $0x84] sm:$0xf] %v530_v58  ;;  %v490_v0 = vmul.f32 %v6636_v23, %v435_v5  ;;  %v542_v8 = vpack.c.bf16 %v488_v55, %v488_v55  ;;  %v398_v17 = vunpack.c.h.bf16 %v338_v49 }
  0x6d   : > { %585 = vst [vmem:[#allocation2 + $0x88] sm:$0xf] %v531_v6  ;;  %v543_v9 = vpack.c.bf16 %v489_v62, %v489_v62  ;;  %v399_v10 = vunpack.c.l.bf16 %v340_v59  ;;  %v452_v14 = vmul.f32 %v6636_v23, %v397_v63  ;;  %2803 = vmatpush.bf16.msrb.mxu0 %v6166_v53 }
  0x6e   : > { %1203 = vmatmul.bf16.gmra.mxu0 %v1107_v16  ;;  %v619_v25 = vld [vmem:[#allocation2 + $0x54] sm:$0xf]  ;;  %586 = vst [vmem:[#allocation2 + $0x8c] sm:$0x1] %v532_v15  ;;  %v544_v26 = vpack.c.bf16 %v490_v0, %v490_v0  ;;  %v453_v27 = vmul.f32 %v6636_v23, %v398_v17  ;;  %v6205_v17 = vld [vmem:[%s8144_s2 + $0x1b8] sm:$0xff] }
  0x6f   : > { %v6981_v32 = vld [vmem:[#allocation2 + $0x58] sm:$0xf]  ;;  %v841_v33 = vshrl.u32 %v619_v25, 16  ;;  %v844_v30 = vshll.u32 %v619_v25, 16  ;;  %596 = vst [vmem:[#allocation2 + $0xb4] sm:$0xf] %v542_v8  ;;  %v454_v37 = vmul.f32 %v6636_v23, %v399_v10  ;;  %v506_v22 = vpack.c.bf16 %v452_v14, %v452_v14  ;;  %3537 = vmatpush.bf16.msra.mxu2 %v6205_v17 }
  0x70   : > { %v6984_v2 = vld [vmem:[#allocation2 + $0x5c] sm:$0x1]  ;;  %v850_v47 = vshll.u32 %v6981_v32, 16  ;;  %v854_v35 = vshrl.u32 %v6981_v32, 16  ;;  %597 = vst [vmem:[#allocation2 + $0xb8] sm:$0xf] %v543_v9  ;;  %v507_v13 = vpack.c.bf16 %v453_v27, %v453_v27 }
  0x71   : > { %v843_v38 = vrot.slane %v841_v33, 4  ;;  %v846_v40 = vrot.slane %v844_v30, 5  ;;  %v860_v41 = vshll.u32 %v6984_v2, 16  ;;  %598 = vst [vmem:[#allocation2 + $0xbc] sm:$0x1] %v544_v26  ;;  %v508_v39 = vpack.c.bf16 %v454_v37, %v454_v37 }
  0x72   : > { %v852_v42 = vrot.slane %v850_v47, 5  ;;  %v856_v28 = vrot.slane %v854_v35, 4  ;;  %560 = vst [vmem:[#allocation2 + $0x24] sm:$0xf] %v506_v22 }
  0x73   : > { %v847_v18 = vor.u32 %v846_v40, %v843_v38  ;;  %v862_v52 = vrot.slane %v860_v41, 5  ;;  %v627_v21 = vld [vmem:[#allocation2 + $0x84] sm:$0xf]  ;;  %561 = vst [vmem:[#allocation2 + $0x28] sm:$0xf] %v507_v13  ;;  %v6213_v13 = vld [vmem:[%s8144_s2 + $0x1f8] sm:$0xff] }
  0x74   : > { %v857_v44 = vor.u32 %v856_v28, %v852_v42  ;;  %v628_v36 = vld [vmem:[#allocation2 + $0x88] sm:$0xf]  ;;  %v937_v45 = vshrl.u32 %v627_v21, 16  ;;  %v940_v7 = vshll.u32 %v627_v21, 16  ;;  %562 = vst [vmem:[#allocation2 + $0x2c] sm:$0x1] %v508_v39  ;;  %4219 = vmatpush.bf16.msra.mxu3 %v6213_v13 }
  0x75   : > { %v848_v46 = vrot.slane %v847_v18, 4  ;;  %v664_v48 = vld [vmem:[#allocation2 + $0x8c] sm:$0x1]  ;;  %v946_v49 = vshll.u32 %v628_v36, 16  ;;  %v950_v51 = vshrl.u32 %v628_v36, 16  ;;  %v6221_v28 = vld [vmem:[%s8144_s2 + $0x238] sm:$0xff] }
  0x76   : > { %v858_v56 = vrot.slane %v857_v44, 4  ;;  %v939_v3 = vrot.slane %v937_v45, 4  ;;  %v942_v57 = vrot.slane %v940_v7, 5  ;;  %v956_v4 = vshll.u32 %v664_v48, 16  ;;  %v635_v58 = vld [vmem:[#allocation2 + $0xb4] sm:$0xf]  ;;  %4645 = vmatpush.bf16.msra.mxu0 %v6221_v28 }
  0x77   : > { %v853_v5 = vsel %vm6729_vm2, %v848_v46, %v852_v42  ;;  %v948_v55 = vrot.slane %v946_v49, 5  ;;  %v952_v59 = vrot.slane %v950_v51, 4  ;;  %v636_v6 = vld [vmem:[#allocation2 + $0xb8] sm:$0xf]  ;;  %v1033_v15 = vshrl.u32 %v635_v58, 16 }
  0x78   : > { %v863_v62 = vsel %vm6729_vm2, %v858_v56, %v862_v52  ;;  %v1087_v63 = vunpack.c.l.b16 %v853_v5  ;;  %v943_v16 = vor.u32 %v942_v57, %v939_v3  ;;  %v958_v0 = vrot.slane %v956_v4, 5  ;;  %v668_v8 = vld [vmem:[#allocation2 + $0xbc] sm:$0x1]  ;;  %v1507_v44 = vld [vmem:[#allocation2] sm:$0xe] }
  0x79   : > { %v1088_v1 = vunpack.c.l.b16 %v863_v62  ;;  %v953_v11 = vor.u32 %v952_v59, %v948_v55  ;;  %v1035_v24 = vrot.slane %v1033_v15, 4  ;;  %v1036_v9 = vshll.u32 %v635_v58, 16  ;;  %v611_v10 = vld [vmem:[#allocation2 + $0x24] sm:$0xf]  ;;  %v6181_v42 = vld [vmem:[%s8144_s2 + $0x178] sm:$0xff] }
  0x7a   : > { %v944_v14 = vrot.slane %v943_v16, 4  ;;  %v1042_v12 = vshll.u32 %v636_v6, 16  ;;  %v1046_v20 = vshrl.u32 %v636_v6, 16  ;;  %v1052_v25 = vshll.u32 %v668_v8, 16  ;;  %v6999_v31 = vld [vmem:[#allocation2 + $0x28] sm:$0xf]  ;;  %3222 = vmatpush.bf16.msra.mxu1 %v6181_v42 }
  0x7b   : > { %v1112_v26 = vpack.c.b16 %v1088_v1, %v1087_v63  ;;  %v954_v27 = vrot.slane %v953_v11, 4  ;;  %v1038_v29 = vrot.slane %v1036_v9, 5  ;;  %v745_v33 = vshrl.u32 %v611_v10, 16  ;;  %v7003_v35 = vld [vmem:[#allocation2 + $0x2c] sm:$0x1] }
  0x7c   : > { %v949_v30 = vsel %vm6729_vm2, %v944_v14, %v948_v55  ;;  %v1044_v37 = vrot.slane %v1042_v12, 5  ;;  %v1048_v22 = vrot.slane %v1046_v20, 4  ;;  %v1054_v47 = vrot.slane %v1052_v25, 5  ;;  %v2235_v58 = vld [vmem:[#allocation2 + $0xc] sm:$0xf] }
  0x7d   : > { %1228 = vmatmul.bf16.gmra.mxu1 %v1112_v26  ;;  %v959_v38 = vsel %vm6729_vm2, %v954_v27, %v958_v0  ;;  %v1095_v40 = vunpack.c.l.b16 %v949_v30  ;;  %v1039_v41 = vor.u32 %v1038_v29, %v1035_v24  ;;  %v747_v39 = vrot.slane %v745_v33, 4  ;;  %v2236_v5 = vld [vmem:[#allocation2 + $0x10] sm:$0xf]  ;;  %v2237_v14 = vld [vmem:[#allocation2 + $0x14] sm:$0x1] }
  0x7e   : > { %v1096_v18 = vunpack.c.l.b16 %v959_v38  ;;  %v1049_v52 = vor.u32 %v1048_v22, %v1044_v37  ;;  %v748_v21 = vshll.u32 %v611_v10, 16  ;;  %v754_v53 = vshll.u32 %v6999_v31, 16  ;;  %v6102_v38 = vld [vmem:[#allocation2] sm:$0xff] }
  0x7f   : > { %v1040_v36 = vrot.slane %v1039_v41, 4  ;;  %v758_v45 = vshrl.u32 %v6999_v31, 16  ;;  %v764_v7 = vshll.u32 %v7003_v35, 16  ;;  %v1560_v46 = vrot.slane %v6752_v43, 5 }
  0x80   : > { %v1116_v48 = vpack.c.b16 %v1096_v18, %v1095_v40  ;;  %v1050_v49 = vrot.slane %v1049_v52, 4  ;;  %v750_v51 = vrot.slane %v748_v21, 5  ;;  %v756_v56 = vrot.slane %v754_v53, 5 }
  0x81   : > { %v1045_v3 = vsel %vm6729_vm2, %v1040_v36, %v1044_v37  ;;  %v760_v57 = vrot.slane %v758_v45, 4  ;;  %v5555_v4 = vrot.slane %v1507_v44, 9  ;;  %v1562_v15 = vrot.slane %v1560_v46, 4 }
  0x82   : > { %1248 = vmatmul.bf16.gmra.mxu2 %v1116_v48  ;;  %v1055_v55 = vsel %vm6729_vm2, %v1050_v49, %v1054_v47  ;;  %v1103_v59 = vunpack.c.l.b16 %v1045_v3  ;;  %v751_v6 = vor.u32 %v750_v51, %v747_v39  ;;  %v766_v16 = vrot.slane %v764_v7, 5  ;;  %v2238_v7 = vld [vmem:[#allocation2 + $0x18] sm:$0xf] }
  0x83   : > { %v1104_v62 = vunpack.c.l.b16 %v1055_v55  ;;  %v761_v63 = vor.u32 %v760_v57, %v756_v56  ;;  %v1563_v0 = vrot.slane %v6762_v50, 5  ;;  %v2284_v17 = vshrl.u32 %v2235_v58, 16  ;;  %v1508_v50 = vld [vmem:[#allocation2 + $0xc] sm:$0xe]  ;;  %v1509_v48 = vld [vmem:[#allocation2 + $0x18] sm:$0xe] }
  0x84   : > { %v752_v8 = vrot.slane %v751_v6, 4  ;;  %v2287_v1 = vshll.u32 %v2235_v58, 16  ;;  %v2293_v11 = vshll.u32 %v2236_v5, 16  ;;  %v1561_v10 = vsel %vm7026_vm5, %v5555_v4, %v1560_v46 }
  0x85   : > { %v1120_v24 = vpack.c.b16 %v1104_v62, %v1103_v59  ;;  %v762_v9 = vrot.slane %v761_v63, 4  ;;  %v2297_v12 = vshrl.u32 %v2236_v5, 16  ;;  %v1564_v25 = vsel %vm7026_vm5, %v1562_v15, %v1563_v0 }
  0x86   : > { %v757_v20 = vsel %vm6729_vm2, %v752_v8, %v756_v56  ;;  %v2286_v26 = vrot.slane %v2284_v17, 4  ;;  %v2289_v27 = vrot.slane %v2287_v1, 5  ;;  %v2295_v30 = vrot.slane %v2293_v11, 5  ;;  %v2239_v56 = vld [vmem:[#allocation2 + $0x1c] sm:$0xf] }
  0x87   : > { %1268 = vmatmul.bf16.gmra.mxu3 %v1120_v24  ;;  %v767_v29 = vsel %vm6729_vm2, %v762_v9, %v766_v16  ;;  %v1079_v33 = vunpack.c.l.b16 %v757_v20  ;;  %v2299_v37 = vrot.slane %v2297_v12, 4  ;;  %v2303_v13 = vshll.u32 %v2237_v14, 16  ;;  %v6142_v16 = vld [vmem:[#allocation2 + $0xc] sm:$0xff]  ;;  %v2240_v14 = vld [vmem:[#allocation2 + $0x20] sm:$0x1] }
  0x88   : > { %v1080_v22 = vunpack.c.l.b16 %v767_v29  ;;  %v2290_v47 = vor.u32 %v2289_v27, %v2286_v26  ;;  %v5556_v41 = vrot.slane %v1508_v50, 9  ;;  %v1687_v42 = vunpack.c.l.b16 %v1561_v10  ;;  %v6204_v12 = vld [vmem:[%s8144_s2 + $0x1b0] sm:$0xff]  ;;  %v2241_v29 = vld [vmem:[#allocation2 + $0x24] sm:$0xf] }
  0x89   : > { %v2300_v40 = vor.u32 %v2299_v37, %v2295_v30  ;;  %v1688_v28 = vunpack.c.l.b16 %v1564_v25  ;;  %v1567_v18 = vrot.slane %v6865_v19, 5  ;;  %v1570_v21 = vrot.slane %v6875_v34, 5  ;;  %v6103_v25 = vld [vmem:[#allocation2 + $0xc] sm:$0xff]  ;;  %3538 = vmatpush.bf16.msra.mxu2 %v6204_v12  ;;  %v2246_v12 = vld [vmem:[#allocation2 + $0x38] sm:$0x1] }
  0x8a   : > { %v1108_v39 = vpack.c.b16 %v1080_v22, %v1079_v33  ;;  %v2291_v52 = vrot.slane %v2290_v47, 4  ;;  %v2305_v44 = vrot.slane %v2303_v13, 5  ;;  %v2308_v3 = vshrl.u32 %v2238_v7, 16  ;;  %v2242_v33 = vld [vmem:[#allocation2 + $0x28] sm:$0xf]  ;;  %v6180_v37 = vld [vmem:[%s8144_s2 + $0x170] sm:$0xff] }
  0x8b   : > { %v2301_v53 = vrot.slane %v2300_v40, 4  ;;  %v1568_v36 = vsel %vm7026_vm5, %v5556_v41, %v1567_v18  ;;  %v1569_v45 = vrot.slane %v1567_v18, 4  ;;  %v1719_v49 = vpack.c.b16 %v1688_v28, %v1687_v42  ;;  %v6220_v22 = vld [vmem:[%s8144_s2 + $0x230] sm:$0xff]  ;;  %3223 = vmatpush.bf16.msra.mxu1 %v6180_v37 }
  0x8c   : > { %1208 = vmatmul.bf16.gmra.mxu0 %v1108_v39  ;;  %v1689_v46 = vunpack.c.l.b16 %v1568_v36  ;;  %v5557_v57 = vrot.slane %v1509_v48, 9  ;;  %v2296_v34 = vsel %vm6729_vm2, %v2291_v52, %v2295_v30  ;;  %v2311_v58 = vshll.u32 %v2238_v7, 16  ;;  %v6212_v30 = vld [vmem:[%s8144_s2 + $0x1f0] sm:$0xff]  ;;  %v6143_v52 = vld [vmem:[#allocation2 + $0x18] sm:$0xff] }
  0x8d   : > { %1426 = vmatmul.bf16.vlgmr.msrb.gmra.mxu1 %v6102_v38  ;;  %v1571_v51 = vsel %vm7026_vm5, %v1569_v45, %v1570_v21  ;;  %v2306_v4 = vsel %vm6729_vm2, %v2301_v53, %v2305_v44  ;;  %v1574_v5 = vrot.slane %v6917_v60, 5  ;;  %v2317_v59 = vshll.u32 %v2239_v56, 16  ;;  %4220 = vmatpush.bf16.msra.mxu3 %v6212_v30 }
  0x8e   : > { %v1690_v19 = vunpack.c.l.b16 %v1571_v51  ;;  %v2321_v6 = vshrl.u32 %v2239_v56, 16  ;;  %v1577_v15 = vrot.slane %v6919_v61, 5  ;;  %v2684_v8 = vunpack.c.l.b16 %v2296_v34  ;;  %4646 = vmatpush.bf16.msra.mxu0 %v6220_v22 }
  0x8f   : > { %v1575_v62 = vsel %vm7026_vm5, %v5557_v57, %v1574_v5  ;;  %v1576_v63 = vrot.slane %v1574_v5, 4  ;;  %v2685_v17 = vunpack.c.l.b16 %v2306_v4  ;;  %v2310_v1 = vrot.slane %v2308_v3, 4  ;;  %v2244_v4 = vld [vmem:[#allocation2 + $0x30] sm:$0xf] }
  0x90   : > { %v1720_v55 = vpack.c.b16 %v1690_v19, %v1689_v46  ;;  %v1691_v0 = vunpack.c.l.b16 %v1575_v62  ;;  %v2313_v24 = vrot.slane %v2311_v58, 5  ;;  %v2319_v60 = vrot.slane %v2317_v59, 5  ;;  %v2243_v46 = vld [vmem:[#allocation2 + $0x2c] sm:$0x1]  ;;  %v6104_v19 = vld [vmem:[#allocation2 + $0x18] sm:$0xff] }
  0x91   : > { %v1578_v11 = vsel %vm7026_vm5, %v1576_v63, %v1577_v15  ;;  %v2323_v9 = vrot.slane %v2321_v6, 4  ;;  %v2716_v20 = vpack.c.b16 %v2685_v17, %v2684_v8  ;;  %v2327_v50 = vshll.u32 %v2240_v14, 16  ;;  %v2245_v58 = vld [vmem:[#allocation2 + $0x34] sm:$0xf]  ;;  %v1510_v6 = vld [vmem:[#allocation2 + $0x24] sm:$0xe] }
  0x92   : > { %1807 = vmatmul.bf16.vlgmr.msrb.gmra.mxu2 %v1719_v49  ;;  %v1692_v10 = vunpack.c.l.b16 %v1578_v11  ;;  %v2314_v26 = vor.u32 %v2313_v24, %v2310_v1  ;;  %v2332_v40 = vshrl.u32 %v2241_v29, 16  ;;  %v2335_v41 = vshll.u32 %v2241_v29, 16  ;;  %v6144_v8 = vld [vmem:[#allocation2 + $0x24] sm:$0xff] }
  0x93   : > { %v2324_v27 = vor.u32 %v2323_v9, %v2319_v60  ;;  %v2329_v38 = vrot.slane %v2327_v50, 5  ;;  %v2341_v39 = vshll.u32 %v2242_v33, 16  ;;  %v2345_v42 = vshrl.u32 %v2242_v33, 16  ;;  %v6105_v50 = vld [vmem:[#allocation2 + $0x24] sm:$0xff] }
  0x94   : > { %v1721_v61 = vpack.c.b16 %v1692_v10, %v1691_v0  ;;  %v2315_v47 = vrot.slane %v2314_v26, 4  ;;  %v2334_v21 = vrot.slane %v2332_v40, 4  ;;  %v2337_v53 = vrot.slane %v2335_v41, 5 }
  0x95   : > { %v2325_v13 = vrot.slane %v2324_v27, 4  ;;  %v2343_v44 = vrot.slane %v2341_v39, 5  ;;  %v2347_v36 = vrot.slane %v2345_v42, 4  ;;  %v2351_v51 = vshll.u32 %v2243_v46, 16  ;;  %v2247_v39 = vld [vmem:[#allocation2 + $0x3c] sm:$0xf] }
  0x96   : > { %v2320_v28 = vsel %vm6729_vm2, %v2315_v47, %v2319_v60  ;;  %v2338_v48 = vor.u32 %v2337_v53, %v2334_v21  ;;  %v1581_v59 = vrot.slane %v6999_v31, 5  ;;  %v2356_v15 = vshrl.u32 %v2244_v4, 16  ;;  %v6211_v47 = vld [vmem:[%s8144_s2 + $0x1e8] sm:$0xff]  ;;  %v2248_v42 = vld [vmem:[#allocation2 + $0x40] sm:$0xf]  ;;  %v6145_v46 = vld [vmem:[#allocation2 + $0x30] sm:$0xff] }
  0x97   : > { %2122 = vmatmul.bf16.vlgmr.msrb.gmra.mxu3 %v6142_v16  ;;  %v2330_v18 = vsel %vm6729_vm2, %v2325_v13, %v2329_v38  ;;  %v2686_v45 = vunpack.c.l.b16 %v2320_v28  ;;  %v2348_v49 = vor.u32 %v2347_v36, %v2343_v44  ;;  %v2353_v34 = vrot.slane %v2351_v51, 5  ;;  %v6179_v13 = vld [vmem:[%s8144_s2 + $0x168] sm:$0xff]  ;;  %v6469_v28 = vld [vmem:[#allocation2 + $0x34] sm:$0xf]  ;;  %v1511_v53 = vld [vmem:[#allocation2 + $0x30] sm:$0xe] }
  0x98   : > { %v2687_v7 = vunpack.c.l.b16 %v2330_v18  ;;  %v2339_v3 = vrot.slane %v2338_v48, 4  ;;  %v2359_v62 = vshll.u32 %v2244_v4, 16  ;;  %v2365_v63 = vshll.u32 %v2245_v58, 16  ;;  %v6219_v38 = vld [vmem:[%s8144_s2 + $0x228] sm:$0xff]  ;;  %4221 = vmatpush.bf16.msra.mxu3 %v6211_v47  ;;  %3224 = vmatpush.bf16.msra.mxu1 %v6179_v13  ;;  %v6470_v51 = vld [vmem:[#allocation2 + $0x38] sm:$0x1] }
  0x99   : > { %v2349_v57 = vrot.slane %v2348_v49, 4  ;;  %v2369_v16 = vshrl.u32 %v2245_v58, 16  ;;  %v5558_v1 = vrot.slane %v1510_v6, 9  ;;  %v1583_v11 = vrot.slane %v1581_v59, 4  ;;  %4647 = vmatpush.bf16.msra.mxu0 %v6219_v38  ;;  %v6472_v47 = vld [vmem:[#allocation2 + $0x44] sm:$0x1] }
  0x9a   : > { %v2717_v56 = vpack.c.b16 %v2687_v7, %v2686_v45  ;;  %v2344_v5 = vsel %vm6729_vm2, %v2339_v3, %v2343_v44  ;;  %v1584_v24 = vrot.slane %v7003_v35, 5  ;;  %v2358_v60 = vrot.slane %v2356_v15, 4  ;;  %v6146_v38 = vld [vmem:[#allocation2 + $0x3c] sm:$0xff] }
  0x9b   : > { %v2688_v0 = vunpack.c.l.b16 %v2344_v5  ;;  %v2361_v9 = vrot.slane %v2359_v62, 5  ;;  %v2367_v10 = vrot.slane %v2365_v63, 5  ;;  %v2371_v14 = vrot.slane %v2369_v16, 4  ;;  %v2249_v5 = vld [vmem:[#allocation2 + $0x44] sm:$0x1]  ;;  %v6106_v62 = vld [vmem:[#allocation2 + $0x30] sm:$0xff] }
  0x9c   : > { %2804 = vmatmul.bf16.vlgmr.msrb.gmra.mxu0 %v2716_v20  ;;  %v1582_v31 = vsel %vm7026_vm5, %v5558_v1, %v1581_v59  ;;  %v1585_v20 = vsel %vm7026_vm5, %v1583_v11, %v1584_v24  ;;  %v2375_v35 = vshll.u32 %v2246_v12, 16  ;;  %v1588_v18 = vrot.slane %v6469_v28, 5  ;;  %v2250_v11 = vld [vmem:[#allocation2 + $0x48] sm:$0xf]  ;;  %v2251_v24 = vld [vmem:[#allocation2 + $0x4c] sm:$0xf] }
  0x9d   : > { %1431 = vmatmul.bf16.gmra.mxu1 %v6103_v25  ;;  %v2362_v26 = vor.u32 %v2361_v9, %v2358_v60  ;;  %v2372_v27 = vor.u32 %v2371_v14, %v2367_v10  ;;  %v1693_v29 = vunpack.c.l.b16 %v1582_v31  ;;  %v1694_v33 = vunpack.c.l.b16 %v1585_v20  ;;  %v6471_v20 = vld [vmem:[#allocation2 + $0x40] sm:$0xf] }
  0x9e   : > { %v2377_v22 = vrot.slane %v2375_v35, 5  ;;  %v2380_v44 = vshrl.u32 %v2247_v39, 16  ;;  %v2383_v36 = vshll.u32 %v2247_v39, 16  ;;  %v2389_v45 = vshll.u32 %v2248_v42, 16 }
  0x9f   : > { %v2363_v30 = vrot.slane %v2362_v26, 4  ;;  %v2373_v37 = vrot.slane %v2372_v27, 4  ;;  %v1722_v40 = vpack.c.b16 %v1694_v33, %v1693_v29  ;;  %v2393_v7 = vshrl.u32 %v2248_v42, 16 }
  0xa0   : > { %v5559_v48 = vrot.slane %v1511_v53, 9  ;;  %v1590_v49 = vrot.slane %v1588_v18, 4  ;;  %v2391_v4 = vrot.slane %v2389_v45, 5  ;;  %v2404_v26 = vshrl.u32 %v2250_v11, 16  ;;  %v2252_v53 = vld [vmem:[#allocation2 + $0x50] sm:$0x1] }
  0xa1   : > { %v2378_v21 = vsel %vm6729_vm2, %v2373_v37, %v2377_v22  ;;  %v2395_v58 = vrot.slane %v2393_v7, 4  ;;  %v2407_v27 = vshll.u32 %v2250_v11, 16  ;;  %v2413_v35 = vshll.u32 %v2251_v24, 16  ;;  %v6473_v11 = vld [vmem:[#allocation2 + $0x4c] sm:$0xf] }
  0xa2   : > { %1812 = vmatmul.bf16.gmra.mxu2 %v1720_v55  ;;  %v2354_v55 = vsel %vm6729_vm2, %v2349_v57, %v2353_v34  ;;  %v2691_v3 = vunpack.c.l.b16 %v2378_v21  ;;  %v2382_v57 = vrot.slane %v2380_v44, 4  ;;  %v2385_v34 = vrot.slane %v2383_v36, 5 }
  0xa3   : > { %v2689_v17 = vunpack.c.l.b16 %v2354_v55  ;;  %v1589_v55 = vsel %vm7026_vm5, %v5559_v48, %v1588_v18  ;;  %v2396_v16 = vor.u32 %v2395_v58, %v2391_v4  ;;  %v1598_v13 = vrot.slane %v6472_v47, 5 }
  0xa4   : > { %v2386_v63 = vor.u32 %v2385_v34, %v2382_v57  ;;  %v2406_v39 = vrot.slane %v2404_v26, 4  ;;  %v2409_v42 = vrot.slane %v2407_v27, 5  ;;  %v2415_v28 = vrot.slane %v2413_v35, 5  ;;  %v6147_v27 = vld [vmem:[#allocation2 + $0x48] sm:$0xff] }
  0xa5   : > { %v2718_v25 = vpack.c.b16 %v2689_v17, %v2688_v0  ;;  %v2399_v0 = vshll.u32 %v2249_v5, 16  ;;  %v1695_v17 = vunpack.c.l.b16 %v1589_v55  ;;  %v2423_v48 = vshll.u32 %v2252_v53, 16  ;;  %v6210_v55 = vld [vmem:[%s8144_s2 + $0x1e0] sm:$0xff] }
  0xa6   : > { %v2387_v9 = vrot.slane %v2386_v63, 4  ;;  %v2410_v7 = vor.u32 %v2409_v42, %v2406_v39  ;;  %v2253_v63 = vld [vmem:[#allocation2 + $0x54] sm:$0xf]  ;;  %4222 = vmatpush.bf16.msra.mxu3 %v6210_v55  ;;  %v2255_v39 = vld [vmem:[#allocation2 + $0x5c] sm:$0x1]  ;;  %v1609_v55 = vrot.slane %v6981_v32, 5 }
  0xa7   : > { %2127 = vmatmul.bf16.gmra.mxu3 %v6143_v52  ;;  %v2368_v52 = vsel %vm6729_vm2, %v2363_v30, %v2367_v10  ;;  %v2397_v10 = vrot.slane %v2396_v16, 4  ;;  %v2401_v14 = vrot.slane %v2399_v0, 5  ;;  %v2425_v58 = vrot.slane %v2423_v48, 5  ;;  %v2254_v16 = vld [vmem:[#allocation2 + $0x58] sm:$0xf] }
  0xa8   : > { %v2392_v29 = vsel %vm6729_vm2, %v2387_v9, %v2391_v4  ;;  %v2411_v34 = vrot.slane %v2410_v7, 4  ;;  %v1513_v9 = vld [vmem:[#allocation2 + $0x48] sm:$0xe]  ;;  %v1612_v32 = vrot.slane %v6984_v2, 5  ;;  %v6109_v2 = vld [vmem:[#allocation2 + $0x54] sm:$0xff] }
  0xa9   : > { %v2402_v33 = vsel %vm6729_vm2, %v2397_v10, %v2401_v14  ;;  %v2428_v10 = vshrl.u32 %v2253_v63, 16  ;;  %v2431_v14 = vshll.u32 %v2253_v63, 16  ;;  %v6108_v7 = vld [vmem:[#allocation2 + $0x48] sm:$0xff] }
  0xaa   : > { %v2693_v21 = vunpack.c.l.b16 %v2402_v33  ;;  %v6474_v33 = vld [vmem:[#allocation2 + $0x50] sm:$0x1] }
  0xab   : > { %v2433_v47 = vrot.slane %v2431_v14, 5  ;;  %v1611_v14 = vrot.slane %v1609_v55, 4 }
  0xac   : > { %2809 = vmatmul.bf16.gmra.mxu0 %v2717_v56  ;;  %v1591_v56 = vrot.slane %v6470_v51, 5 }
  0xad   : > { %1436 = vmatmul.bf16.gmra.mxu1 %v6104_v19  ;;  %v2690_v19 = vunpack.c.l.b16 %v2368_v52  ;;  %v2692_v52 = vunpack.c.l.b16 %v2392_v29 }
  0xae   : > { %v7093_v41 = vpop.f32.mrf.mxu1  ;;  %v1592_v59 = vsel %vm7026_vm5, %v1590_v49, %v1591_v56  ;;  %v6202_v49 = vld [vmem:[%s8144_s2 + $0x1a0] sm:$0xff] }
  0xaf   : > { %v2719_v6 = vpack.c.b16 %v2691_v3, %v2690_v19  ;;  %v1696_v1 = vunpack.c.l.b16 %v1592_v59  ;;  %v2720_v51 = vpack.c.b16 %v2693_v21, %v2692_v52  ;;  %v6107_v19 = vld [vmem:[#allocation2 + $0x3c] sm:$0xff] }
  0xb0   : > { %v6178_v59 = vld [vmem:[%s8144_s2 + $0x160] sm:$0xff] }
  0xb1   : > { %v1723_v12 = vpack.c.b16 %v1696_v1, %v1695_v17  ;;  %3225 = vmatpush.bf16.msra.mxu1 %v6178_v59  ;;  %v2416_v17 = vsel %vm6729_vm2, %v2411_v34, %v2415_v28 }
  0xb2   : > { %1817 = vmatmul.bf16.gmra.mxu2 %v1721_v61  ;;  %v6203_v61 = vld [vmem:[%s8144_s2 + $0x1a8] sm:$0xff] }
  0xb3   : > { %3539 = vmatpush.bf16.msra.mxu2 %v6203_v61  ;;  %v1595_v61 = vrot.slane %v6471_v20, 5  ;;  %v2441_v20 = vshrl.u32 %v2254_v16, 16 }
  0xb5   : > { %v1597_v22 = vrot.slane %v1595_v61, 4 }
  0xb6   : > { %v7103_v15 = vpop.f32.mrf.mxu1 }
  0xb7   : > { %2132 = vmatmul.bf16.gmra.mxu3 %v6144_v8  ;;  %v7105_v8 = vpop.f32.mrf.mxu2  ;;  %v1599_v45 = vsel %vm7026_vm5, %v1597_v22, %v1598_v13  ;;  %3540 = vmatpush.bf16.msra.mxu2 %v6202_v49  ;;  %v2430_v22 = vrot.slane %v2428_v10, 4 }
  0xb8   : > { %v1698_v57 = vunpack.c.l.b16 %v1599_v45  ;;  %v2447_v45 = vshll.u32 %v2255_v39, 16 }
  0xb9   : > { %v2434_v53 = vor.u32 %v2433_v47, %v2430_v22  ;;  %v1613_v47 = vsel %vm7026_vm5, %v1611_v14, %v1612_v32  ;;  %v6217_v14 = vld [vmem:[%s8144_s2 + $0x218] sm:$0xff] }
  0xbb   : > { %v7107_v60 = vpop.f32.mrf.mxu0  ;;  %v7109_v31 = vpop.f32.mrf.mxu3 }
  0xbc   : > { %2814 = vmatmul.bf16.gmra.mxu0 %v2718_v25  ;;  %v1512_v25 = vld [vmem:[#allocation2 + $0x3c] sm:$0xe] }
  0xbd   : > { %1441 = vmatmul.bf16.gmra.mxu1 %v6105_v50  ;;  %v2417_v50 = vshrl.u32 %v2251_v24, 16  ;;  %v5560_v37 = vrot.slane %v1512_v25, 9  ;;  %v1602_v24 = vrot.slane %v6473_v11, 5  ;;  %v2694_v25 = vunpack.c.l.b16 %v2416_v17 }
  0xbf   : > { %v7115_v30 = vpop.f32.mrf.mxu1  ;;  %v2419_v18 = vrot.slane %v2417_v50, 4  ;;  %v1596_v44 = vsel %vm7026_vm5, %v5560_v37, %v1595_v61  ;;  %v5561_v50 = vrot.slane %v1513_v9, 9  ;;  %v1604_v29 = vrot.slane %v1602_v24, 4  ;;  %v6148_v9 = vld [vmem:[#allocation2 + $0x54] sm:$0xff] }
  0xc0   : > { %v1697_v3 = vunpack.c.l.b16 %v1596_v44  ;;  %v1605_v37 = vrot.slane %v6474_v33, 5 }
  0xc2   : > { %1822 = vmatmul.bf16.gmra.mxu2 %v1722_v40  ;;  %v7117_v40 = vpop.f32.mrf.mxu2  ;;  %v1724_v0 = vpack.c.b16 %v1698_v57, %v1697_v3  ;;  %v1606_v52 = vsel %vm7026_vm5, %v1604_v29, %v1605_v37  ;;  %v2449_v57 = vrot.slane %v2447_v45, 5  ;;  %v2258_v37 = vld [vmem:[#allocation2 + $0x68] sm:$0x1] }
  0xc3   : > { %v7121_v36 = vpop.f32.mrf.mxu0  ;;  %v7128_v56 = vpop.f32.mrf.mxu3  ;;  %v1700_v48 = vunpack.c.l.b16 %v1606_v52  ;;  %v6201_v52 = vld [vmem:[%s8144_s2 + $0x198] sm:$0xff] }
  0xc4   : > { %3541 = vmatpush.bf16.msra.mxu2 %v6201_v52 }
  0xc7   : > { %2137 = vmatmul.bf16.gmra.mxu3 %v6145_v46  ;;  %v2420_v46 = vor.u32 %v2419_v18, %v2415_v28  ;;  %v7130_v5 = vpop.f32.mrf.mxu1  ;;  %v1603_v18 = vsel %vm7026_vm5, %v5561_v50, %v1602_v24 }
  0xc9   : > { %v2421_v4 = vrot.slane %v2420_v46, 4  ;;  %v1699_v46 = vunpack.c.l.b16 %v1603_v18  ;;  %v2471_v18 = vshll.u32 %v2258_v37, 16 }
  0xcb   : > { %v2426_v1 = vsel %vm6729_vm2, %v2421_v4, %v2425_v58  ;;  %v1725_v34 = vpack.c.b16 %v1700_v48, %v1699_v46  ;;  %v2256_v4 = vld [vmem:[#allocation2 + $0x60] sm:$0xf]  ;;  %v2257_v58 = vld [vmem:[#allocation2 + $0x64] sm:$0xf]  ;;  %v6209_v46 = vld [vmem:[%s8144_s2 + $0x1d8] sm:$0xff] }
  0xcc   : > { %2819 = vmatmul.bf16.gmra.mxu0 %v2719_v6  ;;  %v6218_v6 = vld [vmem:[%s8144_s2 + $0x220] sm:$0xff]  ;;  %v2695_v35 = vunpack.c.l.b16 %v2426_v1  ;;  %v2452_v17 = vshrl.u32 %v2256_v4, 16  ;;  %v2455_v1 = vshll.u32 %v2256_v4, 16  ;;  %v2461_v11 = vshll.u32 %v2257_v58, 16  ;;  %v6177_v48 = vld [vmem:[%s8144_s2 + $0x158] sm:$0xff]  ;;  %4223 = vmatpush.bf16.msra.mxu3 %v6209_v46 }
  0xcd   : > { %1446 = vmatmul.bf16.gmra.mxu1 %v6106_v62  ;;  %v7141_v62 = vpop.f32.mrf.mxu2  ;;  %4648 = vmatpush.bf16.msra.mxu0 %v6218_v6  ;;  %v2465_v24 = vshrl.u32 %v2257_v58, 16 }
  0xce   : > { %v2721_v21 = vpack.c.b16 %v2695_v35, %v2694_v25  ;;  %v2457_v35 = vrot.slane %v2455_v1, 5  ;;  %v2463_v50 = vrot.slane %v2461_v11, 5  ;;  %3226 = vmatpush.bf16.msra.mxu1 %v6177_v48  ;;  %v1515_v1 = vld [vmem:[#allocation2 + $0x60] sm:$0xe] }
  0xcf   : > { %v2467_v29 = vrot.slane %v2465_v24, 4 }
  0xd0   : > { %v7149_v26 = vpop.f32.mrf.mxu3 }
  0xd1   : > { %v2468_v39 = vor.u32 %v2467_v29, %v2463_v50  ;;  %v6476_v29 = vld [vmem:[#allocation2 + $0x68] sm:$0x1]  ;;  %4649 = vmatpush.bf16.msra.mxu0 %v6217_v14 }
  0xd2   : > { %1827 = vmatmul.bf16.gmra.mxu2 %v1723_v12  ;;  %v2437_v12 = vshll.u32 %v2254_v16, 16  ;;  %v1514_v16 = vld [vmem:[#allocation2 + $0x54] sm:$0xe]  ;;  %v1619_v37 = vrot.slane %v6476_v29, 5 }
  0xd3   : > { %v5562_v10 = vrot.slane %v1514_v16, 9 }
  0xd4   : > { %v2439_v13 = vrot.slane %v2437_v12, 5 }
  0xd5   : > { %v7153_v28 = vpop.f32.mrf.mxu2  ;;  %v1610_v22 = vsel %vm7026_vm5, %v5562_v10, %v1609_v55 }
  0xd7   : > { %2142 = vmatmul.bf16.gmra.mxu3 %v6146_v38  ;;  %v7147_v61 = vpop.f32.mrf.mxu0  ;;  %v2443_v38 = vrot.slane %v2441_v20, 4 }
  0xd9   : > { %v2444_v44 = vor.u32 %v2443_v38, %v2439_v13 }
  0xdb   : > { %v2445_v3 = vrot.slane %v2444_v44, 4  ;;  %v1702_v44 = vunpack.c.l.b16 %v1613_v47 }
  0xdc   : > { %2824 = vmatmul.bf16.gmra.mxu0 %v2720_v51  ;;  %v7161_v51 = vpop.f32.mrf.mxu3 }
  0xdd   : > { %1451 = vmatmul.bf16.gmra.mxu1 %v6107_v19  ;;  %v7151_v42 = vpop.f32.mrf.mxu1  ;;  %v2435_v19 = vrot.slane %v2434_v53, 4  ;;  %v2450_v6 = vsel %vm6729_vm2, %v2445_v3, %v2449_v57  ;;  %v1701_v53 = vunpack.c.l.b16 %v1610_v22  ;;  %v2469_v3 = vrot.slane %v2468_v39, 4  ;;  %v2261_v39 = vld [vmem:[#allocation2 + $0x74] sm:$0x1] }
  0xde   : > { %v2697_v20 = vunpack.c.l.b16 %v2450_v6  ;;  %v2473_v57 = vrot.slane %v2471_v18, 5  ;;  %v2495_v46 = vshll.u32 %v2261_v39, 16 }
  0xdf   : > { %v7159_v49 = vpop.f32.mrf.mxu0  ;;  %v2440_v59 = vsel %vm6729_vm2, %v2435_v19, %v2439_v13  ;;  %v1726_v4 = vpack.c.b16 %v1702_v44, %v1701_v53 }
  0xe0   : > { %v2696_v12 = vunpack.c.l.b16 %v2440_v59  ;;  %v6475_v59 = vld [vmem:[#allocation2 + $0x64] sm:$0xf]  ;;  %v2474_v10 = vsel %vm6729_vm2, %v2469_v3, %v2473_v57 }
  0xe1   : > { %v1616_v6 = vrot.slane %v6475_v59, 5 }
  0xe2   : > { %1832 = vmatmul.bf16.gmra.mxu2 %v1724_v0  ;;  %v2722_v13 = vpack.c.b16 %v2697_v20, %v2696_v12  ;;  %v6149_v20 = vld [vmem:[#allocation2 + $0x60] sm:$0xff] }
  0xe5   : > { %v7168_v63 = vpop.f32.mrf.mxu1 }
  0xe7   : > { %2147 = vmatmul.bf16.gmra.mxu3 %v6147_v27  ;;  %v7170_v0 = vpop.f32.mrf.mxu2  ;;  %v2454_v27 = vrot.slane %v2452_v17, 4 }
  0xe9   : > { %v2458_v38 = vor.u32 %v2457_v35, %v2454_v27  ;;  %v5563_v27 = vrot.slane %v1515_v1, 9  ;;  %v1618_v35 = vrot.slane %v1616_v6, 4 }
  0xeb   : > { %v7173_v25 = vpop.f32.mrf.mxu0  ;;  %v2459_v19 = vrot.slane %v2458_v38, 4  ;;  %v1617_v18 = vsel %vm7026_vm5, %v5563_v27, %v1616_v6  ;;  %v1620_v52 = vsel %vm7026_vm5, %v1618_v35, %v1619_v37  ;;  %v2262_v6 = vld [vmem:[#allocation2 + $0x78] sm:$0xf] }
  0xec   : > { %2829 = vmatmul.bf16.gmra.mxu0 %v2721_v21  ;;  %v2503_v35 = vshll.u32 %v2262_v6, 16 }
  0xed   : > { %1456 = vmatmul.bf16.gmra.mxu1 %v6108_v7  ;;  %v7175_v33 = vpop.f32.mrf.mxu3  ;;  %v2259_v7 = vld [vmem:[#allocation2 + $0x6c] sm:$0xf] }
  0xee   : > { %v2476_v58 = vshrl.u32 %v2259_v7, 16  ;;  %v2479_v16 = vshll.u32 %v2259_v7, 16 }
  0xef   : > { %v7186_v45 = vpop.f32.mrf.mxu2 }
  0xf0   : > { %v2478_v12 = vrot.slane %v2476_v58, 4  ;;  %v2481_v22 = vrot.slane %v2479_v16, 5  ;;  %v2497_v16 = vrot.slane %v2495_v46, 5 }
  0xf2   : > { %1837 = vmatmul.bf16.gmra.mxu2 %v1725_v34  ;;  %v2260_v34 = vld [vmem:[#allocation2 + $0x70] sm:$0xf]  ;;  %v2482_v53 = vor.u32 %v2481_v22, %v2478_v12  ;;  %v1516_v12 = vld [vmem:[#allocation2 + $0x6c] sm:$0xe] }
  0xf3   : > { %v7194_v55 = vpop.f32.mrf.mxu0  ;;  %v2485_v11 = vshll.u32 %v2260_v34, 16  ;;  %v2489_v24 = vshrl.u32 %v2260_v34, 16  ;;  %v1703_v34 = vunpack.c.l.b16 %v1617_v18  ;;  %v6478_v18 = vld [vmem:[#allocation2 + $0x74] sm:$0x1] }
  0xf4   : > { %v2483_v58 = vrot.slane %v2482_v53, 4  ;;  %v6150_v53 = vld [vmem:[#allocation2 + $0x6c] sm:$0xff] }
  0xf5   : > { %v7196_v17 = vpop.f32.mrf.mxu3 }
  0xf7   : > { %2152 = vmatmul.bf16.gmra.mxu3 %v6148_v9  ;;  %v2464_v9 = vsel %vm6729_vm2, %v2459_v19, %v2463_v50  ;;  %v2699_v50 = vunpack.c.l.b16 %v2474_v10  ;;  %v6110_v19 = vld [vmem:[#allocation2 + $0x60] sm:$0xff] }
  0xf8   : > { %v2698_v47 = vunpack.c.l.b16 %v2464_v9  ;;  %v6477_v9 = vld [vmem:[#allocation2 + $0x70] sm:$0xf] }
  0xf9   : > { %v1623_v10 = vrot.slane %v6477_v9, 5 }
  0xfa   : > { %v7184_v21 = vpop.f32.mrf.mxu1  ;;  %v2723_v44 = vpack.c.b16 %v2699_v50, %v2698_v47 }
  0xfb   : > { %v1625_v39 = vrot.slane %v1623_v10, 4 }
  0xfc   : > { %2834 = vmatmul.bf16.gmra.mxu0 %v2722_v13  ;;  %v2487_v13 = vrot.slane %v2485_v11, 5  ;;  %v2263_v11 = vld [vmem:[#allocation2 + $0x7c] sm:$0xf] }
  0xfd   : > { %1461 = vmatmul.bf16.gmra.mxu1 %v6109_v2  ;;  %v2491_v2 = vrot.slane %v2489_v24, 4  ;;  %v2509_v29 = vshll.u32 %v2263_v11, 16  ;;  %v2513_v37 = vshrl.u32 %v2263_v11, 16  ;;  %v2264_v11 = vld [vmem:[#allocation2 + $0x80] sm:$0x1] }
  0xfe   : > { %v2488_v14 = vsel %vm6729_vm2, %v2483_v58, %v2487_v13 }
  0xff   : > { %v2492_v7 = vor.u32 %v2491_v2, %v2487_v13  ;;  %v5564_v2 = vrot.slane %v1516_v12, 9  ;;  %v2700_v13 = vunpack.c.l.b16 %v2488_v14 }
 0x101   : > { %v2493_v59 = vrot.slane %v2492_v7, 4 }
 0x102   : > { %1842 = vmatmul.bf16.gmra.mxu2 %v1726_v4  ;;  %v7205_v32 = vpop.f32.mrf.mxu1  ;;  %v1704_v4 = vunpack.c.l.b16 %v1620_v52  ;;  %v1626_v52 = vrot.slane %v6478_v18, 5  ;;  %v2266_v18 = vld [vmem:[#allocation2 + $0x88] sm:$0xf] }
 0x103   : > { %v2498_v27 = vsel %vm6729_vm2, %v2493_v59, %v2497_v16  ;;  %v1624_v16 = vsel %vm7026_vm5, %v5564_v2, %v1623_v10 }
 0x104   : > { %v1727_v24 = vpack.c.b16 %v1704_v4, %v1703_v34  ;;  %v7228_v34 = vrot.slane %v2509_v29, 5  ;;  %v2515_v4 = vrot.slane %v2513_v37, 4  ;;  %v2265_v37 = vld [vmem:[#allocation2 + $0x84] sm:$0xf] }
 0x105   : > { %v7207_v38 = vpop.f32.mrf.mxu2 }
 0x106   : > { %v2516_v14 = vor.u32 %v2515_v4, %v7228_v34 }
 0x107   : > { %2157 = vmatmul.bf16.gmra.mxu3 %v6149_v20  ;;  %v2500_v20 = vshrl.u32 %v2262_v6, 16  ;;  %v1627_v6 = vsel %vm7026_vm5, %v1625_v39, %v1626_v52 }
 0x109   : > { %v7213_v48 = vpop.f32.mrf.mxu0  ;;  %v2502_v7 = vrot.slane %v2500_v20, 4  ;;  %v1706_v20 = vunpack.c.l.b16 %v1627_v6  ;;  %v6479_v6 = vld [vmem:[#allocation2 + $0x7c] sm:$0xf] }
 0x10a   : > { %v7215_v3 = vpop.f32.mrf.mxu3  ;;  %v1427_v57 = vpop.f32.mrf.mxu1 }
 0x10b   : > { %v1428_v46 = vadd.f32 %v1427_v57, %v7107_v60  ;;  %v6111_v60 = vld [vmem:[#allocation2 + $0x6c] sm:$0xff]  ;;  %v1705_v57 = vunpack.c.l.b16 %v1624_v16  ;;  %v2527_v16 = vshll.u32 %v2265_v37, 16 }
 0x10c   : > { %2839 = vmatmul.bf16.gmra.mxu0 %v2723_v44  ;;  %v2701_v44 = vunpack.c.l.b16 %v2498_v27  ;;  %v2519_v27 = vshll.u32 %v2264_v11, 16  ;;  %v1630_v11 = vrot.slane %v6479_v6, 5 }
 0x10d   : > { %v7217_v1 = vpop.f32.mrf.mxu2  ;;  %1466 = vmatmul.bf16.gmra.mxu1 %v6110_v19  ;;  %v2505_v19 = vrot.slane %v2503_v35, 5  ;;  %v6200_v35 = vld [vmem:[%s8144_s2 + $0x190] sm:$0xff] }
 0x10e   : > { %3542 = vmatpush.bf16.msra.mxu2 %v6200_v35  ;;  %v2521_v4 = vrot.slane %v2519_v27, 5  ;;  %v2529_v35 = vrot.slane %v2527_v16, 5 }
 0x10f   : > { %v2506_v9 = vor.u32 %v2505_v19, %v2502_v7  ;;  %v6176_v7 = vld [vmem:[%s8144_s2 + $0x150] sm:$0xff]  ;;  %v1728_v19 = vpack.c.b16 %v1706_v20, %v1705_v57 }
 0x110   : > { %3227 = vmatpush.bf16.msra.mxu1 %v6176_v7  ;;  %v2267_v7 = vld [vmem:[#allocation2 + $0x8c] sm:$0x1] }
 0x111   : > { %v7223_v22 = vpop.f32.mrf.mxu0 }
 0x112   : > { %v7225_v47 = vpop.f32.mrf.mxu3  ;;  %1847 = vmatmul.bf16.gmra.mxu2 %v1727_v24  ;;  %v1429_v50 = vpop.f32.mrf.mxu1  ;;  %v2724_v24 = vpack.c.b16 %v2701_v44, %v2700_v13  ;;  %v2517_v13 = vrot.slane %v2516_v14, 4  ;;  %v6208_v44 = vld [vmem:[%s8144_s2 + $0x1d0] sm:$0xff] }
 0x113   : > { %v1430_v52 = vadd.f32 %v1429_v50, %v7121_v36  ;;  %v2533_v36 = vshll.u32 %v2266_v18, 16  ;;  %v2537_v50 = vshrl.u32 %v2266_v18, 16  ;;  %4224 = vmatpush.bf16.msra.mxu3 %v6208_v44  ;;  %v6480_v44 = vld [vmem:[#allocation2 + $0x80] sm:$0x1] }
 0x115   : > { %v1808_v58 = vpop.f32.mrf.mxu2 }
 0x116   : > { %v1888_v59 = vadd.f32 %v1808_v58, %v1428_v46 }
 0x117   : > { %2162 = vmatmul.bf16.gmra.mxu3 %v6150_v53  ;;  %v2507_v53 = vrot.slane %v2506_v9, 4 }
 0x119   : > { %v2805_v12 = vpop.f32.mrf.mxu0  ;;  %v2512_v14 = vsel %vm6729_vm2, %v2507_v53, %v7228_v34  ;;  %v1633_v34 = vrot.slane %v6480_v44, 5 }
 0x11a   : > { %v2123_v29 = vpop.f32.mrf.mxu3  ;;  %v1432_v10 = vpop.f32.mrf.mxu1  ;;  %v2702_v53 = vunpack.c.l.b16 %v2512_v14 }
 0x11b   : > { %v2203_v2 = vadd.f32 %v2123_v29, %v1888_v59  ;;  %v1433_v39 = vadd.f32 %v1432_v10, %v7147_v61  ;;  %v2524_v61 = vshrl.u32 %v2265_v37, 16  ;;  %v2535_v29 = vrot.slane %v2533_v36, 5 }
 0x11c   : > { %2844 = vmatmul.bf16.gmra.mxu0 %v2724_v24  ;;  %v1517_v24 = vld [vmem:[#allocation2 + $0x78] sm:$0xe]  ;;  %v2539_v10 = vrot.slane %v2537_v50, 4  ;;  %v2543_v36 = vshll.u32 %v2267_v7, 16 }
 0x11d   : > { %v1810_v46 = vpop.f32.mrf.mxu2  ;;  %1471 = vmatmul.bf16.gmra.mxu1 %v6111_v60  ;;  %v7246_v58 = vadd.f32 %v2805_v12, %v2203_v2  ;;  %v2522_v60 = vsel %vm6729_vm2, %v2517_v13, %v2521_v4  ;;  %v6216_v12 = vld [vmem:[%s8144_s2 + $0x210] sm:$0xff]  ;;  %v2526_v27 = vrot.slane %v2524_v61, 4  ;;  %v6151_v2 = vld [vmem:[#allocation2 + $0x78] sm:$0xff]  ;;  %v5565_v18 = vrot.slane %v1517_v24, 9 }
 0x11e   : > { %v1889_v59 = vadd.f32 %v1810_v46, %v1430_v52  ;;  %v1632_v52 = vrot.slane %v1630_v11, 4  ;;  %4650 = vmatpush.bf16.msra.mxu0 %v6216_v12  ;;  %v2703_v13 = vunpack.c.l.b16 %v2522_v60  ;;  %v2540_v16 = vor.u32 %v2539_v10, %v2535_v29  ;;  %v6112_v12 = vld [vmem:[#allocation2 + $0x78] sm:$0xff]  ;;  %v2268_v10 = vld [vmem:[#allocation2 + $0x90] sm:$0xf] }
 0x11f   : > { %v1631_v61 = vsel %vm7026_vm5, %v5565_v18, %v1630_v11  ;;  %v2269_v18 = vld [vmem:[#allocation2 + $0x94] sm:$0xf] }
 0x120   : > { %v2725_v50 = vpack.c.b16 %v2703_v13, %v2702_v53  ;;  %v6481_v13 = vld [vmem:[#allocation2 + $0x88] sm:$0xf] }
 0x121   : > { %v2807_v9 = vpop.f32.mrf.mxu0  ;;  %v1637_v7 = vrot.slane %v6481_v13, 5  ;;  %v2270_v13 = vld [vmem:[#allocation2 + $0x98] sm:$0x1] }
 0x122   : > { %v2125_v57 = vpop.f32.mrf.mxu3  ;;  %1852 = vmatmul.bf16.gmra.mxu2 %v1728_v19  ;;  %v1434_v20 = vpop.f32.mrf.mxu1  ;;  %v2530_v19 = vor.u32 %v2529_v35, %v2526_v27  ;;  %v2541_v27 = vrot.slane %v2540_v16, 4  ;;  %v2545_v35 = vrot.slane %v2543_v36, 5 }
 0x123   : > { %v2204_v37 = vadd.f32 %v2125_v57, %v1889_v59  ;;  %v1634_v59 = vsel %vm7026_vm5, %v1632_v52, %v1633_v34  ;;  %v1707_v57 = vunpack.c.l.b16 %v1631_v61  ;;  %v1435_v11 = vadd.f32 %v1434_v20, %v7159_v49 }
 0x124   : > { %v1708_v44 = vunpack.c.l.b16 %v1634_v59  ;;  %v2551_v61 = vshll.u32 %v2268_v10, 16  ;;  %v2557_v49 = vshll.u32 %v2269_v18, 16  ;;  %v2561_v20 = vshrl.u32 %v2269_v18, 16 }
 0x125   : > { %v1813_v46 = vpop.f32.mrf.mxu2  ;;  %v7256_v4 = vadd.f32 %v2807_v9, %v2204_v37  ;;  %v2531_v9 = vrot.slane %v2530_v19, 4  ;;  %v2548_v19 = vshrl.u32 %v2268_v10, 16 }
 0x126   : > { %v1890_v6 = vadd.f32 %v1813_v46, %v1433_v39  ;;  %v1729_v53 = vpack.c.b16 %v1708_v44, %v1707_v57  ;;  %v6152_v57 = vld [vmem:[#allocation2 + $0x84] sm:$0xff] }
 0x127   : > { %2167 = vmatmul.bf16.gmra.mxu3 %v6151_v2  ;;  %v2536_v46 = vsel %vm6729_vm2, %v2531_v9, %v2535_v29 }
 0x128   : > { %v2704_v44 = vunpack.c.l.b16 %v2536_v46 }
 0x129   : > { %v2810_v24 = vpop.f32.mrf.mxu0 }
 0x12a   : > { %v2128_v14 = vpop.f32.mrf.mxu3  ;;  %v1437_v60 = vpop.f32.mrf.mxu1 }
 0x12b   : > { %v2205_v37 = vadd.f32 %v2128_v14, %v1890_v6  ;;  %v1438_v39 = vadd.f32 %v1437_v60, %v7173_v25  ;;  %v2546_v25 = vsel %vm6729_vm2, %v2541_v27, %v2545_v35  ;;  %v1518_v6 = vld [vmem:[#allocation2 + $0x84] sm:$0xe]  ;;  %v2553_v27 = vrot.slane %v2551_v61, 5 }
 0x12c   : > { %2849 = vmatmul.bf16.gmra.mxu0 %v2725_v50  ;;  %v5566_v50 = vrot.slane %v1518_v6, 9  ;;  %v2705_v29 = vunpack.c.l.b16 %v2546_v25  ;;  %v7271_v35 = vrot.slane %v2557_v49, 5 }
 0x12d   : > { %v1815_v2 = vpop.f32.mrf.mxu2  ;;  %1476 = vmatmul.bf16.gmra.mxu1 %v6112_v12  ;;  %v7264_v52 = vadd.f32 %v2810_v24, %v2205_v37  ;;  %v1639_v24 = vrot.slane %v1637_v7, 4  ;;  %v6482_v12 = vld [vmem:[#allocation2 + $0x8c] sm:$0x1]  ;;  %v2550_v37 = vrot.slane %v2548_v19, 4  ;;  %v6113_v19 = vld [vmem:[#allocation2 + $0x84] sm:$0xff] }
 0x12e   : > { %v1891_v34 = vadd.f32 %v1815_v2, %v1435_v11  ;;  %v1640_v14 = vrot.slane %v6482_v12, 5  ;;  %v2563_v11 = vrot.slane %v2561_v20, 4  ;;  %v2726_v46 = vpack.c.b16 %v2705_v29, %v2704_v44 }
 0x12f   : > { %v2554_v25 = vor.u32 %v2553_v27, %v2550_v37  ;;  %v2567_v20 = vshll.u32 %v2270_v13, 16  ;;  %v6483_v13 = vld [vmem:[#allocation2 + $0x94] sm:$0xf] }
 0x131   : > { %v2812_v59 = vpop.f32.mrf.mxu0  ;;  %v2555_v12 = vrot.slane %v2554_v25, 4  ;;  %v2569_v37 = vrot.slane %v2567_v20, 5 }
 0x132   : > { %v2130_v16 = vpop.f32.mrf.mxu3  ;;  %1857 = vmatmul.bf16.gmra.mxu2 %v1729_v53  ;;  %v1439_v36 = vpop.f32.mrf.mxu1  ;;  %v1638_v53 = vsel %vm7026_vm5, %v5566_v50, %v1637_v7 }
 0x133   : > { %v2206_v60 = vadd.f32 %v2130_v16, %v1891_v34  ;;  %v1440_v9 = vadd.f32 %v1439_v36, %v7194_v55  ;;  %v1641_v34 = vsel %vm7026_vm5, %v1639_v24, %v1640_v14  ;;  %v2564_v55 = vor.u32 %v2563_v11, %v7271_v35  ;;  %v2271_v16 = vld [vmem:[#allocation2 + $0x9c] sm:$0xf]  ;;  %v2272_v24 = vld [vmem:[#allocation2 + $0xa0] sm:$0xf] }
 0x134   : > { %v1709_v61 = vunpack.c.l.b16 %v1638_v53  ;;  %v1710_v49 = vunpack.c.l.b16 %v1641_v34  ;;  %v2572_v27 = vshrl.u32 %v2271_v16, 16  ;;  %v2585_v53 = vshrl.u32 %v2272_v24, 16  ;;  %v1519_v34 = vld [vmem:[#allocation2 + $0x90] sm:$0xe] }
 0x135   : > { %v1818_v2 = vpop.f32.mrf.mxu2  ;;  %v7273_v10 = vadd.f32 %v2812_v59, %v2206_v60  ;;  %v2565_v14 = vrot.slane %v2564_v55, 4  ;;  %v6207_v60 = vld [vmem:[%s8144_s2 + $0x1c8] sm:$0xff]  ;;  %v2560_v55 = vsel %vm6729_vm2, %v2555_v12, %v7271_v35  ;;  %v5567_v20 = vrot.slane %v1519_v34, 9  ;;  %v6484_v12 = vld [vmem:[#allocation2 + $0x98] sm:$0x1] }
 0x136   : > { %v1892_v18 = vadd.f32 %v1818_v2, %v1438_v39  ;;  %v6199_v39 = vld [vmem:[%s8144_s2 + $0x188] sm:$0xff]  ;;  %v1730_v29 = vpack.c.b16 %v1710_v49, %v1709_v61  ;;  %v2575_v2 = vshll.u32 %v2271_v16, 16  ;;  %4225 = vmatpush.bf16.msra.mxu3 %v6207_v60  ;;  %v2574_v61 = vrot.slane %v2572_v27, 4 }
 0x137   : > { %2172 = vmatmul.bf16.gmra.mxu3 %v6152_v57  ;;  %3543 = vmatpush.bf16.msra.mxu2 %v6199_v39  ;;  %v6175_v57 = vld [vmem:[%s8144_s2 + $0x148] sm:$0xff]  ;;  %v1647_v60 = vrot.slane %v6484_v12, 5 }
 0x138   : > { %3228 = vmatpush.bf16.msra.mxu1 %v6175_v57  ;;  %v2577_v39 = vrot.slane %v2575_v2, 5 }
 0x139   : > { %v2815_v6 = vpop.f32.mrf.mxu0 }
 0x13a   : > { %v2133_v59 = vpop.f32.mrf.mxu3  ;;  %v1442_v7 = vpop.f32.mrf.mxu1 }
 0x13b   : > { %v2207_v36 = vadd.f32 %v2133_v59, %v1892_v18  ;;  %v1443_v50 = vadd.f32 %v1442_v7, %v7213_v48  ;;  %v2581_v18 = vshll.u32 %v2272_v24, 16  ;;  %v2587_v7 = vrot.slane %v2585_v53, 4 }
 0x13c   : > { %2854 = vmatmul.bf16.gmra.mxu0 %v2726_v46  ;;  %v1644_v46 = vrot.slane %v6483_v13, 5  ;;  %v2578_v13 = vor.u32 %v2577_v39, %v2574_v61 }
 0x13d   : > { %v1820_v44 = vpop.f32.mrf.mxu2  ;;  %1481 = vmatmul.bf16.gmra.mxu1 %v6113_v19  ;;  %v7290_v11 = vadd.f32 %v2815_v6, %v2207_v36  ;;  %v2570_v19 = vsel %vm6729_vm2, %v2565_v14, %v2569_v37  ;;  %v2583_v59 = vrot.slane %v2581_v18, 5  ;;  %v6153_v36 = vld [vmem:[#allocation2 + $0x90] sm:$0xff]  ;;  %v2706_v14 = vunpack.c.l.b16 %v2560_v55 }
 0x13e   : > { %v1893_v48 = vadd.f32 %v1820_v44, %v1440_v9  ;;  %v6215_v9 = vld [vmem:[%s8144_s2 + $0x208] sm:$0xff]  ;;  %v1646_v35 = vrot.slane %v1644_v46, 4  ;;  %v2707_v57 = vunpack.c.l.b16 %v2570_v19  ;;  %v2273_v44 = vld [vmem:[#allocation2 + $0xa4] sm:$0x1]  ;;  %v1645_v2 = vsel %vm7026_vm5, %v5567_v20, %v1644_v46 }
 0x13f   : > { %4651 = vmatpush.bf16.msra.mxu0 %v6215_v9  ;;  %v2591_v18 = vshll.u32 %v2273_v44, 16  ;;  %v6114_v9 = vld [vmem:[#allocation2 + $0x90] sm:$0xff]  ;;  %v2274_v46 = vld [vmem:[#allocation2 + $0xa8] sm:$0xf]  ;;  %v2275_v20 = vld [vmem:[#allocation2 + $0xac] sm:$0xf] }
 0x140   : > { %v2727_v53 = vpack.c.b16 %v2707_v57, %v2706_v14  ;;  %v6485_v14 = vld [vmem:[#allocation2 + $0xa0] sm:$0xf]  ;;  %v1520_v44 = vld [vmem:[#allocation2 + $0x9c] sm:$0xe] }
 0x141   : > { %v2817_v25 = vpop.f32.mrf.mxu0  ;;  %v2593_v61 = vrot.slane %v2591_v18, 5  ;;  %v1651_v57 = vrot.slane %v6485_v14, 5 }
 0x142   : > { %v2135_v6 = vpop.f32.mrf.mxu3  ;;  %1862 = vmatmul.bf16.gmra.mxu2 %v1730_v29  ;;  %v1444_v49 = vpop.f32.mrf.mxu1 }
 0x143   : > { %v2208_v16 = vadd.f32 %v2135_v6, %v1893_v48  ;;  %v1445_v24 = vadd.f32 %v1444_v49, %v7223_v22  ;;  %v1648_v48 = vsel %vm7026_vm5, %v1646_v35, %v1647_v60  ;;  %v2588_v22 = vor.u32 %v2587_v7, %v2583_v59 }
 0x144   : > { %v1711_v6 = vunpack.c.l.b16 %v1645_v2  ;;  %v1712_v49 = vunpack.c.l.b16 %v1648_v48  ;;  %v6390_v2 = vld [vmem:[%s6622_s13 + $0xc0] sm:$0xff]  }
 0x145   : > { %v1823_v37 = vpop.f32.mrf.mxu2  ;;  %v7301_v27 = vadd.f32 %v2817_v25, %v2208_v16  ;;  %v2579_v16 = vrot.slane %v2578_v13, 4  ;;  %v2605_v13 = vshll.u32 %v2275_v20, 16 }
 0x146   : > { %v1894_v29 = vadd.f32 %v1823_v37, %v1443_v50  ;;  %v2589_v50 = vrot.slane %v2588_v22, 4  ;;  %v1731_v35 = vpack.c.b16 %v1712_v49, %v1711_v6  ;;  %v2596_v37 = vshrl.u32 %v2274_v46, 16  ;;  %v6154_v6 = vld [vmem:[#allocation2 + $0x9c] sm:$0xff] }
 0x147   : > { %2177 = vmatmul.bf16.gmra.mxu3 %v6153_v36  ;;  %v2584_v12 = vsel %vm6729_vm2, %v2579_v16, %v2583_v59  ;;  %v2609_v22 = vshrl.u32 %v2275_v20, 16  ;;  %v6257_v59 = vunpack.c.h.bf16 %v6390_v2  ;;  %v5568_v49 = vrot.slane %v1520_v44, 9  ;;  %v6486_v16 = vld [vmem:[#allocation2 + $0xa4] sm:$0x1]  ;;  %v379_v20 = vld [vmem:[%s6622_s13 + $0xc8] sm:$0x1] }
 0x148   : > { %v2594_v60 = vsel %vm6729_vm2, %v2589_v50, %v2593_v61  ;;  %v1654_v50 = vrot.slane %v6486_v16, 5  ;;  %v7315_v14 = vrot.slane %v2605_v13, 5 }
 0x149   : > { %v2820_v34 = vpop.f32.mrf.mxu0  ;;  %v1652_v44 = vsel %vm7026_vm5, %v5568_v49, %v1651_v57 }
 0x14a   : > { %v2138_v55 = vpop.f32.mrf.mxu3  ;;  %v1447_v19 = vpop.f32.mrf.mxu1 }
 0x14b   : > { %v2209_v25 = vadd.f32 %v2138_v55, %v1894_v29  ;;  %v2599_v29 = vshll.u32 %v2274_v46, 16  ;;  %v1448_v61 = vadd.f32 %v1447_v19, %v7093_v41 }
 0x14c   : > { %2859 = vmatmul.bf16.gmra.mxu0 %v2727_v53  ;;  %v2709_v53 = vunpack.c.l.b16 %v2594_v60  ;;  %v492_v60 = vmul.f32 %v6257_v59, %v6636_v23 }
 0x14d   : > { %v1825_v39 = vpop.f32.mrf.mxu2  ;;  %1486 = vmatmul.bf16.gmra.mxu1 %v6114_v9  ;;  %v7307_v36 = vadd.f32 %v2820_v34, %v2209_v25  ;;  %v6256_v9 = vunpack.c.l.bf16 %v6390_v2  ;;  %v1653_v25 = vrot.slane %v1651_v57, 4  ;;  %v2601_v46 = vrot.slane %v2599_v29, 5 }
 0x14e   : > { %v1895_v7 = vadd.f32 %v1825_v39, %v1445_v24  ;;  %v2708_v24 = vunpack.c.l.b16 %v2584_v12  ;;  %v2598_v39 = vrot.slane %v2596_v37, 4  ;;  %v438_v2 = vunpack.c.l.bf16 %v379_v20 }
 0x14f   : > { %8156 = vst [vmem:[#allocation4_spill] sm:$0xff] %v7307_v36  ;;  %v2611_v36 = vrot.slane %v2609_v22, 4  ;;  %v491_v12 = vmul.f32 %v6256_v9, %v6636_v23  ;;  %v1655_v41 = vsel %vm7026_vm5, %v1653_v25, %v1654_v50  ;;  %v6115_v9 = vld [vmem:[#allocation2 + $0x9c] sm:$0xff]  ;;  %v1713_v25 = vunpack.c.l.b16 %v1652_v44  ;;  %v6487_v44 = vld [vmem:[#allocation2 + $0xac] sm:$0xf] }
 0x150   : > { %v2728_v37 = vpack.c.b16 %v2709_v53, %v2708_v24  ;;  %v493_v29 = vmul.f32 %v6636_v23, %v438_v2  ;;  %v2602_v16 = vor.u32 %v2601_v46, %v2598_v39  ;;  %v1714_v50 = vunpack.c.l.b16 %v1655_v41  ;;  %v6174_v39 = vld [vmem:[%s8144_s2 + $0x140] sm:$0xff] }
 0x151   : > { %v2822_v48 = vpop.f32.mrf.mxu0  ;;  %v6301_v19 = vpack.c.bf16 %v492_v60, %v491_v12  ;;  %v2612_v59 = vor.u32 %v2611_v36, %v7315_v14  ;;  %v6206_v36 = vld [vmem:[%s8144_s2 + $0x1c0] sm:$0xff]  ;;  %3229 = vmatpush.bf16.msra.mxu1 %v6174_v39  ;;  %v1658_v41 = vrot.slane %v6487_v44, 5  ;;  %v2279_v44 = vld [vmem:[#allocation2 + $0xbc] sm:$0x1] }
 0x152   : > { %v2140_v18 = vpop.f32.mrf.mxu3  ;;  %1867 = vmatmul.bf16.gmra.mxu2 %v1731_v35  ;;  %v1449_v34 = vpop.f32.mrf.mxu1  ;;  %v547_v24 = vpack.c.bf16 %v493_v29, %v493_v29  ;;  %v2603_v20 = vrot.slane %v2602_v16, 4  ;;  %4226 = vmatpush.bf16.msra.mxu3 %v6206_v36 }
 0x153   : > { %v2210_v55 = vadd.f32 %v2140_v18, %v1895_v7  ;;  %v2276_v18 = vld [vmem:[#allocation2 + $0xb0] sm:$0x1]  ;;  %6398 = vst [vmem:[#allocation2 + $0xc0] sm:$0xff] %v6301_v19   ;;  %v1521_v19 = vld [vmem:[#allocation2 + $0xa8] sm:$0xe] }
 0x154   : > { %601 = vst [vmem:[#allocation2 + $0xc8] sm:$0x1] %v547_v24  ;;  %v2608_v29 = vsel %vm6729_vm2, %v2603_v20, %v7315_v14  ;;  %v6155_v24 = vld [vmem:[#allocation2 + $0xa8] sm:$0xff] }
 0x155   : > { %v1828_v35 = vpop.f32.mrf.mxu2  ;;  %v7325_v13 = vadd.f32 %v2822_v48, %v2210_v55  ;;  %v2277_v48 = vld [vmem:[#allocation2 + $0xb4] sm:$0xf]  ;;  %v1450_v55 = vadd.f32 %v1449_v34, %v7103_v15  ;;  %v2710_v39 = vunpack.c.l.b16 %v2608_v29  ;;  %v2639_v29 = vshll.u32 %v2279_v44, 16 }
 0x156   : > { %v1896_v7 = vadd.f32 %v1828_v35, %v1448_v61  ;;  %v2615_v61 = vshll.u32 %v2276_v18, 16  ;;  %v2613_v35 = vrot.slane %v2612_v59, 4  ;;  %v2278_v18 = vld [vmem:[#allocation2 + $0xb8] sm:$0xf]  ;;  %v2620_v15 = vshrl.u32 %v2277_v48, 16  ;;  %v6214_v59 = vld [vmem:[%s8144_s2 + $0x200] sm:$0xff] }
 0x157   : > { %2182 = vmatmul.bf16.gmra.mxu3 %v6154_v6  ;;  %v6198_v6 = vld [vmem:[%s8144_s2 + $0x180] sm:$0xff]  ;;  %v2623_v34 = vshll.u32 %v2277_v48, 16  ;;  %v2633_v16 = vshrl.u32 %v2278_v18, 16  ;;  %v1660_v48 = vrot.slane %v1658_v41, 4  ;;  %4652 = vmatpush.bf16.msra.mxu0 %v6214_v59 }
 0x158   : > { %3544 = vmatpush.bf16.msra.mxu2 %v6198_v6  ;;  %v2617_v12 = vrot.slane %v2615_v61, 5 }
 0x159   : > { %v2825_v22 = vpop.f32.mrf.mxu0 }
 0x15a   : > { %v2143_v57 = vpop.f32.mrf.mxu3  ;;  %v1452_v49 = vpop.f32.mrf.mxu1 }
 0x15b   : > { %v2211_v53 = vadd.f32 %v2143_v57, %v1896_v7  ;;  %v1732_v7 = vpack.c.b16 %v1714_v50, %v1713_v25  ;;  %v2622_v57 = vrot.slane %v2620_v15, 4  ;;  %v2625_v25 = vrot.slane %v2623_v34, 5 }
 0x15c   : > { %2864 = vmatmul.bf16.gmra.mxu0 %v2728_v37  ;;  %v1453_v36 = vadd.f32 %v1452_v49, %v7115_v30  ;;  %v6116_v30 = vld [vmem:[#allocation2 + $0xa8] sm:$0xff] }
 0x15d   : > { %v1830_v46 = vpop.f32.mrf.mxu2  ;;  %1491 = vmatmul.bf16.gmra.mxu1 %v6115_v9  ;;  %v7338_v60 = vadd.f32 %v2825_v22, %v2211_v53  ;;  %v2618_v9 = vsel %vm6729_vm2, %v2613_v35, %v2617_v12  ;;  %v2629_v22 = vshll.u32 %v2278_v18, 16  ;;  %v5569_v53 = vrot.slane %v1521_v19, 9 }
 0x15e   : > { %v1897_v2 = vadd.f32 %v1830_v46, %v1450_v55  ;;  %v6488_v55 = vld [vmem:[#allocation2 + $0xb0] sm:$0x1]  ;;  %v2711_v46 = vunpack.c.l.b16 %v2618_v9  ;;  %v2635_v12 = vrot.slane %v2633_v16, 4  ;;  %v2626_v34 = vor.u32 %v2625_v25, %v2622_v57  ;;  %v2280_v25 = vld [vmem:[#allocation2 + $0xc0] sm:$0xf] }
 0x15f   : > { %v1661_v14 = vrot.slane %v6488_v55, 5  ;;  %v2631_v35 = vrot.slane %v2629_v22, 5  ;;  %v6489_v55 = vld [vmem:[#allocation2 + $0x10] sm:$0xf]  ;;  %v2641_v57 = vrot.slane %v2639_v29, 5 }
 0x160   : > { %v2729_v19 = vpack.c.b16 %v2711_v46, %v2710_v39  ;;  %v2281_v39 = vld [vmem:[#allocation2 + $0xc4] sm:$0xf] }
 0x161   : > { %v2827_v37 = vpop.f32.mrf.mxu0  ;;  %v1662_v15 = vsel %vm7026_vm5, %v1660_v48, %v1661_v14  ;;  %v2636_v49 = vor.u32 %v2635_v12, %v2631_v35  ;;  %v1522_v12 = vld [vmem:[#allocation2 + $0xb4] sm:$0xe]  ;;  %v2657_v29 = vshrl.u32 %v2281_v39, 16 }
 0x162   : > { %v2145_v61 = vpop.f32.mrf.mxu3  ;;  %1872 = vmatmul.bf16.gmra.mxu2 %v1732_v7  ;;  %v1454_v6 = vpop.f32.mrf.mxu1 }
 0x163   : > { %v2212_v50 = vadd.f32 %v2145_v61, %v1897_v2  ;;  %v1659_v2 = vsel %vm7026_vm5, %v5569_v53, %v1658_v41  ;;  %v2983_v41 = vrot.slane %v6489_v55, 5  ;;  %v2637_v48 = vrot.slane %v2636_v49, 4  ;;  %v6492_v55 = vld [vmem:[#allocation2 + $0xbc] sm:$0x1] }
 0x164   : > { %v1715_v16 = vunpack.c.l.b16 %v1659_v2  ;;  %v6491_v2 = vld [vmem:[#allocation2 + $0x14] sm:$0x1]  ;;  %v2653_v49 = vshll.u32 %v2281_v39, 16  ;;  %v2659_v39 = vrot.slane %v2657_v29, 4 }
 0x165   : > { %v1833_v20 = vpop.f32.mrf.mxu2  ;;  %v7349_v18 = vadd.f32 %v2827_v37, %v2212_v50  ;;  %v1716_v37 = vunpack.c.l.b16 %v1662_v15  ;;  %v2627_v50 = vrot.slane %v2626_v34, 4  ;;  %v2647_v15 = vshll.u32 %v2280_v25, 16 }
 0x166   : > { %v1898_v7 = vadd.f32 %v1833_v20, %v1453_v36  ;;  %v2985_v34 = vrot.slane %v2983_v41, 4 }
 0x167   : > { %8157 = vst [vmem:[#allocation5_spill] sm:$0xff] %v7349_v18  ;;  %2187 = vmatmul.bf16.gmra.mxu3 %v6155_v24  ;;  %v1455_v24 = vadd.f32 %v1454_v6, %v7130_v5  ;;  %v1733_v36 = vpack.c.b16 %v1716_v37, %v1715_v16  ;;  %v2632_v20 = vsel %vm6729_vm2, %v2627_v50, %v2631_v35  ;;  %v2986_v5 = vrot.slane %v6491_v2, 5  ;;  %v2917_v35 = vld [vmem:[#allocation2 + $0xc] sm:$0xe]  ;;  %v6156_v50 = vld [vmem:[#allocation2 + $0xb4] sm:$0xff] }
 0x168   : > { %v2644_v6 = vshrl.u32 %v2280_v25, 16  ;;  %v5570_v37 = vrot.slane %v1522_v12, 9  ;;  %v2649_v18 = vrot.slane %v2647_v15, 5  ;;  %v2282_v12 = vld [vmem:[#allocation2 + $0xc8] sm:$0x1] }
 0x169   : > { %v2830_v59 = vpop.f32.mrf.mxu0 }
 0x16a   : > { %v2148_v9 = vpop.f32.mrf.mxu3  ;;  %v1457_v22 = vpop.f32.mrf.mxu1 }
 0x16b   : > { %v2213_v61 = vadd.f32 %v2148_v9, %v1898_v7  ;;  %v6490_v7 = vld [vmem:[#allocation2 + $0xb8] sm:$0xf]  ;;  %v1458_v25 = vadd.f32 %v1457_v22, %v7151_v42 }
 0x16c   : > { %2869 = vmatmul.bf16.gmra.mxu0 %v2729_v19  ;;  %v1665_v44 = vrot.slane %v6490_v7, 5  ;;  %v5779_v7 = vrot.slane %v2917_v35, 9 }
 0x16d   : > { %v1835_v53 = vpop.f32.mrf.mxu2  ;;  %1496 = vmatmul.bf16.gmra.mxu1 %v6116_v30  ;;  %v7356_v46 = vadd.f32 %v2830_v59, %v2213_v61  ;;  %v2642_v30 = vsel %vm6729_vm2, %v2637_v48, %v2641_v57  ;;  %v2712_v59 = vunpack.c.l.b16 %v2632_v20  ;;  %v2655_v57 = vrot.slane %v2653_v49, 5  ;;  %v7373_v49 = vld [vmem:[#allocation2 + $0x1c] sm:$0xf] }
 0x16e   : > { %v1899_v14 = vadd.f32 %v1835_v53, %v1455_v24  ;;  %v1667_v24 = vrot.slane %v1665_v44, 4  ;;  %v1668_v53 = vrot.slane %v6492_v55, 5  ;;  %v2713_v2 = vunpack.c.l.b16 %v2642_v30 }
 0x16f   : > { %8158 = vst [vmem:[#allocation6_spill] sm:$0xff] %v7356_v46  ;;  %v2646_v46 = vrot.slane %v2644_v6, 4  ;;  %v2987_v20 = vsel %vm7026_vm5, %v2985_v34, %v2986_v5  ;;  %v1666_v42 = vsel %vm7026_vm5, %v5570_v37, %v1665_v44  ;;  %v3658_v6 = vld [vmem:[#allocation2 + $0x18] sm:$0xf]  ;;  %v2660_v35 = vor.u32 %v2659_v39, %v2655_v57 }
 0x170   : > { %v3111_v23 = vunpack.c.l.b16 %v2987_v20  ;;  %v1669_v22 = vsel %vm7026_vm5, %v1667_v24, %v1668_v53  ;;  %v2730_v15 = vpack.c.b16 %v2713_v2, %v2712_v59  ;;  %v6117_v34 = vld [vmem:[#allocation2 + $0xb4] sm:$0xff]  ;;  %v2663_v55 = vshll.u32 %v2282_v12, 16 }
 0x171   : > { %v2832_v19 = vpop.f32.mrf.mxu0  ;;  %v2650_v29 = vor.u32 %v2649_v18, %v2646_v46  ;;  %v1718_v44 = vunpack.c.l.b16 %v1669_v22  ;;  %v3707_v37 = vshrl.u32 %v3658_v6, 16  ;;  %v3710_v24 = vshll.u32 %v3658_v6, 16 }
 0x172   : > { %v2150_v9 = vpop.f32.mrf.mxu3  ;;  %1877 = vmatmul.bf16.gmra.mxu2 %v1733_v36  ;;  %v1459_v16 = vpop.f32.mrf.mxu1  ;;  %v2984_v36 = vsel %vm7026_vm5, %v5779_v7, %v2983_v41  ;;  %v3716_v59 = vshll.u32 %v7373_v49, 16  ;;  %v2661_v18 = vrot.slane %v2660_v35, 4  ;;  %v2665_v46 = vrot.slane %v2663_v55, 5 }
 0x173   : > { %v2214_v61 = vadd.f32 %v2150_v9, %v1899_v14  ;;  %v3110_v9 = vunpack.c.l.b16 %v2984_v36  ;;  %v2651_v53 = vrot.slane %v2650_v29, 4  ;;  %v3709_v20 = vrot.slane %v3707_v37, 4  ;;  %v6157_v29 = vld [vmem:[#allocation2 + $0xc0] sm:$0xff] }
 0x174   : > { %v3712_v12 = vrot.slane %v3710_v24, 5 }
 0x175   : > { %v1838_v48 = vpop.f32.mrf.mxu2  ;;  %v7371_v30 = vpack.c.b16 %v3111_v23, %v3110_v9  ;;  %v7375_v41 = vadd.f32 %v2832_v19, %v2214_v61  ;;  %v3720_v23 = vshrl.u32 %v7373_v49, 16  ;;  %v1460_v19 = vadd.f32 %v1459_v16, %v7168_v63 }
 0x176   : > { %v1900_v14 = vadd.f32 %v1838_v48, %v1458_v25  ;;  %v1717_v25 = vunpack.c.l.b16 %v1666_v42  ;;  %v7382_v42 = vld [vmem:[#allocation2 + $0x20] sm:$0x1]  ;;  %v2656_v6 = vsel %vm6729_vm2, %v2651_v53, %v2655_v57  ;;  %v2666_v63 = vsel %vm6729_vm2, %v2661_v18, %v2665_v46  ;;  %v7390_v57 = vld [vmem:[#allocation2 + $0x28] sm:$0xf]  ;;  %v4340_v53 = vld [vmem:[#allocation2 + $0x18] sm:$0xe] }
 0x177   : > { %2192 = vmatmul.bf16.gmra.mxu3 %v6156_v50  ;;  %v3722_v9 = vrot.slane %v3720_v23, 4  ;;  %v3726_v55 = vshll.u32 %v7382_v42, 16  ;;  %v4406_v18 = vrot.slane %v7373_v49, 5 }
 0x178   : > { %v1734_v39 = vpack.c.b16 %v1718_v44, %v1717_v25  ;;  %v2714_v25 = vunpack.c.l.b16 %v2656_v6  ;;  %v2715_v44 = vunpack.c.l.b16 %v2666_v63  ;;  %v2918_v6 = vld [vmem:[#allocation2 + $0x18] sm:$0xe]  ;;  %v6493_v63 = vld [vmem:[#allocation2 + $0x1c] sm:$0xf] }
 0x179   : > { %v2835_v5 = vpop.f32.mrf.mxu0 }
 0x17a   : > { %v2153_v50 = vpop.f32.mrf.mxu3  ;;  %v1462_v7 = vpop.f32.mrf.mxu1 }
 0x17b   : > { %v2215_v48 = vadd.f32 %v2153_v50, %v1900_v14  ;;  %v3718_v14 = vrot.slane %v3716_v59, 5  ;;  %v1463_v50 = vadd.f32 %v1462_v7, %v7184_v21  ;;  %v3740_v7 = vshll.u32 %v7390_v57, 16 }
 0x17c   : > { %2874 = vmatmul.bf16.gmra.mxu0 %v2730_v15 }
 0x17d   : > { %v1840_v61 = vpop.f32.mrf.mxu2  ;;  %1501 = vmatmul.bf16.gmra.mxu1 %v6117_v34  ;;  %v7380_v36 = vadd.f32 %v2835_v5, %v2215_v48  ;;  %v3713_v5 = vor.u32 %v3712_v12, %v3709_v20  ;;  %v3723_v35 = vor.u32 %v3722_v9, %v3718_v14  ;;  %v3661_v48 = vld [vmem:[#allocation2 + $0x24] sm:$0xf]  ;;  %v3744_v20 = vshrl.u32 %v7390_v57, 16 }
 0x17e   : > { %v1901_v2 = vadd.f32 %v1840_v61, %v1460_v19  ;;  %v3728_v19 = vrot.slane %v3726_v55, 5  ;;  %v2731_v61 = vpack.c.b16 %v2715_v44, %v2714_v25  ;;  %v3731_v46 = vshrl.u32 %v3661_v48, 16 }
 0x17f   : > { %v3714_v59 = vrot.slane %v3713_v5, 4  ;;  %v3724_v23 = vrot.slane %v3723_v35, 4  ;;  %v3734_v21 = vshll.u32 %v3661_v48, 16  ;;  %v4408_v35 = vrot.slane %v4406_v18, 4 }
 0x180   : > { %v4409_v55 = vrot.slane %v7382_v42, 5  ;;  %v5780_v44 = vrot.slane %v2918_v6, 9  ;;  %v7404_v48 = vrot.slane %v3740_v7, 5  ;;  %v4802_v7 = vld [vmem:[%s8146_s4] sm:$0xff] }
 0x181   : > { %v2837_v22 = vpop.f32.mrf.mxu0  ;;  %v3719_v5 = vsel %vm6729_vm2, %v3714_v59, %v3718_v14  ;;  %v3729_v49 = vsel %vm6729_vm2, %v3724_v23, %v3728_v19  ;;  %v6182_v59 = vld [vmem:[#allocation2 + $0x18] sm:$0xff]  ;;  %v6494_v23 = vld [vmem:[#allocation2 + $0x20] sm:$0x1] }
 0x182   : > { %v2155_v16 = vpop.f32.mrf.mxu3  ;;  %1882 = vmatmul.bf16.gmra.mxu2 %v1734_v39  ;;  %v1464_v15 = vpop.f32.mrf.mxu1  ;;  %v2993_v19 = vrot.slane %v6494_v23, 5  ;;  %v3664_v23 = vld [vmem:[#allocation2 + $0x30] sm:$0xf] }
 0x183   : > { %v2216_v34 = vadd.f32 %v2155_v16, %v1901_v2  ;;  %v2990_v16 = vrot.slane %v6493_v63, 5 }
 0x185   : > { %v1843_v37 = vpop.f32.mrf.mxu2  ;;  %v7393_v2 = vadd.f32 %v2837_v22, %v2216_v34  ;;  %v6003_v22 = vrot.slane %v4340_v53, 9  ;;  %v1465_v34 = vadd.f32 %v1464_v15, %v7205_v32  ;;  %v4107_v32 = vunpack.c.l.b16 %v3719_v5  ;;  %v7408_v53 = vld [vmem:[#allocation2 + $0x2c] sm:$0x1] }
 0x186   : > { %v1902_v24 = vadd.f32 %v1843_v37, %v1463_v50  ;;  %v3733_v50 = vrot.slane %v3731_v46, 4  ;;  %v3736_v37 = vrot.slane %v3734_v21, 5  ;;  %v4108_v15 = vunpack.c.l.b16 %v3729_v49 }
 0x187   : > { %2197 = vmatmul.bf16.gmra.mxu3 %v6157_v29  ;;  %v4410_v46 = vsel %vm7026_vm5, %v4408_v35, %v4409_v55  ;;  %v2991_v6 = vsel %vm7026_vm5, %v5780_v44, %v2990_v16  ;;  %v6549_v5 = vmov 0  }
 0x188   : > { %v3737_v21 = vor.u32 %v3736_v37, %v3733_v50  ;;  %6464 = vset.pattern.permute.xlu0 %v6549_v5  ;;  %6465 = vset.pattern.permute.xlu1 %v6549_v5  ;;  %v4534_v55 = vunpack.c.l.b16 %v4410_v46  ;;  %v4803_v46 = vld [vmem:[%s8146_s4 + $0x8] sm:$0xff] }
 0x189   : > { %v2840_v39 = vpop.f32.mrf.mxu0  ;;  %4836 = vperm.xlu0 %6464, %v4802_v7   ;;  %6466 = vset.pattern.permute.xlu2 %v6549_v5  ;;  %v3758_v5 = vshll.u32 %v3664_v23, 16 }
 0x18a   : > { %v2158_v12 = vpop.f32.mrf.mxu3  ;;  %v1467_v9 = vpop.f32.mrf.mxu1  ;;  %v3738_v37 = vrot.slane %v3737_v21, 4 }
 0x18b   : > { %v2217_v29 = vadd.f32 %v2158_v12, %v1902_v24  ;;  %v3746_v24 = vrot.slane %v3744_v20, 4  ;;  %v2992_v12 = vrot.slane %v2990_v16, 4  ;;  %v3112_v16 = vunpack.c.l.b16 %v2991_v6  ;;  %v2919_v6 = vld [vmem:[#allocation2 + $0x24] sm:$0xe] }
 0x18c   : > { %2879 = vmatmul.bf16.gmra.mxu0 %v2731_v61 }
 0x18d   : > { %v1845_v25 = vpop.f32.mrf.mxu2  ;;  %3230 = vmatmul.bf16.vlgmr.msra.gmra.mxu1 %v7371_v30  ;;  %v7406_v61 = vadd.f32 %v2840_v39, %v2217_v29  ;;  %v4407_v30 = vsel %vm7026_vm5, %v6003_v22, %v4406_v18  ;;  %v2994_v63 = vsel %vm7026_vm5, %v2992_v12, %v2993_v19  ;;  %v3747_v29 = vor.u32 %v3746_v24, %v7404_v48  ;;  %v4341_v12 = vld [vmem:[#allocation2 + $0x24] sm:$0xe] }
 0x18e   : > { %v1903_v14 = vadd.f32 %v1845_v25, %v1465_v34  ;;  %v3750_v18 = vshll.u32 %v7408_v53, 16  ;;  %v4139_v22 = vpack.c.b16 %v4108_v15, %v4107_v32  ;;  %v1468_v34 = vadd.f32 %v1467_v9, %v7105_v8  ;;  %v7425_v32 = vld [vmem:[#allocation2 + $0x34] sm:$0xf] }
 0x18f   : > { %v4533_v35 = vunpack.c.l.b16 %v4407_v30  ;;  %v3113_v25 = vunpack.c.l.b16 %v2994_v63  ;;  %v6004_v30 = vrot.slane %v4341_v12, 9  ;;  %v6495_v63 = vld [vmem:[#allocation2 + $0x28] sm:$0xf]  ;;  %v6496_v12 = vld [vmem:[#allocation2 + $0x2c] sm:$0x1] }
 0x190   : > { %v3752_v24 = vrot.slane %v3750_v18, 5 }
 0x191   : > { %v2842_v42 = vpop.f32.mrf.mxu0  ;;  %v4565_v19 = vpack.c.b16 %v4534_v55, %v4533_v35  ;;  %v3143_v9 = vpack.c.b16 %v3113_v25, %v3112_v16  ;;  %4841 = vperm.xlu0 %6464, %v4803_v46  }
 0x192   : > { %v2160_v20 = vpop.f32.mrf.mxu3  ;;  %3545 = vmatmul.bf16.vlgmr.msra.gmra.mxu2 %v6182_v59  ;;  %v1469_v39 = vpop.f32.mrf.mxu1  ;;  %v3748_v59 = vrot.slane %v3747_v29, 4  ;;  %v3755_v29 = vshrl.u32 %v3664_v23, 16  ;;  %v3000_v23 = vrot.slane %v6496_v12, 5  ;;  %v4342_v12 = vld [vmem:[#allocation2 + $0x30] sm:$0xe] }
 0x193   : > { %v2218_v49 = vadd.f32 %v2160_v20, %v1903_v14  ;;  %v4413_v14 = vrot.slane %v7390_v57, 5  ;;  %v3743_v20 = vsel %vm6729_vm2, %v3738_v37, %v7404_v48  ;;  %v4416_v48 = vrot.slane %v7408_v53, 5 }
 0x194   : > { %v3753_v57 = vsel %vm6729_vm2, %v3748_v59, %v3752_v24  ;;  %v6183_v59 = vld [vmem:[#allocation2 + $0x24] sm:$0xff] }
 0x195   : > { %v1848_v50 = vpop.f32.mrf.mxu2  ;;  %v7427_v15 = vadd.f32 %v2842_v42, %v2218_v49  ;;  %v2997_v42 = vrot.slane %v6495_v63, 5  ;;  %v3764_v49 = vshll.u32 %v7425_v32, 16  ;;  %v4415_v35 = vrot.slane %v4413_v14, 4 }
 0x196   : > { %v1904_v44 = vadd.f32 %v1848_v50, %v1468_v34  ;;  %v1470_v34 = vadd.f32 %v1469_v39, %v7117_v40  ;;  %v4109_v50 = vunpack.c.l.b16 %v3743_v20  ;;  %v4110_v16 = vunpack.c.l.b16 %v3753_v57  ;;  %v7449_v20 = vld [vmem:[#allocation2 + $0x38] sm:$0x1] }
 0x197   : > { %4227 = vmatmul.bf16.vlgmr.msra.gmra.mxu3 %v4139_v22  ;;  %v3768_v22 = vshrl.u32 %v7425_v32, 16  ;;  %v4414_v25 = vsel %vm7026_vm5, %v6004_v30, %v4413_v14  ;;  %v2999_v24 = vrot.slane %v2997_v42, 4  ;;  %v3757_v40 = vrot.slane %v3755_v29, 4  ;;  %v4804_v14 = vld [vmem:[%s8146_s4 + $0x10] sm:$0xff] }
 0x198   : > { %v3760_v39 = vrot.slane %v3758_v5, 5  ;;  %v7445_v46 = vrot.slane %v3764_v49, 5  ;;  %v4140_v30 = vpack.c.b16 %v4110_v16, %v4109_v50  ;;  %v4535_v57 = vunpack.c.l.b16 %v4414_v25  ;;  %4846 = vperm.xlu1 %6465, %v4804_v14   ;;  %v3667_v16 = vld [vmem:[#allocation2 + $0x3c] sm:$0xf] }
 0x199   : > { %v2845_v8 = vpop.f32.mrf.mxu0  ;;  %v3770_v53 = vrot.slane %v3768_v22, 4  ;;  %v3001_v29 = vsel %vm7026_vm5, %v2999_v24, %v3000_v23  ;;  %v4420_v23 = vrot.slane %v7425_v32, 5 }
 0x19a   : > { %v2163_v21 = vpop.f32.mrf.mxu3  ;;  %v1472_v7 = vpop.f32.mrf.mxu1  ;;  %v3761_v49 = vor.u32 %v3760_v39, %v3757_v40  ;;  %v3115_v50 = vunpack.c.l.b16 %v3001_v29  ;;  %v3779_v40 = vshrl.u32 %v3667_v16, 16  ;;  %v6497_v29 = vld [vmem:[#allocation2 + $0x34] sm:$0xf] }
 0x19b   : > { %v2219_v18 = vadd.f32 %v2163_v21, %v1904_v44  ;;  %v5781_v44 = vrot.slane %v2919_v6, 9  ;;  %v3771_v22 = vor.u32 %v3770_v53, %v7445_v46  ;;  %v3782_v53 = vshll.u32 %v3667_v16, 16 }
 0x19c   : > { %4653 = vmatmul.bf16.vlgmr.msra.gmra.mxu0 %v4565_v19 }
 0x19d   : > { %v1850_v55 = vpop.f32.mrf.mxu2  ;;  %3235 = vmatmul.bf16.gmra.mxu1 %v3143_v9  ;;  %v7443_v19 = vadd.f32 %v2845_v8, %v2219_v18  ;;  %v4417_v9 = vsel %vm7026_vm5, %v4415_v35, %v4416_v48  ;;  %v2998_v63 = vsel %vm7026_vm5, %v5781_v44, %v2997_v42  ;;  %v3774_v35 = vshll.u32 %v7449_v20, 16 }
 0x19e   : > { %v1905_v37 = vadd.f32 %v1850_v55, %v1470_v34  ;;  %v4536_v5 = vunpack.c.l.b16 %v4417_v9  ;;  %v1473_v34 = vadd.f32 %v1472_v7, %v7141_v62  ;;  %v3114_v55 = vunpack.c.l.b16 %v2998_v63  ;;  %v2920_v63 = vld [vmem:[#allocation2 + $0x30] sm:$0xe] }
 0x19f   : > { %v3762_v44 = vrot.slane %v3761_v49, 4  ;;  %v3772_v24 = vrot.slane %v3771_v22, 4  ;;  %v4423_v49 = vrot.slane %v7449_v20, 5  ;;  %v3784_v16 = vrot.slane %v3782_v53, 5 }
 0x1a0   : > { %v4566_v42 = vpack.c.b16 %v4536_v5, %v4535_v57  ;;  %v3144_v7 = vpack.c.b16 %v3115_v50, %v3114_v55  ;;  %v3004_v5 = vrot.slane %v6497_v29, 5  ;;  %v5782_v50 = vrot.slane %v2920_v63, 9  ;;  %v6184_v29 = vld [vmem:[#allocation2 + $0x30] sm:$0xff] }
 0x1a1   : > { %v2847_v21 = vpop.f32.mrf.mxu0 }
 0x1a2   : > { %v2165_v8 = vpop.f32.mrf.mxu3  ;;  %3550 = vmatmul.bf16.gmra.mxu2 %v6183_v59  ;;  %v1474_v6 = vpop.f32.mrf.mxu1  ;;  %v7467_v59 = vld [vmem:[#allocation2 + $0x40] sm:$0xf] }
 0x1a3   : > { %v2220_v18 = vadd.f32 %v2165_v8, %v1905_v37  ;;  %v3776_v37 = vrot.slane %v3774_v35, 5  ;;  %v3788_v9 = vshll.u32 %v7467_v59, 16  ;;  %v3792_v14 = vshrl.u32 %v7467_v59, 16  ;;  %v4805_v8 = vld [vmem:[%s8146_s4 + $0x18] sm:$0xff] }
 0x1a4   : > { %4851 = vperm.xlu1 %6465, %v4805_v8   ;;  %v1475_v22 = vadd.f32 %v1474_v6, %v7153_v28  ;;  %v4422_v35 = vrot.slane %v4420_v23, 4  ;;  %v7486_v6 = vld [vmem:[#allocation2 + $0x44] sm:$0x1] }
 0x1a5   : > { %v1853_v48 = vpop.f32.mrf.mxu2  ;;  %v7470_v39 = vadd.f32 %v2847_v21, %v2220_v18  ;;  %v3767_v21 = vsel %vm6729_vm2, %v3762_v44, %v7445_v46  ;;  %v6005_v18 = vrot.slane %v4342_v12, 9  ;;  %v3794_v8 = vrot.slane %v3792_v14, 4  ;;  %v6498_v44 = vld [vmem:[#allocation2 + $0x38] sm:$0x1] }
 0x1a6   : > { %v1906_v25 = vadd.f32 %v1853_v48, %v1473_v34  ;;  %v3777_v34 = vsel %vm6729_vm2, %v3772_v24, %v3776_v37  ;;  %v3781_v48 = vrot.slane %v3779_v40, 4  ;;  %v3006_v46 = vrot.slane %v3004_v5, 4 }
 0x1a7   : > { %4232 = vmatmul.bf16.gmra.mxu3 %v4140_v30  ;;  %v3007_v12 = vrot.slane %v6498_v44, 5  ;;  %v4112_v28 = vunpack.c.l.b16 %v3777_v34  ;;  %v4421_v37 = vsel %vm7026_vm5, %v6005_v18, %v4420_v23  ;;  %v4424_v40 = vsel %vm7026_vm5, %v4422_v35, %v4423_v49 }
 0x1a8   : > { %v3005_v14 = vsel %vm7026_vm5, %v5782_v50, %v3004_v5  ;;  %v4537_v18 = vunpack.c.l.b16 %v4421_v37  ;;  %v4538_v34 = vunpack.c.l.b16 %v4424_v40  ;;  %v4343_v5 = vld [vmem:[#allocation2 + $0x3c] sm:$0xe]  ;;  %v3670_v50 = vld [vmem:[#allocation2 + $0x48] sm:$0xf] }
 0x1a9   : > { %v2850_v62 = vpop.f32.mrf.mxu0  ;;  %v3116_v35 = vunpack.c.l.b16 %v3005_v14  ;;  %v6499_v14 = vld [vmem:[#allocation2 + $0x40] sm:$0xf] }
 0x1aa   : > { %v2168_v30 = vpop.f32.mrf.mxu3  ;;  %v1477_v57 = vpop.f32.mrf.mxu1 }
 0x1ab   : > { %v2221_v32 = vadd.f32 %v2168_v30, %v1906_v25  ;;  %v3790_v25 = vrot.slane %v3788_v9, 5  ;;  %v1478_v23 = vadd.f32 %v1477_v57, %v7170_v0 }
 0x1ac   : > { %4658 = vmatmul.bf16.gmra.mxu0 %v4566_v42  ;;  %v4111_v42 = vunpack.c.l.b16 %v3767_v21 }
 0x1ad   : > { %v1855_v55 = vpop.f32.mrf.mxu2  ;;  %3240 = vmatmul.bf16.gmra.mxu1 %v3144_v7  ;;  %v7484_v20 = vadd.f32 %v2850_v62, %v2221_v32  ;;  %v3785_v7 = vor.u32 %v3784_v16, %v3781_v48  ;;  %v3008_v62 = vsel %vm7026_vm5, %v3006_v46, %v3007_v12  ;;  %v3795_v63 = vor.u32 %v3794_v8, %v3790_v25  ;;  %v7499_v12 = vld [vmem:[#allocation2 + $0x4c] sm:$0xf] }
 0x1ae   : > { %v1907_v30 = vadd.f32 %v1855_v55, %v1475_v22  ;;  %v3798_v32 = vshll.u32 %v7486_v6, 16  ;;  %v4141_v22 = vpack.c.b16 %v4112_v28, %v4111_v42  ;;  %v3117_v48 = vunpack.c.l.b16 %v3008_v62 }
 0x1af   : > { %v3786_v16 = vrot.slane %v3785_v7, 4  ;;  %v4567_v46 = vpack.c.b16 %v4538_v34, %v4537_v18  ;;  %v4427_v8 = vrot.slane %v7467_v59, 5  ;;  %v6006_v42 = vrot.slane %v4343_v5, 9 }
 0x1b0   : > { %v3800_v44 = vrot.slane %v3798_v32, 5  ;;  %v3145_v57 = vpack.c.b16 %v3117_v48, %v3116_v35  ;;  %v3011_v62 = vrot.slane %v6499_v14, 5  ;;  %v3806_v32 = vshll.u32 %v3670_v50, 16 }
 0x1b1   : > { %v2852_v24 = vpop.f32.mrf.mxu0  ;;  %v3791_v40 = vsel %vm6729_vm2, %v3786_v16, %v3790_v25  ;;  %v4430_v18 = vrot.slane %v7486_v6, 5  ;;  %v4428_v35 = vsel %vm7026_vm5, %v6006_v42, %v4427_v8  ;;  %v6185_v16 = vld [vmem:[#allocation2 + $0x3c] sm:$0xff] }
 0x1b2   : > { %v2170_v53 = vpop.f32.mrf.mxu3  ;;  %3555 = vmatmul.bf16.gmra.mxu2 %v6184_v29  ;;  %v1479_v9 = vpop.f32.mrf.mxu1  ;;  %v3796_v29 = vrot.slane %v3795_v63, 4  ;;  %v3803_v63 = vshrl.u32 %v3670_v50, 16  ;;  %v4113_v34 = vunpack.c.l.b16 %v3791_v40  ;;  %v7519_v40 = vld [vmem:[#allocation2 + $0x50] sm:$0x1] }
 0x1b3   : > { %v2222_v21 = vadd.f32 %v2170_v53, %v1907_v30  ;;  %v2921_v53 = vld [vmem:[#allocation2 + $0x3c] sm:$0xe] }
 0x1b4   : > { %v3801_v7 = vsel %vm6729_vm2, %v3796_v29, %v3800_v44  ;;  %v5783_v48 = vrot.slane %v2921_v53, 9  ;;  %v3013_v29 = vrot.slane %v3011_v62, 4  ;;  %v6500_v44 = vld [vmem:[#allocation2 + $0x44] sm:$0x1] }
 0x1b5   : > { %v1858_v49 = vpop.f32.mrf.mxu2  ;;  %v7501_v30 = vadd.f32 %v2852_v24, %v2222_v21  ;;  %v3812_v24 = vshll.u32 %v7499_v12, 16  ;;  %v3816_v21 = vshrl.u32 %v7499_v12, 16  ;;  %v3014_v5 = vrot.slane %v6500_v44, 5  ;;  %v4344_v44 = vld [vmem:[#allocation2 + $0x48] sm:$0xe] }
 0x1b6   : > { %v1908_v55 = vadd.f32 %v1858_v49, %v1478_v23  ;;  %v4429_v23 = vrot.slane %v4427_v8, 4  ;;  %v4114_v49 = vunpack.c.l.b16 %v3801_v7  ;;  %v4808_v8 = vld [vmem:[%s8146_s4 + $0x30] sm:$0xff]  ;;  %v3012_v14 = vsel %vm7026_vm5, %v5783_v48, %v3011_v62 }
 0x1b7   : > { %4237 = vmatmul.bf16.gmra.mxu3 %v4141_v22  ;;  %v1480_v22 = vadd.f32 %v1479_v9, %v7186_v45  ;;  %v3808_v45 = vrot.slane %v3806_v32, 5  ;;  %v7515_v9 = vrot.slane %v3812_v24, 5  ;;  %v3818_v6 = vrot.slane %v3816_v21, 4  ;;  %4866 = vperm.xlu0 %6464, %v4808_v8  }
 0x1b8   : > { %v4142_v7 = vpack.c.b16 %v4114_v49, %v4113_v34  ;;  %v3673_v49 = vld [vmem:[#allocation2 + $0x54] sm:$0xf] }
 0x1b9   : > { %v2855_v0 = vpop.f32.mrf.mxu0  ;;  %v3819_v21 = vor.u32 %v3818_v6, %v7515_v9  ;;  %v3830_v6 = vshll.u32 %v3673_v49, 16 }
 0x1ba   : > { %v2173_v28 = vpop.f32.mrf.mxu3  ;;  %v1482_v37 = vpop.f32.mrf.mxu1 }
 0x1bb   : > { %v2223_v59 = vadd.f32 %v2173_v28, %v1908_v55 }
 0x1bc   : > { %4663 = vmatmul.bf16.gmra.mxu0 %v4567_v46  ;;  %v3805_v46 = vrot.slane %v3803_v63, 4  ;;  %v3015_v63 = vsel %vm7026_vm5, %v3013_v29, %v3014_v5  ;;  %v3820_v29 = vrot.slane %v3819_v21, 4  ;;  %v4434_v5 = vrot.slane %v7499_v12, 5 }
 0x1bd   : > { %v1860_v25 = vpop.f32.mrf.mxu2  ;;  %3245 = vmatmul.bf16.gmra.mxu1 %v3145_v57  ;;  %v7513_v50 = vadd.f32 %v2855_v0, %v2223_v59  ;;  %v4431_v57 = vsel %vm7026_vm5, %v4429_v23, %v4430_v18  ;;  %v4539_v0 = vunpack.c.l.b16 %v4428_v35  ;;  %v3822_v23 = vshll.u32 %v7519_v40, 16 }
 0x1be   : > { %v1909_v55 = vadd.f32 %v1860_v25, %v1480_v22  ;;  %v4540_v32 = vunpack.c.l.b16 %v4431_v57  ;;  %v3809_v24 = vor.u32 %v3808_v45, %v3805_v46  ;;  %v1483_v22 = vadd.f32 %v1482_v37, %v7207_v38 }
 0x1bf   : > { %v3118_v25 = vunpack.c.l.b16 %v3012_v14  ;;  %v3119_v34 = vunpack.c.l.b16 %v3015_v63  ;;  %v3827_v46 = vshrl.u32 %v3673_v49, 16  ;;  %v2922_v14 = vld [vmem:[#allocation2 + $0x48] sm:$0xe]  ;;  %v4437_v21 = vrot.slane %v7519_v40, 5 }
 0x1c0   : > { %v4568_v62 = vpack.c.b16 %v4540_v32, %v4539_v0  ;;  %v3810_v48 = vrot.slane %v3809_v24, 4  ;;  %v6007_v24 = vrot.slane %v4344_v44, 9  ;;  %v5784_v49 = vrot.slane %v2922_v14, 9  ;;  %v6502_v44 = vld [vmem:[#allocation2 + $0x50] sm:$0x1] }
 0x1c1   : > { %v2857_v28 = vpop.f32.mrf.mxu0  ;;  %v3146_v37 = vpack.c.b16 %v3119_v34, %v3118_v25  ;;  %v3829_v25 = vrot.slane %v3827_v46, 4  ;;  %v3021_v40 = vrot.slane %v6502_v44, 5 }
 0x1c2   : > { %v2175_v42 = vpop.f32.mrf.mxu3  ;;  %3560 = vmatmul.bf16.gmra.mxu2 %v6185_v16  ;;  %v1484_v53 = vpop.f32.mrf.mxu1  ;;  %v7531_v16 = vld [vmem:[#allocation2 + $0x58] sm:$0xf]  ;;  %v3815_v32 = vsel %vm6729_vm2, %v3810_v48, %v7515_v9  ;;  %v6186_v9 = vld [vmem:[#allocation2 + $0x48] sm:$0xff] }
 0x1c3   : > { %v2224_v59 = vadd.f32 %v2175_v42, %v1909_v55  ;;  %v3824_v55 = vrot.slane %v3822_v23, 5  ;;  %v3836_v57 = vshll.u32 %v7531_v16, 16  ;;  %v3840_v8 = vshrl.u32 %v7531_v16, 16  ;;  %v4806_v42 = vld [vmem:[%s8146_s4 + $0x20] sm:$0xff] }
 0x1c4   : > { %4856 = vperm.xlu2 %6466, %v4806_v42   ;;  %v3832_v42 = vrot.slane %v3830_v6, 5  ;;  %v4807_v6 = vld [vmem:[%s8146_s4 + $0x28] sm:$0xff] }
 0x1c5   : > { %v1863_v18 = vpop.f32.mrf.mxu2  ;;  %v7534_v45 = vadd.f32 %v2857_v28, %v2224_v59  ;;  %v6501_v28 = vld [vmem:[#allocation2 + $0x4c] sm:$0xf]  ;;  %v3825_v23 = vsel %vm6729_vm2, %v3820_v29, %v3824_v55  ;;  %v4435_v55 = vsel %vm7026_vm5, %v6007_v24, %v4434_v5 }
 0x1c6   : > { %v1910_v35 = vadd.f32 %v1863_v18, %v1483_v22  ;;  %v3018_v63 = vrot.slane %v6501_v28, 5  ;;  %v1485_v22 = vadd.f32 %v1484_v53, %v7217_v1  ;;  %v4436_v18 = vrot.slane %v4434_v5, 4  ;;  %v7555_v28 = vld [vmem:[#allocation2 + $0x5c] sm:$0x1] }
 0x1c7   : > { %4242 = vmatmul.bf16.gmra.mxu3 %v4142_v7  ;;  %v4809_v7 = vld [vmem:[%s8146_s4 + $0x38] sm:$0xff]  ;;  %v4115_v1 = vunpack.c.l.b16 %v3815_v32  ;;  %v4116_v53 = vunpack.c.l.b16 %v3825_v23  ;;  %v3846_v5 = vshll.u32 %v7555_v28, 16 }
 0x1c8   : > { %4871 = vperm.xlu1 %6465, %v4809_v7   ;;  %v3842_v7 = vrot.slane %v3840_v8, 4  ;;  %v3020_v48 = vrot.slane %v3018_v63, 4  ;;  %v4438_v46 = vsel %vm7026_vm5, %v4436_v18, %v4437_v21  ;;  %v3019_v8 = vsel %vm7026_vm5, %v5784_v49, %v3018_v63 }
 0x1c9   : > { %v2860_v38 = vpop.f32.mrf.mxu0  ;;  %v4143_v24 = vpack.c.b16 %v4116_v53, %v4115_v1  ;;  %v4542_v23 = vunpack.c.l.b16 %v4438_v46  ;;  %v3848_v49 = vrot.slane %v3846_v5, 5  ;;  %v4345_v53 = vld [vmem:[#allocation2 + $0x54] sm:$0xe] }
 0x1ca   : > { %v2178_v0 = vpop.f32.mrf.mxu3  ;;  %v1487_v12 = vpop.f32.mrf.mxu1  ;;  %v3022_v14 = vsel %vm7026_vm5, %v3020_v48, %v3021_v40  ;;  %v3676_v48 = vld [vmem:[#allocation2 + $0x60] sm:$0xf] }
 0x1cb   : > { %v2225_v59 = vadd.f32 %v2178_v0, %v1910_v35  ;;  %v7551_v35 = vrot.slane %v3836_v57, 5  ;;  %v1488_v21 = vadd.f32 %v1487_v12, %v7109_v31  ;;  %v4441_v31 = vrot.slane %v7531_v16, 5  ;;  %v4811_v12 = vld [vmem:[%s8146_s4 + $0x48] sm:$0xff] }
 0x1cc   : > { %4668 = vmatmul.bf16.gmra.mxu0 %v4568_v62  ;;  %4861 = vperm.xlu2 %6466, %v4807_v6   ;;  %v3854_v16 = vshll.u32 %v3676_v48, 16 }
 0x1cd   : > { %v1865_v34 = vpop.f32.mrf.mxu2  ;;  %3250 = vmatmul.bf16.gmra.mxu1 %v3146_v37  ;;  %v7553_v62 = vadd.f32 %v2860_v38, %v2225_v59  ;;  %v3833_v37 = vor.u32 %v3832_v42, %v3829_v25  ;;  %v3843_v59 = vor.u32 %v3842_v7, %v7551_v35  ;;  %v3120_v25 = vunpack.c.l.b16 %v3019_v8  ;;  %v7571_v7 = vld [vmem:[#allocation2 + $0x64] sm:$0xf]  ;;  %4881 = vperm.xlu0 %6464, %v4811_v12  }
 0x1ce   : > { %v1911_v0 = vadd.f32 %v1865_v34, %v1485_v22  ;;  %v4541_v22 = vunpack.c.l.b16 %v4435_v55  ;;  %v3121_v34 = vunpack.c.l.b16 %v3022_v14  ;;  %v3851_v14 = vshrl.u32 %v3676_v48, 16 }
 0x1cf   : > { %v3844_v63 = vrot.slane %v3843_v59, 4  ;;  %v3860_v5 = vshll.u32 %v7571_v7, 16 }
 0x1d0   : > { %v4569_v44 = vpack.c.b16 %v4542_v23, %v4541_v22  ;;  %v3147_v1 = vpack.c.b16 %v3121_v34, %v3120_v25  ;;  %v4443_v25 = vrot.slane %v4441_v31, 4 }
 0x1d1   : > { %v2862_v29 = vpop.f32.mrf.mxu0  ;;  %v3849_v6 = vsel %vm6729_vm2, %v3844_v63, %v3848_v49  ;;  %v6187_v63 = vld [vmem:[#allocation2 + $0x54] sm:$0xff]  ;;  %v6504_v49 = vld [vmem:[#allocation2 + $0x5c] sm:$0x1] }
 0x1d2   : > { %v2180_v57 = vpop.f32.mrf.mxu3  ;;  %3565 = vmatmul.bf16.gmra.mxu2 %v6186_v9  ;;  %v1489_v38 = vpop.f32.mrf.mxu1  ;;  %v3834_v9 = vrot.slane %v3833_v37, 4  ;;  %v3028_v48 = vrot.slane %v6504_v49, 5  ;;  %v4346_v49 = vld [vmem:[#allocation2 + $0x60] sm:$0xe] }
 0x1d3   : > { %v2226_v32 = vadd.f32 %v2180_v57, %v1911_v0  ;;  %v6503_v57 = vld [vmem:[#allocation2 + $0x58] sm:$0xf] }
 0x1d4   : > { %v3839_v37 = vsel %vm6729_vm2, %v3834_v9, %v7551_v35  ;;  %v3025_v8 = vrot.slane %v6503_v57, 5  ;;  %v4444_v35 = vrot.slane %v7555_v28, 5  ;;  %v7590_v57 = vrot.slane %v3860_v5, 5 }
 0x1d5   : > { %v1868_v18 = vpop.f32.mrf.mxu2  ;;  %v7573_v40 = vadd.f32 %v2862_v29, %v2226_v32  ;;  %v2923_v29 = vld [vmem:[#allocation2 + $0x54] sm:$0xe]  ;;  %v3864_v32 = vshrl.u32 %v7571_v7, 16  ;;  %v4117_v23 = vunpack.c.l.b16 %v3839_v37 }
 0x1d6   : > { %v1912_v42 = vadd.f32 %v1868_v18, %v1488_v21  ;;  %v6008_v21 = vrot.slane %v4345_v53, 9  ;;  %v4118_v18 = vunpack.c.l.b16 %v3849_v6  ;;  %v5785_v34 = vrot.slane %v2923_v29, 9  ;;  %v4812_v37 = vld [vmem:[%s8146_s4 + $0x50] sm:$0xff] }
 0x1d7   : > { %4247 = vmatmul.bf16.gmra.mxu3 %v4143_v24  ;;  %v1490_v24 = vadd.f32 %v1489_v38, %v7128_v56  ;;  %v3866_v56 = vrot.slane %v3864_v32, 4  ;;  %v7592_v38 = vld [vmem:[#allocation2 + $0x68] sm:$0x1]  ;;  %v4445_v53 = vsel %vm7026_vm5, %v4443_v25, %v4444_v35  ;;  %4886 = vperm.xlu1 %6465, %v4812_v37  }
 0x1d8   : > { %v4144_v6 = vpack.c.b16 %v4118_v18, %v4117_v23  ;;  %v3870_v32 = vshll.u32 %v7592_v38, 16  ;;  %v4544_v35 = vunpack.c.l.b16 %v4445_v53  ;;  %v4810_v53 = vld [vmem:[%s8146_s4 + $0x40] sm:$0xff] }
 0x1d9   : > { %v2865_v0 = vpop.f32.mrf.mxu0  ;;  %v3867_v5 = vor.u32 %v3866_v56, %v7590_v57  ;;  %4876 = vperm.xlu2 %6466, %v4810_v53  }
 0x1da   : > { %v2183_v55 = vpop.f32.mrf.mxu3  ;;  %v1492_v46 = vpop.f32.mrf.mxu1 }
 0x1db   : > { %v2227_v59 = vadd.f32 %v2183_v55, %v1912_v42  ;;  %v3027_v42 = vrot.slane %v3025_v8, 4  ;;  %v3853_v55 = vrot.slane %v3851_v14, 4  ;;  %v3026_v14 = vsel %vm7026_vm5, %v5785_v34, %v3025_v8 }
 0x1dc   : > { %4673 = vmatmul.bf16.gmra.mxu0 %v4569_v44  ;;  %v3856_v44 = vrot.slane %v3854_v16, 5  ;;  %v3122_v23 = vunpack.c.l.b16 %v3026_v14  ;;  %v3868_v34 = vrot.slane %v3867_v5, 4  ;;  %v2924_v14 = vld [vmem:[#allocation2 + $0x60] sm:$0xe]  ;;  %v4451_v5 = vrot.slane %v7592_v38, 5 }
 0x1dd   : > { %v1870_v22 = vpop.f32.mrf.mxu2  ;;  %3255 = vmatmul.bf16.gmra.mxu1 %v3147_v1  ;;  %v7588_v12 = vadd.f32 %v2865_v0, %v2227_v59  ;;  %v4442_v1 = vsel %vm7026_vm5, %v6008_v21, %v4441_v31  ;;  %v3029_v59 = vsel %vm7026_vm5, %v3027_v42, %v3028_v48  ;;  %v3872_v42 = vrot.slane %v3870_v32, 5 }
 0x1de   : > { %v1913_v9 = vadd.f32 %v1870_v22, %v1490_v24  ;;  %v3857_v31 = vor.u32 %v3856_v44, %v3853_v55  ;;  %v1493_v24 = vadd.f32 %v1492_v46, %v7149_v26  ;;  %v4543_v21 = vunpack.c.l.b16 %v4442_v1  ;;  %v7611_v26 = vld [vmem:[#allocation2 + $0x70] sm:$0xf] }
 0x1df   : > { %v3123_v18 = vunpack.c.l.b16 %v3029_v59  ;;  %v4448_v48 = vrot.slane %v7571_v7, 5  ;;  %v6505_v59 = vld [vmem:[#allocation2 + $0x64] sm:$0xf] }
 0x1e0   : > { %v3858_v8 = vrot.slane %v3857_v31, 4  ;;  %v3032_v31 = vrot.slane %v6505_v59, 5 }
 0x1e1   : > { %v2867_v28 = vpop.f32.mrf.mxu0  ;;  %v3148_v56 = vpack.c.b16 %v3123_v18, %v3122_v23  ;;  %v5786_v23 = vrot.slane %v2924_v14, 9  ;;  %v4814_v14 = vld [vmem:[%s8146_s4 + $0x60] sm:$0xff] }
 0x1e2   : > { %v2185_v0 = vpop.f32.mrf.mxu3  ;;  %3570 = vmatmul.bf16.gmra.mxu2 %v6187_v63  ;;  %v1494_v29 = vpop.f32.mrf.mxu1  ;;  %v3679_v63 = vld [vmem:[#allocation2 + $0x6c] sm:$0xf]  ;;  %4896 = vperm.xlu0 %6464, %v4814_v14  }
 0x1e3   : > { %v2228_v16 = vadd.f32 %v2185_v0, %v1913_v9  ;;  %v4570_v9 = vpack.c.b16 %v4544_v35, %v4543_v21  ;;  %v3875_v46 = vshrl.u32 %v3679_v63, 16  ;;  %v3878_v1 = vshll.u32 %v3679_v63, 16  ;;  %v4815_v14 = vld [vmem:[%s8146_s4 + $0x68] sm:$0xff] }
 0x1e4   : > { %v1495_v32 = vadd.f32 %v1494_v29, %v7161_v51  ;;  %v3884_v21 = vshll.u32 %v7611_v26, 16  ;;  %v3888_v35 = vshrl.u32 %v7611_v26, 16  ;;  %4901 = vperm.xlu1 %6465, %v4815_v14   ;;  %v6508_v14 = vld [vmem:[#allocation2 + $0x74] sm:$0x1] }
 0x1e5   : > { %v1873_v22 = vpop.f32.mrf.mxu2  ;;  %v7609_v55 = vadd.f32 %v2867_v28, %v2228_v16  ;;  %v3863_v28 = vsel %vm6729_vm2, %v3858_v8, %v7590_v57  ;;  %v3873_v16 = vsel %vm6729_vm2, %v3868_v34, %v3872_v42  ;;  %v3877_v18 = vrot.slane %v3875_v46, 4  ;;  %v6188_v57 = vld [vmem:[#allocation2 + $0x60] sm:$0xff]  ;;  %v7631_v46 = vld [vmem:[#allocation2 + $0x74] sm:$0x1] }
 0x1e6   : > { %v1914_v25 = vadd.f32 %v1873_v22, %v1493_v24  ;;  %v4450_v24 = vrot.slane %v4448_v48, 4  ;;  %v3034_v8 = vrot.slane %v3032_v31, 4  ;;  %v4119_v38 = vunpack.c.l.b16 %v3863_v28 }
 0x1e7   : > { %4252 = vmatmul.bf16.gmra.mxu3 %v4144_v6  ;;  %v6009_v6 = vrot.slane %v4346_v49, 9  ;;  %v6506_v49 = vld [vmem:[#allocation2 + $0x68] sm:$0x1]  ;;  %v3886_v53 = vrot.slane %v3884_v21, 5  ;;  %v3894_v21 = vshll.u32 %v7631_v46, 16 }
 0x1e8   : > { %v3035_v34 = vrot.slane %v6506_v49, 5  ;;  %v4452_v29 = vsel %vm7026_vm5, %v4450_v24, %v4451_v5 }
 0x1e9   : > { %v2870_v44 = vpop.f32.mrf.mxu0  ;;  %v4449_v51 = vsel %vm7026_vm5, %v6009_v6, %v4448_v48  ;;  %v4546_v5 = vunpack.c.l.b16 %v4452_v29 }
 0x1ea   : > { %v2188_v37 = vpop.f32.mrf.mxu3  ;;  %v1497_v0 = vpop.f32.mrf.mxu1  ;;  %v3036_v48 = vsel %vm7026_vm5, %v3034_v8, %v3035_v34  ;;  %v4455_v8 = vrot.slane %v7611_v26, 5  ;;  %v3896_v34 = vrot.slane %v3894_v21, 5 }
 0x1eb   : > { %v2229_v7 = vadd.f32 %v2188_v37, %v1914_v25  ;;  %v3880_v25 = vrot.slane %v3878_v1, 5 }
 0x1ec   : > { %4678 = vmatmul.bf16.gmra.mxu0 %v4570_v9  ;;  %v4120_v9 = vunpack.c.l.b16 %v3873_v16  ;;  %v4545_v16 = vunpack.c.l.b16 %v4449_v51 }
 0x1ed   : > { %v1875_v22 = vpop.f32.mrf.mxu2  ;;  %3260 = vmatmul.bf16.gmra.mxu1 %v3148_v56  ;;  %v7625_v42 = vadd.f32 %v2870_v44, %v2229_v7  ;;  %v3890_v56 = vrot.slane %v3888_v35, 4  ;;  %v3881_v1 = vor.u32 %v3880_v25, %v3877_v18  ;;  %v3033_v7 = vsel %vm7026_vm5, %v5786_v23, %v3032_v31  ;;  %v3682_v31 = vld [vmem:[#allocation2 + $0x78] sm:$0xf] }
 0x1ee   : > { %v1915_v63 = vadd.f32 %v1875_v22, %v1495_v32  ;;  %v4145_v28 = vpack.c.b16 %v4120_v9, %v4119_v38  ;;  %v1498_v32 = vadd.f32 %v1497_v0, %v7175_v33  ;;  %v3124_v22 = vunpack.c.l.b16 %v3033_v7  ;;  %v7643_v9 = vld [vmem:[#allocation2 + $0x7c] sm:$0xf] }
 0x1ef   : > { %v3891_v24 = vor.u32 %v3890_v56, %v3886_v53  ;;  %v3125_v18 = vunpack.c.l.b16 %v3036_v48  ;;  %v3882_v25 = vrot.slane %v3881_v1, 4  ;;  %v4571_v23 = vpack.c.b16 %v4546_v5, %v4545_v16  ;;  %v2925_v48 = vld [vmem:[#allocation2 + $0x6c] sm:$0xe] }
 0x1f0   : > { %v3899_v56 = vshrl.u32 %v3682_v31, 16  ;;  %v3902_v1 = vshll.u32 %v3682_v31, 16  ;;  %v4458_v7 = vrot.slane %v7631_v46, 5  ;;  %v3908_v5 = vshll.u32 %v7643_v9, 16 }
 0x1f1   : > { %v2872_v37 = vpop.f32.mrf.mxu0  ;;  %v3149_v51 = vpack.c.b16 %v3125_v18, %v3124_v22  ;;  %v3887_v29 = vsel %vm6729_vm2, %v3882_v25, %v3886_v53  ;;  %v3912_v53 = vshrl.u32 %v7643_v9, 16  ;;  %v5787_v22 = vrot.slane %v2925_v48, 9 }
 0x1f2   : > { %v2190_v44 = vpop.f32.mrf.mxu3  ;;  %3575 = vmatmul.bf16.gmra.mxu2 %v6188_v57  ;;  %v1499_v59 = vpop.f32.mrf.mxu1  ;;  %v4347_v57 = vld [vmem:[#allocation2 + $0x6c] sm:$0xe]  ;;  %v4121_v21 = vunpack.c.l.b16 %v3887_v29  ;;  %v3901_v18 = vrot.slane %v3899_v56, 4  ;;  %v3904_v25 = vrot.slane %v3902_v1, 5  ;;  %v4813_v29 = vld [vmem:[%s8146_s4 + $0x58] sm:$0xff] }
 0x1f3   : > { %v2230_v6 = vadd.f32 %v2190_v44, %v1915_v63  ;;  %v3892_v63 = vrot.slane %v3891_v24, 4  ;;  %v6010_v38 = vrot.slane %v4347_v57, 9  ;;  %4891 = vperm.xlu2 %6466, %v4813_v29  }
 0x1f5   : > { %v1878_v35 = vpop.f32.mrf.mxu2  ;;  %v7645_v33 = vadd.f32 %v2872_v37, %v2230_v6  ;;  %v4457_v6 = vrot.slane %v4455_v8, 4  ;;  %v3897_v24 = vsel %vm6729_vm2, %v3892_v63, %v3896_v34  ;;  %v4456_v46 = vsel %vm7026_vm5, %v6010_v38, %v4455_v8 }
 0x1f6   : > { %v1916_v49 = vadd.f32 %v1878_v35, %v1498_v32  ;;  %v1500_v32 = vadd.f32 %v1499_v59, %v7196_v17  ;;  %v4122_v17 = vunpack.c.l.b16 %v3897_v24  ;;  %v7664_v63 = vrot.slane %v3908_v5, 5  ;;  %v3685_v24 = vld [vmem:[#allocation2 + $0x84] sm:$0xf] }
 0x1f7   : > { %4257 = vmatmul.bf16.gmra.mxu3 %v4145_v28  ;;  %v6507_v28 = vld [vmem:[#allocation2 + $0x70] sm:$0xf]  ;;  %v4459_v59 = vsel %vm7026_vm5, %v4457_v6, %v4458_v7  ;;  %v3914_v34 = vrot.slane %v3912_v53, 4  ;;  %v4547_v38 = vunpack.c.l.b16 %v4456_v46 }
 0x1f8   : > { %v3039_v16 = vrot.slane %v6507_v28, 5  ;;  %v4548_v1 = vunpack.c.l.b16 %v4459_v59  ;;  %v3905_v28 = vor.u32 %v3904_v25, %v3901_v18  ;;  %v4146_v6 = vpack.c.b16 %v4122_v17, %v4121_v21 }
 0x1f9   : > { %v2875_v0 = vpop.f32.mrf.mxu0  ;;  %v3915_v5 = vor.u32 %v3914_v34, %v7664_v63  ;;  %v3923_v21 = vshrl.u32 %v3685_v24, 16 }
 0x1fa   : > { %v2193_v44 = vpop.f32.mrf.mxu3  ;;  %v1502_v26 = vpop.f32.mrf.mxu1  ;;  %v3041_v31 = vrot.slane %v3039_v16, 4  ;;  %v3040_v48 = vsel %vm7026_vm5, %v5787_v22, %v3039_v16  ;;  %v4572_v16 = vpack.c.b16 %v4548_v1, %v4547_v38  ;;  %v3906_v59 = vrot.slane %v3905_v28, 4  ;;  %v2926_v28 = vld [vmem:[#allocation2 + $0x78] sm:$0xe] }
 0x1fb   : > { %v2231_v37 = vadd.f32 %v2193_v44, %v1916_v49  ;;  %v6189_v49 = vld [vmem:[#allocation2 + $0x6c] sm:$0xff]  ;;  %v3042_v44 = vrot.slane %v6508_v14, 5  ;;  %v3126_v46 = vunpack.c.l.b16 %v3040_v48  ;;  %v7678_v14 = vld [vmem:[#allocation2 + $0x88] sm:$0xf]  ;;  %v3916_v18 = vrot.slane %v3915_v5, 4  ;;  %v4817_v5 = vld [vmem:[%s8146_s4 + $0x78] sm:$0xff] }
 0x1fc   : > { %4683 = vmatmul.bf16.gmra.mxu0 %v4571_v23  ;;  %v3932_v17 = vshll.u32 %v7678_v14, 16  ;;  %v3911_v1 = vsel %vm6729_vm2, %v3906_v59, %v7664_v63  ;;  %4911 = vperm.xlu0 %6464, %v4817_v5   ;;  %v7697_v59 = vld [vmem:[#allocation2 + $0x8c] sm:$0x1] }
 0x1fd   : > { %v1880_v35 = vpop.f32.mrf.mxu2  ;;  %3265 = vmatmul.bf16.gmra.mxu1 %v3149_v51  ;;  %v7660_v23 = vadd.f32 %v2875_v0, %v2231_v37  ;;  %v7666_v51 = vld [vmem:[#allocation2 + $0x80] sm:$0x1]  ;;  %v3043_v7 = vsel %vm7026_vm5, %v3041_v31, %v3042_v44  ;;  %v3926_v31 = vshll.u32 %v3685_v24, 16  ;;  %v4462_v44 = vrot.slane %v7643_v9, 5 }
 0x1fe   : > { %v1917_v57 = vadd.f32 %v1880_v35, %v1500_v32  ;;  %v3918_v53 = vshll.u32 %v7666_v51, 16  ;;  %v1503_v32 = vadd.f32 %v1502_v26, %v7215_v3  ;;  %v3936_v3 = vshrl.u32 %v7678_v14, 16 }
 0x1ff   : > { %v4464_v24 = vrot.slane %v4462_v44, 4 }
 0x200   : > { %v3920_v25 = vrot.slane %v3918_v53, 5  ;;  %v3925_v53 = vrot.slane %v3923_v21, 4  ;;  %v4123_v21 = vunpack.c.l.b16 %v3911_v1 }
 0x201   : > { %v2877_v8 = vpop.f32.mrf.mxu0 }
 0x202   : > { %v2195_v56 = vpop.f32.mrf.mxu3  ;;  %3580 = vmatmul.bf16.gmra.mxu2 %v6189_v49  ;;  %v1504_v0 = vpop.f32.mrf.mxu1  ;;  %v3127_v49 = vunpack.c.l.b16 %v3043_v7  ;;  %v4465_v7 = vrot.slane %v7666_v51, 5  ;;  %v3938_v51 = vrot.slane %v3936_v3, 4  ;;  %v3942_v3 = vshll.u32 %v7697_v59, 16 }
 0x203   : > { %v2232_v37 = vadd.f32 %v2195_v56, %v1917_v57  ;;  %v4348_v57 = vld [vmem:[#allocation2 + $0x78] sm:$0xe]  ;;  %v1505_v63 = vadd.f32 %v1504_v0, %v7225_v47 }
 0x204   : > { %v3150_v29 = vpack.c.b16 %v3127_v49, %v3126_v46  ;;  %v6011_v48 = vrot.slane %v4348_v57, 9  ;;  %v5788_v49 = vrot.slane %v2926_v28, 9 }
 0x205   : > { %v1883_v35 = vpop.f32.mrf.mxu2  ;;  %v7683_v26 = vadd.f32 %v2877_v8, %v2232_v37  ;;  %v3921_v37 = vsel %vm6729_vm2, %v3916_v18, %v3920_v25 }
 0x206   : > { %v1918_v22 = vadd.f32 %v1883_v35, %v1503_v32  ;;  %v3928_v32 = vrot.slane %v3926_v31, 5  ;;  %v7695_v35 = vrot.slane %v3932_v17, 5  ;;  %v4463_v47 = vsel %vm7026_vm5, %v6011_v48, %v4462_v44  ;;  %v4818_v44 = vld [vmem:[%s8146_s4 + $0x80] sm:$0xff]  ;;  %v3688_v48 = vld [vmem:[#allocation2 + $0x90] sm:$0xf] }
 0x207   : > { %4262 = vmatmul.bf16.gmra.mxu3 %v4146_v6  ;;  %v6509_v6 = vld [vmem:[#allocation2 + $0x7c] sm:$0xf]  ;;  %v4466_v31 = vsel %vm7026_vm5, %v4464_v24, %v4465_v7  ;;  %4916 = vperm.xlu1 %6465, %v4818_v44  }
 0x208   : > { %v3046_v9 = vrot.slane %v6509_v6, 5  ;;  %v6510_v6 = vld [vmem:[#allocation2 + $0x80] sm:$0x1]  ;;  %v3929_v0 = vor.u32 %v3928_v32, %v3925_v53  ;;  %v3939_v17 = vor.u32 %v3938_v51, %v7695_v35  ;;  %v4550_v53 = vunpack.c.l.b16 %v4466_v31 }
 0x209   : > { %v2880_v34 = vpop.f32.mrf.mxu0  ;;  %v3049_v18 = vrot.slane %v6510_v6, 5  ;;  %v3944_v51 = vrot.slane %v3942_v3, 5 }
 0x20a   : > { %v2198_v56 = vpop.f32.mrf.mxu3  ;;  %v3231_v38 = vpop.f32.mrf.mxu1  ;;  %v3047_v28 = vsel %vm7026_vm5, %v5788_v49, %v3046_v9  ;;  %v3930_v32 = vrot.slane %v3929_v0, 4  ;;  %v3940_v24 = vrot.slane %v3939_v17, 4  ;;  %v4469_v49 = vrot.slane %v7678_v14, 5 }
 0x20b   : > { %v2233_v8 = vadd.f32 %v2198_v56, %v1918_v22  ;;  %v6190_v22 = vld [vmem:[#allocation2 + $0x78] sm:$0xff]  ;;  %v3048_v56 = vrot.slane %v3046_v9, 4  ;;  %v3128_v9 = vunpack.c.l.b16 %v3047_v28 }
 0x20c   : > { %4688 = vmatmul.bf16.gmra.mxu0 %v4572_v16  ;;  %v4124_v16 = vunpack.c.l.b16 %v3921_v37  ;;  %v3935_v17 = vsel %vm6729_vm2, %v3930_v32, %v7695_v35  ;;  %v3945_v14 = vsel %vm6729_vm2, %v3940_v24, %v3944_v51  ;;  %v7742_v24 = vld [vmem:[%s7458_s7] ss:$0 sm:$0xff]  ;;  %v7744_v51 = vld [vmem:[#allocation2 + $0x98] sm:$0x1] }
 0x20d   : > { %v1885_v46 = vpop.f32.mrf.mxu2  ;;  %3270 = vmatmul.bf16.gmra.mxu1 %v3150_v29  ;;  %v7699_v25 = vadd.f32 %v2880_v34, %v2233_v8  ;;  %v4549_v34 = vunpack.c.l.b16 %v4463_v47  ;;  %v3050_v8 = vsel %vm7026_vm5, %v3048_v56, %v3049_v18  ;;  %v3947_v18 = vshrl.u32 %v3688_v48, 16 }
 0x20e   : > { %v1919_v57 = vadd.f32 %v1885_v46, %v1505_v63  ;;  %v4147_v37 = vpack.c.b16 %v4124_v16, %v4123_v21  ;;  %v7714_v63 = vld [vmem:[#allocation2 + $0x94] sm:$0xf]  ;;  %v4349_v46 = vld [vmem:[#allocation2 + $0x84] sm:$0xe]  ;;  %v3129_v6 = vunpack.c.l.b16 %v3050_v8  ;;  %v3950_v47 = vshll.u32 %v3688_v48, 16 }
 0x20f   : > { %8159 = vst [vmem:[#allocation7_spill] sm:$0xff] %v7699_v25  ;;  %v3960_v21 = vshrl.u32 %v7714_v63, 16  ;;  %v4573_v16 = vpack.c.b16 %v4550_v53, %v4549_v34  ;;  %v6012_v31 = vrot.slane %v4349_v46, 9  ;;  %v2927_v8 = vld [vmem:[#allocation2 + $0x84] sm:$0xe]  ;;  %v3949_v44 = vrot.slane %v3947_v18, 4 }
 0x210   : > { %v3151_v28 = vpack.c.b16 %v3129_v6, %v3128_v9  ;;  %v3952_v34 = vrot.slane %v3950_v47, 5  ;;  %v6511_v53 = vld [vmem:[#allocation2 + $0x88] sm:$0xf]  ;;  %v4126_v6 = vunpack.c.l.b16 %v3945_v14  ;;  %v5789_v47 = vrot.slane %v2927_v8, 9 }
 0x211   : > { %v2882_v29 = vpop.f32.mrf.mxu0  ;;  %v3053_v46 = vrot.slane %v6511_v53, 5  ;;  %v3962_v32 = vrot.slane %v3960_v21, 4  ;;  %v4470_v18 = vsel %vm7026_vm5, %v6012_v31, %v4469_v49  ;;  %v3966_v14 = vshll.u32 %v7744_v51, 16  ;;  %v4350_v31 = vld [vmem:[#allocation2 + $0x90] sm:$0xe] }
 0x212   : > { %v2200_v5 = vpop.f32.mrf.mxu3  ;;  %3585 = vmatmul.bf16.gmra.mxu2 %v6190_v22  ;;  %v3233_v1 = vpop.f32.mrf.mxu1  ;;  %v3311_v22 = vadd.f32 %v3231_v38, %v7246_v58  ;;  %v4472_v58 = vrot.slane %v7697_v59, 5  ;;  %v4816_v59 = vld [vmem:[%s8146_s4 + $0x70] sm:$0xff] }
 0x213   : > { %v2234_v7 = vadd.f32 %v2200_v5, %v1919_v57  ;;  %v3956_v57 = vshll.u32 %v7714_v63, 16  ;;  %v4471_v5 = vrot.slane %v4469_v49, 4  ;;  %4906 = vperm.xlu2 %6466, %v4816_v59   ;;  %v3312_v21 = vadd.f32 %v3233_v1, %v7256_v4  ;;  %v6191_v59 = vld [vmem:[#allocation2 + $0x84] sm:$0xff]  ;;  %v7756_v49 = vld [vmem:[%s8147_s5] ss:$0 sm:$0xff] }
 0x215   : > { %v3546_v56 = vpop.f32.mrf.mxu2  ;;  %v7726_v38 = vadd.f32 %v2882_v29, %v2234_v7  ;;  %v7730_v35 = vrot.slane %v3956_v57, 5  ;;  %v4821_v29 = vld [vmem:[%s8146_s4 + $0x98] sm:$0xff]  ;;  %v4820_v7 = vld [vmem:[%s8146_s4 + $0x90] sm:$0xff] }
 0x216   : > { %v3626_v0 = vadd.f32 %v3546_v56, %v3311_v22  ;;  %4931 = vperm.xlu1 %6465, %v4821_v29   ;;  %v4837_v22 = vpop.permute.xlu0 %4836  ;;  %v4125_v56 = vunpack.c.l.b16 %v3935_v17  ;;  %4926 = vperm.xlu0 %6464, %v4820_v7   ;;  %v3055_v29 = vrot.slane %v3053_v46, 4  ;;  %v3691_v7 = vld [vmem:[#allocation2 + $0x9c] sm:$0xf] }
 0x217   : > { %4267 = vmatmul.bf16.gmra.mxu3 %v4147_v37  ;;  %8160 = vst [vmem:[#allocation8_spill] sm:$0xff] %v7726_v38  ;;  %v3963_v17 = vor.u32 %v3962_v32, %v7730_v35  ;;  %v4476_v32 = vrot.slane %v7714_v63, 5  ;;  %v4823_v63 = vld [vmem:[%s8146_s4 + $0xa8] sm:$0xff] }
 0x219   : > { %v4654_v3 = vpop.f32.mrf.mxu0 }
 0x21a   : > { %v4228_v48 = vpop.f32.mrf.mxu3  ;;  %v7728_v37 = vpop.f32.mrf.mxu1 }
 0x21b   : > { %v4308_v9 = vadd.f32 %v4228_v48, %v3626_v0  ;;  %v4473_v0 = vsel %vm7026_vm5, %v4471_v5, %v4472_v58  ;;  %v3953_v48 = vor.u32 %v3952_v34, %v3949_v44  ;;  %v4551_v58 = vunpack.c.l.b16 %v4470_v18 }
 0x21c   : > { %4693 = vmatmul.bf16.gmra.mxu0 %v4573_v16  ;;  %v6512_v16 = vld [vmem:[#allocation2 + $0x8c] sm:$0x1]  ;;  %v4552_v44 = vunpack.c.l.b16 %v4473_v0  ;;  %v6013_v18 = vrot.slane %v4350_v31, 9  ;;  %v3974_v0 = vshll.u32 %v3691_v7, 16  ;;  %v4478_v31 = vrot.slane %v4476_v32, 4 }
 0x21d   : > { %v4734_v57 = vadd.f32 %v4654_v3, %v4308_v9  ;;  %v3548_v53 = vpop.f32.mrf.mxu2  ;;  %3275 = vmatmul.bf16.gmra.mxu1 %v3151_v28  ;;  %v3056_v38 = vrot.slane %v6512_v16, 5  ;;  %v4148_v3 = vpack.c.b16 %v4126_v6, %v4125_v56  ;;  %v3054_v28 = vsel %vm7026_vm5, %v5789_v47, %v3053_v46  ;;  %v7762_v9 = vld [vmem:[#allocation2 + $0xa0] sm:$0xf]  ;;  %v4824_v46 = vld [vmem:[%s8146_s4 + $0xb0] sm:$0xff] }
 0x21e   : > { %v3627_v1 = vadd.f32 %v3548_v53, %v3312_v21  ;;  %v3954_v34 = vrot.slane %v3953_v48, 4  ;;  %v3964_v56 = vrot.slane %v3963_v17, 4  ;;  %v3968_v6 = vrot.slane %v3966_v14, 5  ;;  %4946 = vperm.xlu1 %6465, %v4824_v46   ;;  %4941 = vperm.xlu0 %6464, %v4823_v63  }
 0x21f   : > { %v4770_v4 = vmul.f32 %v7742_v24, %v4734_v57  ;;  %v3057_v57 = vsel %vm7026_vm5, %v3055_v29, %v3056_v38  ;;  %v3130_v21 = vunpack.c.l.b16 %v3054_v28  ;;  %v4479_v53 = vrot.slane %v7744_v51, 5 }
 0x220   : > { %v3971_v38 = vshrl.u32 %v3691_v7, 16  ;;  %v3980_v48 = vshll.u32 %v7762_v9, 16  ;;  %v3313_v17 = vadd.f32 %v7728_v37, %v7264_v52  ;;  %v3959_v51 = vsel %vm6729_vm2, %v3954_v34, %v7730_v35 }
 0x221   : > { %v4656_v5 = vpop.f32.mrf.mxu0  ;;  %v4994_v8 = vadd.f32 %v4837_v22, %v4770_v4  ;;  %v3131_v4 = vunpack.c.l.b16 %v3057_v57  ;;  %v3976_v52 = vrot.slane %v3974_v0, 5  ;;  %v4477_v35 = vsel %vm7026_vm5, %v6013_v18, %v4476_v32  ;;  %v4827_v0 = vld [vmem:[%s8146_s4 + $0xc8] sm:$0xff] }
 0x222   : > { %v4230_v16 = vpop.f32.mrf.mxu3  ;;  %3590 = vmatmul.bf16.gmra.mxu2 %v6191_v59  ;;  %v3238_v25 = vpop.f32.mrf.mxu1  ;;  %v3984_v59 = vshrl.u32 %v7762_v9, 16  ;;  %v3973_v46 = vrot.slane %v3971_v38, 4  ;;  %v7787_v37 = vrot.slane %v3980_v48, 5 }
 0x223   : > { %v7773_v22 = vadd.f32 %v7756_v49, %v4994_v8  ;;  %v4309_v47 = vadd.f32 %v4230_v16, %v3627_v1  ;;  %v4574_v8 = vpack.c.b16 %v4552_v44, %v4551_v58  ;;  %v4842_v1 = vpop.permute.xlu0 %4841  ;;  %v3152_v63 = vpack.c.b16 %v3131_v4, %v3130_v21  ;;  %v4826_v21 = vld [vmem:[%s8146_s4 + $0xc0] sm:$0xff] }
 0x224   : > { %v3986_v57 = vrot.slane %v3984_v59, 4  ;;  %v7807_v59 = vld [vmem:[#allocation2 + $0xa4] sm:$0x1] }
 0x225   : > { %v4735_v29 = vadd.f32 %v4656_v5, %v4309_v47  ;;  %v3551_v14 = vpop.f32.mrf.mxu2  ;;  %v5062_v28 = vmul.f32 0.2, %v7773_v22  ;;  %v3969_v5 = vsel %vm6729_vm2, %v3964_v56, %v3968_v6  ;;  %v2928_v56 = vld [vmem:[#allocation2 + $0x90] sm:$0xe]  ;;  %v6513_v6 = vld [vmem:[#allocation2 + $0x94] sm:$0xf] }
 0x226   : > { %v3628_v16 = vadd.f32 %v3551_v14, %v3313_v17  ;;  %v3060_v38 = vrot.slane %v6513_v6, 5  ;;  %v7805_v48 = vunpack.c.l.b16 %v3969_v5  ;;  %4961 = vperm.xlu1 %6465, %v4827_v0   ;;  %v4847_v17 = vpop.permute.xlu1 %4846  ;;  %v4553_v14 = vunpack.c.l.b16 %v4477_v35  ;;  %4956 = vperm.xlu0 %6464, %v4826_v21   ;;  %v6192_v5 = vld [vmem:[#allocation2 + $0x90] sm:$0xff] }
 0x227   : > { %4272 = vmatmul.bf16.gmra.mxu3 %v4148_v3  ;;  %v4771_v7 = vmul.f32 %v7742_v24, %v4735_v29  ;;  %v4480_v3 = vsel %vm7026_vm5, %v4478_v31, %v4479_v53  ;;  %v7795_v29 = vunpack.c.l.b16 %v3959_v51  ;;  %v5094_v32 = vmax.f32 %v7773_v22, %v5062_v28 }
 0x228   : > { %v4554_v4 = vunpack.c.l.b16 %v4480_v3  ;;  %v3977_v31 = vor.u32 %v3976_v52, %v3973_v46  ;;  %v3314_v22 = vadd.f32 %v3238_v25, %v7273_v10 }
 0x229   : > { %v4659_v58 = vpop.f32.mrf.mxu0  ;;  %v4995_v44 = vadd.f32 %v4842_v1, %v4771_v7  ;;  %v3987_v1 = vor.u32 %v3986_v57, %v7787_v37  ;;  %v5126_v35 = vmul.f32 1.4142135, %v5094_v32  ;;  %v3694_v57 = vld [vmem:[#allocation2 + $0xa8] sm:$0xf]  ;;  %v7820_v32 = vld [vmem:[#allocation2 + $0xac] sm:$0xf] }
 0x22a   : > { %v4233_v34 = vpop.f32.mrf.mxu3  ;;  %v7793_v47 = vpop.f32.mrf.mxu1  ;;  %v7815_v10 = vpack.c.b16 %v4554_v4, %v4553_v14  ;;  %v3978_v25 = vrot.slane %v3977_v31, 4  ;;  %v3995_v14 = vshrl.u32 %v3694_v57, 16  ;;  %v3998_v4 = vshll.u32 %v3694_v57, 16 }
 0x22b   : > { %v5031_v18 = vadd.f32 %v7756_v49, %v4995_v44  ;;  %v4310_v53 = vadd.f32 %v4233_v34, %v3628_v16  ;;  %v5790_v16 = vrot.slane %v2928_v56, 9  ;;  %v3062_v44 = vrot.slane %v3060_v38, 4  ;;  %v6514_v34 = vld [vmem:[#allocation2 + $0x98] sm:$0x1] }
 0x22c   : > { %4698 = vmatmul.bf16.gmra.mxu0 %v4574_v8  ;;  %v3063_v6 = vrot.slane %v6514_v34, 5  ;;  %v3990_v8 = vshll.u32 %v7807_v59, 16  ;;  %v6067_v31 = vclamps-f32 %v5126_v35, 256.0  ;;  %v4004_v34 = vshll.u32 %v7820_v32, 16 }
 0x22d   : > { %v5063_v51 = vmul.f32 0.2, %v5031_v18  ;;  %v4736_v7 = vadd.f32 %v4659_v58, %v4310_v53  ;;  %v3553_v28 = vpop.f32.mrf.mxu2  ;;  %3280 = vmatmul.bf16.gmra.mxu1 %v3152_v63  ;;  %v4149_v58 = vpack.c.b16 %v7805_v48, %v7795_v29  ;;  %v3061_v21 = vsel %vm7026_vm5, %v5790_v16, %v3060_v38  ;;  %v4819_v48 = vld [vmem:[%s8146_s4 + $0x88] sm:$0xff]  ;;  %v4829_v38 = vld [vmem:[%s8146_s4 + $0xd8] sm:$0xff] }
 0x22e   : > { %v3629_v52 = vadd.f32 %v3553_v28, %v3314_v22  ;;  %v3988_v53 = vrot.slane %v3987_v1, 4  ;;  %v3992_v29 = vrot.slane %v3990_v8, 5  ;;  %4921 = vperm.xlu2 %6466, %v4819_v48   ;;  %v3132_v16 = vunpack.c.l.b16 %v3061_v21  ;;  %4971 = vperm.xlu0 %6464, %v4829_v38   ;;  %v4852_v57 = vpop.permute.xlu1 %4851 }
 0x22f   : > { %v5095_v3 = vmax.f32 %v5031_v18, %v5063_v51  ;;  %v4772_v46 = vmul.f32 %v7742_v24, %v4736_v7  ;;  %v3064_v7 = vsel %vm7026_vm5, %v3062_v44, %v3063_v6  ;;  %v4483_v44 = vrot.slane %v7762_v9, 5 }
 0x230   : > { %v4008_v6 = vshrl.u32 %v7820_v32, 16  ;;  %v3993_v9 = vsel %vm6729_vm2, %v3988_v53, %v3992_v29  ;;  %v4000_v21 = vrot.slane %v3998_v4, 5  ;;  %v2929_v53 = vld [vmem:[#allocation2 + $0x9c] sm:$0xe]  ;;  %v6515_v29 = vld [vmem:[#allocation2 + $0xa0] sm:$0xf] }
 0x231   : > { %v5127_v63 = vmul.f32 1.4142135, %v5095_v3  ;;  %v4661_v56 = vpop.f32.mrf.mxu0  ;;  %v4996_v0 = vadd.f32 %v4847_v17, %v4772_v46  ;;  %v4830_v17 = vld [vmem:[%s8146_s4 + $0xe0] sm:$0xff]  ;;  %v3315_v3 = vadd.f32 %v7793_v47, %v7290_v11  ;;  %v4485_v47 = vrot.slane %v4483_v44, 4 }
 0x232   : > { %v4235_v18 = vpop.f32.mrf.mxu3  ;;  %3595 = vmatmul.bf16.gmra.mxu2 %v6192_v5  ;;  %v3243_v51 = vpop.f32.mrf.mxu1  ;;  %4976 = vperm.xlu1 %6465, %v4830_v17   ;;  %v4351_v5 = vld [vmem:[#allocation2 + $0x9c] sm:$0xe]  ;;  %v7855_v17 = vrot.slane %v4004_v34, 5  ;;  %v4010_v38 = vrot.slane %v4008_v6, 4  ;;  %v4832_v34 = vld [vmem:[%s8146_s4 + $0xf0] sm:$0xff] }
 0x233   : > { %v6068_v1 = vclamps-f32 %v5127_v63, 256.0  ;;  %v7834_v22 = vadd.f32 %v7756_v49, %v4996_v0  ;;  %v4311_v28 = vadd.f32 %v4235_v18, %v3629_v52  ;;  %v3133_v52 = vunpack.c.l.b16 %v3064_v7 }
 0x234   : > { %v3983_v63 = vsel %vm6729_vm2, %v3978_v25, %v7787_v37  ;;  %v3997_v0 = vrot.slane %v3995_v14, 4  ;;  %v6014_v11 = vrot.slane %v4351_v5, 9  ;;  %v4486_v7 = vrot.slane %v7807_v59, 5  ;;  %v4833_v59 = vld [vmem:[%s8146_s4 + $0xf8] sm:$0xff] }
 0x235   : > { %v6306_v8 = vpack.c.bf16 %v6068_v1, %v6067_v31  ;;  %v4737_v35 = vadd.f32 %v4661_v56, %v4311_v28  ;;  %v3556_v46 = vpop.f32.mrf.mxu2  ;;  %v5064_v18 = vmul.f32 0.2, %v7834_v22  ;;  %v3153_v31 = vpack.c.b16 %v3133_v52, %v3132_v16  ;;  %v4857_v52 = vpop.permute.xlu2 %4856 }
 0x236   : > { %v3630_v48 = vadd.f32 %v3556_v46, %v3315_v3  ;;  %v3067_v14 = vrot.slane %v6515_v29, 5  ;;  %v7861_v28 = vunpack.c.l.b16 %v3993_v9  ;;  %v4001_v5 = vor.u32 %v4000_v21, %v3997_v0  ;;  %v7875_v3 = vld [vmem:[#allocation2 + $0xb0] sm:$0x1]  ;;  %4986 = vperm.xlu0 %6464, %v4832_v34  }
 0x237   : > { %6307 = vst [vmem:[%s7839_s27] sm:$0xff] %v6306_v8   ;;  %4277 = vmatmul.bf16.gmra.mxu3 %v4149_v58  ;;  %v4773_v56 = vmul.f32 %v7742_v24, %v4737_v35  ;;  %v7859_v58 = vunpack.c.l.b16 %v3983_v63  ;;  %v5096_v16 = vmax.f32 %v7834_v22, %v5064_v18  ;;  %v7873_v35 = vsel %vm7026_vm5, %v6014_v11, %v4483_v44  ;;  %v6516_v18 = vld [vmem:[#allocation2 + $0xa4] sm:$0x1] }
 0x238   : > { %v3316_v46 = vadd.f32 %v3243_v51, %v7301_v27  ;;  %v5791_v22 = vrot.slane %v2929_v53, 9  ;;  %v4011_v63 = vor.u32 %v4010_v38, %v7855_v17  ;;  %v3069_v21 = vrot.slane %v3067_v14, 4 }
 0x239   : > { %v4664_v37 = vpop.f32.mrf.mxu0  ;;  %v4997_v25 = vadd.f32 %v4852_v57, %v4773_v56  ;;  %v7881_v57 = vsel %vm7026_vm5, %v4485_v47, %v4486_v7  ;;  %v3070_v56 = vrot.slane %v6516_v18, 5  ;;  %v4150_v27 = vpack.c.b16 %v7861_v28, %v7859_v58 }
 0x23a   : > { %v4238_v4 = vpop.f32.mrf.mxu3  ;;  %v7857_v1 = vpop.f32.mrf.mxu1  ;;  %4991 = vperm.xlu1 %6465, %v4833_v59   ;;  %v4014_v51 = vshll.u32 %v7875_v3, 16  ;;  %v5128_v11 = vmul.f32 1.4142135, %v5096_v16  ;;  %v3068_v53 = vsel %vm7026_vm5, %v5791_v22, %v3067_v14  ;;  %v4012_v29 = vrot.slane %v4011_v63, 4  ;;  %v4822_v14 = vld [vmem:[%s8146_s4 + $0xa0] sm:$0xff] }
 0x23b   : > { %v5033_v6 = vadd.f32 %v7756_v49, %v4997_v25  ;;  %v4312_v8 = vadd.f32 %v4238_v4, %v3630_v48  ;;  %v6193_v48 = vld [vmem:[#allocation2 + $0x9c] sm:$0xff]  ;;  %v3697_v25 = vld [vmem:[#allocation2 + $0xb4] sm:$0xf]  ;;  %v3071_v28 = vsel %vm7026_vm5, %v3069_v21, %v3070_v56  ;;  %v4490_v34 = vrot.slane %v7820_v32, 5  ;;  %4936 = vperm.xlu2 %6466, %v4822_v14  }
 0x23c   : > { %4703 = vmatmul.bf16.gmra.mxu0 %v7815_v10  ;;  %v4002_v10 = vrot.slane %v4001_v5, 4  ;;  %v4352_v5 = vld [vmem:[#allocation2 + $0xa8] sm:$0xe]  ;;  %v4493_v21 = vrot.slane %v7875_v3, 5 }
 0x23d   : > { %v5065_v9 = vmul.f32 0.2, %v5033_v6  ;;  %v4738_v0 = vadd.f32 %v4664_v37, %v4312_v8  ;;  %v3558_v44 = vpop.f32.mrf.mxu2  ;;  %3285 = vmatmul.bf16.gmra.mxu1 %v3153_v31  ;;  %v4555_v37 = vunpack.c.l.b16 %v7873_v35  ;;  %v4556_v31 = vunpack.c.l.b16 %v7881_v57 }
 0x23e   : > { %v3631_v38 = vadd.f32 %v3558_v44, %v3316_v46  ;;  %v4007_v8 = vsel %vm6729_vm2, %v4002_v10, %v7855_v17  ;;  %v4016_v35 = vrot.slane %v4014_v51, 5  ;;  %v4019_v46 = vshrl.u32 %v3697_v25, 16 }
 0x23f   : > { %v5097_v47 = vmax.f32 %v5033_v6, %v5065_v9  ;;  %v4774_v7 = vmul.f32 %v7742_v24, %v4738_v0  ;;  %v6069_v57 = vclamps-f32 %v5128_v11, 256.0  ;;  %v7906_v9 = vld [vmem:[#allocation2 + $0xb8] sm:$0xf]  ;;  %v3134_v0 = vunpack.c.l.b16 %v3068_v53 }
 0x240   : > { %v3135_v44 = vunpack.c.l.b16 %v3071_v28  ;;  %v6015_v17 = vrot.slane %v4352_v5, 9  ;;  %v4492_v11 = vrot.slane %v4490_v34, 4  ;;  %v6517_v5 = vld [vmem:[#allocation2 + $0xac] sm:$0xf] }
 0x241   : > { %v5129_v4 = vmul.f32 1.4142135, %v5097_v47  ;;  %v4666_v59 = vpop.f32.mrf.mxu0  ;;  %v4998_v58 = vadd.f32 %v4857_v52, %v4774_v7  ;;  %v4022_v52 = vshll.u32 %v3697_v25, 16  ;;  %v4862_v47 = vpop.permute.xlu2 %4861  ;;  %v4021_v7 = vrot.slane %v4019_v46, 4 }
 0x242   : > { %v4240_v16 = vpop.f32.mrf.mxu3  ;;  %3600 = vmatmul.bf16.gmra.mxu2 %v6193_v48  ;;  %v7895_v6 = vpop.f32.mrf.mxu1  ;;  %v8161_v48 = vld [vmem:[#allocation4_spill] sm:$0xff]  ;;  %v4491_v28 = vsel %vm7026_vm5, %v6015_v17, %v4490_v34  ;;  %v4825_v34 = vld [vmem:[%s8146_s4 + $0xb8] sm:$0xff] }
 0x243   : > { %v6070_v22 = vclamps-f32 %v5129_v4, 256.0  ;;  %v7904_v63 = vadd.f32 %v7756_v49, %v4998_v58  ;;  %v4313_v32 = vadd.f32 %v4240_v16, %v3631_v38  ;;  %v3317_v10 = vadd.f32 %v7857_v1, %v8161_v48  ;;  %v7933_v17 = vld [vmem:[#allocation2 + $0xbc] sm:$0x1]  ;;  %4951 = vperm.xlu2 %6466, %v4825_v34  }
 0x244   : > { %v4024_v25 = vrot.slane %v4022_v52, 5  ;;  %v4028_v38 = vshll.u32 %v7906_v9, 16  ;;  %v4032_v4 = vshrl.u32 %v7906_v9, 16  ;;  %v4576_v1 = vpack.c.b16 %v4556_v31, %v4555_v37 }
 0x245   : > { %v6311_v18 = vpack.c.bf16 %v6070_v22, %v6069_v57  ;;  %v4739_v56 = vadd.f32 %v4666_v59, %v4313_v32  ;;  %v3561_v51 = vpop.f32.mrf.mxu2  ;;  %v5066_v53 = vmul.f32 0.2, %v7904_v63  ;;  %v4017_v59 = vsel %vm6729_vm2, %v4012_v29, %v4016_v35  ;;  %v2930_v22 = vld [vmem:[#allocation2 + $0xa8] sm:$0xe] }
 0x246   : > { %v3632_v58 = vadd.f32 %v3561_v51, %v3317_v10  ;;  %v3074_v16 = vrot.slane %v6517_v5, 5  ;;  %v3154_v52 = vpack.c.b16 %v3135_v44, %v3134_v0  ;;  %v7920_v57 = vunpack.c.l.b16 %v4007_v8  ;;  %v6518_v51 = vld [vmem:[#allocation2 + $0xb0] sm:$0x1] }
 0x247   : > { %6399 = vst [vmem:[%s7839_s27 + $0x8] sm:$0xff] %v6311_v18   ;;  %4282 = vmatmul.bf16.gmra.mxu3 %v4150_v27  ;;  %v4775_v3 = vmul.f32 %v7742_v24, %v4739_v56  ;;  %v4494_v27 = vsel %vm7026_vm5, %v4492_v11, %v4493_v21  ;;  %v7924_v56 = vunpack.c.l.b16 %v4017_v59  ;;  %v4025_v29 = vor.u32 %v4024_v25, %v4021_v7  ;;  %v3700_v59 = vld [vmem:[#allocation2 + $0xc0] sm:$0xf] }
 0x248   : > { %v7926_v37 = vrot.slane %v4028_v38, 5  ;;  %v4034_v31 = vrot.slane %v4032_v4, 4  ;;  %v5098_v35 = vmax.f32 %v7904_v63, %v5066_v53  ;;  %v4557_v44 = vunpack.c.l.b16 %v4491_v28  ;;  %v4867_v63 = vpop.permute.xlu0 %4866  ;;  %v6194_v4 = vld [vmem:[#allocation2 + $0xa8] sm:$0xff] }
 0x249   : > { %v4669_v14 = vpop.f32.mrf.mxu0  ;;  %v4999_v46 = vadd.f32 %v4862_v47, %v4775_v3  ;;  %v4558_v21 = vunpack.c.l.b16 %v4494_v27  ;;  %v5792_v48 = vrot.slane %v2930_v22, 9  ;;  %v3076_v10 = vrot.slane %v3074_v16, 4 }
 0x24a   : > { %v4243_v32 = vpop.f32.mrf.mxu3  ;;  %v3251_v18 = vpop.f32.mrf.mxu1  ;;  %v3077_v11 = vrot.slane %v6518_v51, 5  ;;  %v3318_v25 = vadd.f32 %v7895_v6, %v7325_v13  ;;  %v4026_v53 = vrot.slane %v4025_v29, 4  ;;  %v4035_v3 = vor.u32 %v4034_v31, %v7926_v37  ;;  %v4353_v29 = vld [vmem:[#allocation2 + $0xb4] sm:$0xe] }
 0x24b   : > { %v5035_v8 = vadd.f32 %v7756_v49, %v4999_v46  ;;  %v4314_v0 = vadd.f32 %v4243_v32, %v3632_v58  ;;  %v4038_v58 = vshll.u32 %v7933_v17, 16  ;;  %v7942_v27 = vpack.c.b16 %v4558_v21, %v4557_v44  ;;  %v4828_v44 = vld [vmem:[%s8146_s4 + $0xd0] sm:$0xff] }
 0x24c   : > { %4708 = vmatmul.bf16.gmra.mxu0 %v4576_v1  ;;  %v5130_v1 = vmul.f32 1.4142135, %v5098_v35  ;;  %v3075_v13 = vsel %vm7026_vm5, %v5792_v48, %v3074_v16  ;;  %v3078_v6 = vsel %vm7026_vm5, %v3076_v10, %v3077_v11  ;;  %v4043_v31 = vshrl.u32 %v3700_v59, 16  ;;  %4966 = vperm.xlu2 %6466, %v4828_v44   ;;  %v380_v11 = vld [vmem:[%s6622_s13 + $0xcc] sm:$0xff]  }
 0x24d   : > { %v5067_v47 = vmul.f32 0.2, %v5035_v8  ;;  %v4740_v7 = vadd.f32 %v4669_v14, %v4314_v0  ;;  %v3563_v38 = vpop.f32.mrf.mxu2  ;;  %3290 = vmatmul.bf16.gmra.mxu1 %v3154_v52  ;;  %v4151_v14 = vpack.c.b16 %v7924_v56, %v7920_v57  ;;  %v4046_v34 = vshll.u32 %v3700_v59, 16  ;;  %v4872_v59 = vpop.permute.xlu1 %4871 }
 0x24e   : > { %v3633_v46 = vadd.f32 %v3563_v38, %v3318_v25  ;;  %v4031_v57 = vsel %vm6729_vm2, %v4026_v53, %v7926_v37  ;;  %v4036_v56 = vrot.slane %v4035_v3, 4  ;;  %v4040_v0 = vrot.slane %v4038_v58, 5  ;;  %v7958_v38 = vld [vmem:[#allocation2 + $0xc4] sm:$0xf] }
 0x24f   : > { %v5099_v28 = vmax.f32 %v5035_v8, %v5067_v47  ;;  %v4776_v5 = vmul.f32 %v7742_v24, %v4740_v7  ;;  %v4497_v16 = vrot.slane %v7906_v9, 5  ;;  %v6071_v21 = vclamps-f32 %v5130_v1, 256.0 }
 0x250   : > { %v3319_v47 = vadd.f32 %v3251_v18, %v7338_v60  ;;  %v3136_v7 = vunpack.c.l.b16 %v3075_v13  ;;  %v3137_v37 = vunpack.c.l.b16 %v3078_v6  ;;  %v6016_v25 = vrot.slane %v4353_v29, 9  ;;  %v2931_v13 = vld [vmem:[#allocation2 + $0xb4] sm:$0xe] }
 0x251   : > { %v5131_v52 = vmul.f32 1.4142135, %v5099_v28  ;;  %v4671_v22 = vpop.f32.mrf.mxu0  ;;  %v5000_v32 = vadd.f32 %v4867_v63, %v4776_v5  ;;  %v4045_v53 = vrot.slane %v4043_v31, 4  ;;  %v4048_v3 = vrot.slane %v4046_v34, 5 }
 0x252   : > { %v4245_v35 = vpop.f32.mrf.mxu3  ;;  %3605 = vmatmul.bf16.gmra.mxu2 %v6194_v4  ;;  %v3253_v8 = vpop.f32.mrf.mxu1  ;;  %v4041_v1 = vsel %vm6729_vm2, %v4036_v56, %v4040_v0  ;;  %v4500_v28 = vrot.slane %v7933_v17, 5  ;;  %v439_v5 = vunpack.c.l.bf16 %v380_v11  ;;  %v4052_v6 = vshll.u32 %v7958_v38, 16 }
 0x253   : > { %v6072_v48 = vclamps-f32 %v5131_v52, 256.0  ;;  %v5036_v10 = vadd.f32 %v7756_v49, %v5000_v32  ;;  %v4315_v51 = vadd.f32 %v4245_v35, %v3633_v46  ;;  %v4499_v46 = vrot.slane %v4497_v16, 4  ;;  %v6519_v32 = vld [vmem:[#allocation2 + $0xb8] sm:$0xf] }
 0x254   : > { %v3155_v52 = vpack.c.b16 %v3137_v37, %v3136_v7  ;;  %v3081_v29 = vrot.slane %v6519_v32, 5  ;;  %v4056_v31 = vshrl.u32 %v7958_v38, 16  ;;  %v7969_v17 = vunpack.c.l.b16 %v4041_v1 }
 0x255   : > { %v6316_v9 = vpack.c.bf16 %v6072_v48, %v6071_v21  ;;  %v4741_v63 = vadd.f32 %v4671_v22, %v4315_v51  ;;  %v3566_v4 = vpop.f32.mrf.mxu2  ;;  %v5068_v58 = vmul.f32 0.2, %v5036_v10  ;;  %v7966_v22 = vunpack.c.l.b16 %v4031_v57  ;;  %v4831_v57 = vld [vmem:[%s8146_s4 + $0xe8] sm:$0xff] }
 0x256   : > { %v3634_v18 = vadd.f32 %v3566_v4, %v3319_v47  ;;  %v4049_v56 = vor.u32 %v4048_v3, %v4045_v53  ;;  %v5793_v48 = vrot.slane %v2931_v13, 9  ;;  %v440_v51 = vunpack.c.h.bf16 %v380_v11  ;;  %v8162_v47 = vld [vmem:[#allocation3_spill] sm:$0xff]  ;;  %4981 = vperm.xlu2 %6466, %v4831_v57   ;;  %v382_v3 = vld [vmem:[%s6622_s13 + $0xd4] sm:$0x1]  ;;  %v4877_v13 = vpop.permute.xlu2 %4876 }
 0x257   : > { %6400 = vst [vmem:[%s7839_s27 + $0x10] sm:$0xff] %v6316_v9   ;;  %4287 = vmatmul.bf16.gmra.mxu3 %v4151_v14  ;;  %v4777_v60 = vmul.f32 %v7742_v24, %v4741_v63  ;;  %v7973_v14 = vsel %vm7026_vm5, %v6016_v25, %v4497_v16  ;;  %v5100_v0 = vmax.f32 %v5036_v10, %v5068_v58  ;;  %v7984_v25 = vrot.slane %v4052_v6, 5  ;;  %v8163_v10 = vld [vmem:[#allocation5_spill] sm:$0xff]  ;;  %v6195_v6 = vld [vmem:[#allocation2 + $0xb4] sm:$0xff] }
 0x258   : > { %v494_v7 = vmul.f32 %v8162_v47, %v439_v5  ;;  %v7982_v16 = vsel %vm7026_vm5, %v4499_v46, %v4500_v28  ;;  %v3320_v63 = vadd.f32 %v3253_v8, %v8163_v10  ;;  %v3083_v4 = vrot.slane %v3081_v29, 4  ;;  %v6520_v5 = vld [vmem:[#allocation2 + $0xbc] sm:$0x1]  ;;  %v7990_v28 = vld [vmem:[#allocation2 + $0xc8] sm:$0x1] }
 0x259   : > { %v4674_v34 = vpop.f32.mrf.mxu0  ;;  %v5001_v35 = vadd.f32 %v4872_v59, %v4777_v60  ;;  %v4058_v53 = vrot.slane %v4056_v31, 4  ;;  %v495_v11 = vmul.f32 %v8162_v47, %v440_v51  ;;  %v3084_v60 = vrot.slane %v6520_v5, 5 }
 0x25a   : > { %v4248_v44 = vpop.f32.mrf.mxu3  ;;  %v3256_v21 = vpop.f32.mrf.mxu1  ;;  %v5132_v46 = vmul.f32 1.4142135, %v5100_v0  ;;  %v4050_v8 = vrot.slane %v4049_v56, 4  ;;  %v4062_v51 = vshll.u32 %v7990_v28, 16 }
 0x25b   : > { %v5037_v37 = vadd.f32 %v7756_v49, %v5001_v35  ;;  %v4316_v9 = vadd.f32 %v4248_v44, %v3634_v18  ;;  %v548_v18 = vpack.c.bf16 %v494_v7, %v494_v7  ;;  %v549_v32 = vpack.c.bf16 %v495_v11, %v495_v11 }
 0x25c   : > { %4713 = vmatmul.bf16.gmra.mxu0 %v7942_v27  ;;  %v3082_v27 = vsel %vm7026_vm5, %v5793_v48, %v3081_v29  ;;  %v4059_v57 = vor.u32 %v4058_v53, %v7984_v25  ;;  %v4152_v29 = vpack.c.b16 %v7969_v17, %v7966_v22  ;;  %v3085_v56 = vsel %vm7026_vm5, %v3083_v4, %v3084_v60 }
 0x25d   : > { %v5069_v58 = vmul.f32 0.2, %v5037_v37  ;;  %v4742_v59 = vadd.f32 %v4674_v34, %v4316_v9  ;;  %v3568_v1 = vpop.f32.mrf.mxu2  ;;  %3295 = vmatmul.bf16.gmra.mxu1 %v3155_v52  ;;  %602 = vst [vmem:[#allocation2 + $0xcc] sm:$0xf] %v548_v18  ;;  %v441_v34 = vunpack.c.l.bf16 %v382_v3  ;;  %v4559_v52 = vunpack.c.l.b16 %v7973_v14  ;;  %v8164_v18 = vld [vmem:[#allocation6_spill] sm:$0xff] }
 0x25e   : > { %v3635_v44 = vadd.f32 %v3568_v1, %v3320_v63  ;;  %603 = vst [vmem:[#allocation2 + $0xd0] sm:$0xf] %v549_v32  ;;  %v3138_v14 = vunpack.c.l.b16 %v3082_v27  ;;  %v4055_v63 = vsel %vm6729_vm2, %v4050_v8, %v7984_v25  ;;  %v6073_v11 = vclamps-f32 %v5132_v46, 256.0  ;;  %v4882_v27 = vpop.permute.xlu0 %4881  ;;  %v4354_v25 = vld [vmem:[#allocation2 + $0xc0] sm:$0xe] }
 0x25f   : > { %v5101_v31 = vmax.f32 %v5037_v37, %v5069_v58  ;;  %v4778_v35 = vmul.f32 %v7742_v24, %v4742_v59  ;;  %v4560_v37 = vunpack.c.l.b16 %v7982_v16  ;;  %v496_v53 = vmul.f32 %v8162_v47, %v441_v34  ;;  %v6521_v34 = vld [vmem:[#allocation2 + $0xc4] sm:$0xf] }
 0x260   : > { %v3139_v58 = vunpack.c.l.b16 %v3085_v56  ;;  %v4060_v4 = vrot.slane %v4059_v57, 4  ;;  %v4064_v59 = vrot.slane %v4062_v51, 5  ;;  %v3088_v57 = vrot.slane %v6521_v34, 5 }
 0x261   : > { %v5133_v0 = vmul.f32 1.4142135, %v5101_v31  ;;  %v4676_v7 = vpop.f32.mrf.mxu0  ;;  %v5002_v9 = vadd.f32 %v4877_v13, %v4778_v35  ;;  %v550_v1 = vpack.c.bf16 %v496_v53, %v496_v53  ;;  %v3321_v13 = vadd.f32 %v3256_v21, %v8164_v18  ;;  %v6522_v18 = vld [vmem:[#allocation2 + $0xc8] sm:$0x1] }
 0x262   : > { %v4250_v48 = vpop.f32.mrf.mxu3  ;;  %3610 = vmatmul.bf16.gmra.mxu2 %v6195_v6  ;;  %v3258_v10 = vpop.f32.mrf.mxu1  ;;  %v4578_v47 = vpack.c.b16 %v4560_v37, %v4559_v52  ;;  %v4065_v35 = vsel %vm6729_vm2, %v4060_v4, %v4064_v59  ;;  %v4504_v21 = vrot.slane %v7958_v38, 5  ;;  %v6017_v52 = vrot.slane %v4354_v25, 9 }
 0x263   : > { %v6074_v3 = vclamps-f32 %v5133_v0, 256.0  ;;  %v5038_v22 = vadd.f32 %v7756_v49, %v5002_v9  ;;  %v4317_v17 = vadd.f32 %v4250_v48, %v3635_v44  ;;  %604 = vst [vmem:[#allocation2 + $0xd4] sm:$0x1] %v550_v1  ;;  %v8015_v44 = vunpack.c.l.b16 %v4055_v63 }
 0x264   : > { %v3703_v32 = vld [vmem:[#allocation2 + $0xcc] sm:$0xf]  ;;  %v3156_v9 = vpack.c.b16 %v3139_v58, %v3138_v14  ;;  %v4136_v38 = vunpack.c.l.b16 %v4065_v35  ;;  %v4507_v4 = vrot.slane %v7990_v28, 5  ;;  %v4506_v14 = vrot.slane %v4504_v21, 4 }
 0x265   : > { %v6321_v5 = vpack.c.bf16 %v6074_v3, %v6073_v11  ;;  %v5070_v16 = vmul.f32 0.2, %v5038_v22  ;;  %v4743_v60 = vadd.f32 %v4676_v7, %v4317_v17  ;;  %v3571_v6 = vpop.f32.mrf.mxu2  ;;  %v8011_v31 = vld [vmem:[#allocation2 + $0xd0] sm:$0xf]  ;;  %v4067_v37 = vshrl.u32 %v3703_v32, 16 }
 0x266   : > { %v3636_v8 = vadd.f32 %v3571_v6, %v3321_v13  ;;  %v4070_v53 = vshll.u32 %v3703_v32, 16  ;;  %v4076_v11 = vshll.u32 %v8011_v31, 16  ;;  %v4080_v3 = vshrl.u32 %v8011_v31, 16  ;;  %v4887_v6 = vpop.permute.xlu1 %4886 }
 0x267   : > { %6401 = vst [vmem:[%s7839_s27 + $0x18] sm:$0xff] %v6321_v5   ;;  %4292 = vmatmul.bf16.gmra.mxu3 %v4152_v29  ;;  %v4779_v46 = vmul.f32 %v7742_v24, %v4743_v60  ;;  %v5102_v51 = vmax.f32 %v5038_v22, %v5070_v16  ;;  %v2932_v29 = vld [vmem:[#allocation2 + $0xc0] sm:$0xe]  ;;  %v3322_v22 = vadd.f32 %v3258_v10, %v7375_v41  ;;  %v3090_v59 = vrot.slane %v3088_v57, 4 }
 0x268   : > { %v5794_v58 = vrot.slane %v2932_v29, 9  ;;  %v3091_v13 = vrot.slane %v6522_v18, 5  ;;  %v4069_v25 = vrot.slane %v4067_v37, 4  ;;  %v4082_v28 = vrot.slane %v4080_v3, 4 }
 0x269   : > { %v4679_v0 = vpop.f32.mrf.mxu0  ;;  %v5003_v7 = vadd.f32 %v4882_v27, %v4779_v46  ;;  %v5134_v1 = vmul.f32 1.4142135, %v5102_v51  ;;  %v6196_v27 = vld [vmem:[#allocation2 + $0xc0] sm:$0xff]  ;;  %v4072_v46 = vrot.slane %v4070_v53, 5  ;;  %v4153_v32 = vpack.c.b16 %v4136_v38, %v8015_v44 }
 0x26a   : > { %v4253_v56 = vpop.f32.mrf.mxu3  ;;  %v3261_v48 = vpop.f32.mrf.mxu1  ;;  %v4505_v35 = vsel %vm7026_vm5, %v6017_v52, %v4504_v21  ;;  %v8029_v34 = vld [vmem:[#allocation2 + $0xd4] sm:$0x1]  ;;  %v3089_v29 = vsel %vm7026_vm5, %v5794_v58, %v3088_v57  ;;  %v3092_v44 = vsel %vm7026_vm5, %v3090_v59, %v3091_v13 }
 0x26b   : > { %v5039_v63 = vadd.f32 %v7756_v49, %v5003_v7  ;;  %v4318_v17 = vadd.f32 %v4253_v56, %v3636_v8  ;;  %v8023_v8 = vrot.slane %v4076_v11, 5  ;;  %v6075_v56 = vclamps-f32 %v5134_v1, 256.0  ;;  %v4892_v59 = vpop.permute.xlu2 %4891 }
 0x26c   : > { %4718 = vmatmul.bf16.gmra.mxu0 %v4578_v47  ;;  %v4073_v11 = vor.u32 %v4072_v46, %v4069_v25  ;;  %v4561_v38 = vunpack.c.l.b16 %v4505_v35  ;;  %v3140_v57 = vunpack.c.l.b16 %v3089_v29  ;;  %v3323_v58 = vadd.f32 %v3261_v48, %v7380_v36 }
 0x26d   : > { %v5071_v5 = vmul.f32 0.2, %v5039_v63  ;;  %v4744_v16 = vadd.f32 %v4679_v0, %v4318_v17  ;;  %v3573_v60 = vpop.f32.mrf.mxu2  ;;  %3300 = vmatmul.bf16.gmra.mxu1 %v3156_v9  ;;  %v4508_v9 = vsel %vm7026_vm5, %v4506_v14, %v4507_v4  ;;  %v4083_v21 = vor.u32 %v4082_v28, %v8023_v8 }
 0x26e   : > { %v3637_v10 = vadd.f32 %v3573_v60, %v3322_v22  ;;  %v4086_v17 = vshll.u32 %v8029_v34, 16  ;;  %v4562_v4 = vunpack.c.l.b16 %v4508_v9  ;;  %v4511_v46 = vrot.slane %v8011_v31, 5 }
 0x26f   : > { %v5103_v47 = vmax.f32 %v5039_v63, %v5071_v5  ;;  %v4780_v41 = vmul.f32 %v7742_v24, %v4744_v16  ;;  %v3141_v5 = vunpack.c.l.b16 %v3092_v44  ;;  %v4074_v16 = vrot.slane %v4073_v11, 4  ;;  %v6197_v11 = vld [vmem:[#allocation2 + $0xcc] sm:$0xff] }
 0x270   : > { %v4084_v60 = vrot.slane %v4083_v21, 4  ;;  %v4579_v25 = vpack.c.b16 %v4562_v4, %v4561_v38  ;;  %v4514_v44 = vrot.slane %v8029_v34, 5 }
 0x271   : > { %v5135_v51 = vmul.f32 1.4142135, %v5103_v47  ;;  %v4681_v0 = vpop.f32.mrf.mxu0  ;;  %v5004_v7 = vadd.f32 %v4887_v6, %v4780_v41  ;;  %v3157_v41 = vpack.c.b16 %v3141_v5, %v3140_v57  ;;  %v4079_v35 = vsel %vm6729_vm2, %v4074_v16, %v8023_v8  ;;  %v4897_v8 = vpop.permute.xlu0 %4896  ;;  %v8063_v5 = vld [vmem:[%s8147_s5] ss:$0 sm:$0xff] }
 0x272   : > { %v4255_v37 = vpop.f32.mrf.mxu3  ;;  %3615 = vmatmul.bf16.gmra.mxu2 %v6196_v27  ;;  %v3263_v53 = vpop.f32.mrf.mxu1  ;;  %v4088_v27 = vrot.slane %v4086_v17, 5  ;;  %v4137_v21 = vunpack.c.l.b16 %v4079_v35 }
 0x273   : > { %v6076_v52 = vclamps-f32 %v5135_v51, 256.0  ;;  %v5040_v3 = vadd.f32 %v7756_v49, %v5004_v7  ;;  %v4319_v63 = vadd.f32 %v4255_v37, %v3637_v10  ;;  %v4355_v10 = vld [vmem:[#allocation2 + $0xcc] sm:$0xe]  ;;  %v4513_v7 = vrot.slane %v4511_v46, 4 }
 0x274   : > { %v6018_v31 = vrot.slane %v4355_v10, 9 }
 0x275   : > { %v6326_v22 = vpack.c.bf16 %v6076_v52, %v6075_v56  ;;  %v4745_v14 = vadd.f32 %v4681_v0, %v4319_v63  ;;  %v3576_v1 = vpop.f32.mrf.mxu2  ;;  %v5072_v18 = vmul.f32 0.2, %v5040_v3  ;;  %v3324_v56 = vadd.f32 %v3263_v53, %v7393_v2 }
 0x276   : > { %v3638_v6 = vadd.f32 %v3576_v1, %v3323_v58  ;;  %v4512_v2 = vsel %vm7026_vm5, %v6018_v31, %v4511_v46  ;;  %v4515_v34 = vsel %vm7026_vm5, %v4513_v7, %v4514_v44 }
 0x277   : > { %6402 = vst [vmem:[%s7839_s27 + $0x20] sm:$0xff] %v6326_v22   ;;  %4297 = vmatmul.bf16.gmra.mxu3 %v4153_v32  ;;  %v4781_v13 = vmul.f32 %v7742_v24, %v4745_v14  ;;  %v5104_v51 = vmax.f32 %v5040_v3, %v5072_v18  ;;  %v4089_v24 = vsel %vm6729_vm2, %v4084_v60, %v4088_v27  ;;  %v4563_v60 = vunpack.c.l.b16 %v4512_v2 }
 0x278   : > { %v4564_v18 = vunpack.c.l.b16 %v4515_v34 }
 0x279   : > { %v4684_v28 = vpop.f32.mrf.mxu0  ;;  %v5005_v47 = vadd.f32 %v4892_v59, %v4781_v13  ;;  %v5136_v52 = vmul.f32 1.4142135, %v5104_v51  ;;  %v4912_v34 = vpop.permute.xlu0 %4911 }
 0x27a   : > { %v4258_v36 = vpop.f32.mrf.mxu3  ;;  %v3266_v48 = vpop.f32.mrf.mxu1 }
 0x27b   : > { %v5041_v32 = vadd.f32 %v7756_v49, %v5005_v47  ;;  %v4320_v0 = vadd.f32 %v4258_v36, %v3638_v6  ;;  %v4138_v49 = vunpack.c.l.b16 %v4089_v24  ;;  %v6077_v58 = vclamps-f32 %v5136_v52, 256.0 }
 0x27c   : > { %4723 = vmatmul.bf16.gmra.mxu0 %v4579_v25  ;;  %v3325_v6 = vadd.f32 %v3266_v48, %v7406_v61  ;;  %v4902_v25 = vpop.permute.xlu1 %4901 }
 0x27d   : > { %v5073_v9 = vmul.f32 0.2, %v5041_v32  ;;  %v4746_v29 = vadd.f32 %v4684_v28, %v4320_v0  ;;  %v3578_v37 = vpop.f32.mrf.mxu2  ;;  %3305 = vmatmul.bf16.gmra.mxu1 %v3157_v41  ;;  %v4154_v22 = vpack.c.b16 %v4138_v49, %v4137_v21  ;;  %v4580_v41 = vpack.c.b16 %v4564_v18, %v4563_v60 }
 0x27e   : > { %v3639_v17 = vadd.f32 %v3578_v37, %v3324_v56 }
 0x27f   : > { %v5105_v3 = vmax.f32 %v5041_v32, %v5073_v9  ;;  %v4782_v63 = vmul.f32 %v8053_v54, %v4746_v29  ;;  %v4907_v9 = vpop.permute.xlu2 %4906 }
 0x281   : > { %v5137_v38 = vmul.f32 1.4142135, %v5105_v3  ;;  %v4686_v4 = vpop.f32.mrf.mxu0  ;;  %v5006_v57 = vadd.f32 %v4897_v8, %v4782_v63 }
 0x282   : > { %v4260_v53 = vpop.f32.mrf.mxu3  ;;  %3620 = vmatmul.bf16.gmra.mxu2 %v6197_v11  ;;  %v3268_v14 = vpop.f32.mrf.mxu1 }
 0x283   : > { %v6078_v1 = vclamps-f32 %v5137_v38, 256.0  ;;  %v5042_v59 = vadd.f32 %v8063_v5, %v5006_v57  ;;  %v4321_v16 = vadd.f32 %v4260_v53, %v3639_v17  ;;  %v3326_v48 = vadd.f32 %v3268_v14, %v7427_v15 }
 0x285   : > { %v6331_v13 = vpack.c.bf16 %v6078_v1, %v6077_v58  ;;  %v4747_v43 = vadd.f32 %v4686_v4, %v4321_v16  ;;  %v3581_v27 = vpop.f32.mrf.mxu2  ;;  %v5074_v46 = vmul.f32 0.2, %v5042_v59 }
 0x286   : > { %v3640_v47 = vadd.f32 %v3581_v27, %v3325_v6 }
 0x287   : > { %6403 = vst [vmem:[%s7839_s27 + $0x28] sm:$0xff] %v6331_v13   ;;  %4302 = vmatmul.bf16.gmra.mxu3 %v4154_v22  ;;  %v4783_v28 = vmul.f32 %v8053_v54, %v4747_v43  ;;  %v5106_v32 = vmax.f32 %v5042_v59, %v5074_v46 }
 0x289   : > { %v4689_v10 = vpop.f32.mrf.mxu0  ;;  %v5007_v36 = vadd.f32 %v4902_v25, %v4783_v28  ;;  %v5138_v29 = vmul.f32 1.4142135, %v5106_v32  ;;  %v4917_v25 = vpop.permute.xlu1 %4916 }
 0x28a   : > { %v4263_v35 = vpop.f32.mrf.mxu3  ;;  %v3271_v51 = vpop.f32.mrf.mxu1 }
 0x28b   : > { %v5043_v0 = vadd.f32 %v8063_v5, %v5007_v36  ;;  %v4322_v24 = vadd.f32 %v4263_v35, %v3640_v47  ;;  %v6079_v3 = vclamps-f32 %v5138_v29, 256.0  ;;  %v3327_v57 = vadd.f32 %v3271_v51, %v7443_v19  ;;  %v4922_v29 = vpop.permute.xlu2 %4921 }
 0x28c   : > { %4728 = vmatmul.bf16.gmra.mxu0 %v4580_v41 }
 0x28d   : > { %v5075_v31 = vmul.f32 0.2, %v5043_v0  ;;  %v4748_v61 = vadd.f32 %v4689_v10, %v4322_v24  ;;  %v3583_v7 = vpop.f32.mrf.mxu2 }
 0x28e   : > { %v3641_v44 = vadd.f32 %v3583_v7, %v3326_v48 }
 0x28f   : > { %v5107_v56 = vmax.f32 %v5043_v0, %v5075_v31  ;;  %v4784_v37 = vmul.f32 %v8053_v54, %v4748_v61 }
 0x291   : > { %v5139_v8 = vmul.f32 1.4142135, %v5107_v56  ;;  %v4691_v11 = vpop.f32.mrf.mxu0  ;;  %v5008_v21 = vadd.f32 %v4907_v9, %v4784_v37 }
 0x292   : > { %v4265_v49 = vpop.f32.mrf.mxu3  ;;  %v3273_v52 = vpop.f32.mrf.mxu1 }
 0x293   : > { %v6080_v63 = vclamps-f32 %v5139_v8, 256.0  ;;  %v5044_v17 = vadd.f32 %v8063_v5, %v5008_v21  ;;  %v4323_v38 = vadd.f32 %v4265_v49, %v3641_v44  ;;  %v3328_v27 = vadd.f32 %v3273_v52, %v7470_v39 }
 0x295   : > { %v6336_v4 = vpack.c.bf16 %v6080_v63, %v6079_v3  ;;  %v4749_v15 = vadd.f32 %v4691_v11, %v4323_v38  ;;  %v3586_v2 = vpop.f32.mrf.mxu2  ;;  %v5076_v53 = vmul.f32 0.2, %v5044_v17 }
 0x296   : > { %v3642_v14 = vadd.f32 %v3586_v2, %v3327_v57 }
 0x297   : > { %6404 = vst [vmem:[%s7839_s27 + $0x30] sm:$0xff] %v6336_v4   ;;  %v4785_v22 = vmul.f32 %v8053_v54, %v4749_v15  ;;  %v5108_v60 = vmax.f32 %v5044_v17, %v5076_v53  ;;  %v4927_v53 = vpop.permute.xlu0 %4926 }
 0x299   : > { %v4694_v58 = vpop.f32.mrf.mxu0  ;;  %v5009_v1 = vadd.f32 %v4912_v34, %v4785_v22  ;;  %v5140_v46 = vmul.f32 1.4142135, %v5108_v60 }
 0x29a   : > { %v4268_v59 = vpop.f32.mrf.mxu3  ;;  %v3276_v16 = vpop.f32.mrf.mxu1 }
 0x29b   : > { %v5045_v18 = vadd.f32 %v8063_v5, %v5009_v1  ;;  %v4324_v13 = vadd.f32 %v4268_v59, %v3642_v14  ;;  %v6081_v0 = vclamps-f32 %v5140_v46, 256.0  ;;  %v3329_v7 = vadd.f32 %v3276_v16, %v7484_v20 }
 0x29d   : > { %v5077_v43 = vmul.f32 0.2, %v5045_v18  ;;  %v4750_v6 = vadd.f32 %v4694_v58, %v4324_v13  ;;  %v3588_v19 = vpop.f32.mrf.mxu2 }
 0x29e   : > { %v3643_v41 = vadd.f32 %v3588_v19, %v3328_v27 }
 0x29f   : > { %v5109_v28 = vmax.f32 %v5045_v18, %v5077_v43  ;;  %v4786_v47 = vmul.f32 %v8053_v54, %v4750_v6 }
 0x2a1   : > { %v5141_v10 = vmul.f32 1.4142135, %v5109_v28  ;;  %v4696_v36 = vpop.f32.mrf.mxu0  ;;  %v5010_v35 = vadd.f32 %v4917_v25, %v4786_v47  ;;  %v4932_v28 = vpop.permute.xlu1 %4931 }
 0x2a2   : > { %v4270_v51 = vpop.f32.mrf.mxu3  ;;  %v3278_v32 = vpop.f32.mrf.mxu1 }
 0x2a3   : > { %v6082_v24 = vclamps-f32 %v5141_v10, 256.0  ;;  %v5046_v31 = vadd.f32 %v8063_v5, %v5010_v35  ;;  %v4325_v61 = vadd.f32 %v4270_v51, %v3643_v41  ;;  %v3330_v4 = vadd.f32 %v3278_v32, %v7501_v30 }
 0x2a5   : > { %v6341_v48 = vpack.c.bf16 %v6082_v24, %v6081_v0  ;;  %v4751_v39 = vadd.f32 %v4696_v36, %v4325_v61  ;;  %v3591_v9 = vpop.f32.mrf.mxu2  ;;  %v5078_v56 = vmul.f32 0.2, %v5046_v31 }
 0x2a6   : > { %v3644_v44 = vadd.f32 %v3591_v9, %v3329_v7  ;;  %v4937_v9 = vpop.permute.xlu2 %4936 }
 0x2a7   : > { %6405 = vst [vmem:[%s7839_s27 + $0x38] sm:$0xff] %v6341_v48   ;;  %v4787_v37 = vmul.f32 %v8053_v54, %v4751_v39  ;;  %v5110_v52 = vmax.f32 %v5046_v31, %v5078_v56 }
 0x2a9   : > { %v4699_v8 = vpop.f32.mrf.mxu0  ;;  %v5011_v11 = vadd.f32 %v4922_v29, %v4787_v37  ;;  %v5142_v15 = vmul.f32 1.4142135, %v5110_v52 }
 0x2aa   : > { %v4273_v21 = vpop.f32.mrf.mxu3  ;;  %v3281_v49 = vpop.f32.mrf.mxu1 }
 0x2ab   : > { %v5047_v3 = vadd.f32 %v8063_v5, %v5011_v11  ;;  %v4326_v63 = vadd.f32 %v4273_v21, %v3644_v44  ;;  %v6083_v16 = vclamps-f32 %v5142_v15, 256.0  ;;  %v3331_v6 = vadd.f32 %v3281_v49, %v7513_v50  ;;  %v4942_v15 = vpop.permute.xlu0 %4941 }
 0x2ad   : > { %v5079_v17 = vmul.f32 0.2, %v5047_v3  ;;  %v4752_v38 = vadd.f32 %v4699_v8, %v4326_v63  ;;  %v3593_v20 = vpop.f32.mrf.mxu2 }
 0x2ae   : > { %v3645_v34 = vadd.f32 %v3593_v20, %v3330_v4 }
 0x2af   : > { %v5111_v57 = vmax.f32 %v5047_v3, %v5079_v17  ;;  %v4788_v2 = vmul.f32 %v8053_v54, %v4752_v38 }
 0x2b1   : > { %v5143_v22 = vmul.f32 1.4142135, %v5111_v57  ;;  %v5012_v14 = vadd.f32 %v4927_v53, %v4788_v2  ;;  %v4701_v58 = vpop.f32.mrf.mxu0 }
 0x2b2   : > { %v4275_v1 = vpop.f32.mrf.mxu3  ;;  %v3283_v59 = vpop.f32.mrf.mxu1 }
 0x2b3   : > { %v6084_v60 = vclamps-f32 %v5143_v22, 256.0  ;;  %v5048_v18 = vadd.f32 %v8063_v5, %v5012_v14  ;;  %v4327_v13 = vadd.f32 %v4275_v1, %v3645_v34  ;;  %v3332_v31 = vadd.f32 %v3283_v59, %v7534_v45 }
 0x2b5   : > { %v6346_v43 = vpack.c.bf16 %v6084_v60, %v6083_v16  ;;  %v4753_v30 = vadd.f32 %v4701_v58, %v4327_v13  ;;  %v3596_v27 = vpop.f32.mrf.mxu2  ;;  %v5080_v19 = vmul.f32 0.2, %v5048_v18 }
 0x2b6   : > { %v3646_v46 = vadd.f32 %v3596_v27, %v3331_v6 }
 0x2b7   : > { %6406 = vst [vmem:[%s7839_s27 + $0x40] sm:$0xff] %v6346_v43   ;;  %v4789_v25 = vmul.f32 %v8053_v54, %v4753_v30  ;;  %v5112_v35 = vmax.f32 %v5048_v18, %v5080_v19  ;;  %v4947_v30 = vpop.permute.xlu1 %4946 }
 0x2b9   : > { %v5013_v47 = vadd.f32 %v4932_v28, %v4789_v25  ;;  %v4704_v41 = vpop.f32.mrf.mxu0  ;;  %v5144_v61 = vmul.f32 1.4142135, %v5112_v35 }
 0x2ba   : > { %v4278_v10 = vpop.f32.mrf.mxu3  ;;  %v3286_v36 = vpop.f32.mrf.mxu1 }
 0x2bb   : > { %v5049_v51 = vadd.f32 %v8063_v5, %v5013_v47  ;;  %v4328_v32 = vadd.f32 %v4278_v10, %v3646_v46  ;;  %v6085_v11 = vclamps-f32 %v5144_v61, 256.0  ;;  %v3333_v63 = vadd.f32 %v3286_v36, %v7553_v62 }
 0x2bd   : > { %v5081_v0 = vmul.f32 0.2, %v5049_v51  ;;  %v4754_v24 = vadd.f32 %v4704_v41, %v4328_v32  ;;  %v3598_v50 = vpop.f32.mrf.mxu2 }
 0x2be   : > { %v3647_v7 = vadd.f32 %v3598_v50, %v3332_v31  ;;  %v4952_v31 = vpop.permute.xlu2 %4951 }
 0x2bf   : > { %v5113_v48 = vmax.f32 %v5049_v51, %v5081_v0  ;;  %v4790_v39 = vmul.f32 %v8053_v54, %v4754_v24 }
 0x2c1   : > { %v5145_v29 = vmul.f32 1.4142135, %v5113_v48  ;;  %v5014_v56 = vadd.f32 %v4937_v9, %v4790_v39  ;;  %v4706_v37 = vpop.f32.mrf.mxu0 }
 0x2c2   : > { %v4280_v44 = vpop.f32.mrf.mxu3  ;;  %v3288_v8 = vpop.f32.mrf.mxu1 }
 0x2c3   : > { %v6086_v21 = vclamps-f32 %v5145_v29, 256.0  ;;  %v5050_v49 = vadd.f32 %v8063_v5, %v5014_v56  ;;  %v4329_v52 = vadd.f32 %v4280_v44, %v3647_v7  ;;  %v3334_v16 = vadd.f32 %v3288_v8, %v7573_v40 }
 0x2c5   : > { %v6351_v3 = vpack.c.bf16 %v6086_v21, %v6085_v11  ;;  %v4755_v45 = vadd.f32 %v4706_v37, %v4329_v52  ;;  %v3601_v17 = vpop.f32.mrf.mxu2  ;;  %v5082_v38 = vmul.f32 0.2, %v5050_v49  ;;  %v4957_v52 = vpop.permute.xlu0 %4956 }
 0x2c6   : > { %v3648_v20 = vadd.f32 %v3601_v17, %v3333_v63 }
 0x2c7   : > { %6407 = vst [vmem:[%s7839_s27 + $0x48] sm:$0xff] %v6351_v3   ;;  %v4791_v4 = vmul.f32 %v8053_v54, %v4755_v45  ;;  %v5114_v22 = vmax.f32 %v5050_v49, %v5082_v38 }
 0x2c9   : > { %v5015_v57 = vadd.f32 %v4942_v15, %v4791_v4  ;;  %v4709_v2 = vpop.f32.mrf.mxu0  ;;  %v5146_v60 = vmul.f32 1.4142135, %v5114_v22 }
 0x2ca   : > { %v4283_v34 = vpop.f32.mrf.mxu3  ;;  %v3291_v53 = vpop.f32.mrf.mxu1 }
 0x2cb   : > { %v5051_v14 = vadd.f32 %v8063_v5, %v5015_v57  ;;  %v4330_v58 = vadd.f32 %v4283_v34, %v3648_v20  ;;  %v6087_v28 = vclamps-f32 %v5146_v60, 256.0  ;;  %v3335_v35 = vadd.f32 %v3291_v53, %v7588_v12 }
 0x2cd   : > { %v5083_v1 = vmul.f32 0.2, %v5051_v14  ;;  %v4756_v59 = vadd.f32 %v4709_v2, %v4330_v58  ;;  %v3603_v62 = vpop.f32.mrf.mxu2 }
 0x2ce   : > { %v3649_v43 = vadd.f32 %v3603_v62, %v3334_v16 }
 0x2cf   : > { %v5115_v18 = vmax.f32 %v5051_v14, %v5083_v1  ;;  %v4792_v13 = vmul.f32 %v8053_v54, %v4756_v59  ;;  %v4962_v1 = vpop.permute.xlu1 %4961 }
 0x2d1   : > { %v5147_v6 = vmul.f32 1.4142135, %v5115_v18  ;;  %v5016_v27 = vadd.f32 %v4947_v30, %v4792_v13  ;;  %v4711_v19 = vpop.f32.mrf.mxu0 }
 0x2d2   : > { %v4285_v25 = vpop.f32.mrf.mxu3  ;;  %v3293_v46 = vpop.f32.mrf.mxu1 }
 0x2d3   : > { %v6088_v47 = vclamps-f32 %v5147_v6, 256.0  ;;  %v5052_v41 = vadd.f32 %v8063_v5, %v5016_v27  ;;  %v4331_v10 = vadd.f32 %v4285_v25, %v3649_v43  ;;  %v3336_v44 = vadd.f32 %v3293_v46, %v7609_v55 }
 0x2d5   : > { %v6356_v36 = vpack.c.bf16 %v6088_v47, %v6087_v28  ;;  %v4757_v40 = vadd.f32 %v4711_v19, %v4331_v10  ;;  %v3606_v51 = vpop.f32.mrf.mxu2  ;;  %v5084_v32 = vmul.f32 0.2, %v5052_v41  ;;  %v4967_v47 = vpop.permute.xlu2 %4966 }
 0x2d6   : > { %v3650_v24 = vadd.f32 %v3606_v51, %v3335_v35 }
 0x2d7   : > { %6408 = vst [vmem:[%s7839_s27 + $0x50] sm:$0xff] %v6356_v36   ;;  %v4793_v0 = vmul.f32 %v8053_v54, %v4757_v40  ;;  %v5116_v7 = vmax.f32 %v5052_v41, %v5084_v32 }
 0x2d9   : > { %v5017_v50 = vadd.f32 %v4952_v31, %v4793_v0  ;;  %v4714_v61 = vpop.f32.mrf.mxu0  ;;  %v5148_v8 = vmul.f32 1.4142135, %v5116_v7 }
 0x2da   : > { %v4288_v48 = vpop.f32.mrf.mxu3  ;;  %v3296_v39 = vpop.f32.mrf.mxu1 }
 0x2db   : > { %v5053_v9 = vadd.f32 %v8063_v5, %v5017_v50  ;;  %v4332_v29 = vadd.f32 %v4288_v48, %v3650_v24  ;;  %v6089_v4 = vclamps-f32 %v5148_v8, 256.0  ;;  %v3337_v34 = vadd.f32 %v3296_v39, %v7625_v42 }
 0x2dd   : > { %v5085_v56 = vmul.f32 0.2, %v5053_v9  ;;  %v4758_v37 = vadd.f32 %v4714_v61, %v4332_v29  ;;  %v3608_v12 = vpop.f32.mrf.mxu2 }
 0x2de   : > { %v3651_v49 = vadd.f32 %v3608_v12, %v3336_v44 }
 0x2df   : > { %v5117_v11 = vmax.f32 %v5053_v9, %v5085_v56  ;;  %v4794_v21 = vmul.f32 %v8053_v54, %v4758_v37  ;;  %v4972_v9 = vpop.permute.xlu0 %4971 }
 0x2e1   : > { %v5149_v3 = vmul.f32 1.4142135, %v5117_v11  ;;  %v5018_v45 = vadd.f32 %v4957_v52, %v4794_v21  ;;  %v4716_v63 = vpop.f32.mrf.mxu0 }
 0x2e2   : > { %v4290_v17 = vpop.f32.mrf.mxu3  ;;  %v3298_v38 = vpop.f32.mrf.mxu1 }
 0x2e3   : > { %v6090_v20 = vclamps-f32 %v5149_v3, 256.0  ;;  %v5054_v15 = vadd.f32 %v8063_v5, %v5018_v45  ;;  %v4333_v57 = vadd.f32 %v4290_v17, %v3651_v49  ;;  %v3338_v27 = vadd.f32 %v3298_v38, %v7645_v33  ;;  %v4977_v38 = vpop.permute.xlu1 %4976 }
 0x2e5   : > { %v6361_v2 = vpack.c.bf16 %v6090_v20, %v6089_v4  ;;  %v4759_v55 = vadd.f32 %v4716_v63, %v4333_v57  ;;  %v3611_v53 = vpop.f32.mrf.mxu2  ;;  %v5086_v22 = vmul.f32 0.2, %v5054_v15 }
 0x2e6   : > { %v3652_v58 = vadd.f32 %v3611_v53, %v3337_v34 }
 0x2e7   : > { %6409 = vst [vmem:[%s7839_s27 + $0x58] sm:$0xff] %v6361_v2   ;;  %v4795_v14 = vmul.f32 %v8053_v54, %v4759_v55  ;;  %v5118_v60 = vmax.f32 %v5054_v15, %v5086_v22 }
 0x2e9   : > { %v5019_v59 = vadd.f32 %v4962_v1, %v4795_v14  ;;  %v4719_v16 = vpop.f32.mrf.mxu0  ;;  %v5150_v19 = vmul.f32 1.4142135, %v5118_v60  ;;  %v8165_v14 = vld [vmem:[#allocation7_spill] sm:$0xff]  ;;  %v4982_v60 = vpop.permute.xlu2 %4981 }
 0x2ea   : > { %v4293_v62 = vpop.f32.mrf.mxu3  ;;  %v3301_v43 = vpop.f32.mrf.mxu1 }
 0x2eb   : > { %v5055_v18 = vadd.f32 %v8063_v5, %v5019_v59  ;;  %v4334_v13 = vadd.f32 %v4293_v62, %v3652_v58  ;;  %v6091_v35 = vclamps-f32 %v5150_v19, 256.0  ;;  %v3339_v33 = vadd.f32 %v3301_v43, %v7660_v23 }
 0x2ed   : > { %v5087_v30 = vmul.f32 0.2, %v5055_v18  ;;  %v4760_v6 = vadd.f32 %v4719_v16, %v4334_v13  ;;  %v3613_v42 = vpop.f32.mrf.mxu2 }
 0x2ee   : > { %v3653_v28 = vadd.f32 %v3613_v42, %v3338_v27 }
 0x2ef   : > { %v5119_v25 = vmax.f32 %v5055_v18, %v5087_v30  ;;  %v4796_v46 = vmul.f32 %v8053_v54, %v4760_v6 }
 0x2f1   : > { %v5151_v41 = vmul.f32 1.4142135, %v5119_v25  ;;  %v5020_v10 = vadd.f32 %v4967_v47, %v4796_v46  ;;  %v4721_v36 = vpop.f32.mrf.mxu0  ;;  %v8166_v46 = vld [vmem:[#allocation8_spill] sm:$0xff] }
 0x2f2   : > { %v4295_v40 = vpop.f32.mrf.mxu3  ;;  %v3303_v61 = vpop.f32.mrf.mxu1 }
 0x2f3   : > { %v6092_v51 = vclamps-f32 %v5151_v41, 256.0  ;;  %v5056_v32 = vadd.f32 %v8063_v5, %v5020_v10  ;;  %v4335_v0 = vadd.f32 %v4295_v40, %v3653_v28  ;;  %v3340_v49 = vadd.f32 %v3303_v61, %v7683_v26 }
 0x2f5   : > { %v6366_v24 = vpack.c.bf16 %v6092_v51, %v6091_v35  ;;  %v4761_v31 = vadd.f32 %v4721_v36, %v4335_v0  ;;  %v3616_v50 = vpop.f32.mrf.mxu2  ;;  %v5088_v48 = vmul.f32 0.2, %v5056_v32  ;;  %v4987_v35 = vpop.permute.xlu0 %4986 }
 0x2f6   : > { %v3654_v7 = vadd.f32 %v3616_v50, %v3339_v33 }
 0x2f7   : > { %6410 = vst [vmem:[%s7839_s27 + $0x60] sm:$0xff] %v6366_v24   ;;  %v4797_v39 = vmul.f32 %v8053_v54, %v4761_v31  ;;  %v5120_v44 = vmax.f32 %v5056_v32, %v5088_v48 }
 0x2f9   : > { %v5021_v29 = vadd.f32 %v4972_v9, %v4797_v39  ;;  %v4724_v56 = vpop.f32.mrf.mxu0  ;;  %v5152_v52 = vmul.f32 1.4142135, %v5120_v44 }
 0x2fa   : > { %v4298_v37 = vpop.f32.mrf.mxu3  ;;  %v3306_v17 = vpop.f32.mrf.mxu1 }
 0x2fb   : > { %v5057_v12 = vadd.f32 %v8063_v5, %v5021_v29  ;;  %v4336_v8 = vadd.f32 %v4298_v37, %v3654_v7  ;;  %v6093_v2 = vclamps-f32 %v5152_v52, 256.0  ;;  %v3341_v58 = vadd.f32 %v3306_v17, %v8165_v14  ;;  %v4992_v29 = vpop.permute.xlu1 %4991 }
 0x2fd   : > { %v5089_v11 = vmul.f32 0.2, %v5057_v12  ;;  %v4762_v21 = vadd.f32 %v4724_v56, %v4336_v8  ;;  %v3618_v23 = vpop.f32.mrf.mxu2 }
 0x2fe   : > { %v3655_v63 = vadd.f32 %v3618_v23, %v3340_v49 }
 0x2ff   : > { %v5121_v3 = vmax.f32 %v5057_v12, %v5089_v11  ;;  %v4798_v45 = vmul.f32 %v8053_v54, %v4762_v21 }
 0x301   : > { %v5153_v4 = vmul.f32 1.4142135, %v5121_v3  ;;  %v5022_v20 = vadd.f32 %v4977_v38, %v4798_v45  ;;  %v4726_v15 = vpop.f32.mrf.mxu0 }
 0x302   : > { %v4300_v57 = vpop.f32.mrf.mxu3  ;;  %v3308_v13 = vpop.f32.mrf.mxu1 }
 0x303   : > { %v6094_v55 = vclamps-f32 %v5153_v4, 256.0  ;;  %v5058_v34 = vadd.f32 %v8063_v5, %v5022_v20  ;;  %v4337_v53 = vadd.f32 %v4300_v57, %v3655_v63  ;;  %v3342_v28 = vadd.f32 %v3308_v13, %v8166_v46 }
 0x305   : > { %v6371_v22 = vpack.c.bf16 %v6094_v55, %v6093_v2  ;;  %v4763_v26 = vadd.f32 %v4726_v15, %v4337_v53  ;;  %v3621_v1 = vpop.f32.mrf.mxu2  ;;  %v5090_v59 = vmul.f32 0.2, %v5058_v34 }
 0x306   : > { %v3656_v62 = vadd.f32 %v3621_v1, %v3341_v58 }
 0x307   : > { %6411 = vst [vmem:[%s7839_s27 + $0x68] sm:$0xff] %v6371_v22   ;;  %v4799_v16 = vmul.f32 %v8053_v54, %v4763_v26  ;;  %v5122_v6 = vmax.f32 %v5058_v34, %v5090_v59 }
 0x309   : > { %v5023_v18 = vadd.f32 %v4982_v60, %v4799_v16  ;;  %v4729_v43 = vpop.f32.mrf.mxu0  ;;  %v5154_v41 = vmul.f32 1.4142135, %v5122_v6 }
 0x30a   : > { %v4303_v30 = vpop.f32.mrf.mxu3 }
 0x30b   : > { %v5059_v27 = vadd.f32 %v8063_v5, %v5023_v18  ;;  %v4338_v42 = vadd.f32 %v4303_v30, %v3656_v62  ;;  %v6095_v24 = vclamps-f32 %v5154_v41, 256.0 }
 0x30d   : > { %v5091_v19 = vmul.f32 0.2, %v5059_v27  ;;  %v4764_v25 = vadd.f32 %v4729_v43, %v4338_v42  ;;  %v3623_v47 = vpop.f32.mrf.mxu2 }
 0x30e   : > { %v3657_v40 = vadd.f32 %v3623_v47, %v3342_v28 }
 0x30f   : > { %v5123_v10 = vmax.f32 %v5059_v27, %v5091_v19  ;;  %v4800_v36 = vmul.f32 %v8053_v54, %v4764_v25 }
 0x311   : > { %v5155_v51 = vmul.f32 1.4142135, %v5123_v10  ;;  %v5024_v32 = vadd.f32 %v4987_v35, %v4800_v36  ;;  %v4731_v61 = vpop.f32.mrf.mxu0 }
 0x312   : > { %v4305_v0 = vpop.f32.mrf.mxu3 }
 0x313   : > { %v6096_v31 = vclamps-f32 %v5155_v51, 256.0  ;;  %v5060_v33 = vadd.f32 %v8063_v5, %v5024_v32  ;;  %v4339_v50 = vadd.f32 %v4305_v0, %v3657_v40 }
 0x315   : > { %v6376_v48 = vpack.c.bf16 %v6096_v31, %v6095_v24  ;;  %v4765_v39 = vadd.f32 %v4731_v61, %v4339_v50  ;;  %v5092_v7 = vmul.f32 0.2, %v5060_v33 }
 0x317   : > { %6412 = vst [vmem:[%s7839_s27 + $0x70] sm:$0xff] %v6376_v48   ;;  %v4801_v9 = vmul.f32 %v8053_v54, %v4765_v39  ;;  %v5124_v37 = vmax.f32 %v5060_v33, %v5092_v7 }
 0x319   : > { %v5025_v56 = vadd.f32 %v4992_v29, %v4801_v9  ;;  %v5156_v8 = vmul.f32 1.4142135, %v5124_v37 }
 0x31b   : > { %v5061_v44 = vadd.f32 %v8063_v5, %v5025_v56  ;;  %v6097_v49 = vclamps-f32 %v5156_v8, 256.0 }
 0x31d   : > { %v5093_v12 = vmul.f32 0.2, %v5061_v44 }
 0x31f   : > { %v5125_v11 = vmax.f32 %v5061_v44, %v5093_v12 }
 0x321   : > { %v5157_v21 = vmul.f32 1.4142135, %v5125_v11 }
 0x323   : > { %v6098_v23 = vclamps-f32 %v5157_v21, 256.0 }
 0x325   : > { %v6381_v52 = vpack.c.bf16 %v6098_v23, %v6097_v49 }
 0x327   : > { %6413 = vst [vmem:[%s7839_s27 + $0x78] sm:$0xff] %v6381_v52  }
 0x328 PF: > { %s16_s23 = sadd.s32 1, %s6547_s23   ;;  %s8167_s21 = smov %s6543_s22 }
 0x329   : > { %p13_p5 = scmp.ge.s32.totalorder %s16_s23, 4   ;;  %s8168_s22 = smov %s8170_s24 }
 0x32b   :  { %15 = sbr.rel (!%p13_p5) target bundleno = 2 (0x2), region = 94 }

// kernel: synthesis_block_no_up_forward.3
= control target key start
LH: loop header
LB: loop body
LE: loop exit
PB: predicated region body
PF: predicated region fallthrough
CT: control target
= control target key end

     0   :  { %s7094_s13 = smov 0   ;;  %s7096_s14 = smov 0   ;;  %s8782_s0 = inlined_call_operand.vmem [shape: bf16[2,18,18,128], index: 0, kind: input, shape index: {}]   ;;  %s8783_s1 = inlined_call_operand.vmem [shape: bf16[2,1,128], index: 1, kind: input, shape index: {}]   ;;  %s8784_s2 = inlined_call_operand.vmem [shape: bf16[3,3,128,128], index: 2, kind: input, shape index: {}]   ;;  %s8785_s3 = inlined_call_operand.vmem [shape: f32[2,1,128], index: 3, kind: input, shape index: {}]   ;;  %s8786_s4 = inlined_call_operand.vmem [shape: f32[1,256,1], index: 4, kind: input, shape index: {}]   ;;  %s8787_s5 = inlined_call_operand.vmem [shape: f32[1,1,128], index: 5, kind: input, shape index: {}]   ;;  %s8788_s6 = inlined_call_operand.vmem [shape: bf16[2,1,128], index: 6, kind: input, shape index: {}]   ;;  %s8789_s7 = inlined_call_operand.vmem [shape: bf16[128,128], index: 7, kind: input, shape index: {}]   ;;  %s8790_s8 = inlined_call_operand.vmem [shape: f32[1,1,128], index: 8, kind: input, shape index: {}]   ;;  %s8791_s9 = inlined_call_operand.vmem [shape: f32[2,256,128], index: 9, kind: output, shape index: {0}]   ;;  %s8792_s10 = inlined_call_operand.vmem [shape: f32[2,256,128], index: 10, kind: output, shape index: {1}]  }
   0x1   :  { %s7098_s15 = smov 0  }
   0x2 LB: > { %s33_s16 = sadd.s32 1, %s7032_s14  ;;  %p5951_p0 = scmp.ge.s32.totalorder %s7036_s15, 1  ;;  %s7036_s15 = sphi %s7098_s15, %s21_s15   ;;  %s7032_s14 = sphi %s7096_s14, %s8850_s14   ;;  %s7028_s13 = sphi %s7094_s13, %s8849_s13  }
   0x3   : > { %p35_p1 = scmp.ge.s32.totalorder %s33_s16, 2  ;;  %p366_p2 = scmp.lt.s32.totalorder %s7036_s15, 3 }
   0x5   : > { %s8852_s16 = smov (%p35_p1, %s33_s16), 0  ;;  %p367_p3 = pnand %p5951_p0, %p366_p2 }
   0x7   : > { %370 = sbr.rel (%p367_p3) target bundleno = 979 (0x3d3), region = 56 }
   0xc   : > { %v6736_v0 = vld [vmem:[%s8784_s2 + $0x38] sm:$0xff]  ;;  %p431_p4 = scmp.lt.s32.totalorder %s7028_s13, 1  ;;  %v6735_v2 = vld [vmem:[%s8784_s2 + $0x30] sm:$0xff]  ;;  %v6734_v4 = vld [vmem:[%s8784_s2 + $0x28] sm:$0xff]  ;;  %vm815_vm0 = vsmask.f32 3328 }
   0xd   : > { %v6744_v1 = vld [vmem:[%s8784_s2 + $0x78] sm:$0xff]  ;;  %6946 = vmatpush.bf16.msra.mxu3 %v6736_v0  ;;  %v6743_v3 = vld [vmem:[%s8784_s2 + $0x70] sm:$0xff]  ;;  %1564 = vmatpush.bf16.msra.mxu1 %v6736_v0  ;;  %v6742_v6 = vld [vmem:[%s8784_s2 + $0x68] sm:$0xff]  ;;  %vm816_vm1 = vsmask.f32 7440  ;;  %vm1701_vm3 = vcmask 1042432  }
   0xe   : > { %6938 = vmatpush.bf16.msra.mxu2 %v6744_v1  ;;  %s8854_s13 = smov (!%p431_p4, %s7028_s13), 1  ;;  %1331 = vmatpush.bf16.msra.mxu0 %v6744_v1  ;;  %v6733_v23 = vld [vmem:[%s8784_s2 + $0x20] sm:$0xff]  ;;  %v6732_v40 = vld [vmem:[%s8784_s2 + $0x18] sm:$0xff]  ;;  %v6731_v58 = vld [vmem:[%s8784_s2 + $0x10] sm:$0xff]  ;;  %vm1702_vm4 = vcmask 1046532  }
   0xf   : > { %s6954_s25 = smul.u32 216, %s8854_s13  ;;  %s438_s28 = scalar_lea.vmem %s8783_s1, %s8854_s13  ;;  %v6741_v24 = vld [vmem:[%s8784_s2 + $0x60] sm:$0xff]  ;;  %v6740_v41 = vld [vmem:[%s8784_s2 + $0x58] sm:$0xff]  ;;  %v6739_v59 = vld [vmem:[%s8784_s2 + $0x50] sm:$0xff] }
  0x10   : > { %v529_v5 = vld [vmem:[%s438_s28] sm:$0x1]  ;;  %vm7241_vm2 = vmor %vm815_vm0, %vm816_vm1  ;;  %s8147_s12 = scalar_lea.vmem %s8785_s3, %s8854_s13  ;;  %s450_s30 = scalar_lea.vmem %s8788_s6, %s8854_s13 }
  0x11   : > { %6947 = vmatpush.bf16.msra.mxu3 %v6735_v2  ;;  %s7140_s19 = scalar_lea.vmem %s8782_s0, %s6954_s25  ;;  %v531_v7 = vpack.i.b16 %v529_v5, %v529_v5  ;;  %1565 = vmatpush.bf16.msra.mxu1 %v6735_v2  ;;  %vm7549_vm5 = vmor %vm1701_vm3, %vm1702_vm4  ;;  %s6711_s11 = sshll.u32 %s8854_s13, 8 }
  0x12   : > { %6939 = vmatpush.bf16.msra.mxu2 %v6743_v3  ;;  %1332 = vmatpush.bf16.msra.mxu0 %v6743_v3  ;;  %v6925_v8 = vld [vmem:[%s7140_s19 + $0x60] sm:$0xff]   ;;  %v501_v9 = vld [vmem:[%s7140_s19 + $0x68] sm:$0x1]  ;;  %v502_v16 = vld [vmem:[%s7140_s19 + $0x6c] sm:$0xff]   ;;  %s8406_s20 = scalar_lea.vmem %s8791_s9, %s6711_s11  ;;  %s8639_s25 = scalar_lea.vmem %s8792_s10, %s6711_s11 }
  0x13   : > { %v6842_v10 = vld [vmem:[%s7140_s19] sm:$0xff]   ;;  %v6859_v11 = vunpack.c.l.bf16 %v6925_v8  ;;  %v6860_v12 = vunpack.c.h.bf16 %v6925_v8  ;;  %v533_v13 = vperm.slane %v531_v7, 0  ;;  %v560_v14 = vunpack.c.l.bf16 %v501_v9  ;;  %v477_v15 = vld [vmem:[%s7140_s19 + $0x8] sm:$0x1]  ;;  %v504_v17 = vld [vmem:[%s7140_s19 + $0x74] sm:$0x1] }
  0x14   : > { %v6843_v18 = vunpack.c.l.bf16 %v6842_v10  ;;  %v6844_v19 = vunpack.c.h.bf16 %v6842_v10  ;;  %v536_v20 = vunpack.c.l.bf16 %v477_v15  ;;  %v561_v21 = vunpack.c.l.bf16 %v502_v16  ;;  %v478_v22 = vld [vmem:[%s7140_s19 + $0xc] sm:$0xff]   ;;  %v6926_v30 = vld [vmem:[%s7140_s19 + $0x78] sm:$0xff]   ;;  %v480_v35 = vld [vmem:[%s7140_s19 + $0x14] sm:$0x1] }
  0x15   : > { %6948 = vmatpush.bf16.msra.mxu3 %v6734_v4  ;;  %v7155_v25 = vunpack.c.l.bf16 %v533_v13  ;;  %v562_v26 = vunpack.c.h.bf16 %v502_v16  ;;  %v563_v27 = vunpack.c.l.bf16 %v504_v17  ;;  %1566 = vmatpush.bf16.msra.mxu1 %v6734_v4  ;;  %v537_v28 = vunpack.c.l.bf16 %v478_v22  ;;  %v507_v50 = vld [vmem:[%s7140_s19 + $0x80] sm:$0x1]  ;;  %v6922_v51 = vld [vmem:[%s7140_s19 + $0x18] sm:$0xff]   ;;  %v6730_v7 = vld [vmem:[%s8784_s2 + $0x8] sm:$0xff] }
  0x16   : > { %6940 = vmatpush.bf16.msra.mxu2 %v6742_v6  ;;  %1333 = vmatpush.bf16.msra.mxu0 %v6742_v6  ;;  %v538_v29 = vunpack.c.h.bf16 %v478_v22  ;;  %v6863_v45 = vunpack.c.l.bf16 %v6926_v30  ;;  %v539_v48 = vunpack.c.l.bf16 %v480_v35  ;;  %v6864_v49 = vunpack.c.h.bf16 %v6926_v30  ;;  %v483_v57 = vld [vmem:[%s7140_s19 + $0x20] sm:$0x1]  ;;  %v6738_v8 = vld [vmem:[%s8784_s2 + $0x48] sm:$0xff]  ;;  %v6776_v35 = vld [vmem:[%s8784_s2 + $0xf8] sm:$0xff] }
  0x17   : > { %v613_v31 = vmul.f32 %v6859_v11, %v7155_v25  ;;  %v614_v32 = vmul.f32 %v6860_v12, %v7155_v25  ;;  %v615_v33 = vmul.f32 %v7155_v25, %v560_v14  ;;  %v589_v34 = vmul.f32 %v6843_v18, %v7155_v25  ;;  %v6729_v15 = vld [vmem:[%s8784_s2] sm:$0xff] }
  0x18   : > { %v590_v36 = vmul.f32 %v6844_v19, %v7155_v25  ;;  %v591_v37 = vmul.f32 %v7155_v25, %v536_v20  ;;  %v616_v38 = vmul.f32 %v7155_v25, %v561_v21  ;;  %v617_v39 = vmul.f32 %v7155_v25, %v562_v26  ;;  %v6737_v21 = vld [vmem:[%s8784_s2 + $0x40] sm:$0xff] }
  0x19   : > { %6949 = vmatpush.bf16.msra.mxu3 %v6733_v23  ;;  %v6900_v42 = vpack.c.bf16 %v614_v32, %v613_v31  ;;  %v669_v43 = vpack.c.bf16 %v615_v33, %v615_v33  ;;  %v618_v44 = vmul.f32 %v7155_v25, %v563_v27  ;;  %1567 = vmatpush.bf16.msra.mxu1 %v6733_v23  ;;  %v566_v56 = vunpack.c.l.bf16 %v507_v50  ;;  %v6752_v33 = vld [vmem:[%s8784_s2 + $0xb8] sm:$0xff] }
  0x1a   : > { %6941 = vmatpush.bf16.msra.mxu2 %v6741_v24  ;;  %1334 = vmatpush.bf16.msra.mxu0 %v6741_v24  ;;  %v645_v46 = vpack.c.bf16 %v591_v37, %v591_v37  ;;  %v6880_v47 = vpack.c.bf16 %v590_v36, %v589_v34  ;;  %v670_v52 = vpack.c.bf16 %v616_v38, %v616_v38  ;;  %v6847_v62 = vunpack.c.l.bf16 %v6922_v51 }
  0x1b   : > { %6933 = vst [vmem:[#allocation2 + $0x60] sm:$0xff] %v6900_v42   ;;  %v671_v53 = vpack.c.bf16 %v617_v39, %v617_v39  ;;  %v619_v54 = vmul.f32 %v6863_v45, %v7155_v25  ;;  %v620_v55 = vmul.f32 %v6864_v49, %v7155_v25  ;;  %v672_v60 = vpack.c.bf16 %v618_v44, %v618_v44 }
  0x1c   : > { %723 = vst [vmem:[#allocation2 + $0x68] sm:$0x1] %v669_v43  ;;  %v7186_v61 = vmul.f32 %v7155_v25, %v537_v28  ;;  %v6848_v63 = vunpack.c.h.bf16 %v6922_v51  ;;  %v7189_v0 = vmul.f32 %v7155_v25, %v538_v29  ;;  %v7192_v1 = vmul.f32 %v7155_v25, %v539_v48 }
  0x1d   : > { %6950 = vmatpush.bf16.msra.mxu3 %v6732_v40  ;;  %6881 = vst [vmem:[#allocation2] sm:$0xff] %v6880_v47   ;;  %1568 = vmatpush.bf16.msra.mxu1 %v6732_v40  ;;  %v6905_v2 = vpack.c.bf16 %v620_v55, %v619_v54  ;;  %v542_v3 = vunpack.c.l.bf16 %v483_v57  ;;  %v7195_v4 = vmul.f32 %v7155_v25, %v566_v56  ;;  %v6784_v40 = vld [vmem:[%s8784_s2 + $0x138] sm:$0xff] }
  0x1e   : > { %6942 = vmatpush.bf16.msra.mxu2 %v6740_v41  ;;  %1335 = vmatpush.bf16.msra.mxu0 %v6740_v41  ;;  %699 = vst [vmem:[#allocation2 + $0x8] sm:$0x1] %v645_v46  ;;  %v7198_v5 = vmul.f32 %v6847_v62, %v7155_v25  ;;  %v7201_v6 = vmul.f32 %v6848_v63, %v7155_v25 }
  0x1f   : > { %724 = vst [vmem:[#allocation2 + $0x6c] sm:$0xf] %v670_v52  ;;  %v7210_v9 = vmul.f32 %v7155_v25, %v542_v3  ;;  %v646_v12 = vpack.c.bf16 %v7186_v61, %v7186_v61  ;;  %v647_v13 = vpack.c.bf16 %v7189_v0, %v7189_v0  ;;  %v648_v14 = vpack.c.bf16 %v7192_v1, %v7192_v1 }
  0x20   : > { %725 = vst [vmem:[#allocation2 + $0x70] sm:$0xf] %v671_v53  ;;  %v675_v26 = vpack.c.bf16 %v7195_v4, %v7195_v4  ;;  %v6885_v28 = vpack.c.bf16 %v7201_v6, %v7198_v5  ;;  %v6750_v6 = vld [vmem:[%s8784_s2 + $0xa8] sm:$0xff] }
  0x21   : > { %6951 = vmatpush.bf16.msra.mxu3 %v6731_v58  ;;  %726 = vst [vmem:[#allocation2 + $0x74] sm:$0x1] %v672_v60  ;;  %1569 = vmatpush.bf16.msra.mxu1 %v6731_v58  ;;  %v651_v27 = vpack.c.bf16 %v7210_v9, %v7210_v9 }
  0x22   : > { %6943 = vmatpush.bf16.msra.mxu2 %v6739_v59  ;;  %1336 = vmatpush.bf16.msra.mxu0 %v6739_v59  ;;  %v767_v10 = vld [vmem:[#allocation2 + $0x60] sm:$0xf]  ;;  %v768_v11 = vld [vmem:[#allocation2 + $0x64] sm:$0xf]  ;;  %6934 = vst [vmem:[#allocation2 + $0x78] sm:$0xff] %v6905_v2  }
  0x23   : > { %v807_v16 = vld [vmem:[#allocation2 + $0x68] sm:$0x1]  ;;  %v1011_v17 = vshrl.u32 %v767_v10, 16  ;;  %v1014_v18 = vshll.u32 %v767_v10, 16  ;;  %v1020_v19 = vshll.u32 %v768_v11, 16  ;;  %v1024_v20 = vshrl.u32 %v768_v11, 16 }
  0x24   : > { %v1030_v22 = vshll.u32 %v807_v16, 16  ;;  %v751_v23 = vld [vmem:[#allocation2] sm:$0xf]  ;;  %v752_v24 = vld [vmem:[#allocation2 + $0x4] sm:$0xf]  ;;  %v6783_v16 = vld [vmem:[%s8784_s2 + $0x130] sm:$0xff] }
  0x25   : > { %6952 = vmatpush.bf16.msra.mxu3 %v6730_v7  ;;  %v1013_v29 = vrot.slane %v1011_v17, 4  ;;  %v1016_v30 = vrot.slane %v1014_v18, 5  ;;  %v1022_v31 = vrot.slane %v1020_v19, 5  ;;  %v1026_v32 = vrot.slane %v1024_v20, 4  ;;  %v799_v34 = vld [vmem:[#allocation2 + $0x8] sm:$0x1]  ;;  %1570 = vmatpush.bf16.msra.mxu1 %v6730_v7 }
  0x26   : > { %6944 = vmatpush.bf16.msra.mxu2 %v6738_v8  ;;  %1337 = vmatpush.bf16.msra.mxu0 %v6738_v8  ;;  %v1032_v36 = vrot.slane %v1030_v22, 5  ;;  %v819_v37 = vshrl.u32 %v751_v23, 16  ;;  %v822_v38 = vshll.u32 %v751_v23, 16  ;;  %v828_v39 = vshll.u32 %v752_v24, 16  ;;  %v769_v41 = vld [vmem:[#allocation2 + $0x6c] sm:$0xf] }
  0x27   : > { %v6721_v42 = vld [vmem:[#allocation2 + $0x60] sm:$0xff]  ;;  %v1017_v43 = vor.u32 %v1016_v30, %v1013_v29  ;;  %v1027_v44 = vor.u32 %v1026_v32, %v1022_v31  ;;  %v832_v45 = vshrl.u32 %v752_v24, 16  ;;  %v838_v46 = vshll.u32 %v799_v34, 16  ;;  %v770_v48 = vld [vmem:[#allocation2 + $0x70] sm:$0xf]  ;;  %6930 = vst [vmem:[#allocation2 + $0x18] sm:$0xff] %v6885_v28  }
  0x28   : > { %v6713_v47 = vld [vmem:[#allocation2] sm:$0xff]  ;;  %v821_v50 = vrot.slane %v819_v37, 4  ;;  %v824_v51 = vrot.slane %v822_v38, 5  ;;  %v830_v52 = vrot.slane %v828_v39, 5  ;;  %v808_v53 = vld [vmem:[#allocation2 + $0x74] sm:$0x1] }
  0x29   : > { %v1035_v54 = vshrl.u32 %v769_v41, 16  ;;  %6953 = vmatpush.bf16.msra.mxu3 %v6729_v15  ;;  %v1018_v55 = vrot.slane %v1017_v43, 4  ;;  %v1028_v56 = vrot.slane %v1027_v44, 4  ;;  %v834_v57 = vrot.slane %v832_v45, 4  ;;  %700 = vst [vmem:[#allocation2 + $0xc] sm:$0xf] %v646_v12  ;;  %1571 = vmatpush.bf16.msra.mxu1 %v6729_v15 }
  0x2a   : > { %6945 = vmatpush.bf16.msra.mxu2 %v6737_v21  ;;  %v840_v58 = vrot.slane %v838_v46, 5  ;;  %1338 = vmatpush.bf16.msra.mxu0 %v6737_v21  ;;  %v825_v59 = vor.u32 %v824_v51, %v821_v50  ;;  %v1038_v61 = vshll.u32 %v769_v41, 16  ;;  %v1044_v62 = vshll.u32 %v770_v48, 16  ;;  %701 = vst [vmem:[#allocation2 + $0x10] sm:$0xf] %v647_v13  ;;  %v6751_v7 = vld [vmem:[%s8784_s2 + $0xb0] sm:$0xff] }
  0x2b   : > { %v1037_v60 = vrot.slane %v1035_v54, 4  ;;  %v1023_v63 = vsel %vm7241_vm2, %v1018_v55, %v1022_v31  ;;  %v1033_v0 = vsel %vm7241_vm2, %v1028_v56, %v1032_v36  ;;  %v835_v2 = vor.u32 %v834_v57, %v830_v52  ;;  %v6775_v8 = vld [vmem:[%s8784_s2 + $0xf0] sm:$0xff]  ;;  %v771_v10 = vld [vmem:[#allocation2 + $0x78] sm:$0xf]  ;;  %702 = vst [vmem:[#allocation2 + $0x14] sm:$0x1] %v648_v14 }
  0x2c   : > { %v1048_v3 = vshrl.u32 %v770_v48, 16  ;;  %1612 = vmatmul.bf16.vlgmr.msra.gmra.mxu3 %v6721_v42  ;;  %v1235_v11 = vunpack.c.l.b16 %v1023_v63  ;;  %v1236_v12 = vunpack.c.l.b16 %v1033_v0  ;;  %v826_v13 = vrot.slane %v825_v59, 4  ;;  %1572 = vmatmul.bf16.vlgmr.msra.gmra.mxu1 %v6713_v47  ;;  %729 = vst [vmem:[#allocation2 + $0x80] sm:$0x1] %v675_v26  ;;  %v7278_v28 = vld [vmem:[%s7140_s19 + $0x84] sm:$0xff]  }
  0x2d   : > { %2260 = vmatpush.bf16.msrb.mxu3 %v6776_v35  ;;  %v1040_v15 = vrot.slane %v1038_v61, 5  ;;  %v836_v17 = vrot.slane %v835_v2, 4  ;;  %v1046_v18 = vrot.slane %v1044_v62, 5  ;;  %v1054_v20 = vshll.u32 %v808_v53, 16  ;;  %705 = vst [vmem:[#allocation2 + $0x20] sm:$0x1] %v651_v27 }
  0x2e   : > { %1945 = vmatpush.bf16.msrb.mxu2 %v6752_v33  ;;  %2942 = vmatpush.bf16.msrb.mxu0 %v6784_v40  ;;  %v1050_v19 = vrot.slane %v1048_v3, 4  ;;  %v1259_v21 = vpack.c.b16 %v1236_v12, %v1235_v11  ;;  %v831_v22 = vsel %vm7241_vm2, %v826_v13, %v830_v52  ;;  %v1059_v1 = vshrl.u32 %v771_v10, 16  ;;  %v772_v39 = vld [vmem:[#allocation2 + $0x7c] sm:$0xf]  ;;  %v6774_v51 = vld [vmem:[%s8784_s2 + $0xe8] sm:$0xff] }
  0x2f   : > { %v1041_v23 = vor.u32 %v1040_v15, %v1037_v60  ;;  %v841_v14 = vsel %vm7241_vm2, %v836_v17, %v840_v58  ;;  %v1219_v24 = vunpack.c.l.b16 %v831_v22  ;;  %v1056_v30 = vrot.slane %v1054_v20, 5  ;;  %v755_v56 = vld [vmem:[#allocation2 + $0x18] sm:$0xf]  ;;  %v756_v61 = vld [vmem:[#allocation2 + $0x1c] sm:$0xf]  ;;  %v6782_v3 = vld [vmem:[%s8784_s2 + $0x128] sm:$0xff] }
  0x30   : > { %v1051_v29 = vor.u32 %v1050_v19, %v1046_v18  ;;  %1379 = vmatmul.bf16.vlgmr.msra.gmra.mxu2 %v1259_v21  ;;  %v1220_v4 = vunpack.c.l.b16 %v841_v14  ;;  %v753_v31 = vld [vmem:[#allocation2 + $0xc] sm:$0xf]  ;;  %v1061_v5 = vrot.slane %v1059_v1, 4  ;;  %v1062_v36 = vshll.u32 %v771_v10, 16 }
  0x31   : > { %2261 = vmatpush.bf16.msrb.mxu3 %v6775_v8  ;;  %v1042_v26 = vrot.slane %v1041_v23, 4  ;;  %v754_v33 = vld [vmem:[#allocation2 + $0x10] sm:$0xf]  ;;  %v843_v34 = vshrl.u32 %v753_v31, 16  ;;  %v846_v35 = vshll.u32 %v753_v31, 16  ;;  %v567_v44 = vunpack.c.l.bf16 %v7278_v28 }
  0x32   : > { %1946 = vmatpush.bf16.msrb.mxu2 %v6751_v7  ;;  %2943 = vmatpush.bf16.msrb.mxu0 %v6783_v16  ;;  %v1052_v32 = vrot.slane %v1051_v29, 4  ;;  %v1251_v37 = vpack.c.b16 %v1220_v4, %v1219_v24  ;;  %v852_v27 = vshll.u32 %v754_v33, 16  ;;  %v856_v38 = vshrl.u32 %v754_v33, 16  ;;  %v800_v41 = vld [vmem:[#allocation2 + $0x14] sm:$0x1]  ;;  %v6722_v7 = vld [vmem:[#allocation2 + $0x6c] sm:$0xff] }
  0x33   : > { %v1047_v9 = vsel %vm7241_vm2, %v1042_v26, %v1046_v18  ;;  %v845_v42 = vrot.slane %v843_v34, 4  ;;  %v848_v43 = vrot.slane %v846_v35, 5  ;;  %v862_v48 = vshll.u32 %v800_v41, 16  ;;  %v809_v50 = vld [vmem:[#allocation2 + $0x80] sm:$0x1]  ;;  %v6714_v15 = vld [vmem:[#allocation2 + $0xc] sm:$0xff] }
  0x34   : > { %v1057_v40 = vsel %vm7241_vm2, %v1052_v32, %v1056_v30  ;;  %1339 = vmatmul.bf16.vlgmr.msra.gmra.mxu0 %v1251_v37  ;;  %v7285_v45 = vunpack.c.l.b16 %v1047_v9  ;;  %v854_v46 = vrot.slane %v852_v27, 5  ;;  %v858_v47 = vrot.slane %v856_v38, 4  ;;  %v801_v18 = vld [vmem:[#allocation2 + $0x20] sm:$0x1]  ;;  %v486_v27 = vld [vmem:[%s7140_s19 + $0x2c] sm:$0x1] }
  0x35   : > { %v849_v52 = vor.u32 %v848_v43, %v845_v42  ;;  %v1064_v53 = vrot.slane %v1062_v36, 5  ;;  %v1068_v54 = vshll.u32 %v772_v39, 16  ;;  %v1072_v55 = vshrl.u32 %v772_v39, 16  ;;  %2262 = vmatpush.bf16.msrb.mxu3 %v6774_v51  ;;  %v6927_v42 = vld [vmem:[%s7140_s19 + $0x90] sm:$0xff]  }
  0x36   : > { %1947 = vmatpush.bf16.msrb.mxu2 %v6750_v6  ;;  %v1238_v57 = vunpack.c.l.b16 %v1057_v40  ;;  %v859_v58 = vor.u32 %v858_v47, %v854_v46  ;;  %v864_v59 = vrot.slane %v862_v48, 5  ;;  %v1078_v60 = vshll.u32 %v809_v50, 16  ;;  %2944 = vmatpush.bf16.msrb.mxu0 %v6782_v3  ;;  %v484_v6 = vld [vmem:[%s7140_s19 + $0x24] sm:$0xff]   ;;  %v513_v47 = vld [vmem:[%s7140_s19 + $0x98] sm:$0x1] }
  0x37   : > { %v850_v62 = vrot.slane %v849_v52, 4  ;;  %v1065_v63 = vor.u32 %v1064_v53, %v1061_v5  ;;  %v1070_v0 = vrot.slane %v1068_v54, 5  ;;  %v1074_v2 = vrot.slane %v1072_v55, 4  ;;  %v510_v5 = vld [vmem:[%s7140_s19 + $0x8c] sm:$0x1]  ;;  %v6773_v3 = vld [vmem:[%s8784_s2 + $0xe0] sm:$0xff] }
  0x38   : > { %v860_v8 = vrot.slane %v859_v58, 4  ;;  %v1080_v10 = vrot.slane %v1078_v60, 5  ;;  %v867_v11 = vshrl.u32 %v755_v56, 16  ;;  %v870_v12 = vshll.u32 %v755_v56, 16 }
  0x39   : > { %v855_v13 = vsel %vm7241_vm2, %v850_v62, %v854_v46  ;;  %v1066_v16 = vrot.slane %v1065_v63, 4  ;;  %v1075_v17 = vor.u32 %v1074_v2, %v1070_v0  ;;  %v876_v19 = vshll.u32 %v756_v61, 16  ;;  %v489_v62 = vld [vmem:[%s7140_s19 + $0x38] sm:$0x1]  ;;  %2263 = vmatpush.bf16.msrb.mxu3 %v6773_v3 }
  0x3a   : > { %v865_v20 = vsel %vm7241_vm2, %v860_v8, %v864_v59  ;;  %v1221_v21 = vunpack.c.l.b16 %v855_v13  ;;  %v869_v22 = vrot.slane %v867_v11, 4  ;;  %v872_v23 = vrot.slane %v870_v12, 5 }
  0x3b   : > { %v1260_v1 = vpack.c.b16 %v1238_v57, %v7285_v45  ;;  %v1222_v14 = vunpack.c.l.b16 %v865_v20  ;;  %v1071_v24 = vsel %vm7241_vm2, %v1066_v16, %v1070_v0  ;;  %v1076_v29 = vrot.slane %v1075_v17, 4 }
  0x3c   : > { %1617 = vmatmul.bf16.gmra.mxu3 %v6722_v7  ;;  %v873_v30 = vor.u32 %v872_v23, %v869_v22  ;;  %v878_v4 = vrot.slane %v876_v19, 5  ;;  %v880_v26 = vshrl.u32 %v756_v61, 16  ;;  %v886_v31 = vshll.u32 %v801_v18, 16  ;;  %1577 = vmatmul.bf16.gmra.mxu1 %v6714_v15  ;;  %v6923_v61 = vld [vmem:[%s7140_s19 + $0x30] sm:$0xff]   ;;  %v6781_v7 = vld [vmem:[%s8784_s2 + $0x120] sm:$0xff]  ;;  %v6723_v22 = vld [vmem:[#allocation2 + $0x78] sm:$0xff] }
  0x3d   : > { %v1081_v32 = vsel %vm7241_vm2, %v1076_v29, %v1080_v10  ;;  %v568_v33 = vunpack.c.h.bf16 %v7278_v28  ;;  %v622_v34 = vmul.f32 %v7155_v25, %v567_v44  ;;  %v1252_v35 = vpack.c.b16 %v1222_v14, %v1221_v21  ;;  %v6749_v44 = vld [vmem:[%s8784_s2 + $0xa0] sm:$0xff]  ;;  %2945 = vmatpush.bf16.msrb.mxu0 %v6781_v7 }
  0x3e   : > { %v7306_v36 = vunpack.c.l.b16 %v1071_v24  ;;  %v874_v37 = vrot.slane %v873_v30, 4  ;;  %v882_v9 = vrot.slane %v880_v26, 4  ;;  %v569_v40 = vunpack.c.l.bf16 %v510_v5  ;;  %1948 = vmatpush.bf16.msrb.mxu2 %v6749_v44  ;;  %v514_v19 = vld [vmem:[%s7140_s19 + $0x9c] sm:$0xff]  }
  0x3f   : > { %v623_v38 = vmul.f32 %v7155_v25, %v568_v33  ;;  %v676_v39 = vpack.c.bf16 %v622_v34, %v622_v34  ;;  %v543_v41 = vunpack.c.l.bf16 %v484_v6  ;;  %v7311_v43 = vunpack.c.l.b16 %v1081_v32  ;;  %v6715_v30 = vld [vmem:[#allocation2 + $0x18] sm:$0xff] }
  0x40   : > { %1384 = vmatmul.bf16.gmra.mxu2 %v1260_v1  ;;  %v883_v45 = vor.u32 %v882_v9, %v878_v4  ;;  %v888_v28 = vrot.slane %v886_v31, 5  ;;  %v544_v46 = vunpack.c.h.bf16 %v484_v6  ;;  %v879_v48 = vsel %vm7241_vm2, %v874_v37, %v878_v4  ;;  %v7344_v31 = vld [vmem:[%s7140_s19 + $0x3c] sm:$0xff]  }
  0x41   : > { %v677_v50 = vpack.c.bf16 %v623_v38, %v623_v38  ;;  %730 = vst [vmem:[#allocation2 + $0x84] sm:$0xf] %v676_v39  ;;  %v624_v51 = vmul.f32 %v7155_v25, %v569_v40  ;;  %v545_v52 = vunpack.c.l.bf16 %v486_v27  ;;  %v598_v54 = vmul.f32 %v7155_v25, %v543_v41  ;;  %v516_v38 = vld [vmem:[%s7140_s19 + $0xa4] sm:$0x1] }
  0x42   : > { %v884_v53 = vrot.slane %v883_v45, 4  ;;  %v599_v55 = vmul.f32 %v7155_v25, %v544_v46  ;;  %v6867_v56 = vunpack.c.l.bf16 %v6927_v42  ;;  %v6868_v59 = vunpack.c.h.bf16 %v6927_v42 }
  0x43   : > { %731 = vst [vmem:[#allocation2 + $0x88] sm:$0xf] %v677_v50  ;;  %v678_v57 = vpack.c.bf16 %v624_v51, %v624_v51  ;;  %v600_v58 = vmul.f32 %v7155_v25, %v545_v52  ;;  %v572_v60 = vunpack.c.l.bf16 %v513_v47  ;;  %v652_v0 = vpack.c.bf16 %v598_v54, %v598_v54 }
  0x44   : > { %1344 = vmatmul.bf16.gmra.mxu0 %v1252_v35  ;;  %v889_v63 = vsel %vm7241_vm2, %v884_v53, %v888_v28  ;;  %v653_v2 = vpack.c.bf16 %v599_v55, %v599_v55  ;;  %v625_v8 = vmul.f32 %v6867_v56, %v7155_v25  ;;  %v7334_v10 = vunpack.c.l.b16 %v879_v48 }
  0x45   : > { %732 = vst [vmem:[#allocation2 + $0x8c] sm:$0x1] %v678_v57  ;;  %v654_v11 = vpack.c.bf16 %v600_v58, %v600_v58  ;;  %v626_v12 = vmul.f32 %v6868_v59, %v7155_v25  ;;  %v627_v13 = vmul.f32 %v7155_v25, %v572_v60  ;;  %v7338_v15 = vunpack.c.l.b16 %v889_v63 }
  0x46   : > { %706 = vst [vmem:[#allocation2 + $0x24] sm:$0xf] %v652_v0  ;;  %v6851_v16 = vunpack.c.l.bf16 %v6923_v61  ;;  %v6852_v17 = vunpack.c.h.bf16 %v6923_v61  ;;  %v548_v18 = vunpack.c.l.bf16 %v489_v62  ;;  %v573_v24 = vunpack.c.l.bf16 %v514_v19  ;;  %v6748_v62 = vld [vmem:[%s8784_s2 + $0x98] sm:$0xff] }
  0x47   : > { %707 = vst [vmem:[#allocation2 + $0x28] sm:$0xf] %v653_v2  ;;  %v6910_v20 = vpack.c.bf16 %v626_v12, %v625_v8  ;;  %v681_v21 = vpack.c.bf16 %v627_v13, %v627_v13  ;;  %v574_v29 = vunpack.c.h.bf16 %v514_v19  ;;  %v1261_v5 = vpack.c.b16 %v7311_v43, %v7306_v36  ;;  %1949 = vmatpush.bf16.msrb.mxu2 %v6748_v62 }
  0x48   : > { %v773_v23 = vld [vmem:[#allocation2 + $0x84] sm:$0xf]  ;;  %708 = vst [vmem:[#allocation2 + $0x2c] sm:$0x1] %v654_v11  ;;  %v601_v1 = vmul.f32 %v6851_v16, %v7155_v25  ;;  %v602_v14 = vmul.f32 %v6852_v17, %v7155_v25  ;;  %v1253_v6 = vpack.c.b16 %v7338_v15, %v7334_v10  ;;  %v603_v33 = vmul.f32 %v7155_v25, %v548_v18 }
  0x49   : > { %v1083_v4 = vshrl.u32 %v773_v23, 16  ;;  %v1086_v26 = vshll.u32 %v773_v23, 16  ;;  %6935 = vst [vmem:[#allocation2 + $0x90] sm:$0xff] %v6910_v20   ;;  %v628_v40 = vmul.f32 %v7155_v25, %v573_v24  ;;  %v629_v36 = vmul.f32 %v7155_v25, %v574_v29  ;;  %v6772_v24 = vld [vmem:[%s8784_s2 + $0xd8] sm:$0xff] }
  0x4a   : > { %v774_v32 = vld [vmem:[#allocation2 + $0x88] sm:$0xf]  ;;  %735 = vst [vmem:[#allocation2 + $0x98] sm:$0x1] %v681_v21  ;;  %v6890_v34 = vpack.c.bf16 %v602_v14, %v601_v1  ;;  %v575_v41 = vunpack.c.l.bf16 %v516_v38  ;;  %v549_v42 = vunpack.c.l.bf16 %v7344_v31  ;;  %v657_v51 = vpack.c.bf16 %v603_v33, %v603_v33  ;;  %v6780_v29 = vld [vmem:[%s8784_s2 + $0x118] sm:$0xff]  ;;  %2264 = vmatpush.bf16.msrb.mxu3 %v6772_v24 }
  0x4b   : > { %v1085_v35 = vrot.slane %v1083_v4, 4  ;;  %v1088_v37 = vrot.slane %v1086_v26, 5  ;;  %v1092_v9 = vshll.u32 %v774_v32, 16  ;;  %v1096_v27 = vshrl.u32 %v774_v32, 16  ;;  %2946 = vmatpush.bf16.msrb.mxu0 %v6780_v29  ;;  %v6724_v38 = vld [vmem:[#allocation2 + $0x84] sm:$0xff] }
  0x4c   : > { %1622 = vmatmul.bf16.gmra.mxu3 %v6723_v22  ;;  %v810_v39 = vld [vmem:[#allocation2 + $0x8c] sm:$0x1]  ;;  %6931 = vst [vmem:[#allocation2 + $0x30] sm:$0xff] %v6890_v34   ;;  %1582 = vmatmul.bf16.gmra.mxu1 %v6715_v30  ;;  %v630_v52 = vmul.f32 %v7155_v25, %v575_v41  ;;  %v682_v7 = vpack.c.bf16 %v628_v40, %v628_v40  ;;  %v550_v34 = vunpack.c.h.bf16 %v7344_v31  ;;  %v495_v24 = vld [vmem:[%s7140_s19 + $0x50] sm:$0x1] }
  0x4d   : > { %v1089_v43 = vor.u32 %v1088_v37, %v1085_v35  ;;  %v1094_v45 = vrot.slane %v1092_v9, 5  ;;  %v1098_v28 = vrot.slane %v1096_v27, 4  ;;  %v1102_v44 = vshll.u32 %v810_v39, 16  ;;  %v757_v46 = vld [vmem:[#allocation2 + $0x24] sm:$0xf] }
  0x4e   : > { %v758_v47 = vld [vmem:[#allocation2 + $0x28] sm:$0xf]  ;;  %v891_v48 = vshrl.u32 %v757_v46, 16  ;;  %v894_v50 = vshll.u32 %v757_v46, 16  ;;  %v683_v8 = vpack.c.bf16 %v629_v36, %v629_v36  ;;  %711 = vst [vmem:[#allocation2 + $0x38] sm:$0x1] %v657_v51  ;;  %v684_v15 = vpack.c.bf16 %v630_v52, %v630_v52 }
  0x4f   : > { %v1090_v53 = vrot.slane %v1089_v43, 4  ;;  %v1099_v54 = vor.u32 %v1098_v28, %v1094_v45  ;;  %v1104_v55 = vrot.slane %v1102_v44, 5  ;;  %v802_v56 = vld [vmem:[#allocation2 + $0x2c] sm:$0x1]  ;;  %v900_v57 = vshll.u32 %v758_v47, 16  ;;  %v6716_v28 = vld [vmem:[#allocation2 + $0x24] sm:$0xff] }
  0x50   : > { %1389 = vmatmul.bf16.gmra.mxu2 %v1261_v5  ;;  %v893_v58 = vrot.slane %v891_v48, 4  ;;  %v896_v59 = vrot.slane %v894_v50, 5  ;;  %v904_v60 = vshrl.u32 %v758_v47, 16  ;;  %v910_v61 = vshll.u32 %v802_v56, 16  ;;  %v775_v2 = vld [vmem:[#allocation2 + $0x90] sm:$0xf] }
  0x51   : > { %v1100_v63 = vrot.slane %v1099_v54, 4  ;;  %v902_v0 = vrot.slane %v900_v57, 5  ;;  %v776_v3 = vld [vmem:[#allocation2 + $0x94] sm:$0xf]  ;;  %v1095_v10 = vsel %vm7241_vm2, %v1090_v53, %v1094_v45  ;;  %v811_v13 = vld [vmem:[#allocation2 + $0x98] sm:$0x1] }
  0x52   : > { %v897_v11 = vor.u32 %v896_v59, %v893_v58  ;;  %v906_v12 = vrot.slane %v904_v60, 4  ;;  %v912_v16 = vrot.slane %v910_v61, 5  ;;  %v1107_v17 = vshrl.u32 %v775_v2, 16  ;;  %736 = vst [vmem:[#allocation2 + $0x9c] sm:$0xf] %v682_v7 }
  0x53   : > { %v1110_v18 = vshll.u32 %v775_v2, 16  ;;  %v1116_v19 = vshll.u32 %v776_v3, 16  ;;  %v759_v20 = vld [vmem:[#allocation2 + $0x30] sm:$0xf]  ;;  %v1105_v21 = vsel %vm7241_vm2, %v1100_v63, %v1104_v55  ;;  %v1120_v1 = vshrl.u32 %v776_v3, 16 }
  0x54   : > { %1349 = vmatmul.bf16.gmra.mxu0 %v1253_v6  ;;  %v898_v22 = vrot.slane %v897_v11, 4  ;;  %v907_v23 = vor.u32 %v906_v12, %v902_v0  ;;  %v760_v14 = vld [vmem:[#allocation2 + $0x34] sm:$0xf]  ;;  %v1109_v30 = vrot.slane %v1107_v17, 4  ;;  %v1126_v5 = vshll.u32 %v811_v13, 16 }
  0x55   : > { %v1112_v4 = vrot.slane %v1110_v18, 5  ;;  %v1118_v26 = vrot.slane %v1116_v19, 5  ;;  %v1241_v6 = vunpack.c.l.b16 %v1095_v10  ;;  %v1122_v33 = vrot.slane %v1120_v1, 4  ;;  %737 = vst [vmem:[#allocation2 + $0xa0] sm:$0xf] %v683_v8 }
  0x56   : > { %v908_v32 = vrot.slane %v907_v23, 4  ;;  %v1242_v35 = vunpack.c.l.b16 %v1105_v21  ;;  %v903_v37 = vsel %vm7241_vm2, %v898_v22, %v902_v0  ;;  %v915_v27 = vshrl.u32 %v759_v20, 16  ;;  %738 = vst [vmem:[#allocation2 + $0xa4] sm:$0x1] %v684_v15  ;;  %v492_v43 = vld [vmem:[%s7140_s19 + $0x44] sm:$0x1] }
  0x57   : > { %v1113_v9 = vor.u32 %v1112_v4, %v1109_v30  ;;  %v1123_v39 = vor.u32 %v1122_v33, %v1118_v26  ;;  %v1128_v40 = vrot.slane %v1126_v5, 5  ;;  %v918_v36 = vshll.u32 %v759_v20, 16  ;;  %v803_v50 = vld [vmem:[#allocation2 + $0x38] sm:$0x1]  ;;  %v519_v20 = vld [vmem:[%s7140_s19 + $0xb0] sm:$0x1] }
  0x58   : > { %v924_v41 = vshll.u32 %v760_v14, 16  ;;  %v913_v45 = vsel %vm7241_vm2, %v908_v32, %v912_v16  ;;  %v917_v46 = vrot.slane %v915_v27, 4  ;;  %v928_v47 = vshrl.u32 %v760_v14, 16  ;;  %v6928_v16 = vld [vmem:[%s7140_s19 + $0xa8] sm:$0xff]   ;;  %v6771_v33 = vld [vmem:[%s8784_s2 + $0xd0] sm:$0xff] }
  0x59   : > { %v1114_v44 = vrot.slane %v1113_v9, 4  ;;  %v1124_v48 = vrot.slane %v1123_v39, 4  ;;  %v920_v51 = vrot.slane %v918_v36, 5  ;;  %v1262_v53 = vpack.c.b16 %v1242_v35, %v1241_v6  ;;  %v777_v61 = vld [vmem:[#allocation2 + $0x9c] sm:$0xf]  ;;  %v6924_v21 = vld [vmem:[%s7140_s19 + $0x48] sm:$0xff]   ;;  %2265 = vmatpush.bf16.msrb.mxu3 %v6771_v33 }
  0x5a   : > { %v7375_v52 = vrot.slane %v924_v41, 5  ;;  %v930_v55 = vrot.slane %v928_v47, 4  ;;  %v551_v56 = vunpack.c.l.bf16 %v492_v43  ;;  %v1225_v57 = vunpack.c.l.b16 %v903_v37 }
  0x5b   : > { %v1119_v54 = vsel %vm7241_vm2, %v1114_v44, %v1118_v26  ;;  %v1226_v58 = vunpack.c.l.b16 %v913_v45  ;;  %v1129_v59 = vsel %vm7241_vm2, %v1124_v48, %v1128_v40  ;;  %v921_v60 = vor.u32 %v920_v51, %v917_v46  ;;  %v520_v45 = vld [vmem:[%s7140_s19 + $0xb4] sm:$0xff]  }
  0x5c   : > { %1627 = vmatmul.bf16.gmra.mxu3 %v6724_v38  ;;  %1587 = vmatmul.bf16.gmra.mxu1 %v6716_v28  ;;  %v934_v62 = vshll.u32 %v803_v50, 16  ;;  %v778_v63 = vld [vmem:[#allocation2 + $0xa0] sm:$0xf]  ;;  %v604_v0 = vmul.f32 %v7155_v25, %v549_v42  ;;  %v605_v2 = vmul.f32 %v7155_v25, %v550_v34  ;;  %v7385_v3 = vunpack.c.l.b16 %v1119_v54  ;;  %v6747_v42 = vld [vmem:[%s8784_s2 + $0x90] sm:$0xff] }
  0x5d   : > { %v7387_v7 = vunpack.c.l.b16 %v1129_v59  ;;  %v931_v8 = vor.u32 %v930_v55, %v7375_v52  ;;  %v1131_v10 = vshrl.u32 %v777_v61, 16  ;;  %v1134_v11 = vshll.u32 %v777_v61, 16  ;;  %1950 = vmatpush.bf16.msrb.mxu2 %v6747_v42  ;;  %v7402_v29 = vld [vmem:[#allocation2 + $0xa4] sm:$0x1]  ;;  %v6779_v34 = vld [vmem:[%s8784_s2 + $0x110] sm:$0xff] }
  0x5e   : > { %v606_v12 = vmul.f32 %v7155_v25, %v551_v56  ;;  %v1254_v13 = vpack.c.b16 %v1226_v58, %v1225_v57  ;;  %v922_v31 = vrot.slane %v921_v60, 4  ;;  %v1140_v15 = vshll.u32 %v778_v63, 16  ;;  %2947 = vmatpush.bf16.msrb.mxu0 %v6779_v34  ;;  %v6725_v48 = vld [vmem:[#allocation2 + $0x90] sm:$0xff] }
  0x5f   : > { %v936_v17 = vrot.slane %v934_v62, 5  ;;  %v1144_v18 = vshrl.u32 %v778_v63, 16  ;;  %v658_v19 = vpack.c.bf16 %v604_v0, %v604_v0  ;;  %v1263_v22 = vpack.c.b16 %v7387_v7, %v7385_v3  ;;  %v496_v54 = vld [vmem:[%s7140_s19 + $0x54] sm:$0xff]   ;;  %v522_v0 = vld [vmem:[%s7140_s19 + $0xbc] sm:$0x1]  ;;  %v6746_v7 = vld [vmem:[%s8784_s2 + $0x88] sm:$0xff] }
  0x60   : > { %1394 = vmatmul.bf16.gmra.mxu2 %v1262_v53  ;;  %v932_v23 = vrot.slane %v931_v8, 4  ;;  %v7399_v1 = vrot.slane %v1131_v10, 4  ;;  %v659_v14 = vpack.c.bf16 %v605_v2, %v605_v2  ;;  %v7404_v30 = vrot.slane %v1134_v11, 5  ;;  %v6717_v56 = vld [vmem:[#allocation2 + $0x30] sm:$0xff] }
  0x61   : > { %v660_v4 = vpack.c.bf16 %v606_v12, %v606_v12  ;;  %712 = vst [vmem:[#allocation2 + $0x3c] sm:$0xf] %v658_v19  ;;  %v6871_v26 = vunpack.c.l.bf16 %v6928_v16  ;;  %v6872_v5 = vunpack.c.h.bf16 %v6928_v16  ;;  %v927_v6 = vsel %vm7241_vm2, %v922_v31, %v7375_v52  ;;  %1951 = vmatpush.bf16.msrb.mxu2 %v6746_v7  ;;  %v6769_v7 = vld [vmem:[%s8784_s2 + $0xc0] sm:$0xff] }
  0x62   : > { %v7409_v32 = vrot.slane %v1140_v15, 5  ;;  %713 = vst [vmem:[#allocation2 + $0x40] sm:$0xf] %v659_v14  ;;  %v578_v35 = vunpack.c.l.bf16 %v519_v20  ;;  %v6855_v37 = vunpack.c.l.bf16 %v6924_v21  ;;  %v7417_v9 = vrot.slane %v1144_v18, 4 }
  0x63   : > { %714 = vst [vmem:[#allocation2 + $0x44] sm:$0x1] %v660_v4  ;;  %v631_v27 = vmul.f32 %v6871_v26, %v7155_v25  ;;  %v632_v38 = vmul.f32 %v6872_v5, %v7155_v25  ;;  %v6856_v39 = vunpack.c.h.bf16 %v6924_v21  ;;  %v937_v40 = vsel %vm7241_vm2, %v932_v23, %v936_v17  ;;  %v498_v21 = vld [vmem:[%s7140_s19 + $0x5c] sm:$0x1] }
  0x64   : > { %1354 = vmatmul.bf16.gmra.mxu0 %v1254_v13  ;;  %v1150_v36 = vshll.u32 %v7402_v29, 16  ;;  %v633_v41 = vmul.f32 %v7155_v25, %v578_v35  ;;  %v554_v43 = vunpack.c.l.bf16 %v495_v24  ;;  %v7426_v28 = vunpack.c.l.b16 %v927_v6 }
  0x65   : > { %v6915_v44 = vpack.c.bf16 %v632_v38, %v631_v27  ;;  %v607_v46 = vmul.f32 %v6855_v37, %v7155_v25  ;;  %v608_v47 = vmul.f32 %v6856_v39, %v7155_v25  ;;  %v579_v52 = vunpack.c.l.bf16 %v520_v45 }
  0x66   : > { %v687_v50 = vpack.c.bf16 %v633_v41, %v633_v41  ;;  %v609_v51 = vmul.f32 %v7155_v25, %v554_v43  ;;  %v580_v53 = vunpack.c.h.bf16 %v520_v45  ;;  %v1228_v55 = vunpack.c.l.b16 %v937_v40 }
  0x67   : > { %v1137_v57 = vor.u32 %v7404_v30, %v7399_v1  ;;  %v1147_v58 = vor.u32 %v7417_v9, %v7409_v32  ;;  %6936 = vst [vmem:[#allocation2 + $0xa8] sm:$0xff] %v6915_v44   ;;  %v6895_v59 = vpack.c.bf16 %v608_v47, %v607_v46  ;;  %v634_v62 = vmul.f32 %v7155_v25, %v579_v52  ;;  %v6778_v44 = vld [vmem:[%s8784_s2 + $0x108] sm:$0xff] }
  0x68   : > { %v761_v60 = vld [vmem:[#allocation2 + $0x3c] sm:$0xf]  ;;  %741 = vst [vmem:[#allocation2 + $0xb0] sm:$0x1] %v687_v50  ;;  %v663_v61 = vpack.c.bf16 %v609_v51, %v609_v51  ;;  %v635_v63 = vmul.f32 %v7155_v25, %v580_v53  ;;  %v555_v2 = vunpack.c.l.bf16 %v496_v54  ;;  %v581_v12 = vunpack.c.l.bf16 %v522_v0  ;;  %2948 = vmatpush.bf16.msrb.mxu0 %v6778_v44 }
  0x69   : > { %v7439_v8 = vld [vmem:[#allocation2 + $0x40] sm:$0xf]  ;;  %v939_v10 = vshrl.u32 %v761_v60, 16  ;;  %v942_v11 = vshll.u32 %v761_v60, 16  ;;  %6932 = vst [vmem:[#allocation2 + $0x48] sm:$0xff] %v6895_v59   ;;  %v556_v13 = vunpack.c.h.bf16 %v496_v54  ;;  %v688_v42 = vpack.c.bf16 %v634_v62, %v634_v62 }
  0x6a   : > { %v948_v31 = vshll.u32 %v7439_v8, 16  ;;  %v952_v15 = vshrl.u32 %v7439_v8, 16  ;;  %717 = vst [vmem:[#allocation2 + $0x50] sm:$0x1] %v663_v61  ;;  %v689_v16 = vpack.c.bf16 %v635_v63, %v635_v63  ;;  %v7443_v17 = vld [vmem:[#allocation2 + $0x44] sm:$0x1]  ;;  %v636_v20 = vmul.f32 %v7155_v25, %v581_v12 }
  0x6b   : > { %v941_v18 = vrot.slane %v939_v10, 4  ;;  %v944_v19 = vrot.slane %v942_v11, 5  ;;  %742 = vst [vmem:[#allocation2 + $0xb4] sm:$0xf] %v688_v42  ;;  %v557_v14 = vunpack.c.l.bf16 %v498_v21  ;;  %v1138_v24 = vrot.slane %v1137_v57, 4  ;;  %v6726_v60 = vld [vmem:[#allocation2 + $0x9c] sm:$0xff] }
  0x6c   : > { %1632 = vmatmul.bf16.gmra.mxu3 %v6725_v48  ;;  %1592 = vmatmul.bf16.gmra.mxu1 %v6717_v56  ;;  %v7447_v23 = vrot.slane %v948_v31, 5  ;;  %v954_v1 = vrot.slane %v952_v15, 4  ;;  %v1152_v29 = vrot.slane %v1150_v36, 5  ;;  %743 = vst [vmem:[#allocation2 + $0xb8] sm:$0xf] %v689_v16  ;;  %v610_v30 = vmul.f32 %v7155_v25, %v555_v2  ;;  %v6718_v2 = vld [vmem:[#allocation2 + $0x3c] sm:$0xff] }
  0x6d   : > { %v1255_v4 = vpack.c.b16 %v1228_v55, %v7426_v28  ;;  %v1148_v26 = vrot.slane %v1147_v58, 4  ;;  %v958_v5 = vshll.u32 %v7443_v17, 16  ;;  %v611_v34 = vmul.f32 %v7155_v25, %v556_v13  ;;  %v6770_v28 = vld [vmem:[%s8784_s2 + $0xc8] sm:$0xff]  ;;  %v6792_v21 = vld [vmem:[%s8784_s2 + $0x178] sm:$0xff] }
  0x6e   : > { %v779_v6 = vld [vmem:[#allocation2 + $0xa8] sm:$0xf]  ;;  %v780_v33 = vld [vmem:[#allocation2 + $0xac] sm:$0xf]  ;;  %v945_v35 = vor.u32 %v944_v19, %v941_v18  ;;  %v955_v37 = vor.u32 %v954_v1, %v7447_v23  ;;  %v690_v9 = vpack.c.bf16 %v636_v20, %v636_v20  ;;  %v612_v27 = vmul.f32 %v7155_v25, %v557_v14  ;;  %2266 = vmatpush.bf16.msrb.mxu3 %v6770_v28 }
  0x6f   : > { %v1155_v38 = vshrl.u32 %v779_v6, 16  ;;  %v1158_v39 = vshll.u32 %v779_v6, 16  ;;  %v1164_v40 = vshll.u32 %v780_v33, 16  ;;  %v1168_v3 = vshrl.u32 %v780_v33, 16  ;;  %v813_v51 = vld [vmem:[#allocation2 + $0xb0] sm:$0x1]  ;;  %3368 = vmatpush.bf16.msrb.mxu1 %v6792_v21 }
  0x70   : > { %1399 = vmatmul.bf16.gmra.mxu2 %v1263_v22  ;;  %v763_v22 = vld [vmem:[#allocation2 + $0x48] sm:$0xf]  ;;  %v664_v36 = vpack.c.bf16 %v610_v30, %v610_v30  ;;  %v1143_v41 = vsel %vm7241_vm2, %v1138_v24, %v7409_v32  ;;  %v1153_v43 = vsel %vm7241_vm2, %v1148_v26, %v1152_v29  ;;  %v7466_v45 = vld [vmem:[#allocation2 + $0x4c] sm:$0xf]  ;;  %v665_v46 = vpack.c.bf16 %v611_v34, %v611_v34  ;;  %v6745_v6 = vld [vmem:[%s8784_s2 + $0x80] sm:$0xff] }
  0x71   : > { %v946_v47 = vrot.slane %v945_v35, 4  ;;  %v956_v48 = vrot.slane %v955_v37, 4  ;;  %v960_v50 = vrot.slane %v958_v5, 5  ;;  %744 = vst [vmem:[#allocation2 + $0xbc] sm:$0x1] %v690_v9  ;;  %v666_v32 = vpack.c.bf16 %v612_v27, %v612_v27  ;;  %v6791_v33 = vld [vmem:[%s8784_s2 + $0x170] sm:$0xff]  ;;  %1952 = vmatpush.bf16.msrb.mxu2 %v6745_v6 }
  0x72   : > { %v1157_v52 = vrot.slane %v1155_v38, 4  ;;  %v1160_v53 = vrot.slane %v1158_v39, 5  ;;  %v1166_v54 = vrot.slane %v1164_v40, 5  ;;  %v1170_v55 = vrot.slane %v1168_v3, 4  ;;  %718 = vst [vmem:[#allocation2 + $0x54] sm:$0xf] %v664_v36  ;;  %2267 = vmatpush.bf16.msrb.mxu3 %v6769_v7 }
  0x73   : > { %v963_v56 = vshrl.u32 %v763_v22, 16  ;;  %v966_v57 = vshll.u32 %v763_v22, 16  ;;  %v972_v58 = vshll.u32 %v7466_v45, 16  ;;  %v976_v59 = vshrl.u32 %v7466_v45, 16  ;;  %719 = vst [vmem:[#allocation2 + $0x58] sm:$0xf] %v665_v46  ;;  %3369 = vmatpush.bf16.msrb.mxu1 %v6791_v33 }
  0x74   : > { %1359 = vmatmul.bf16.gmra.mxu0 %v1255_v4  ;;  %v1245_v61 = vunpack.c.l.b16 %v1143_v41  ;;  %v1246_v62 = vunpack.c.l.b16 %v1153_v43  ;;  %v951_v63 = vsel %vm7241_vm2, %v946_v47, %v7447_v23  ;;  %v961_v0 = vsel %vm7241_vm2, %v956_v48, %v960_v50  ;;  %720 = vst [vmem:[#allocation2 + $0x5c] sm:$0x1] %v666_v32  ;;  %v7481_v13 = vld [vmem:[#allocation2 + $0x50] sm:$0x1]  ;;  %v781_v4 = vld [vmem:[#allocation2 + $0xb4] sm:$0xf] }
  0x75   : > { %v1161_v10 = vor.u32 %v1160_v53, %v1157_v52  ;;  %v1171_v11 = vor.u32 %v1170_v55, %v1166_v54  ;;  %v1174_v12 = vshll.u32 %v813_v51, 16  ;;  %v965_v31 = vrot.slane %v963_v56, 4  ;;  %v782_v5 = vld [vmem:[#allocation2 + $0xb8] sm:$0xf]  ;;  %v6790_v22 = vld [vmem:[%s8784_s2 + $0x168] sm:$0xff]  ;;  %v6777_v43 = vld [vmem:[%s8784_s2 + $0x100] sm:$0xff] }
  0x76   : > { %v968_v15 = vrot.slane %v966_v57, 5  ;;  %v974_v42 = vrot.slane %v972_v58, 5  ;;  %v978_v16 = vrot.slane %v976_v59, 4  ;;  %v1264_v18 = vpack.c.b16 %v1246_v62, %v1245_v61  ;;  %v6789_v48 = vld [vmem:[%s8784_s2 + $0x160] sm:$0xff]  ;;  %v6727_v50 = vld [vmem:[#allocation2 + $0xa8] sm:$0xff]  ;;  %2949 = vmatpush.bf16.msrb.mxu0 %v6777_v43  ;;  %v6824_v33 = vld [vmem:[%s8784_s2 + $0x1f8] sm:$0xff] }
  0x77   : > { %v1229_v19 = vunpack.c.l.b16 %v951_v63  ;;  %v1230_v20 = vunpack.c.l.b16 %v961_v0  ;;  %v982_v23 = vshll.u32 %v7481_v13, 16  ;;  %v1162_v1 = vrot.slane %v1161_v10, 4  ;;  %3370 = vmatpush.bf16.msrb.mxu1 %v6790_v22  ;;  %v6719_v59 = vld [vmem:[#allocation2 + $0x48] sm:$0xff]  ;;  %4365 = vmatpush.bf16.msra.mxu3 %v6824_v33  ;;  %v6785_v43 = vld [vmem:[%s8784_s2 + $0x140] sm:$0xff] }
  0x78   : > { %v1172_v14 = vrot.slane %v1171_v11, 4  ;;  %v1176_v24 = vrot.slane %v1174_v12, 5  ;;  %v969_v29 = vor.u32 %v968_v15, %v965_v31  ;;  %v979_v30 = vor.u32 %v978_v16, %v974_v42  ;;  %v2381_v6 = vld [vmem:[#allocation2 + $0xc] sm:$0xf] }
  0x79   : > { %v1256_v26 = vpack.c.b16 %v1230_v20, %v1229_v19  ;;  %v984_v34 = vrot.slane %v982_v23, 5  ;;  %v1167_v35 = vsel %vm7241_vm2, %v1162_v1, %v1166_v54  ;;  %v1179_v9 = vshrl.u32 %v781_v4, 16  ;;  %v765_v36 = vld [vmem:[#allocation2 + $0x54] sm:$0xf]  ;;  %v814_v54 = vld [vmem:[#allocation2 + $0xbc] sm:$0x1] }
  0x7a   : > { %v1177_v37 = vsel %vm7241_vm2, %v1172_v14, %v1176_v24  ;;  %v1182_v27 = vshll.u32 %v781_v4, 16  ;;  %v970_v38 = vrot.slane %v969_v29, 4  ;;  %v980_v39 = vrot.slane %v979_v30, 4  ;;  %v7503_v41 = vld [vmem:[#allocation2 + $0x58] sm:$0xf]  ;;  %v6787_v14 = vld [vmem:[%s8784_s2 + $0x150] sm:$0xff] }
  0x7b   : > { %v1188_v40 = vshll.u32 %v782_v5, 16  ;;  %v1192_v3 = vshrl.u32 %v782_v5, 16  ;;  %v1247_v28 = vunpack.c.l.b16 %v1167_v35  ;;  %v1248_v44 = vunpack.c.l.b16 %v1177_v37  ;;  %3371 = vmatpush.bf16.msrb.mxu1 %v6789_v48  ;;  %v7517_v10 = vld [vmem:[#allocation2 + $0x5c] sm:$0x1]  ;;  %v2382_v35 = vld [vmem:[#allocation2 + $0x10] sm:$0xf] }
  0x7c   : > { %1637 = vmatmul.bf16.gmra.mxu3 %v6726_v60  ;;  %1597 = vmatmul.bf16.gmra.mxu1 %v6718_v2  ;;  %v1181_v46 = vrot.slane %v1179_v9, 4  ;;  %v1184_v47 = vrot.slane %v1182_v27, 5  ;;  %v975_v32 = vsel %vm7241_vm2, %v970_v38, %v974_v42  ;;  %v985_v51 = vsel %vm7241_vm2, %v980_v39, %v984_v34  ;;  %v6788_v42 = vld [vmem:[%s8784_s2 + $0x158] sm:$0xff]  ;;  %v6786_v34 = vld [vmem:[%s8784_s2 + $0x148] sm:$0xff] }
  0x7d   : > { %v1190_v52 = vrot.slane %v1188_v40, 5  ;;  %v1194_v53 = vrot.slane %v1192_v3, 4  ;;  %v987_v55 = vshrl.u32 %v765_v36, 16  ;;  %v990_v56 = vshll.u32 %v765_v36, 16  ;;  %v6816_v24 = vld [vmem:[%s8784_s2 + $0x1b8] sm:$0xff] }
  0x7e   : > { %v996_v57 = vshll.u32 %v7503_v41, 16  ;;  %v1000_v58 = vshrl.u32 %v7503_v41, 16  ;;  %v1265_v60 = vpack.c.b16 %v1248_v44, %v1247_v28  ;;  %v1185_v61 = vor.u32 %v1184_v47, %v1181_v46  ;;  %3683 = vmatpush.bf16.msra.mxu2 %v6816_v24  ;;  %v6728_v39 = vld [vmem:[#allocation2 + $0xb4] sm:$0xff] }
  0x7f   : > { %v1231_v62 = vunpack.c.l.b16 %v975_v32  ;;  %v1232_v63 = vunpack.c.l.b16 %v985_v51  ;;  %v1195_v0 = vor.u32 %v1194_v53, %v1190_v52  ;;  %v1198_v2 = vshll.u32 %v814_v54, 16  ;;  %3372 = vmatpush.bf16.msrb.mxu1 %v6788_v42  ;;  %v6720_v36 = vld [vmem:[#allocation2 + $0x54] sm:$0xff]  ;;  %v3063_v51 = vld [vmem:[#allocation2 + $0xc] sm:$0xe] }
  0x80   : > { %1404 = vmatmul.bf16.gmra.mxu2 %v1264_v18  ;;  %v989_v11 = vrot.slane %v987_v55, 4  ;;  %v992_v12 = vrot.slane %v990_v56, 5  ;;  %v998_v31 = vrot.slane %v996_v57, 5  ;;  %v1002_v15 = vrot.slane %v1000_v58, 4  ;;  %v6832_v28 = vld [vmem:[%s8784_s2 + $0x238] sm:$0xff] }
  0x81   : > { %v1186_v16 = vrot.slane %v1185_v61, 4  ;;  %v1200_v18 = vrot.slane %v1198_v2, 5  ;;  %v1006_v19 = vshll.u32 %v7517_v10, 16  ;;  %v1257_v20 = vpack.c.b16 %v1232_v63, %v1231_v62  ;;  %4791 = vmatpush.bf16.msra.mxu0 %v6832_v28  ;;  %v2383_v57 = vld [vmem:[#allocation2 + $0x14] sm:$0x1] }
  0x82   : > { %v1196_v21 = vrot.slane %v1195_v0, 4  ;;  %v993_v23 = vor.u32 %v992_v12, %v989_v11  ;;  %v1003_v1 = vor.u32 %v1002_v15, %v998_v31  ;;  %v2430_v27 = vshrl.u32 %v2381_v6, 16  ;;  %v6987_v2 = vld [vmem:[#allocation2 + $0x8] sm:$0x1]  ;;  %v2384_v24 = vld [vmem:[#allocation2 + $0x18] sm:$0xf] }
  0x83   : > { %v1008_v29 = vrot.slane %v1006_v19, 5  ;;  %3373 = vmatpush.bf16.msrb.mxu1 %v6787_v14  ;;  %v1191_v30 = vsel %vm7241_vm2, %v1186_v16, %v1190_v52  ;;  %v2433_v38 = vshll.u32 %v2381_v6, 16  ;;  %v2439_v7 = vshll.u32 %v2382_v35, 16  ;;  %v1653_v52 = vld [vmem:[#allocation2] sm:$0xe] }
  0x84   : > { %1364 = vmatmul.bf16.gmra.mxu0 %v1256_v26  ;;  %v1201_v4 = vsel %vm7241_vm2, %v1196_v21, %v1200_v18  ;;  %v994_v26 = vrot.slane %v993_v23, 4  ;;  %v1004_v5 = vrot.slane %v1003_v1, 4  ;;  %v1249_v37 = vunpack.c.l.b16 %v1191_v30 }
  0x85   : > { %v1250_v9 = vunpack.c.l.b16 %v1201_v4  ;;  %v2443_v22 = vshrl.u32 %v2382_v35, 16  ;;  %v3129_v44 = vrot.slane %v2382_v35, 5  ;;  %v2432_v53 = vrot.slane %v2430_v27, 4 }
  0x86   : > { %v999_v40 = vsel %vm7241_vm2, %v994_v26, %v998_v31  ;;  %v1009_v3 = vsel %vm7241_vm2, %v1004_v5, %v1008_v29  ;;  %v2435_v54 = vrot.slane %v2433_v38, 5  ;;  %v2441_v55 = vrot.slane %v2439_v7, 5  ;;  %v2385_v29 = vld [vmem:[#allocation2 + $0x1c] sm:$0xf]  ;;  %v6753_v26 = vld [vmem:[#allocation2 + $0xc] sm:$0xff] }
  0x87   : > { %3374 = vmatpush.bf16.msrb.mxu1 %v6786_v34  ;;  %v1266_v46 = vpack.c.b16 %v1250_v9, %v1249_v37  ;;  %v1233_v47 = vunpack.c.l.b16 %v999_v40  ;;  %v1234_v48 = vunpack.c.l.b16 %v1009_v3  ;;  %v2445_v56 = vrot.slane %v2443_v22, 4  ;;  %v3064_v3 = vld [vmem:[#allocation2 + $0x18] sm:$0xe]  ;;  %v6988_v22 = vld [vmem:[#allocation2 + $0x10] sm:$0xf] }
  0x88   : > { %v6325_v58 = vrot.slane %v3063_v51, 9  ;;  %v6101_v62 = vrot.slane %v1653_v52, 9  ;;  %v1709_v11 = vrot.slane %v6987_v2, 5  ;;  %v2436_v12 = vor.u32 %v2435_v54, %v2432_v53 }
  0x89   : > { %v1258_v61 = vpack.c.b16 %v1234_v48, %v1233_v47  ;;  %v2446_v31 = vor.u32 %v2445_v56, %v2441_v55  ;;  %v2449_v15 = vshll.u32 %v2383_v57, 16  ;;  %v2454_v33 = vshrl.u32 %v2384_v24, 16  ;;  %v6989_v56 = vld [vmem:[#allocation2 + $0x14] sm:$0x1] }
  0x8a   : > { %v3130_v42 = vsel %vm7549_vm5, %v6325_v58, %v3129_v44  ;;  %v2457_v34 = vshll.u32 %v2384_v24, 16  ;;  %v2463_v37 = vshll.u32 %v2385_v29, 16  ;;  %v2467_v9 = vshrl.u32 %v2385_v29, 16  ;;  %v2388_v24 = vld [vmem:[#allocation2 + $0x28] sm:$0xf] }
  0x8b   : > { %3375 = vmatpush.bf16.msrb.mxu1 %v6785_v43  ;;  %v2447_v21 = vrot.slane %v2446_v31, 4  ;;  %v2451_v23 = vrot.slane %v2449_v15, 5  ;;  %v3256_v1 = vunpack.c.l.b16 %v3130_v42  ;;  %v3136_v38 = vrot.slane %v2385_v29, 5 }
  0x8c   : > { %1642 = vmatmul.bf16.gmra.mxu3 %v6727_v50  ;;  %1602 = vmatmul.bf16.gmra.mxu1 %v6719_v59  ;;  %v6986_v50 = vld [vmem:[#allocation2 + $0x4] sm:$0xf]  ;;  %v3131_v59 = vrot.slane %v3129_v44, 4  ;;  %v2456_v43 = vrot.slane %v2454_v33, 4  ;;  %v2459_v28 = vrot.slane %v2457_v34, 5  ;;  %v2465_v47 = vrot.slane %v2463_v37, 5 }
  0x8d   : > { %v1706_v32 = vrot.slane %v6986_v50, 5  ;;  %v2452_v6 = vsel %vm7241_vm2, %v2447_v21, %v2451_v23  ;;  %v1654_v44 = vld [vmem:[#allocation2 + $0xc] sm:$0xe]  ;;  %v2469_v48 = vrot.slane %v2467_v9, 4  ;;  %v6326_v50 = vrot.slane %v3064_v3, 9 }
  0x8e   : > { %v2831_v40 = vunpack.c.l.b16 %v2452_v6  ;;  %v6102_v54 = vrot.slane %v1654_v44, 9  ;;  %v2460_v58 = vor.u32 %v2459_v28, %v2456_v43  ;;  %v2487_v9 = vshll.u32 %v2388_v24, 16  ;;  %v6990_v43 = vld [vmem:[#allocation2 + $0x1c] sm:$0xf]  ;;  %v3065_v44 = vld [vmem:[#allocation2 + $0x24] sm:$0xe] }
  0x8f   : > { %v1708_v63 = vrot.slane %v1706_v32, 4  ;;  %v1707_v18 = vsel %vm7549_vm5, %v6101_v62, %v1706_v32  ;;  %v3138_v32 = vrot.slane %v3136_v38, 4  ;;  %v3137_v2 = vsel %vm7549_vm5, %v6326_v50, %v3136_v38 }
  0x90   : > { %1409 = vmatmul.bf16.gmra.mxu2 %v1265_v60  ;;  %v3132_v60 = vrot.slane %v2383_v57, 5  ;;  %v1833_v30 = vunpack.c.l.b16 %v1707_v18  ;;  %v1716_v57 = vrot.slane %v6989_v56, 5  ;;  %v2461_v18 = vrot.slane %v2460_v58, 4 }
  0x91   : > { %v1710_v19 = vsel %vm7549_vm5, %v1708_v63, %v1709_v11  ;;  %v3258_v23 = vunpack.c.l.b16 %v3137_v2  ;;  %v3143_v3 = vrot.slane %v2388_v24, 5  ;;  %v1720_v28 = vrot.slane %v6990_v43, 5 }
  0x92   : > { %v3133_v16 = vsel %vm7549_vm5, %v3131_v59, %v3132_v60  ;;  %v1834_v4 = vunpack.c.l.b16 %v1710_v19  ;;  %v2470_v60 = vor.u32 %v2469_v48, %v2465_v47  ;;  %v6823_v19 = vld [vmem:[%s8784_s2 + $0x1f0] sm:$0xff]  ;;  %v1655_v48 = vld [vmem:[#allocation2 + $0x18] sm:$0xe] }
  0x93   : > { %v3257_v14 = vunpack.c.l.b16 %v3133_v16  ;;  %4366 = vmatpush.bf16.msra.mxu3 %v6823_v19  ;;  %v6103_v58 = vrot.slane %v1655_v48, 9 }
  0x94   : > { %1369 = vmatmul.bf16.gmra.mxu0 %v1257_v20  ;;  %v2437_v20 = vrot.slane %v2436_v12, 4  ;;  %v1865_v7 = vpack.c.b16 %v1834_v4, %v1833_v30  ;;  %v6815_v12 = vld [vmem:[%s8784_s2 + $0x1b0] sm:$0xff] }
  0x95   : > { %v3288_v35 = vpack.c.b16 %v3257_v14, %v3256_v1  ;;  %3684 = vmatpush.bf16.msra.mxu2 %v6815_v12  ;;  %v2387_v14 = vld [vmem:[#allocation2 + $0x24] sm:$0xf] }
  0x96   : > { %v2442_v5 = vsel %vm7241_vm2, %v2437_v20, %v2441_v55  ;;  %v2471_v20 = vrot.slane %v2470_v60, 4  ;;  %v2478_v6 = vshrl.u32 %v2387_v14, 16  ;;  %v2481_v33 = vshll.u32 %v2387_v14, 16  ;;  %v6991_v60 = vld [vmem:[#allocation2 + $0x20] sm:$0x1] }
  0x98   : > { %v2480_v50 = vrot.slane %v2478_v6, 4 }
  0x9c   : > { %1647 = vmatmul.bf16.gmra.mxu3 %v6728_v39  ;;  %1607 = vmatmul.bf16.gmra.mxu1 %v6720_v36  ;;  %v2830_v39 = vunpack.c.l.b16 %v2442_v5  ;;  %v1713_v36 = vrot.slane %v6988_v22, 5  ;;  %v2466_v5 = vsel %vm7241_vm2, %v2461_v18, %v2465_v47 }
  0x9e   : > { %v2862_v53 = vpack.c.b16 %v2831_v40, %v2830_v39  ;;  %v1715_v55 = vrot.slane %v1713_v36, 4  ;;  %v1714_v42 = vsel %vm7549_vm5, %v6102_v54, %v1713_v36  ;;  %v6831_v40 = vld [vmem:[%s8784_s2 + $0x230] sm:$0xff]  ;;  %v2832_v36 = vunpack.c.l.b16 %v2466_v5 }
  0x9f   : > { %v1835_v30 = vunpack.c.l.b16 %v1714_v42  ;;  %4792 = vmatpush.bf16.msra.mxu0 %v6831_v40  ;;  %v6327_v54 = vrot.slane %v3065_v44, 9  ;;  %v2391_v5 = vld [vmem:[#allocation2 + $0x34] sm:$0xf] }
  0xa0   : > { %1414 = vmatmul.bf16.gmra.mxu2 %v1266_v46  ;;  %v2386_v46 = vld [vmem:[#allocation2 + $0x20] sm:$0x1]  ;;  %v1717_v16 = vsel %vm7549_vm5, %v1715_v55, %v1716_v57  ;;  %v3145_v55 = vrot.slane %v3143_v3, 4  ;;  %v2515_v40 = vshrl.u32 %v2391_v5, 16  ;;  %v3150_v44 = vrot.slane %v2391_v5, 5 }
  0xa1   : > { %v3139_v51 = vrot.slane %v2386_v46, 5  ;;  %v1836_v4 = vunpack.c.l.b16 %v1717_v16  ;;  %v3144_v18 = vsel %vm7549_vm5, %v6327_v54, %v3143_v3  ;;  %v3066_v54 = vld [vmem:[#allocation2 + $0x30] sm:$0xe] }
  0xa3   : > { %v3140_v11 = vsel %vm7549_vm5, %v3138_v32, %v3139_v51  ;;  %v1866_v22 = vpack.c.b16 %v1836_v4, %v1835_v30  ;;  %v2483_v32 = vrot.slane %v2481_v33, 5  ;;  %v2389_v51 = vld [vmem:[#allocation2 + $0x2c] sm:$0x1]  ;;  %v3260_v4 = vunpack.c.l.b16 %v3144_v18 }
  0xa4   : > { %1374 = vmatmul.bf16.gmra.mxu0 %v1258_v61  ;;  %v2473_v61 = vshll.u32 %v2386_v46, 16  ;;  %v3259_v1 = vunpack.c.l.b16 %v3140_v11  ;;  %v3146_v56 = vrot.slane %v2389_v51, 5 }
  0xa5   : > { %v2484_v2 = vor.u32 %v2483_v32, %v2480_v50  ;;  %v6992_v50 = vld [vmem:[#allocation2 + $0x28] sm:$0xf] }
  0xa6   : > { %v2475_v21 = vrot.slane %v2473_v61, 5  ;;  %v3289_v37 = vpack.c.b16 %v3259_v1, %v3258_v23  ;;  %v1723_v61 = vrot.slane %v6991_v60, 5  ;;  %v3147_v19 = vsel %vm7549_vm5, %v3145_v55, %v3146_v56  ;;  %v1656_v56 = vld [vmem:[#allocation2 + $0x24] sm:$0xe] }
  0xa7   : > { %v2485_v14 = vrot.slane %v2484_v2, 4  ;;  %v1727_v32 = vrot.slane %v6992_v50, 5  ;;  %v6328_v60 = vrot.slane %v3066_v54, 9 }
  0xa9   : > { %v1573_v27 = vpop.f32.mrf.mxu1 }
  0xac   : > { %2268 = vmatmul.bf16.vlgmr.msrb.gmra.mxu3 %v6753_v26  ;;  %3376 = vmatmul.bf16.vlgmr.msrb.gmra.mxu1 %v3288_v35  ;;  %v6754_v26 = vld [vmem:[#allocation2 + $0x18] sm:$0xff]  ;;  %v2476_v35 = vsel %vm7241_vm2, %v2471_v20, %v2475_v21  ;;  %v1721_v21 = vsel %vm7549_vm5, %v6103_v58, %v1720_v28  ;;  %v2517_v58 = vrot.slane %v2515_v40, 4 }
  0xad   : > { %v2833_v47 = vunpack.c.l.b16 %v2476_v35  ;;  %v1837_v6 = vunpack.c.l.b16 %v1721_v21 }
  0xaf   : > { %v1613_v52 = vpop.f32.mrf.mxu3 }
  0xb0   : > { %1953 = vmatmul.bf16.vlgmr.msrb.gmra.mxu2 %v1865_v7 }
  0xb1   : > { %v1340_v59 = vpop.f32.mrf.mxu0  ;;  %v1575_v63 = vpop.f32.mrf.mxu1 }
  0xb2   : > { %v7565_v62 = vadd.f32 %v1573_v27, %v1340_v59  ;;  %v2491_v27 = vshrl.u32 %v2388_v24, 16  ;;  %v1722_v59 = vrot.slane %v1720_v28, 4  ;;  %v2390_v24 = vld [vmem:[#allocation2 + $0x30] sm:$0xf] }
  0xb3   : > { %v1380_v31 = vpop.f32.mrf.mxu2  ;;  %v2502_v35 = vshrl.u32 %v2390_v24, 16 }
  0xb4   : > { %2950 = vmatmul.bf16.vlgmr.msrb.gmra.mxu0 %v2862_v53  ;;  %v7574_v15 = vadd.f32 %v1613_v52, %v1380_v31  ;;  %v2489_v52 = vrot.slane %v2487_v9, 5  ;;  %v2493_v53 = vrot.slane %v2491_v27, 4  ;;  %v2497_v31 = vshll.u32 %v2389_v51, 16  ;;  %v6755_v9 = vld [vmem:[#allocation2 + $0x24] sm:$0xff] }
  0xb5   : > { %v1724_v23 = vsel %vm7549_vm5, %v1722_v59, %v1723_v61  ;;  %v2504_v51 = vrot.slane %v2502_v35, 4  ;;  %v2392_v59 = vld [vmem:[#allocation2 + $0x38] sm:$0x1]  ;;  %v3152_v61 = vrot.slane %v3150_v44, 4 }
  0xb6   : > { %v2494_v12 = vor.u32 %v2493_v53, %v2489_v52  ;;  %v2499_v30 = vrot.slane %v2497_v31, 5  ;;  %v1838_v33 = vunpack.c.l.b16 %v1724_v23  ;;  %v2490_v27 = vsel %vm7241_vm2, %v2485_v14, %v2489_v52  ;;  %v6993_v31 = vld [vmem:[#allocation2 + $0x2c] sm:$0x1] }
  0xb7   : > { %v1615_v29 = vpop.f32.mrf.mxu3  ;;  %v2834_v48 = vunpack.c.l.b16 %v2490_v27  ;;  %v2521_v21 = vshll.u32 %v2392_v59, 16  ;;  %v6822_v27 = vld [vmem:[%s8784_s2 + $0x1e8] sm:$0xff] }
  0xb8   : > { %v1867_v28 = vpack.c.b16 %v1838_v33, %v1837_v6  ;;  %4367 = vmatpush.bf16.msra.mxu3 %v6822_v27 }
  0xb9   : > { %v1342_v34 = vpop.f32.mrf.mxu0  ;;  %v1578_v39 = vpop.f32.mrf.mxu1 }
  0xba   : > { %v7587_v38 = vadd.f32 %v1575_v63, %v1342_v34  ;;  %v2863_v63 = vpack.c.b16 %v2833_v47, %v2832_v36 }
  0xbb   : > { %v1382_v7 = vpop.f32.mrf.mxu2 }
  0xbc   : > { %v7592_v46 = vadd.f32 %v1615_v29, %v1382_v7  ;;  %2273 = vmatmul.bf16.gmra.mxu3 %v6754_v26  ;;  %3381 = vmatmul.bf16.gmra.mxu1 %v3289_v37  ;;  %v2495_v29 = vrot.slane %v2494_v12, 4  ;;  %v3261_v26 = vunpack.c.l.b16 %v3147_v19  ;;  %v2505_v37 = vshll.u32 %v2390_v24, 16 }
  0xbd   : > { %v1729_v12 = vrot.slane %v1727_v32, 4 }
  0xbe   : > { %v2500_v7 = vsel %vm7241_vm2, %v2495_v29, %v2499_v30  ;;  %v2507_v53 = vrot.slane %v2505_v37, 5  ;;  %v3151_v29 = vsel %vm7549_vm5, %v6328_v60, %v3150_v44  ;;  %v2523_v37 = vrot.slane %v2521_v21, 5 }
  0xbf   : > { %v1618_v57 = vpop.f32.mrf.mxu3  ;;  %v2835_v55 = vunpack.c.l.b16 %v2500_v7 }
  0xc0   : > { %1958 = vmatmul.bf16.gmra.mxu2 %v1866_v22  ;;  %v3290_v22 = vpack.c.b16 %v3261_v26, %v3260_v4  ;;  %v2508_v18 = vor.u32 %v2507_v53, %v2504_v51  ;;  %v6814_v4 = vld [vmem:[%s8784_s2 + $0x1a8] sm:$0xff] }
  0xc1   : > { %v1345_v11 = vpop.f32.mrf.mxu0  ;;  %v1580_v16 = vpop.f32.mrf.mxu1  ;;  %v2864_v19 = vpack.c.b16 %v2835_v55, %v2834_v48  ;;  %3685 = vmatpush.bf16.msra.mxu2 %v6814_v4 }
  0xc2   : > { %v7594_v42 = vadd.f32 %v1578_v39, %v1345_v11  ;;  %v2511_v39 = vshll.u32 %v2391_v5, 16  ;;  %v6104_v11 = vrot.slane %v1656_v56, 9  ;;  %v2509_v33 = vrot.slane %v2508_v18, 4  ;;  %v1657_v18 = vld [vmem:[#allocation2 + $0x30] sm:$0xe] }
  0xc3   : > { %v1385_v20 = vpop.f32.mrf.mxu2 }
  0xc4   : > { %2955 = vmatmul.bf16.gmra.mxu0 %v2863_v63  ;;  %v7604_v1 = vadd.f32 %v1618_v57, %v1385_v20  ;;  %v2513_v57 = vrot.slane %v2511_v39, 5  ;;  %v3153_v63 = vrot.slane %v2392_v59, 5  ;;  %v1728_v5 = vsel %vm7549_vm5, %v6104_v11, %v1727_v32  ;;  %v6830_v59 = vld [vmem:[%s8784_s2 + $0x228] sm:$0xff] }
  0xc5   : > { %v3262_v39 = vunpack.c.l.b16 %v3151_v29  ;;  %v1839_v7 = vunpack.c.l.b16 %v1728_v5  ;;  %4793 = vmatpush.bf16.msra.mxu0 %v6830_v59 }
  0xc6   : > { %v2518_v20 = vor.u32 %v2517_v58, %v2513_v57  ;;  %v3154_v30 = vsel %vm7549_vm5, %v3152_v61, %v3153_v63 }
  0xc7   : > { %v1620_v34 = vpop.f32.mrf.mxu3  ;;  %v3263_v40 = vunpack.c.l.b16 %v3154_v30 }
  0xc8   : > { %v2519_v35 = vrot.slane %v2518_v20, 4 }
  0xc9   : > { %v1347_v3 = vpop.f32.mrf.mxu0  ;;  %v1583_v43 = vpop.f32.mrf.mxu1  ;;  %v3291_v54 = vpack.c.b16 %v3263_v40, %v3262_v39 }
  0xca   : > { %v7610_v36 = vadd.f32 %v1580_v16, %v1347_v3  ;;  %v1730_v16 = vrot.slane %v6993_v31, 5  ;;  %v2394_v3 = vld [vmem:[#allocation2 + $0x40] sm:$0xf]  ;;  %v2524_v48 = vsel %vm7241_vm2, %v2519_v35, %v2523_v37  ;;  %v3067_v31 = vld [vmem:[#allocation2 + $0x3c] sm:$0xe] }
  0xcb   : > { %v1387_v47 = vpop.f32.mrf.mxu2  ;;  %v2535_v32 = vshll.u32 %v2394_v3, 16  ;;  %v2539_v51 = vshrl.u32 %v2394_v3, 16  ;;  %v3157_v60 = vrot.slane %v2394_v3, 5  ;;  %v2837_v63 = vunpack.c.l.b16 %v2524_v48 }
  0xcc   : > { %v7612_v52 = vadd.f32 %v1620_v34, %v1387_v47  ;;  %2278 = vmatmul.bf16.gmra.mxu3 %v6755_v9  ;;  %3386 = vmatmul.bf16.gmra.mxu1 %v3290_v22  ;;  %v1731_v6 = vsel %vm7549_vm5, %v1729_v12, %v1730_v16  ;;  %v2393_v9 = vld [vmem:[#allocation2 + $0x3c] sm:$0xf]  ;;  %v6756_v47 = vld [vmem:[#allocation2 + $0x30] sm:$0xff] }
  0xcd   : > { %v1840_v22 = vunpack.c.l.b16 %v1731_v6  ;;  %v2526_v44 = vshrl.u32 %v2393_v9, 16  ;;  %v2529_v50 = vshll.u32 %v2393_v9, 16  ;;  %v2537_v20 = vrot.slane %v2535_v32, 5  ;;  %v6995_v6 = vld [vmem:[#allocation2 + $0x38] sm:$0x1] }
  0xce   : > { %v2541_v21 = vrot.slane %v2539_v51, 4  ;;  %v3159_v29 = vrot.slane %v3157_v60, 4 }
  0xcf   : > { %v1623_v2 = vpop.f32.mrf.mxu3  ;;  %v1868_v58 = vpack.c.b16 %v1840_v22, %v1839_v7  ;;  %v2528_v12 = vrot.slane %v2526_v44, 4 }
  0xd0   : > { %1963 = vmatmul.bf16.gmra.mxu2 %v1867_v28  ;;  %v2514_v28 = vsel %vm7241_vm2, %v2509_v33, %v2513_v57  ;;  %v1737_v33 = vrot.slane %v6995_v6, 5  ;;  %v2542_v9 = vor.u32 %v2541_v21, %v2537_v20 }
  0xd1   : > { %v1350_v23 = vpop.f32.mrf.mxu0  ;;  %v1585_v24 = vpop.f32.mrf.mxu1  ;;  %v2836_v61 = vunpack.c.l.b16 %v2514_v28 }
  0xd2   : > { %v7614_v14 = vadd.f32 %v1583_v43, %v1350_v23  ;;  %v2395_v23 = vld [vmem:[#allocation2 + $0x44] sm:$0x1] }
  0xd3   : > { %v1390_v26 = vpop.f32.mrf.mxu2  ;;  %v3160_v30 = vrot.slane %v2395_v23, 5  ;;  %v2865_v35 = vpack.c.b16 %v2837_v63, %v2836_v61  ;;  %v2545_v27 = vshll.u32 %v2395_v23, 16 }
  0xd4   : > { %2960 = vmatmul.bf16.gmra.mxu0 %v2864_v19  ;;  %v7627_v34 = vadd.f32 %v1623_v2, %v1390_v26  ;;  %v6994_v2 = vld [vmem:[#allocation2 + $0x34] sm:$0xf]  ;;  %v2531_v19 = vrot.slane %v2529_v50, 5  ;;  %v6105_v26 = vrot.slane %v1657_v18, 9  ;;  %v2543_v50 = vrot.slane %v2542_v9, 4 }
  0xd5   : > { %v1734_v11 = vrot.slane %v6994_v2, 5  ;;  %v3161_v22 = vsel %vm7549_vm5, %v3159_v29, %v3160_v30  ;;  %v2547_v32 = vrot.slane %v2545_v27, 5  ;;  %v2398_v9 = vld [vmem:[#allocation2 + $0x50] sm:$0x1] }
  0xd6   : > { %v2532_v37 = vor.u32 %v2531_v19, %v2528_v12 }
  0xd7   : > { %v1625_v43 = vpop.f32.mrf.mxu3  ;;  %v1736_v5 = vrot.slane %v1734_v11, 4  ;;  %v1735_v28 = vsel %vm7549_vm5, %v6105_v26, %v1734_v11  ;;  %v2548_v63 = vsel %vm7241_vm2, %v2543_v50, %v2547_v32  ;;  %v1744_v50 = vrot.slane %v7443_v17, 5 }
  0xd8   : > { %v2533_v48 = vrot.slane %v2532_v37, 4  ;;  %v1841_v59 = vunpack.c.l.b16 %v1735_v28  ;;  %v2839_v26 = vunpack.c.l.b16 %v2548_v63  ;;  %v1658_v37 = vld [vmem:[#allocation2 + $0x3c] sm:$0xe] }
  0xd9   : > { %v1352_v53 = vpop.f32.mrf.mxu0  ;;  %v1588_v56 = vpop.f32.mrf.mxu1  ;;  %v1738_v44 = vsel %vm7549_vm5, %v1736_v5, %v1737_v33  ;;  %v3068_v5 = vld [vmem:[#allocation2 + $0x48] sm:$0xe] }
  0xda   : > { %v7636_v55 = vadd.f32 %v1585_v24, %v1352_v53  ;;  %v6329_v24 = vrot.slane %v3067_v31, 9  ;;  %v3265_v53 = vunpack.c.l.b16 %v3161_v22  ;;  %v2538_v61 = vsel %vm7241_vm2, %v2533_v48, %v2537_v20 }
  0xdb   : > { %v1392_v57 = vpop.f32.mrf.mxu2  ;;  %v1741_v20 = vrot.slane %v7439_v8, 5  ;;  %v3167_v22 = vrot.slane %v2398_v9, 5 }
  0xdc   : > { %v7641_v16 = vadd.f32 %v1625_v43, %v1392_v57  ;;  %2283 = vmatmul.bf16.gmra.mxu3 %v6756_v47  ;;  %3391 = vmatmul.bf16.gmra.mxu1 %v3291_v54  ;;  %v3158_v7 = vsel %vm7549_vm5, %v6329_v24, %v3157_v60  ;;  %v2396_v54 = vld [vmem:[#allocation2 + $0x48] sm:$0xf]  ;;  %v1842_v60 = vunpack.c.l.b16 %v1738_v44  ;;  %v6757_v57 = vld [vmem:[#allocation2 + $0x3c] sm:$0xff]  ;;  %v6106_v44 = vrot.slane %v1658_v37, 9 }
  0xdd   : > { %v3264_v51 = vunpack.c.l.b16 %v3158_v7  ;;  %v2550_v2 = vshrl.u32 %v2396_v54, 16  ;;  %v2553_v11 = vshll.u32 %v2396_v54, 16  ;;  %v1743_v48 = vrot.slane %v1741_v20, 4 }
  0xde   : > { %v1869_v30 = vpack.c.b16 %v1842_v60, %v1841_v59  ;;  %v6813_v60 = vld [vmem:[%s8784_s2 + $0x1a0] sm:$0xff] }
  0xdf   : > { %v1628_v4 = vpop.f32.mrf.mxu3  ;;  %v3292_v31 = vpack.c.b16 %v3265_v53, %v3264_v51  ;;  %v2552_v33 = vrot.slane %v2550_v2, 4  ;;  %v2569_v53 = vshll.u32 %v2398_v9, 16  ;;  %v1745_v63 = vsel %vm7549_vm5, %v1743_v48, %v1744_v50  ;;  %3686 = vmatpush.bf16.msra.mxu2 %v6813_v60 }
  0xe0   : > { %1968 = vmatmul.bf16.gmra.mxu2 %v1868_v58  ;;  %v1748_v50 = vrot.slane %v7466_v45, 5  ;;  %v1751_v45 = vrot.slane %v7481_v13, 5 }
  0xe1   : > { %v1355_v39 = vpop.f32.mrf.mxu0  ;;  %v1590_v3 = vpop.f32.mrf.mxu1 }
  0xe2   : > { %v7643_v40 = vadd.f32 %v1588_v56, %v1355_v39  ;;  %v2397_v56 = vld [vmem:[#allocation2 + $0x4c] sm:$0xf] }
  0xe3   : > { %v1395_v43 = vpop.f32.mrf.mxu2  ;;  %v2559_v18 = vshll.u32 %v2397_v56, 16  ;;  %v2563_v19 = vshrl.u32 %v2397_v56, 16  ;;  %v3164_v24 = vrot.slane %v2397_v56, 5 }
  0xe4   : > { %2965 = vmatmul.bf16.gmra.mxu0 %v2865_v35  ;;  %v7653_v47 = vadd.f32 %v1628_v4, %v1395_v43  ;;  %v2838_v4 = vunpack.c.l.b16 %v2538_v61  ;;  %v2555_v35 = vrot.slane %v2553_v11, 5  ;;  %v1742_v61 = vsel %vm7549_vm5, %v6106_v44, %v1741_v20  ;;  %v6821_v11 = vld [vmem:[%s8784_s2 + $0x1e0] sm:$0xff] }
  0xe5   : > { %v2561_v27 = vrot.slane %v2559_v18, 5  ;;  %v2565_v39 = vrot.slane %v2563_v19, 4  ;;  %v3166_v7 = vrot.slane %v3164_v24, 4  ;;  %4368 = vmatpush.bf16.msra.mxu3 %v6821_v11 }
  0xe6   : > { %v2866_v28 = vpack.c.b16 %v2839_v26, %v2838_v4  ;;  %v2556_v32 = vor.u32 %v2555_v35, %v2552_v33  ;;  %v1844_v4 = vunpack.c.l.b16 %v1745_v63  ;;  %v6758_v26 = vld [vmem:[#allocation2 + $0x48] sm:$0xff] }
  0xe7   : > { %v1630_v58 = vpop.f32.mrf.mxu3  ;;  %v2566_v8 = vor.u32 %v2565_v39, %v2561_v27  ;;  %v3168_v59 = vsel %vm7549_vm5, %v3166_v7, %v3167_v22 }
  0xe8   : > { %v2557_v2 = vrot.slane %v2556_v32, 4  ;;  %v3267_v19 = vunpack.c.l.b16 %v3168_v59  ;;  %v3069_v32 = vld [vmem:[#allocation2 + $0x54] sm:$0xe]  ;;  %v2401_v59 = vld [vmem:[#allocation2 + $0x5c] sm:$0x1] }
  0xe9   : > { %v1357_v12 = vpop.f32.mrf.mxu0  ;;  %v1593_v23 = vpop.f32.mrf.mxu1 }
  0xea   : > { %v7659_v21 = vadd.f32 %v1590_v3, %v1357_v12  ;;  %v6330_v3 = vrot.slane %v3068_v5, 9  ;;  %v2567_v12 = vrot.slane %v2566_v8, 4  ;;  %v2562_v5 = vsel %vm7241_vm2, %v2557_v2, %v2561_v27 }
  0xeb   : > { %v1397_v29 = vpop.f32.mrf.mxu2  ;;  %v2840_v27 = vunpack.c.l.b16 %v2562_v5  ;;  %v3174_v2 = vrot.slane %v2401_v59, 5 }
  0xec   : > { %v7661_v6 = vadd.f32 %v1630_v58, %v1397_v29  ;;  %2288 = vmatmul.bf16.gmra.mxu3 %v6757_v57  ;;  %3396 = vmatmul.bf16.gmra.mxu1 %v3292_v31  ;;  %v3165_v58 = vsel %vm7549_vm5, %v6330_v3, %v3164_v24  ;;  %v2571_v31 = vrot.slane %v2569_v53, 5  ;;  %v2400_v24 = vld [vmem:[#allocation2 + $0x58] sm:$0xf]  ;;  %v1659_v53 = vld [vmem:[#allocation2 + $0x48] sm:$0xe] }
  0xed   : > { %v3266_v18 = vunpack.c.l.b16 %v3165_v58  ;;  %v2583_v39 = vshll.u32 %v2400_v24, 16  ;;  %v2587_v3 = vshrl.u32 %v2400_v24, 16 }
  0xee   : > { %v2572_v37 = vsel %vm7241_vm2, %v2567_v12, %v2571_v31  ;;  %v6107_v12 = vrot.slane %v1659_v53, 9  ;;  %v1750_v31 = vrot.slane %v1748_v50, 4  ;;  %v6759_v53 = vld [vmem:[#allocation2 + $0x54] sm:$0xff] }
  0xef   : > { %v1633_v43 = vpop.f32.mrf.mxu3  ;;  %v3293_v9 = vpack.c.b16 %v3267_v19, %v3266_v18  ;;  %v2841_v8 = vunpack.c.l.b16 %v2572_v37  ;;  %v2585_v60 = vrot.slane %v2583_v39, 5 }
  0xf0   : > { %1973 = vmatmul.bf16.gmra.mxu2 %v1869_v30  ;;  %v1843_v30 = vunpack.c.l.b16 %v1742_v61  ;;  %v6331_v61 = vrot.slane %v3069_v32, 9  ;;  %v1752_v13 = vsel %vm7549_vm5, %v1750_v31, %v1751_v45 }
  0xf1   : > { %v1360_v51 = vpop.f32.mrf.mxu0  ;;  %v1595_v56 = vpop.f32.mrf.mxu1  ;;  %v2867_v18 = vpack.c.b16 %v2841_v8, %v2840_v27 }
  0xf2   : > { %v7665_v54 = vadd.f32 %v1593_v23, %v1360_v51  ;;  %v2399_v23 = vld [vmem:[#allocation2 + $0x54] sm:$0xf]  ;;  %v1870_v48 = vpack.c.b16 %v1844_v4, %v1843_v30 }
  0xf3   : > { %v1400_v57 = vpop.f32.mrf.mxu2  ;;  %v2574_v20 = vshrl.u32 %v2399_v23, 16  ;;  %v2577_v33 = vshll.u32 %v2399_v23, 16 }
  0xf4   : > { %2970 = vmatmul.bf16.gmra.mxu0 %v2866_v28  ;;  %v7674_v17 = vadd.f32 %v1633_v43, %v1400_v57  ;;  %v6829_v43 = vld [vmem:[%s8784_s2 + $0x220] sm:$0xff]  ;;  %v3171_v28 = vrot.slane %v2400_v24, 5  ;;  %v2589_v57 = vrot.slane %v2587_v3, 4 }
  0xf5   : > { %v2576_v58 = vrot.slane %v2574_v20, 4  ;;  %4794 = vmatpush.bf16.msra.mxu0 %v6829_v43 }
  0xf6   : > { %v3173_v63 = vrot.slane %v3171_v28, 4  ;;  %v2590_v24 = vor.u32 %v2589_v57, %v2585_v60 }
  0xf7   : > { %v1635_v29 = vpop.f32.mrf.mxu3 }
  0xf8   : > { %v3175_v5 = vsel %vm7549_vm5, %v3173_v63, %v3174_v2  ;;  %v2591_v39 = vrot.slane %v2590_v24, 4  ;;  %v3070_v24 = vld [vmem:[#allocation2 + $0x60] sm:$0xe] }
  0xf9   : > { %v1362_v35 = vpop.f32.mrf.mxu0  ;;  %v1598_v22 = vpop.f32.mrf.mxu1  ;;  %v3269_v43 = vunpack.c.l.b16 %v3175_v5 }
  0xfa   : > { %v7687_v7 = vadd.f32 %v1595_v56, %v1362_v35  ;;  %v2579_v56 = vrot.slane %v2577_v33, 5  ;;  %v1749_v33 = vsel %vm7549_vm5, %v6107_v12, %v1748_v50 }
  0xfb   : > { %v1402_v44 = vpop.f32.mrf.mxu2 }
  0xfc   : > { %v7693_v51 = vadd.f32 %v1635_v29, %v1402_v44  ;;  %2293 = vmatmul.bf16.gmra.mxu3 %v6758_v26  ;;  %3401 = vmatmul.bf16.gmra.mxu1 %v3293_v9  ;;  %v2580_v19 = vor.u32 %v2579_v56, %v2576_v58  ;;  %v2593_v29 = vshll.u32 %v2401_v59, 16  ;;  %v3172_v26 = vsel %vm7549_vm5, %v6331_v61, %v3171_v28  ;;  %v2402_v9 = vld [vmem:[#allocation2 + $0x60] sm:$0xf]  ;;  %v2403_v28 = vld [vmem:[#allocation2 + $0x64] sm:$0xf] }
  0xfd   : > { %v1845_v44 = vunpack.c.l.b16 %v1749_v33  ;;  %v2598_v32 = vshrl.u32 %v2402_v9, 16  ;;  %v2601_v8 = vshll.u32 %v2402_v9, 16  ;;  %v2607_v58 = vshll.u32 %v2403_v28, 16 }
  0xfe   : > { %v2581_v37 = vrot.slane %v2580_v19, 4  ;;  %v2595_v3 = vrot.slane %v2593_v29, 5  ;;  %v2611_v56 = vshrl.u32 %v2403_v28, 16  ;;  %v3178_v12 = vrot.slane %v2403_v28, 5 }
  0xff   : > { %v1638_v11 = vpop.f32.mrf.mxu3  ;;  %v2600_v19 = vrot.slane %v2598_v32, 4  ;;  %v2609_v5 = vrot.slane %v2607_v58, 5  ;;  %v6332_v33 = vrot.slane %v3070_v24, 9 }
 0x100   : > { %1978 = vmatmul.bf16.gmra.mxu2 %v1870_v48  ;;  %v1846_v48 = vunpack.c.l.b16 %v1752_v13  ;;  %v2586_v50 = vsel %vm7241_vm2, %v2581_v37, %v2585_v60  ;;  %v2596_v57 = vsel %vm7241_vm2, %v2591_v39, %v2595_v3  ;;  %v3180_v13 = vrot.slane %v3178_v12, 4 }
 0x101   : > { %v1365_v23 = vpop.f32.mrf.mxu0  ;;  %v1600_v4 = vpop.f32.mrf.mxu1  ;;  %v2842_v45 = vunpack.c.l.b16 %v2586_v50  ;;  %v2843_v29 = vunpack.c.l.b16 %v2596_v57 }
 0x102   : > { %v7696_v30 = vadd.f32 %v1598_v22, %v1365_v23  ;;  %v3268_v22 = vunpack.c.l.b16 %v3172_v26  ;;  %v2603_v23 = vrot.slane %v2601_v8, 5  ;;  %v1660_v26 = vld [vmem:[#allocation2 + $0x54] sm:$0xe] }
 0x103   : > { %v1405_v20 = vpop.f32.mrf.mxu2  ;;  %v6108_v39 = vrot.slane %v1660_v26, 9 }
 0x104   : > { %2975 = vmatmul.bf16.gmra.mxu0 %v2867_v18  ;;  %v7706_v35 = vadd.f32 %v1638_v11, %v1405_v20  ;;  %v3294_v61 = vpack.c.b16 %v3269_v43, %v3268_v22  ;;  %v1871_v11 = vpack.c.b16 %v1846_v48, %v1845_v44  ;;  %v1755_v18 = vrot.slane %v7503_v41, 5 }
 0x105   : > { %v2613_v20 = vrot.slane %v2611_v56, 4  ;;  %v1758_v41 = vrot.slane %v7517_v10, 5  ;;  %v2604_v22 = vor.u32 %v2603_v23, %v2600_v19  ;;  %v2868_v43 = vpack.c.b16 %v2843_v29, %v2842_v45  ;;  %v2406_v19 = vld [vmem:[#allocation2 + $0x70] sm:$0xf] }
 0x106   : > { %v1757_v3 = vrot.slane %v1755_v18, 4  ;;  %v1756_v58 = vsel %vm7549_vm5, %v6108_v39, %v1755_v18 }
 0x107   : > { %v1640_v27 = vpop.f32.mrf.mxu3  ;;  %v2614_v28 = vor.u32 %v2613_v20, %v2609_v5  ;;  %v1847_v23 = vunpack.c.l.b16 %v1756_v58  ;;  %v6760_v20 = vld [vmem:[#allocation2 + $0x60] sm:$0xff] }
 0x108   : > { %v1759_v56 = vsel %vm7549_vm5, %v1757_v3, %v1758_v41 }
 0x109   : > { %v1367_v59 = vpop.f32.mrf.mxu0  ;;  %v1603_v2 = vpop.f32.mrf.mxu1  ;;  %v1848_v18 = vunpack.c.l.b16 %v1759_v56  ;;  %v1661_v56 = vld [vmem:[#allocation2 + $0x60] sm:$0xe] }
 0x10a   : > { %v7712_v63 = vadd.f32 %v1600_v4, %v1367_v59  ;;  %v2404_v4 = vld [vmem:[#allocation2 + $0x68] sm:$0x1]  ;;  %v2605_v59 = vrot.slane %v2604_v22, 4 }
 0x10b   : > { %v1407_v31 = vpop.f32.mrf.mxu2  ;;  %v3181_v37 = vrot.slane %v2404_v4, 5  ;;  %v2617_v44 = vshll.u32 %v2404_v4, 16  ;;  %v1872_v22 = vpack.c.b16 %v1848_v18, %v1847_v23  ;;  %v6997_v18 = vld [vmem:[#allocation2 + $0x68] sm:$0x1] }
 0x10c   : > { %v7715_v60 = vadd.f32 %v1640_v27, %v1407_v31  ;;  %2298 = vmatmul.bf16.gmra.mxu3 %v6759_v53  ;;  %3406 = vmatmul.bf16.gmra.mxu1 %v3294_v61  ;;  %v6812_v27 = vld [vmem:[%s8784_s2 + $0x198] sm:$0xff]  ;;  %v3179_v53 = vsel %vm7549_vm5, %v6332_v33, %v3178_v12  ;;  %v2615_v61 = vrot.slane %v2614_v28, 4  ;;  %v2610_v29 = vsel %vm7241_vm2, %v2605_v59, %v2609_v5 }
 0x10d   : > { %v3182_v50 = vsel %vm7549_vm5, %v3180_v13, %v3181_v37  ;;  %3687 = vmatpush.bf16.msra.mxu2 %v6812_v27  ;;  %v6820_v12 = vld [vmem:[%s8784_s2 + $0x1d8] sm:$0xff]  ;;  %v3270_v31 = vunpack.c.l.b16 %v3179_v53  ;;  %v2631_v13 = vshll.u32 %v2406_v19, 16  ;;  %v2635_v37 = vshrl.u32 %v2406_v19, 16  ;;  %v6996_v27 = vld [vmem:[#allocation2 + $0x64] sm:$0xf] }
 0x10e   : > { %v3271_v45 = vunpack.c.l.b16 %v3182_v50  ;;  %4369 = vmatpush.bf16.msra.mxu3 %v6820_v12  ;;  %v3185_v28 = vrot.slane %v2406_v19, 5  ;;  %v1762_v53 = vrot.slane %v6996_v27, 5  ;;  %v6109_v19 = vrot.slane %v1661_v56, 9 }
 0x10f   : > { %v1643_v9 = vpop.f32.mrf.mxu3  ;;  %v2633_v59 = vrot.slane %v2631_v13, 5 }
 0x110   : > { %1983 = vmatmul.bf16.gmra.mxu2 %v1871_v11  ;;  %v2405_v11 = vld [vmem:[#allocation2 + $0x6c] sm:$0xf]  ;;  %v3295_v39 = vpack.c.b16 %v3271_v45, %v3270_v31  ;;  %v3187_v12 = vrot.slane %v3185_v28, 4  ;;  %v1764_v23 = vrot.slane %v1762_v53, 4 }
 0x111   : > { %v1370_v48 = vpop.f32.mrf.mxu0  ;;  %v1605_v8 = vpop.f32.mrf.mxu1  ;;  %v2622_v26 = vshrl.u32 %v2405_v11, 16  ;;  %v2625_v33 = vshll.u32 %v2405_v11, 16 }
 0x112   : > { %v7721_v32 = vadd.f32 %v1603_v2, %v1370_v48  ;;  %v2619_v2 = vrot.slane %v2617_v44, 5  ;;  %v2844_v44 = vunpack.c.l.b16 %v2610_v29  ;;  %v1765_v29 = vrot.slane %v6997_v18, 5 }
 0x113   : > { %v1410_v10 = vpop.f32.mrf.mxu2  ;;  %v2624_v50 = vrot.slane %v2622_v26, 4 }
 0x114   : > { %2980 = vmatmul.bf16.gmra.mxu0 %v2868_v43  ;;  %v7731_v57 = vadd.f32 %v1643_v9, %v1410_v10  ;;  %v2620_v4 = vsel %vm7241_vm2, %v2615_v61, %v2619_v2  ;;  %v6828_v43 = vld [vmem:[%s8784_s2 + $0x218] sm:$0xff]  ;;  %v3071_v10 = vld [vmem:[#allocation2 + $0x6c] sm:$0xe]  ;;  %v2637_v61 = vrot.slane %v2635_v37, 4  ;;  %v2407_v2 = vld [vmem:[#allocation2 + $0x74] sm:$0x1] }
 0x115   : > { %v2845_v48 = vunpack.c.l.b16 %v2620_v4  ;;  %4795 = vmatpush.bf16.msra.mxu0 %v6828_v43  ;;  %v6333_v11 = vrot.slane %v3071_v10, 9  ;;  %v3188_v31 = vrot.slane %v2407_v2, 5 }
 0x116   : > { %8797 = vst [vmem:[#allocation3_spill] sm:$0xff] %v7731_v57  ;;  %v2638_v4 = vor.u32 %v2637_v61, %v2633_v59 }
 0x117   : > { %v1645_v24 = vpop.f32.mrf.mxu3  ;;  %v2869_v26 = vpack.c.b16 %v2845_v48, %v2844_v44  ;;  %v3186_v37 = vsel %vm7549_vm5, %v6333_v11, %v3185_v28  ;;  %v2409_v28 = vld [vmem:[#allocation2 + $0x7c] sm:$0xf] }
 0x118   : > { %v3272_v10 = vunpack.c.l.b16 %v3186_v37 }
 0x119   : > { %v1372_v9 = vpop.f32.mrf.mxu0  ;;  %v1608_v41 = vpop.f32.mrf.mxu1 }
 0x11a   : > { %v7740_v3 = vadd.f32 %v1605_v8, %v1372_v9  ;;  %v2627_v8 = vrot.slane %v2625_v33, 5 }
 0x11b   : > { %v1412_v5 = vpop.f32.mrf.mxu2 }
 0x11c   : > { %v7745_v58 = vadd.f32 %v1645_v24, %v1412_v5  ;;  %2303 = vmatmul.bf16.gmra.mxu3 %v6760_v20  ;;  %3411 = vmatmul.bf16.gmra.mxu1 %v3295_v39  ;;  %v2628_v24 = vor.u32 %v2627_v8, %v2624_v50  ;;  %v2641_v20 = vshll.u32 %v2407_v2, 16  ;;  %v3189_v39 = vsel %vm7549_vm5, %v3187_v12, %v3188_v31  ;;  %v2408_v50 = vld [vmem:[#allocation2 + $0x78] sm:$0xf]  ;;  %v6761_v31 = vld [vmem:[#allocation2 + $0x6c] sm:$0xff] }
 0x11d   : > { %v1763_v5 = vsel %vm7549_vm5, %v6109_v19, %v1762_v53  ;;  %v3273_v56 = vunpack.c.l.b16 %v3189_v39  ;;  %v2646_v11 = vshrl.u32 %v2408_v50, 16  ;;  %v2649_v12 = vshll.u32 %v2408_v50, 16 }
 0x11e   : > { %8798 = vst [vmem:[#allocation4_spill] sm:$0xff] %v7745_v58  ;;  %v2629_v48 = vrot.slane %v2628_v24, 4  ;;  %v2643_v27 = vrot.slane %v2641_v20, 5  ;;  %v1849_v8 = vunpack.c.l.b16 %v1763_v5  ;;  %v2655_v19 = vshll.u32 %v2409_v28, 16 }
 0x11f   : > { %v1648_v45 = vpop.f32.mrf.mxu3  ;;  %v3192_v20 = vrot.slane %v2409_v28, 5  ;;  %v2651_v5 = vrot.slane %v2649_v12, 5  ;;  %v6999_v12 = vld [vmem:[#allocation2 + $0x74] sm:$0x1] }
 0x120   : > { %1988 = vmatmul.bf16.gmra.mxu2 %v1872_v22  ;;  %v1766_v22 = vsel %vm7549_vm5, %v1764_v23, %v1765_v29  ;;  %v2634_v53 = vsel %vm7241_vm2, %v2629_v48, %v2633_v59  ;;  %v2659_v23 = vshrl.u32 %v2409_v28, 16  ;;  %v3296_v29 = vpack.c.b16 %v3273_v56, %v3272_v10  ;;  %v1662_v48 = vld [vmem:[#allocation2 + $0x6c] sm:$0xe] }
 0x121   : > { %v1375_v9 = vpop.f32.mrf.mxu0  ;;  %v1610_v13 = vpop.f32.mrf.mxu1  ;;  %v1850_v61 = vunpack.c.l.b16 %v1766_v22  ;;  %v2846_v37 = vunpack.c.l.b16 %v2634_v53  ;;  %v3072_v22 = vld [vmem:[#allocation2 + $0x78] sm:$0xe]  ;;  %v2657_v50 = vrot.slane %v2655_v19, 5  ;;  %v6110_v53 = vrot.slane %v1662_v48, 9  ;;  %v6811_v19 = vld [vmem:[%s8784_s2 + $0x190] sm:$0xff] }
 0x122   : > { %v7747_v33 = vadd.f32 %v1608_v41, %v1375_v9  ;;  %v2639_v41 = vrot.slane %v2638_v4, 4  ;;  %v2661_v10 = vrot.slane %v2659_v23, 4  ;;  %v6334_v56 = vrot.slane %v3072_v22, 9  ;;  %3688 = vmatpush.bf16.msra.mxu2 %v6811_v19 }
 0x123   : > { %v1415_v43 = vpop.f32.mrf.mxu2  ;;  %v1873_v24 = vpack.c.b16 %v1850_v61, %v1849_v8  ;;  %v3194_v8 = vrot.slane %v3192_v20, 4 }
 0x124   : > { %2985 = vmatmul.bf16.gmra.mxu0 %v2869_v26  ;;  %v7757_v44 = vadd.f32 %v1648_v45, %v1415_v43  ;;  %v2644_v45 = vsel %vm7241_vm2, %v2639_v41, %v2643_v27  ;;  %v2648_v43 = vrot.slane %v2646_v11, 4  ;;  %v6998_v41 = vld [vmem:[#allocation2 + $0x70] sm:$0xf] }
 0x125   : > { %v2847_v39 = vunpack.c.l.b16 %v2644_v45  ;;  %v1769_v27 = vrot.slane %v6998_v41, 5 }
 0x126   : > { %8799 = vst [vmem:[#allocation5_spill] sm:$0xff] %v7757_v44  ;;  %v2652_v45 = vor.u32 %v2651_v5, %v2648_v43 }
 0x127   : > { %v1650_v2 = vpop.f32.mrf.mxu3  ;;  %v1771_v11 = vrot.slane %v1769_v27, 4 }
 0x128   : > { %v2653_v43 = vrot.slane %v2652_v45, 4 }
 0x129   : > { %v1377_v18 = vpop.f32.mrf.mxu0  ;;  %v7765_v4 = vpop.f32.mrf.mxu1 }
 0x12a   : > { %v7763_v26 = vadd.f32 %v1610_v13, %v1377_v18  ;;  %v2410_v13 = vld [vmem:[#allocation2 + $0x80] sm:$0x1]  ;;  %v2870_v18 = vpack.c.b16 %v2847_v39, %v2846_v37 }
 0x12b   : > { %v1417_v9 = vpop.f32.mrf.mxu2  ;;  %v3195_v61 = vrot.slane %v2410_v13, 5 }
 0x12c   : > { %v7767_v59 = vadd.f32 %v1650_v2, %v1417_v9  ;;  %2308 = vmatmul.bf16.gmra.mxu3 %v6761_v31  ;;  %3416 = vmatmul.bf16.gmra.mxu1 %v3296_v29  ;;  %v1772_v2 = vrot.slane %v6999_v12, 5  ;;  %v2662_v9 = vor.u32 %v2661_v10, %v2657_v50  ;;  %v2665_v31 = vshll.u32 %v2410_v13, 16 }
 0x12d   : > { %v3193_v29 = vsel %vm7549_vm5, %v6334_v56, %v3192_v20  ;;  %v3196_v37 = vsel %vm7549_vm5, %v3194_v8, %v3195_v61  ;;  %v6819_v20 = vld [vmem:[%s8784_s2 + $0x1d0] sm:$0xff]  ;;  %v2411_v56 = vld [vmem:[#allocation2 + $0x84] sm:$0xf]  ;;  %v2412_v61 = vld [vmem:[#allocation2 + $0x88] sm:$0xf] }
 0x12e   : > { %8800 = vst [vmem:[#allocation6_spill] sm:$0xff] %v7767_v59  ;;  %v1773_v22 = vsel %vm7549_vm5, %v1771_v11, %v1772_v2  ;;  %v2663_v48 = vrot.slane %v2662_v9, 4  ;;  %v2667_v41 = vrot.slane %v2665_v31, 5  ;;  %v3274_v10 = vunpack.c.l.b16 %v3193_v29  ;;  %4370 = vmatpush.bf16.msra.mxu3 %v6819_v20  ;;  %v6762_v11 = vld [vmem:[#allocation2 + $0x78] sm:$0xff] }
 0x12f   : > { %v2269_v28 = vpop.f32.mrf.mxu3  ;;  %v3275_v13 = vunpack.c.l.b16 %v3196_v37  ;;  %v2670_v2 = vshrl.u32 %v2411_v56, 16  ;;  %v2673_v9 = vshll.u32 %v2411_v56, 16  ;;  %v2679_v29 = vshll.u32 %v2412_v61, 16 }
 0x130   : > { %1993 = vmatmul.bf16.gmra.mxu2 %v1873_v24  ;;  %v1770_v24 = vsel %vm7549_vm5, %v6110_v53, %v1769_v27  ;;  %v2668_v12 = vsel %vm7241_vm2, %v2663_v48, %v2667_v41  ;;  %v2683_v37 = vshrl.u32 %v2412_v61, 16  ;;  %v3073_v41 = vld [vmem:[#allocation2 + $0x84] sm:$0xe] }
 0x131   : > { %v2951_v59 = vpop.f32.mrf.mxu0  ;;  %v7772_v23 = vpop.f32.mrf.mxu1  ;;  %v1851_v53 = vunpack.c.l.b16 %v1770_v24  ;;  %v3297_v19 = vpack.c.b16 %v3275_v13, %v3274_v10  ;;  %v2849_v48 = vunpack.c.l.b16 %v2668_v12  ;;  %v1663_v10 = vld [vmem:[#allocation2 + $0x78] sm:$0xe]  ;;  %v7000_v13 = vld [vmem:[#allocation2 + $0x7c] sm:$0xf]  ;;  %v2672_v56 = vrot.slane %v2670_v2, 4 }
 0x132   : > { %v6111_v58 = vrot.slane %v1663_v10, 9 }
 0x133   : > { %v1954_v39 = vpop.f32.mrf.mxu2 }
 0x134   : > { %2990 = vmatmul.bf16.gmra.mxu0 %v2870_v18  ;;  %v2034_v5 = vadd.f32 %v1954_v39, %v7565_v62  ;;  %v1852_v18 = vunpack.c.l.b16 %v1773_v22  ;;  %v2658_v62 = vsel %vm7241_vm2, %v2653_v43, %v2657_v50  ;;  %v3199_v50 = vrot.slane %v2412_v61, 5 }
 0x135   : > { %v2848_v22 = vunpack.c.l.b16 %v2658_v62  ;;  %v2685_v61 = vrot.slane %v2683_v37, 4 }
 0x136   : > { %v2349_v8 = vadd.f32 %v2269_v28, %v2034_v5  ;;  %v6840_v28 = vld [vmem:[%s8789_s7 + $0x38] sm:$0xff]  ;;  %v1874_v5 = vpack.c.b16 %v1852_v18, %v1851_v53  ;;  %v6335_v53 = vrot.slane %v3073_v41, 9  ;;  %v3201_v18 = vrot.slane %v3199_v50, 4  ;;  %v2414_v41 = vld [vmem:[#allocation2 + $0x90] sm:$0xf] }
 0x137   : > { %v2271_v27 = vpop.f32.mrf.mxu3  ;;  %5586 = vmatpush.bf16.msra.mxu1 %v6840_v28  ;;  %v2871_v28 = vpack.c.b16 %v2849_v48, %v2848_v22 }
 0x138   : > { %v3031_v45 = vadd.f32 %v2951_v59, %v2349_v8  ;;  %v6827_v59 = vld [vmem:[%s8784_s2 + $0x210] sm:$0xff]  ;;  %v2675_v8 = vrot.slane %v2673_v9, 5  ;;  %v3200_v37 = vsel %vm7549_vm5, %v6335_v53, %v3199_v50  ;;  %v2694_v53 = vshrl.u32 %v2414_v41, 16 }
 0x139   : > { %v2953_v31 = vpop.f32.mrf.mxu0  ;;  %v7796_v24 = vpop.f32.mrf.mxu1  ;;  %4796 = vmatpush.bf16.msra.mxu0 %v6827_v59 }
 0x13a   : > { %v7794_v39 = vadd.f32 %v7765_v4, %v3031_v45  ;;  %v1776_v4 = vrot.slane %v7000_v13, 5  ;;  %v2413_v45 = vld [vmem:[#allocation2 + $0x8c] sm:$0x1]  ;;  %v2676_v2 = vor.u32 %v2675_v8, %v2672_v56  ;;  %v3276_v8 = vunpack.c.l.b16 %v3200_v37 }
 0x13b   : > { %v1956_v43 = vpop.f32.mrf.mxu2  ;;  %v3202_v62 = vrot.slane %v2413_v45, 5  ;;  %v2689_v59 = vshll.u32 %v2413_v45, 16 }
 0x13c   : > { %8801 = vst [vmem:[#allocation7_spill] sm:$0xff] %v7794_v39  ;;  %v2035_v20 = vadd.f32 %v1956_v43, %v7587_v38  ;;  %2313 = vmatmul.bf16.gmra.mxu3 %v6762_v11  ;;  %3421 = vmatmul.bf16.gmra.mxu1 %v3297_v19  ;;  %v7802_v39 = vrot.slane %v2679_v29, 5  ;;  %v1778_v11 = vrot.slane %v1776_v4, 4  ;;  %v7001_v43 = vld [vmem:[#allocation2 + $0x80] sm:$0x1]  ;;  %v1777_v22 = vsel %vm7549_vm5, %v6111_v58, %v1776_v4 }
 0x13d   : > { %v1779_v13 = vrot.slane %v7001_v43, 5  ;;  %v2691_v56 = vrot.slane %v2689_v59, 5  ;;  %v1853_v43 = vunpack.c.l.b16 %v1777_v22 }
 0x13e   : > { %v2350_v44 = vadd.f32 %v2271_v27, %v2035_v20  ;;  %v2686_v19 = vor.u32 %v2685_v61, %v7802_v39  ;;  %v2415_v20 = vld [vmem:[#allocation2 + $0x94] sm:$0xf] }
 0x13f   : > { %v2274_v12 = vpop.f32.mrf.mxu3  ;;  %v1780_v48 = vsel %vm7549_vm5, %v1778_v11, %v1779_v13 }
 0x140   : > { %1998 = vmatmul.bf16.gmra.mxu2 %v1874_v5  ;;  %v3032_v38 = vadd.f32 %v2953_v31, %v2350_v44  ;;  %v3203_v5 = vsel %vm7549_vm5, %v3201_v18, %v3202_v62  ;;  %v2687_v10 = vrot.slane %v2686_v19, 4  ;;  %v2697_v18 = vshll.u32 %v2414_v41, 16  ;;  %v7002_v19 = vld [vmem:[#allocation2 + $0x88] sm:$0xf] }
 0x141   : > { %v2956_v9 = vpop.f32.mrf.mxu0  ;;  %v7808_v27 = vpop.f32.mrf.mxu1  ;;  %v3277_v50 = vunpack.c.l.b16 %v3203_v5  ;;  %v2703_v62 = vshll.u32 %v2415_v20, 16  ;;  %v1854_v58 = vunpack.c.l.b16 %v1780_v48  ;;  %v3206_v5 = vrot.slane %v2415_v20, 5 }
 0x142   : > { %v7806_v29 = vadd.f32 %v7772_v23, %v3032_v38  ;;  %v2677_v23 = vrot.slane %v2676_v2, 4  ;;  %v6763_v38 = vld [vmem:[#allocation2 + $0x84] sm:$0xff]  ;;  %v2692_v13 = vsel %vm7241_vm2, %v2687_v10, %v2691_v56  ;;  %v2699_v22 = vrot.slane %v2697_v18, 5  ;;  %v7003_v18 = vld [vmem:[#allocation2 + $0x8c] sm:$0x1] }
 0x143   : > { %v1959_v44 = vpop.f32.mrf.mxu2  ;;  %v3298_v2 = vpack.c.b16 %v3277_v50, %v3276_v8  ;;  %v7829_v48 = vrot.slane %v2703_v62, 5  ;;  %v1875_v10 = vpack.c.b16 %v1854_v58, %v1853_v43  ;;  %v2851_v8 = vunpack.c.l.b16 %v2692_v13  ;;  %v2416_v50 = vld [vmem:[#allocation2 + $0x98] sm:$0x1]  ;;  %v6810_v58 = vld [vmem:[%s8784_s2 + $0x188] sm:$0xff] }
 0x144   : > { %8802 = vst [vmem:[#allocation8_spill] sm:$0xff] %v7806_v29  ;;  %2995 = vmatmul.bf16.gmra.mxu0 %v2871_v28  ;;  %v2036_v31 = vadd.f32 %v1959_v44, %v7594_v42  ;;  %v2707_v28 = vshrl.u32 %v2415_v20, 16  ;;  %v2682_v11 = vsel %vm7241_vm2, %v2677_v23, %v7802_v39  ;;  %v3074_v39 = vld [vmem:[#allocation2 + $0x90] sm:$0xe]  ;;  %v3208_v20 = vrot.slane %v3206_v5, 4  ;;  %3689 = vmatpush.bf16.msra.mxu2 %v6810_v58  ;;  %v6826_v58 = vld [vmem:[%s8784_s2 + $0x208] sm:$0xff] }
 0x145   : > { %v2850_v56 = vunpack.c.l.b16 %v2682_v11  ;;  %v1786_v62 = vrot.slane %v7003_v18, 5  ;;  %v2713_v57 = vshll.u32 %v2416_v50, 16  ;;  %4797 = vmatpush.bf16.msra.mxu0 %v6826_v58 }
 0x146   : > { %v2351_v45 = vadd.f32 %v2274_v12, %v2036_v31  ;;  %v1783_v12 = vrot.slane %v7002_v19, 5  ;;  %v2696_v31 = vrot.slane %v2694_v53, 4  ;;  %v2709_v41 = vrot.slane %v2707_v28, 4 }
 0x147   : > { %v2276_v61 = vpop.f32.mrf.mxu3  ;;  %v6336_v19 = vrot.slane %v3074_v39, 9  ;;  %v6818_v39 = vld [vmem:[%s8784_s2 + $0x1c8] sm:$0xff] }
 0x148   : > { %v3033_v42 = vadd.f32 %v2956_v9, %v2351_v45  ;;  %v1664_v9 = vld [vmem:[#allocation2 + $0x84] sm:$0xe]  ;;  %v1785_v45 = vrot.slane %v1783_v12, 4  ;;  %v2700_v29 = vor.u32 %v2699_v22, %v2696_v31  ;;  %v2710_v28 = vor.u32 %v2709_v41, %v7829_v48  ;;  %4371 = vmatpush.bf16.msra.mxu3 %v6818_v39 }
 0x149   : > { %v2958_v4 = vpop.f32.mrf.mxu0  ;;  %v7827_v37 = vpop.f32.mrf.mxu1  ;;  %v2715_v41 = vrot.slane %v2713_v57, 5 }
 0x14a   : > { %v7825_v59 = vadd.f32 %v7796_v24, %v3033_v42  ;;  %v6112_v24 = vrot.slane %v1664_v9, 9  ;;  %v2701_v31 = vrot.slane %v2700_v29, 4  ;;  %v2711_v22 = vrot.slane %v2710_v28, 4 }
 0x14b   : > { %v1961_v44 = vpop.f32.mrf.mxu2 }
 0x14c   : > { %8803 = vst [vmem:[#allocation9_spill] sm:$0xff] %v7825_v59  ;;  %v2037_v23 = vadd.f32 %v1961_v44, %v7610_v36  ;;  %2318 = vmatmul.bf16.gmra.mxu3 %v6763_v38  ;;  %3426 = vmatmul.bf16.gmra.mxu1 %v3298_v2  ;;  %v3209_v59 = vrot.slane %v2416_v50, 5  ;;  %v2872_v38 = vpack.c.b16 %v2851_v8, %v2850_v56 }
 0x14d   : > { %v1784_v11 = vsel %vm7549_vm5, %v6112_v24, %v1783_v12  ;;  %v3207_v2 = vsel %vm7549_vm5, %v6336_v19, %v3206_v5  ;;  %v1787_v44 = vsel %vm7549_vm5, %v1785_v45, %v1786_v62  ;;  %v2417_v12 = vld [vmem:[#allocation2 + $0x9c] sm:$0xf]  ;;  %v2706_v57 = vsel %vm7241_vm2, %v2701_v31, %v7829_v48  ;;  %v6764_v45 = vld [vmem:[#allocation2 + $0x90] sm:$0xff]  ;;  %v4948_v48 = vld [vmem:[%s8786_s4] sm:$0xff] }
 0x14e   : > { %v2352_v42 = vadd.f32 %v2276_v61, %v2037_v23  ;;  %v3278_v5 = vunpack.c.l.b16 %v3207_v2  ;;  %v1855_v56 = vunpack.c.l.b16 %v1784_v11  ;;  %v1856_v8 = vunpack.c.l.b16 %v1787_v44  ;;  %v6839_v62 = vld [vmem:[%s8789_s7 + $0x30] sm:$0xff] }
 0x14f   : > { %v2279_v53 = vpop.f32.mrf.mxu3  ;;  %v2718_v50 = vshrl.u32 %v2417_v12, 16  ;;  %v7004_v44 = vld [vmem:[#allocation2 + $0x94] sm:$0xf]  ;;  %5587 = vmatpush.bf16.msra.mxu1 %v6839_v62  ;;  %v7005_v62 = vld [vmem:[#allocation2 + $0x98] sm:$0x1] }
 0x150   : > { %2003 = vmatmul.bf16.gmra.mxu2 %v1875_v10  ;;  %v3034_v36 = vadd.f32 %v2958_v4, %v2352_v42  ;;  %v3210_v4 = vsel %vm7549_vm5, %v3208_v20, %v3209_v59  ;;  %v7853_v10 = vld [vmem:[#allocation2 + $0xa0] sm:$0xf]  ;;  %v2721_v42 = vshll.u32 %v2417_v12, 16  ;;  %v1790_v31 = vrot.slane %v7004_v44, 5 }
 0x151   : > { %v2961_v43 = vpop.f32.mrf.mxu0  ;;  %v7841_v13 = vpop.f32.mrf.mxu1  ;;  %v3279_v23 = vunpack.c.l.b16 %v3210_v4  ;;  %v2727_v19 = vshll.u32 %v7853_v10, 16  ;;  %v2731_v20 = vshrl.u32 %v7853_v10, 16  ;;  %v3213_v11 = vrot.slane %v7853_v10, 5 }
 0x152   : > { %v7837_v61 = vadd.f32 %v7808_v27, %v3034_v36  ;;  %v1876_v36 = vpack.c.b16 %v1856_v8, %v1855_v56  ;;  %v2852_v4 = vunpack.c.l.b16 %v2706_v57  ;;  %v2723_v12 = vrot.slane %v2721_v42, 5 }
 0x153   : > { %v1964_v9 = vpop.f32.mrf.mxu2  ;;  %v3299_v18 = vpack.c.b16 %v3279_v23, %v3278_v5  ;;  %v7878_v39 = vrot.slane %v2727_v19, 5  ;;  %v2733_v5 = vrot.slane %v2731_v20, 4  ;;  %v2419_v23 = vld [vmem:[#allocation2 + $0xa4] sm:$0x1]  ;;  %v3215_v56 = vrot.slane %v3213_v11, 4 }
 0x154   : > { %3000 = vmatmul.bf16.gmra.mxu0 %v2872_v38  ;;  %v2038_v27 = vadd.f32 %v1964_v9, %v7614_v14  ;;  %v2716_v14 = vsel %vm7241_vm2, %v2711_v22, %v2715_v41  ;;  %v2720_v22 = vrot.slane %v2718_v50, 4  ;;  %v3216_v8 = vrot.slane %v2419_v23, 5 }
 0x155   : > { %v2853_v9 = vunpack.c.l.b16 %v2716_v14  ;;  %v2734_v19 = vor.u32 %v2733_v5, %v7878_v39  ;;  %v2737_v20 = vshll.u32 %v2419_v23, 16 }
 0x156   : > { %v2353_v59 = vadd.f32 %v2279_v53, %v2038_v27  ;;  %v1665_v27 = vld [vmem:[#allocation2 + $0x90] sm:$0xe]  ;;  %v2724_v42 = vor.u32 %v2723_v12, %v2720_v22 }
 0x157   : > { %v2281_v29 = vpop.f32.mrf.mxu3  ;;  %v2873_v14 = vpack.c.b16 %v2853_v9, %v2852_v4  ;;  %v6113_v50 = vrot.slane %v1665_v27, 9  ;;  %v2735_v22 = vrot.slane %v2734_v19, 4 }
 0x158   : > { %v3035_v24 = vadd.f32 %v2961_v43, %v2353_v59  ;;  %v7038_v43 = vmov 0   ;;  %v2725_v44 = vrot.slane %v2724_v42, 4  ;;  %v1666_v42 = vld [vmem:[#allocation2 + $0x9c] sm:$0xe] }
 0x159   : > { %v2963_v53 = vpop.f32.mrf.mxu0  ;;  %v7871_v38 = vpop.f32.mrf.mxu1  ;;  %6980 = vset.pattern.permute.xlu0 %v7038_v43  ;;  %6981 = vset.pattern.permute.xlu1 %v7038_v43  ;;  %v1791_v4 = vsel %vm7549_vm5, %v6113_v50, %v1790_v31  ;;  %v6765_v50 = vld [vmem:[#allocation2 + $0x9c] sm:$0xff] }
 0x15a   : > { %v7869_v28 = vadd.f32 %v7827_v37, %v3035_v24  ;;  %4982 = vperm.xlu0 %6980, %v4948_v48   ;;  %v3075_v37 = vld [vmem:[#allocation2 + $0x9c] sm:$0xe]  ;;  %6982 = vset.pattern.permute.xlu2 %v7038_v43  ;;  %v1792_v24 = vrot.slane %v1790_v31, 4 }
 0x15b   : > { %v1966_v2 = vpop.f32.mrf.mxu2  ;;  %v6337_v59 = vrot.slane %v3075_v37, 9  ;;  %v2739_v37 = vrot.slane %v2737_v20, 5 }
 0x15c   : > { %v2039_v41 = vadd.f32 %v1966_v2, %v7636_v55  ;;  %2323 = vmatmul.bf16.gmra.mxu3 %v6764_v45  ;;  %3431 = vmatmul.bf16.gmra.mxu1 %v3299_v18  ;;  %v1793_v55 = vrot.slane %v7005_v62, 5 }
 0x15d   : > { %v3214_v58 = vsel %vm7549_vm5, %v6337_v59, %v3213_v11  ;;  %v1857_v59 = vunpack.c.l.b16 %v1791_v4 }
 0x15e   : > { %v2354_v10 = vadd.f32 %v2281_v29, %v2039_v41  ;;  %v4949_v29 = vld [vmem:[%s8786_s4 + $0x8] sm:$0xff]  ;;  %v1794_v9 = vsel %vm7549_vm5, %v1792_v24, %v1793_v55  ;;  %v3280_v11 = vunpack.c.l.b16 %v3214_v58  ;;  %v7006_v24 = vld [vmem:[#allocation2 + $0xa0] sm:$0xf] }
 0x15f   : > { %v2284_v57 = vpop.f32.mrf.mxu3  ;;  %v7898_v41 = vld [vmem:[#allocation2 + $0xac] sm:$0xf]  ;;  %v1858_v31 = vunpack.c.l.b16 %v1794_v9  ;;  %v1797_v62 = vrot.slane %v7006_v24, 5 }
 0x160   : > { %2008 = vmatmul.bf16.gmra.mxu2 %v1876_v36  ;;  %v3036_v45 = vadd.f32 %v2963_v53, %v2354_v10  ;;  %v3217_v53 = vsel %vm7549_vm5, %v3215_v56, %v3216_v8  ;;  %v2420_v36 = vld [vmem:[#allocation2 + $0xa8] sm:$0xf]  ;;  %v2751_v56 = vshll.u32 %v7898_v41, 16  ;;  %v2755_v8 = vshrl.u32 %v7898_v41, 16 }
 0x161   : > { %v2966_v48 = vpop.f32.mrf.mxu0  ;;  %v7887_v43 = vpop.f32.mrf.mxu1  ;;  %v3281_v27 = vunpack.c.l.b16 %v3217_v53  ;;  %v2742_v12 = vshrl.u32 %v2420_v36, 16  ;;  %v2745_v5 = vshll.u32 %v2420_v36, 16  ;;  %v3220_v53 = vrot.slane %v7898_v41, 5  ;;  %v6929_v36 = vld [vmem:[%s7140_s19 + $0xc0] sm:$0xff]  }
 0x162   : > { %v7885_v18 = vadd.f32 %v7841_v13, %v3036_v45  ;;  %4987 = vperm.xlu0 %6980, %v4949_v29   ;;  %v4954_v29 = vld [vmem:[%s8786_s4 + $0x30] sm:$0xff]  ;;  %v1877_v4 = vpack.c.b16 %v1858_v31, %v1857_v59  ;;  %v7920_v9 = vrot.slane %v2751_v56, 5  ;;  %v525_v59 = vld [vmem:[%s7140_s19 + $0xc8] sm:$0x1] }
 0x163   : > { %v1969_v2 = vpop.f32.mrf.mxu2  ;;  %v3300_v45 = vpack.c.b16 %v3281_v27, %v3280_v11  ;;  %v2744_v19 = vrot.slane %v2742_v12, 4  ;;  %v2747_v20 = vrot.slane %v2745_v5, 5  ;;  %v6114_v11 = vrot.slane %v1666_v42, 9  ;;  %v2422_v27 = vld [vmem:[#allocation2 + $0xb0] sm:$0x1] }
 0x164   : > { %3005 = vmatmul.bf16.gmra.mxu0 %v2873_v14  ;;  %v2040_v13 = vadd.f32 %v1969_v2, %v7643_v40  ;;  %v2730_v40 = vsel %vm7241_vm2, %v2725_v44, %v7878_v39  ;;  %v3076_v44 = vld [vmem:[#allocation2 + $0xa8] sm:$0xe]  ;;  %v1799_v12 = vrot.slane %v1797_v62, 4  ;;  %v7007_v5 = vld [vmem:[#allocation2 + $0xa4] sm:$0x1]  ;;  %v3222_v24 = vrot.slane %v3220_v53, 4 }
 0x165   : > { %v1800_v41 = vrot.slane %v7007_v5, 5  ;;  %v6338_v56 = vrot.slane %v3076_v44, 9  ;;  %v584_v42 = vunpack.c.l.bf16 %v525_v59 }
 0x166   : > { %v2355_v23 = vadd.f32 %v2284_v57, %v2040_v13  ;;  %v2740_v57 = vsel %vm7241_vm2, %v2735_v22, %v2739_v37  ;;  %v2757_v13 = vrot.slane %v2755_v8, 4  ;;  %v2854_v37 = vunpack.c.l.b16 %v2730_v40 }
 0x167   : > { %v2286_v10 = vpop.f32.mrf.mxu3  ;;  %v3223_v8 = vrot.slane %v2422_v27, 5  ;;  %v3221_v44 = vsel %vm7549_vm5, %v6338_v56, %v3220_v53  ;;  %v6817_v53 = vld [vmem:[%s8784_s2 + $0x1c0] sm:$0xff]  ;;  %v7954_v56 = vld [vmem:[#allocation2 + $0xb8] sm:$0xf] }
 0x168   : > { %v3037_v14 = vadd.f32 %v2966_v48, %v2355_v23  ;;  %v4950_v48 = vld [vmem:[%s8786_s4 + $0x10] sm:$0xff]  ;;  %v2748_v23 = vor.u32 %v2747_v20, %v2744_v19  ;;  %v1798_v19 = vsel %vm7549_vm5, %v6114_v11, %v1797_v62  ;;  %v6809_v20 = vld [vmem:[%s8784_s2 + $0x180] sm:$0xff]  ;;  %v3282_v59 = vunpack.c.l.b16 %v3221_v44  ;;  %4372 = vmatpush.bf16.msra.mxu3 %v6817_v53 }
 0x169   : > { %v2968_v55 = vpop.f32.mrf.mxu0  ;;  %v7916_v58 = vpop.f32.mrf.mxu1  ;;  %4992 = vperm.xlu1 %6981, %v4950_v48   ;;  %3690 = vmatpush.bf16.msra.mxu2 %v6809_v20  ;;  %v6838_v20 = vld [vmem:[%s8789_s7 + $0x28] sm:$0xff]  ;;  %v6825_v44 = vld [vmem:[%s8784_s2 + $0x200] sm:$0xff] }
 0x16a   : > { %v7914_v39 = vadd.f32 %v7871_v38, %v3037_v14  ;;  %5012 = vperm.xlu0 %6980, %v4954_v29   ;;  %v2855_v38 = vunpack.c.l.b16 %v2740_v57  ;;  %v6875_v14 = vunpack.c.l.bf16 %v6929_v36  ;;  %v2758_v29 = vor.u32 %v2757_v13, %v7920_v9  ;;  %5588 = vmatpush.bf16.msra.mxu1 %v6838_v20  ;;  %v7009_v20 = vld [vmem:[#allocation2 + $0xb0] sm:$0x1] }
 0x16b   : > { %v1971_v2 = vpop.f32.mrf.mxu2  ;;  %v2749_v11 = vrot.slane %v2748_v23, 4  ;;  %4798 = vmatpush.bf16.msra.mxu0 %v6825_v44 }
 0x16c   : > { %v2041_v22 = vadd.f32 %v1971_v2, %v7659_v21  ;;  %2328 = vmatmul.bf16.gmra.mxu3 %v6765_v50  ;;  %3436 = vmatmul.bf16.gmra.mxu1 %v3300_v45  ;;  %v2761_v21 = vshll.u32 %v2422_v27, 16  ;;  %v6876_v50 = vunpack.c.h.bf16 %v6929_v36  ;;  %v637_v40 = vmul.f32 %v6875_v14, %v7155_v25  ;;  %v4951_v36 = vld [vmem:[%s8786_s4 + $0x18] sm:$0xff] }
 0x16d   : > { %v2874_v45 = vpack.c.b16 %v2855_v38, %v2854_v37  ;;  %v639_v37 = vmul.f32 %v7155_v25, %v584_v42  ;;  %v2759_v27 = vrot.slane %v2758_v29, 4  ;;  %v2775_v42 = vshll.u32 %v7954_v56, 16 }
 0x16e   : > { %v2356_v31 = vadd.f32 %v2286_v10, %v2041_v22  ;;  %v1801_v10 = vsel %vm7549_vm5, %v1799_v12, %v1800_v41  ;;  %v3224_v22 = vsel %vm7549_vm5, %v3222_v24, %v3223_v8  ;;  %v2763_v12 = vrot.slane %v2761_v21, 5  ;;  %v2423_v41 = vld [vmem:[#allocation2 + $0xb4] sm:$0xf] }
 0x16f   : > { %v2289_v48 = vpop.f32.mrf.mxu3  ;;  %v693_v14 = vpack.c.bf16 %v639_v37, %v639_v37  ;;  %v1859_v24 = vunpack.c.l.b16 %v1798_v19  ;;  %v1860_v8 = vunpack.c.l.b16 %v1801_v10 }
 0x170   : > { %2013 = vmatmul.bf16.gmra.mxu2 %v1877_v4  ;;  %v3038_v57 = vadd.f32 %v2968_v55, %v2356_v31  ;;  %v4957_v55 = vld [vmem:[%s8786_s4 + $0x48] sm:$0xff]  ;;  %v638_v4 = vmul.f32 %v6876_v50, %v7155_v25  ;;  %v3283_v31 = vunpack.c.l.b16 %v3224_v22  ;;  %v2764_v21 = vsel %vm7241_vm2, %v2759_v27, %v2763_v12 }
 0x171   : > { %v2971_v2 = vpop.f32.mrf.mxu0  ;;  %v7943_v62 = vpop.f32.mrf.mxu1  ;;  %4997 = vperm.xlu1 %6981, %v4951_v36   ;;  %747 = vst [vmem:[#allocation2 + $0xc8] sm:$0x1] %v693_v14  ;;  %v2766_v50 = vshrl.u32 %v2423_v41, 16  ;;  %v3227_v22 = vrot.slane %v7954_v56, 5  ;;  %v7008_v27 = vld [vmem:[#allocation2 + $0xac] sm:$0xf] }
 0x172   : > { %v7941_v13 = vadd.f32 %v7887_v43, %v3038_v57  ;;  %5027 = vperm.xlu0 %6980, %v4957_v55   ;;  %v6920_v5 = vpack.c.bf16 %v638_v4, %v637_v40  ;;  %v6766_v57 = vld [vmem:[#allocation2 + $0xa8] sm:$0xff]  ;;  %v3301_v10 = vpack.c.b16 %v3283_v31, %v3282_v59  ;;  %v1878_v55 = vpack.c.b16 %v1860_v8, %v1859_v24  ;;  %v2425_v31 = vld [vmem:[#allocation2 + $0xbc] sm:$0x1] }
 0x173   : > { %v1974_v38 = vpop.f32.mrf.mxu2  ;;  %v1804_v12 = vrot.slane %v7008_v27, 5  ;;  %v7982_v14 = vrot.slane %v2775_v42, 5  ;;  %v3229_v24 = vrot.slane %v3227_v22, 4  ;;  %v3230_v8 = vrot.slane %v2425_v31, 5 }
 0x174   : > { %3010 = vmatmul.bf16.gmra.mxu0 %v2874_v45  ;;  %v2042_v43 = vadd.f32 %v1974_v38, %v7665_v54  ;;  %6937 = vst [vmem:[#allocation2 + $0xc0] sm:$0xff] %v6920_v5   ;;  %v2754_v54 = vsel %vm7241_vm2, %v2749_v11, %v7920_v9  ;;  %v2769_v45 = vshll.u32 %v2423_v41, 16  ;;  %v4955_v9 = vld [vmem:[%s8786_s4 + $0x38] sm:$0xff]  ;;  %v2857_v11 = vunpack.c.l.b16 %v2764_v21  ;;  %v1667_v41 = vld [vmem:[#allocation2 + $0xa8] sm:$0xe] }
 0x175   : > { %v2856_v38 = vunpack.c.l.b16 %v2754_v54  ;;  %v2768_v5 = vrot.slane %v2766_v50, 4  ;;  %v6115_v50 = vrot.slane %v1667_v41, 9  ;;  %v2785_v42 = vshll.u32 %v2425_v31, 16 }
 0x176   : > { %v2357_v23 = vadd.f32 %v2289_v48, %v2042_v43  ;;  %v2779_v48 = vshrl.u32 %v7954_v56, 16  ;;  %v2771_v53 = vrot.slane %v2769_v45, 5 }
 0x177   : > { %v2291_v29 = vpop.f32.mrf.mxu3  ;;  %v2875_v21 = vpack.c.b16 %v2857_v11, %v2856_v38  ;;  %v1805_v38 = vsel %vm7549_vm5, %v6115_v50, %v1804_v12  ;;  %v6767_v50 = vld [vmem:[#allocation2 + $0xb4] sm:$0xff] }
 0x178   : > { %v3039_v40 = vadd.f32 %v2971_v2, %v2357_v23  ;;  %v4960_v2 = vld [vmem:[%s8786_s4 + $0x60] sm:$0xff]  ;;  %v2781_v59 = vrot.slane %v2779_v48, 4 }
 0x179   : > { %v2973_v19 = vpop.f32.mrf.mxu0  ;;  %v7975_v4 = vpop.f32.mrf.mxu1  ;;  %5017 = vperm.xlu1 %6981, %v4955_v9   ;;  %v1807_v9 = vrot.slane %v7009_v20, 5 }
 0x17a   : > { %v7973_v36 = vadd.f32 %v7916_v58, %v3039_v40  ;;  %5042 = vperm.xlu0 %6980, %v4960_v2   ;;  %v3077_v58 = vld [vmem:[#allocation2 + $0xb4] sm:$0xe]  ;;  %v1806_v40 = vrot.slane %v1804_v12, 4  ;;  %v2782_v45 = vor.u32 %v2781_v59, %v7982_v14 }
 0x17b   : > { %v1976_v37 = vpop.f32.mrf.mxu2  ;;  %v6339_v23 = vrot.slane %v3077_v58, 9  ;;  %v2426_v44 = vld [vmem:[#allocation2 + $0xc0] sm:$0xf] }
 0x17c   : > { %v2043_v43 = vadd.f32 %v1976_v37, %v7687_v7  ;;  %2333 = vmatmul.bf16.gmra.mxu3 %v6766_v57  ;;  %3441 = vmatmul.bf16.gmra.mxu1 %v3301_v10  ;;  %v2772_v57 = vor.u32 %v2771_v53, %v2768_v5  ;;  %v4963_v10 = vld [vmem:[%s8786_s4 + $0x78] sm:$0xff]  ;;  %v1808_v11 = vsel %vm7549_vm5, %v1806_v40, %v1807_v9  ;;  %v2783_v58 = vrot.slane %v2782_v45, 4 }
 0x17d   : > { %v2790_v59 = vshrl.u32 %v2426_v44, 16  ;;  %v2793_v31 = vshll.u32 %v2426_v44, 16  ;;  %v1862_v40 = vunpack.c.l.b16 %v1808_v11  ;;  %v3078_v11 = vld [vmem:[#allocation2 + $0xc0] sm:$0xe] }
 0x17e   : > { %v2358_v56 = vadd.f32 %v2291_v29, %v2043_v43  ;;  %v4958_v29 = vld [vmem:[%s8786_s4 + $0x50] sm:$0xff]  ;;  %v2773_v5 = vrot.slane %v2772_v57, 4  ;;  %v2787_v43 = vrot.slane %v2785_v42, 5  ;;  %v4961_v42 = vld [vmem:[%s8786_s4 + $0x68] sm:$0xff] }
 0x17f   : > { %v2294_v54 = vpop.f32.mrf.mxu3  ;;  %v2792_v45 = vrot.slane %v2790_v59, 4 }
 0x180   : > { %2018 = vmatmul.bf16.gmra.mxu2 %v1878_v55  ;;  %v7984_v7 = vadd.f32 %v2973_v19, %v2358_v56  ;;  %v3228_v55 = vsel %vm7549_vm5, %v6339_v23, %v3227_v22  ;;  %v3231_v19 = vsel %vm7549_vm5, %v3229_v24, %v3230_v8  ;;  %v8004_v22 = vld [vmem:[#allocation2 + $0xc4] sm:$0xf]  ;;  %v2788_v9 = vsel %vm7241_vm2, %v2783_v58, %v2787_v43  ;;  %v8028_v43 = vld [vmem:[#allocation2 + $0x1c] sm:$0xf] }
 0x181   : > { %v2976_v48 = vpop.f32.mrf.mxu0  ;;  %v7993_v2 = vpop.f32.mrf.mxu1  ;;  %5032 = vperm.xlu1 %6981, %v4958_v29   ;;  %v3284_v41 = vunpack.c.l.b16 %v3228_v55  ;;  %v3285_v53 = vunpack.c.l.b16 %v3231_v19  ;;  %v2799_v12 = vshll.u32 %v8004_v22, 16  ;;  %v2803_v24 = vshrl.u32 %v8004_v22, 16  ;;  %v3804_v19 = vld [vmem:[#allocation2 + $0x18] sm:$0xf] }
 0x182   : > { %8804 = vst [vmem:[#allocation10_spill] sm:$0xff] %v7993_v2  ;;  %5057 = vperm.xlu0 %6980, %v4963_v10   ;;  %v3234_v55 = vrot.slane %v8004_v22, 5  ;;  %v8048_v2 = vld [vmem:[#allocation2 + $0x20] sm:$0x1] }
 0x183   : > { %v1979_v37 = vpop.f32.mrf.mxu2  ;;  %v3302_v57 = vpack.c.b16 %v3285_v53, %v3284_v41  ;;  %v7010_v41 = vld [vmem:[#allocation2 + $0xb8] sm:$0xf] }
 0x184   : > { %3015 = vmatmul.bf16.gmra.mxu0 %v2875_v21  ;;  %v2044_v27 = vadd.f32 %v1979_v37, %v7696_v30  ;;  %v1861_v21 = vunpack.c.l.b16 %v1805_v38  ;;  %v2778_v30 = vsel %vm7241_vm2, %v2773_v5, %v7982_v14  ;;  %v2428_v14 = vld [vmem:[#allocation2 + $0xc8] sm:$0x1]  ;;  %v8025_v37 = vrot.slane %v2799_v12, 5  ;;  %v1668_v12 = vld [vmem:[#allocation2 + $0xb4] sm:$0xe] }
 0x185   : > { %v2805_v38 = vrot.slane %v2803_v24, 4  ;;  %v2858_v58 = vunpack.c.l.b16 %v2778_v30  ;;  %v1811_v53 = vrot.slane %v7010_v41, 5  ;;  %v2809_v22 = vshll.u32 %v2428_v14, 16 }
 0x186   : > { %v2359_v56 = vadd.f32 %v2294_v54, %v2044_v27  ;;  %v2795_v54 = vrot.slane %v2793_v31, 5  ;;  %v1879_v5 = vpack.c.b16 %v1862_v40, %v1861_v21  ;;  %v3853_v31 = vshrl.u32 %v3804_v19, 16 }
 0x187   : > { %v2296_v23 = vpop.f32.mrf.mxu3  ;;  %v3236_v24 = vrot.slane %v3234_v55, 4  ;;  %v3862_v21 = vshll.u32 %v8028_v43, 16  ;;  %v3866_v40 = vshrl.u32 %v8028_v43, 16 }
 0x188   : > { %v3041_v8 = vadd.f32 %v2976_v48, %v2359_v56  ;;  %v4966_v48 = vld [vmem:[%s8786_s4 + $0x90] sm:$0xff]  ;;  %v2796_v59 = vor.u32 %v2795_v54, %v2792_v45  ;;  %v6116_v45 = vrot.slane %v1668_v12, 9  ;;  %v1813_v54 = vrot.slane %v1811_v53, 4 }
 0x189   : > { %v2978_v20 = vpop.f32.mrf.mxu0  ;;  %v8022_v10 = vpop.f32.mrf.mxu1  ;;  %5047 = vperm.xlu1 %6981, %v4961_v42   ;;  %v3237_v42 = vrot.slane %v2428_v14, 5  ;;  %v4964_v14 = vld [vmem:[%s8786_s4 + $0x80] sm:$0xff]  ;;  %v3868_v12 = vrot.slane %v3866_v40, 4  ;;  %v3872_v40 = vshll.u32 %v8048_v2, 16 }
 0x18a   : > { %v8020_v29 = vadd.f32 %v7975_v4, %v3041_v8  ;;  %5072 = vperm.xlu0 %6980, %v4966_v48   ;;  %v2859_v4 = vunpack.c.l.b16 %v2788_v9  ;;  %v6340_v8 = vrot.slane %v3078_v11, 9  ;;  %v2811_v11 = vrot.slane %v2809_v22, 5 }
 0x18b   : > { %v1981_v44 = vpop.f32.mrf.mxu2 }
 0x18c   : > { %v2045_v27 = vadd.f32 %v1981_v44, %v7712_v63  ;;  %2338 = vmatmul.bf16.gmra.mxu3 %v6767_v50  ;;  %3446 = vmatmul.bf16.gmra.mxu1 %v3302_v57  ;;  %v2806_v63 = vor.u32 %v2805_v38, %v8025_v37  ;;  %v3856_v50 = vshll.u32 %v3804_v19, 16  ;;  %v2876_v9 = vpack.c.b16 %v2859_v4, %v2858_v58  ;;  %v4969_v19 = vld [vmem:[%s8786_s4 + $0xa8] sm:$0xff] }
 0x18d   : > { %v3855_v58 = vrot.slane %v3853_v31, 4 }
 0x18e   : > { %v2360_v56 = vadd.f32 %v2296_v23, %v2045_v27  ;;  %v7011_v23 = vld [vmem:[#allocation2 + $0xbc] sm:$0x1]  ;;  %v2797_v27 = vrot.slane %v2796_v59, 4  ;;  %v2807_v41 = vrot.slane %v2806_v63, 4  ;;  %v3858_v22 = vrot.slane %v3856_v50, 5 }
 0x18f   : > { %v2299_v48 = vpop.f32.mrf.mxu3  ;;  %v1814_v44 = vrot.slane %v7011_v23, 5  ;;  %v1812_v59 = vsel %vm7549_vm5, %v6116_v45, %v1811_v53  ;;  %v6768_v53 = vld [vmem:[#allocation2 + $0xc0] sm:$0xff] }
 0x190   : > { %2023 = vmatmul.bf16.gmra.mxu2 %v1879_v5  ;;  %v8033_v30 = vadd.f32 %v2978_v20, %v2360_v56  ;;  %v3235_v20 = vsel %vm7549_vm5, %v6340_v8, %v3234_v55  ;;  %v3238_v5 = vsel %vm7549_vm5, %v3236_v24, %v3237_v42  ;;  %v3864_v56 = vrot.slane %v3862_v21, 5 }
 0x191   : > { %v2981_v57 = vpop.f32.mrf.mxu0  ;;  %v8041_v38 = vpop.f32.mrf.mxu1  ;;  %5062 = vperm.xlu1 %6981, %v4964_v14   ;;  %v1815_v55 = vsel %vm7549_vm5, %v1813_v54, %v1814_v44  ;;  %v3286_v8 = vunpack.c.l.b16 %v3235_v20  ;;  %v3287_v31 = vunpack.c.l.b16 %v3238_v5  ;;  %v2802_v42 = vsel %vm7241_vm2, %v2797_v27, %v8025_v37  ;;  %v4952_v37 = vld [vmem:[%s8786_s4 + $0x20] sm:$0xff] }
 0x192   : > { %5087 = vperm.xlu0 %6980, %v4969_v19   ;;  %v2812_v50 = vsel %vm7241_vm2, %v2807_v41, %v2811_v11  ;;  %v3869_v21 = vor.u32 %v3868_v12, %v3864_v56  ;;  %v1863_v45 = vunpack.c.l.b16 %v1812_v59  ;;  %v1864_v14 = vunpack.c.l.b16 %v1815_v55  ;;  %v4967_v11 = vld [vmem:[%s8786_s4 + $0x98] sm:$0xff]  ;;  %5002 = vperm.xlu2 %6982, %v4952_v37   ;;  %v4972_v5 = vld [vmem:[%s8786_s4 + $0xc0] sm:$0xff]  ;;  %v8078_v59 = vld [vmem:[#allocation2 + $0x28] sm:$0xf] }
 0x193   : > { %v1984_v4 = vpop.f32.mrf.mxu2  ;;  %v3303_v44 = vpack.c.b16 %v3287_v31, %v3286_v8  ;;  %v2861_v27 = vunpack.c.l.b16 %v2812_v50  ;;  %v4552_v50 = vrot.slane %v8028_v43, 5  ;;  %v4975_v43 = vld [vmem:[%s8786_s4 + $0xd8] sm:$0xff] }
 0x194   : > { %3020 = vmatmul.bf16.gmra.mxu0 %v2876_v9  ;;  %v2046_v23 = vadd.f32 %v1984_v4, %v7721_v32  ;;  %v3859_v32 = vor.u32 %v3858_v22, %v3855_v58  ;;  %v3870_v41 = vrot.slane %v3869_v21, 4  ;;  %v3874_v22 = vrot.slane %v3872_v40, 5  ;;  %v4486_v21 = vld [vmem:[#allocation2 + $0x18] sm:$0xe] }
 0x195   : > { %v6549_v37 = vrot.slane %v4486_v21, 9  ;;  %v4956_v21 = vld [vmem:[%s8786_s4 + $0x40] sm:$0xff] }
 0x196   : > { %v2361_v24 = vadd.f32 %v2299_v48, %v2046_v23  ;;  %v6837_v48 = vld [vmem:[%s8789_s7 + $0x20] sm:$0xff]  ;;  %v3860_v4 = vrot.slane %v3859_v32, 4 }
 0x197   : > { %v2301_v63 = vpop.f32.mrf.mxu3  ;;  %5589 = vmatpush.bf16.msra.mxu1 %v6837_v48  ;;  %v3807_v23 = vld [vmem:[#allocation2 + $0x24] sm:$0xf] }
 0x198   : > { %v3043_v9 = vadd.f32 %v2981_v57, %v2361_v24  ;;  %v2860_v57 = vunpack.c.l.b16 %v2802_v42  ;;  %v3865_v24 = vsel %vm7241_vm2, %v3860_v4, %v3864_v56  ;;  %v3875_v42 = vsel %vm7241_vm2, %v3870_v41, %v3874_v22  ;;  %v4953_v56 = vld [vmem:[%s8786_s4 + $0x28] sm:$0xff] }
 0x199   : > { %v2983_v54 = vpop.f32.mrf.mxu0  ;;  %v8072_v20 = vpop.f32.mrf.mxu1  ;;  %5077 = vperm.xlu1 %6981, %v4967_v11   ;;  %v3877_v32 = vshrl.u32 %v3807_v23, 16  ;;  %v3880_v40 = vshll.u32 %v3807_v23, 16  ;;  %v4554_v11 = vrot.slane %v4552_v50, 4  ;;  %v8102_v22 = vld [vmem:[#allocation2 + $0x2c] sm:$0x1] }
 0x19a   : > { %v8070_v19 = vadd.f32 %v8022_v10, %v3043_v9  ;;  %5102 = vperm.xlu0 %6980, %v4972_v5   ;;  %v1880_v10 = vpack.c.b16 %v1864_v14, %v1863_v45  ;;  %v2877_v8 = vpack.c.b16 %v2861_v27, %v2860_v57  ;;  %v3886_v9 = vshll.u32 %v8078_v59, 16  ;;  %v4970_v45 = vld [vmem:[%s8786_s4 + $0xb0] sm:$0xff]  ;;  %5007 = vperm.xlu2 %6982, %v4953_v56  }
 0x19b   : > { %v1986_v58 = vpop.f32.mrf.mxu2  ;;  %v4253_v14 = vunpack.c.l.b16 %v3865_v24  ;;  %v4555_v57 = vrot.slane %v8048_v2, 5  ;;  %v3879_v27 = vrot.slane %v3877_v32, 4 }
 0x19c   : > { %v2047_v12 = vadd.f32 %v1986_v58, %v7740_v3  ;;  %2343 = vmatmul.bf16.gmra.mxu3 %v6768_v53  ;;  %3451 = vmatmul.bf16.gmra.mxu1 %v3303_v44  ;;  %v3882_v58 = vrot.slane %v3880_v40, 5  ;;  %v3888_v4 = vrot.slane %v3886_v9, 5 }
 0x19d   : > { %v4556_v24 = vsel %vm7549_vm5, %v4554_v11, %v4555_v57  ;;  %v3810_v11 = vld [vmem:[#allocation2 + $0x30] sm:$0xf]  ;;  %v8122_v57 = vld [vmem:[#allocation2 + $0x34] sm:$0xf] }
 0x19e   : > { %v2362_v55 = vadd.f32 %v2301_v63, %v2047_v12  ;;  %v3890_v63 = vshrl.u32 %v8078_v59, 16  ;;  %v4680_v56 = vunpack.c.l.b16 %v4556_v24  ;;  %v3910_v24 = vshll.u32 %v8122_v57, 16 }
 0x19f   : > { %v2304_v31 = vpop.f32.mrf.mxu3 }
 0x1a0   : > { %2028 = vmatmul.bf16.gmra.mxu2 %v1880_v10  ;;  %v8085_v3 = vadd.f32 %v2983_v54, %v2362_v55  ;;  %v4254_v54 = vunpack.c.l.b16 %v3875_v42  ;;  %v3892_v41 = vrot.slane %v3890_v63, 4  ;;  %v4553_v55 = vsel %vm7549_vm5, %v6549_v37, %v4552_v50  ;;  %v4978_v50 = vld [vmem:[%s8786_s4 + $0xf0] sm:$0xff] }
 0x1a1   : > { %v2986_v53 = vpop.f32.mrf.mxu0  ;;  %v8098_v44 = vpop.f32.mrf.mxu1  ;;  %5092 = vperm.xlu1 %6981, %v4970_v45   ;;  %v3883_v42 = vor.u32 %v3882_v58, %v3879_v27 }
 0x1a2   : > { %5117 = vperm.xlu0 %6980, %v4975_v43   ;;  %v4285_v23 = vpack.c.b16 %v4254_v54, %v4253_v14  ;;  %v3893_v32 = vor.u32 %v3892_v41, %v3888_v4  ;;  %5022 = vperm.xlu2 %6982, %v4956_v21   ;;  %v6793_v43 = vld [vmem:[#allocation2 + $0x18] sm:$0xff]  ;;  %v4487_v41 = vld [vmem:[#allocation2 + $0x24] sm:$0xe] }
 0x1a3   : > { %v1989_v48 = vpop.f32.mrf.mxu2  ;;  %v3884_v14 = vrot.slane %v3883_v42, 4  ;;  %v4959_v42 = vld [vmem:[%s8786_s4 + $0x58] sm:$0xff] }
 0x1a4   : > { %3025 = vmatmul.bf16.gmra.mxu0 %v2877_v8  ;;  %v2048_v5 = vadd.f32 %v1989_v48, %v7747_v33  ;;  %v3896_v8 = vshll.u32 %v8102_v22, 16  ;;  %v3894_v54 = vrot.slane %v3893_v32, 4 }
 0x1a5   : > { %v3889_v58 = vsel %vm7241_vm2, %v3884_v14, %v3888_v4  ;;  %v4976_v4 = vld [vmem:[%s8786_s4 + $0xe0] sm:$0xff] }
 0x1a6   : > { %v2363_v12 = vadd.f32 %v2304_v31, %v2048_v5  ;;  %v4973_v31 = vld [vmem:[%s8786_s4 + $0xc8] sm:$0xff]  ;;  %v3898_v48 = vrot.slane %v3896_v8, 5  ;;  %v4255_v8 = vunpack.c.l.b16 %v3889_v58 }
 0x1a7   : > { %v2306_v10 = vpop.f32.mrf.mxu3 }
 0x1a8   : > { %v3045_v2 = vadd.f32 %v2986_v53, %v2363_v12  ;;  %v4679_v53 = vunpack.c.l.b16 %v4553_v55  ;;  %v4559_v12 = vrot.slane %v8078_v59, 5  ;;  %v3901_v55 = vshrl.u32 %v3810_v11, 16 }
 0x1a9   : > { %v2988_v33 = vpop.f32.mrf.mxu0  ;;  %v3417_v9 = vpop.f32.mrf.mxu1  ;;  %5107 = vperm.xlu1 %6981, %v4973_v31   ;;  %v6550_v31 = vrot.slane %v4487_v41, 9 }
 0x1aa   : > { %v8119_v40 = vadd.f32 %v8072_v20, %v3045_v2  ;;  %5132 = vperm.xlu0 %6980, %v4978_v50   ;;  %v4711_v27 = vpack.c.b16 %v4680_v56, %v4679_v53  ;;  %v3914_v2 = vshrl.u32 %v8122_v57, 16  ;;  %5037 = vperm.xlu2 %6982, %v4959_v42   ;;  %v4561_v50 = vrot.slane %v4559_v12, 4  ;;  %v6794_v42 = vld [vmem:[#allocation2 + $0x24] sm:$0xff] }
 0x1ab   : > { %v1991_v63 = vpop.f32.mrf.mxu2  ;;  %v3903_v53 = vrot.slane %v3901_v55, 4 }
 0x1ac   : > { %v2049_v45 = vadd.f32 %v1991_v63, %v7763_v26  ;;  %4373 = vmatmul.bf16.vlgmr.msra.gmra.mxu3 %v4285_v23  ;;  %v3899_v26 = vsel %vm7241_vm2, %v3894_v54, %v3898_v48  ;;  %v4562_v63 = vrot.slane %v8102_v22, 5  ;;  %v8149_v54 = vld [vmem:[#allocation2 + $0x38] sm:$0x1] }
 0x1ad   : > { %v3920_v41 = vshll.u32 %v8149_v54, 16 }
 0x1ae   : > { %v2364_v37 = vadd.f32 %v2306_v10, %v2049_v45  ;;  %v3904_v10 = vshll.u32 %v3810_v11, 16  ;;  %v3912_v45 = vrot.slane %v3910_v24, 5  ;;  %v4563_v22 = vsel %vm7549_vm5, %v4561_v50, %v4562_v63 }
 0x1af   : > { %v2309_v20 = vpop.f32.mrf.mxu3  ;;  %v3922_v50 = vrot.slane %v3920_v41, 5 }
 0x1b0   : > { %3691 = vmatmul.bf16.vlgmr.msra.gmra.mxu2 %v6793_v43  ;;  %v8124_v5 = vadd.f32 %v2988_v33, %v2364_v37  ;;  %v4256_v33 = vunpack.c.l.b16 %v3899_v26  ;;  %v3906_v56 = vrot.slane %v3904_v10, 5  ;;  %v3916_v43 = vrot.slane %v3914_v2, 4 }
 0x1b1   : > { %v2991_v23 = vpop.f32.mrf.mxu0  ;;  %v8139_v32 = vpop.f32.mrf.mxu1  ;;  %5122 = vperm.xlu1 %6981, %v4976_v4  }
 0x1b2   : > { %v4286_v11 = vpack.c.b16 %v4256_v33, %v4255_v8  ;;  %v3907_v58 = vor.u32 %v3906_v56, %v3903_v53  ;;  %v3917_v26 = vor.u32 %v3916_v43, %v3912_v45  ;;  %v3813_v8 = vld [vmem:[#allocation2 + $0x3c] sm:$0xf]  ;;  %v8168_v33 = vld [vmem:[#allocation2 + $0x40] sm:$0xf]  ;;  %v4488_v56 = vld [vmem:[#allocation2 + $0x30] sm:$0xe] }
 0x1b3   : > { %v1994_v59 = vpop.f32.mrf.mxu2  ;;  %v3925_v43 = vshrl.u32 %v3813_v8, 16  ;;  %v6551_v41 = vrot.slane %v4488_v56, 9 }
 0x1b4   : > { %4799 = vmatmul.bf16.vlgmr.msra.gmra.mxu0 %v4711_v27  ;;  %v2050_v21 = vadd.f32 %v1994_v59, %v7574_v15  ;;  %v4560_v15 = vsel %vm7549_vm5, %v6550_v31, %v4559_v12  ;;  %v4979_v12 = vld [vmem:[%s8786_s4 + $0xf8] sm:$0xff]  ;;  %v4682_v59 = vunpack.c.l.b16 %v4563_v22  ;;  %v3918_v31 = vrot.slane %v3917_v26, 4 }
 0x1b5   : > { %v4681_v4 = vunpack.c.l.b16 %v4560_v15 }
 0x1b6   : > { %v2365_v14 = vadd.f32 %v2309_v20, %v2050_v21  ;;  %v6836_v20 = vld [vmem:[%s8789_s7 + $0x18] sm:$0xff]  ;;  %v3908_v21 = vrot.slane %v3907_v58, 4 }
 0x1b7   : > { %v2311_v48 = vpop.f32.mrf.mxu3  ;;  %5590 = vmatpush.bf16.msra.mxu1 %v6836_v20  ;;  %v4712_v15 = vpack.c.b16 %v4682_v59, %v4681_v4 }
 0x1b8   : > { %v3047_v37 = vadd.f32 %v2991_v23, %v2365_v14  ;;  %v4962_v23 = vld [vmem:[%s8786_s4 + $0x70] sm:$0xff]  ;;  %v3928_v14 = vshll.u32 %v3813_v8, 16  ;;  %v3913_v58 = vsel %vm7241_vm2, %v3908_v21, %v3912_v45  ;;  %v3815_v8 = vld [vmem:[#allocation2 + $0x44] sm:$0x1] }
 0x1b9   : > { %v2993_v27 = vpop.f32.mrf.mxu0  ;;  %v3422_v10 = vpop.f32.mrf.mxu1  ;;  %5052 = vperm.xlu2 %6982, %v4962_v23   ;;  %5137 = vperm.xlu1 %6981, %v4979_v12   ;;  %v4569_v23 = vrot.slane %v8149_v54, 5  ;;  %v3927_v12 = vrot.slane %v3925_v43, 4  ;;  %v4257_v4 = vunpack.c.l.b16 %v3913_v58  ;;  %v3944_v43 = vshll.u32 %v3815_v8, 16 }
 0x1ba   : > { %v8165_v55 = vadd.f32 %v3417_v9, %v3047_v37  ;;  %v4566_v9 = vrot.slane %v8122_v57, 5  ;;  %v3934_v37 = vshll.u32 %v8168_v33, 16  ;;  %v4965_v57 = vld [vmem:[%s8786_s4 + $0x88] sm:$0xff] }
 0x1bb   : > { %v1996_v24 = vpop.f32.mrf.mxu2 }
 0x1bc   : > { %v2051_v2 = vadd.f32 %v1996_v24, %v7592_v46  ;;  %4378 = vmatmul.bf16.gmra.mxu3 %v4286_v11  ;;  %v3938_v46 = vshrl.u32 %v8168_v33, 16  ;;  %v4568_v20 = vrot.slane %v4566_v9, 4  ;;  %v3930_v24 = vrot.slane %v3928_v14, 5 }
 0x1be   : > { %v2366_v63 = vadd.f32 %v2311_v48, %v2051_v2  ;;  %v3923_v48 = vsel %vm7241_vm2, %v3918_v31, %v3922_v50  ;;  %v3936_v2 = vrot.slane %v3934_v37, 5  ;;  %v4567_v31 = vsel %vm7549_vm5, %v6551_v41, %v4566_v9 }
 0x1bf   : > { %v2314_v53 = vpop.f32.mrf.mxu3  ;;  %v4258_v59 = vunpack.c.l.b16 %v3923_v48  ;;  %v4570_v54 = vsel %vm7549_vm5, %v4568_v20, %v4569_v23  ;;  %v3946_v20 = vrot.slane %v3944_v43, 5 }
 0x1c0   : > { %3696 = vmatmul.bf16.gmra.mxu2 %v6794_v42  ;;  %v8173_v11 = vadd.f32 %v2993_v27, %v2366_v63  ;;  %v3940_v42 = vrot.slane %v3938_v46, 4  ;;  %v3931_v63 = vor.u32 %v3930_v24, %v3927_v12  ;;  %v4684_v58 = vunpack.c.l.b16 %v4570_v54  ;;  %v8196_v12 = vld [vmem:[#allocation2 + $0x4c] sm:$0xf] }
 0x1c1   : > { %v2996_v22 = vpop.f32.mrf.mxu0  ;;  %v8182_v26 = vpop.f32.mrf.mxu1  ;;  %5067 = vperm.xlu2 %6982, %v4965_v57   ;;  %v4287_v37 = vpack.c.b16 %v4258_v59, %v4257_v4  ;;  %v4573_v59 = vrot.slane %v8168_v33, 5 }
 0x1c2   : > { %8805 = vst [vmem:[#allocation11_spill] sm:$0xff] %v8182_v26  ;;  %v3941_v56 = vor.u32 %v3940_v42, %v3936_v2  ;;  %v3932_v57 = vrot.slane %v3931_v63, 4  ;;  %v3958_v63 = vshll.u32 %v8196_v12, 16 }
 0x1c3   : > { %v1999_v27 = vpop.f32.mrf.mxu2 }
 0x1c4   : > { %4804 = vmatmul.bf16.gmra.mxu0 %v4712_v15  ;;  %v2052_v45 = vadd.f32 %v1999_v27, %v7604_v1  ;;  %v4968_v1 = vld [vmem:[%s8786_s4 + $0xa0] sm:$0xff]  ;;  %v3942_v41 = vrot.slane %v3941_v56, 4  ;;  %v3816_v27 = vld [vmem:[#allocation2 + $0x48] sm:$0xf] }
 0x1c5   : > { %v3952_v54 = vshll.u32 %v3816_v27, 16 }
 0x1c6   : > { %v2367_v21 = vadd.f32 %v2314_v53, %v2052_v45  ;;  %v4683_v53 = vunpack.c.l.b16 %v4567_v31  ;;  %v3947_v4 = vsel %vm7241_vm2, %v3942_v41, %v3946_v20  ;;  %v3960_v41 = vrot.slane %v3958_v63, 5 }
 0x1c7   : > { %v2316_v50 = vpop.f32.mrf.mxu3 }
 0x1c8   : > { %v3049_v14 = vadd.f32 %v2996_v22, %v2367_v21  ;;  %v6795_v22 = vld [vmem:[#allocation2 + $0x30] sm:$0xff]  ;;  %v4713_v42 = vpack.c.b16 %v4684_v58, %v4683_v53  ;;  %v3949_v21 = vshrl.u32 %v3816_v27, 16  ;;  %v4576_v53 = vrot.slane %v3815_v8, 5 }
 0x1c9   : > { %v2998_v46 = vpop.f32.mrf.mxu0  ;;  %v3427_v48 = vpop.f32.mrf.mxu1  ;;  %5082 = vperm.xlu2 %6982, %v4968_v1  }
 0x1ca   : > { %v8193_v15 = vadd.f32 %v3422_v10, %v3049_v14  ;;  %v3937_v10 = vsel %vm7241_vm2, %v3932_v57, %v3936_v2  ;;  %v4971_v2 = vld [vmem:[%s8786_s4 + $0xb8] sm:$0xff]  ;;  %v4260_v14 = vunpack.c.l.b16 %v3947_v4  ;;  %v3951_v58 = vrot.slane %v3949_v21, 4 }
 0x1cb   : > { %v2001_v9 = vpop.f32.mrf.mxu2  ;;  %v4259_v43 = vunpack.c.l.b16 %v3937_v10  ;;  %v3954_v57 = vrot.slane %v3952_v54, 5  ;;  %v6835_v54 = vld [vmem:[%s8789_s7 + $0x10] sm:$0xff] }
 0x1cc   : > { %v2053_v23 = vadd.f32 %v2001_v9, %v7612_v52  ;;  %4383 = vmatmul.bf16.gmra.mxu3 %v4287_v37  ;;  %v4489_v52 = vld [vmem:[#allocation2 + $0x3c] sm:$0xe]  ;;  %5591 = vmatpush.bf16.msra.mxu1 %v6835_v54 }
 0x1cd   : > { %v6552_v1 = vrot.slane %v4489_v52, 9  ;;  %v3955_v8 = vor.u32 %v3954_v57, %v3951_v58  ;;  %v3819_v58 = vld [vmem:[#allocation2 + $0x54] sm:$0xf] }
 0x1ce   : > { %v2368_v24 = vadd.f32 %v2316_v50, %v2053_v23  ;;  %v3962_v50 = vshrl.u32 %v8196_v12, 16  ;;  %v8213_v23 = vld [vmem:[#allocation2 + $0x50] sm:$0x1] }
 0x1cf   : > { %v2319_v45 = vpop.f32.mrf.mxu3  ;;  %v4574_v10 = vsel %vm7549_vm5, %v6552_v1, %v4573_v59 }
 0x1d0   : > { %3701 = vmatmul.bf16.gmra.mxu2 %v6795_v22  ;;  %v8203_v31 = vadd.f32 %v2998_v46, %v2368_v24  ;;  %v4575_v46 = vrot.slane %v4573_v59, 4  ;;  %v3964_v20 = vrot.slane %v3962_v50, 4  ;;  %v4288_v24 = vpack.c.b16 %v4260_v14, %v4259_v43  ;;  %v6796_v14 = vld [vmem:[#allocation2 + $0x3c] sm:$0xff] }
 0x1d1   : > { %v3001_v56 = vpop.f32.mrf.mxu0  ;;  %v8210_v37 = vpop.f32.mrf.mxu1  ;;  %5097 = vperm.xlu2 %6982, %v4971_v2   ;;  %v4685_v2 = vunpack.c.l.b16 %v4574_v10  ;;  %v4580_v10 = vrot.slane %v8196_v12, 5 }
 0x1d2   : > { %8806 = vst [vmem:[#allocation12_spill] sm:$0xff] %v8210_v37  ;;  %v4577_v4 = vsel %vm7549_vm5, %v4575_v46, %v4576_v53  ;;  %v3965_v21 = vor.u32 %v3964_v20, %v3960_v41 }
 0x1d3   : > { %v2004_v33 = vpop.f32.mrf.mxu2 }
 0x1d4   : > { %4809 = vmatmul.bf16.gmra.mxu0 %v4713_v42  ;;  %v2054_v9 = vadd.f32 %v2004_v33, %v7627_v34  ;;  %v3968_v42 = vshll.u32 %v8213_v23, 16  ;;  %v3956_v33 = vrot.slane %v3955_v8, 4  ;;  %v3966_v1 = vrot.slane %v3965_v21, 4 }
 0x1d6   : > { %v2369_v22 = vadd.f32 %v2319_v45, %v2054_v9  ;;  %v4974_v45 = vld [vmem:[%s8786_s4 + $0xd0] sm:$0xff]  ;;  %v3970_v46 = vrot.slane %v3968_v42, 5  ;;  %v8229_v9 = vld [vmem:[#allocation2 + $0x58] sm:$0xf]  ;;  %v4977_v42 = vld [vmem:[%s8786_s4 + $0xe8] sm:$0xff] }
 0x1d7   : > { %v2321_v27 = vpop.f32.mrf.mxu3  ;;  %v3982_v8 = vshll.u32 %v8229_v9, 16  ;;  %v3986_v21 = vshrl.u32 %v8229_v9, 16 }
 0x1d8   : > { %v3051_v52 = vadd.f32 %v3001_v56, %v2369_v22  ;;  %v4686_v56 = vunpack.c.l.b16 %v4577_v4  ;;  %v3961_v22 = vsel %vm7241_vm2, %v3956_v33, %v3960_v41 }
 0x1d9   : > { %v3003_v34 = vpop.f32.mrf.mxu0  ;;  %v3432_v59 = vpop.f32.mrf.mxu1  ;;  %5112 = vperm.xlu2 %6982, %v4974_v45   ;;  %v4261_v54 = vunpack.c.l.b16 %v3961_v22  ;;  %v3984_v33 = vrot.slane %v3982_v8, 5  ;;  %v6797_v8 = vld [vmem:[#allocation2 + $0x48] sm:$0xff] }
 0x1da   : > { %v8226_v63 = vadd.f32 %v3427_v48, %v3051_v52  ;;  %v4714_v48 = vpack.c.b16 %v4686_v56, %v4685_v2  ;;  %v3973_v52 = vshrl.u32 %v3819_v58, 16  ;;  %v4582_v2 = vrot.slane %v4580_v10, 4 }
 0x1db   : > { %v2006_v50 = vpop.f32.mrf.mxu2  ;;  %v4583_v56 = vrot.slane %v8213_v23, 5 }
 0x1dc   : > { %8807 = vst [vmem:[#allocation13_spill] sm:$0xff] %v8226_v63  ;;  %v2055_v43 = vadd.f32 %v2006_v50, %v7641_v16  ;;  %4388 = vmatmul.bf16.gmra.mxu3 %v4288_v24  ;;  %v3971_v16 = vsel %vm7241_vm2, %v3966_v1, %v3970_v46  ;;  %v4490_v24 = vld [vmem:[#allocation2 + $0x48] sm:$0xe]  ;;  %v3988_v1 = vrot.slane %v3986_v21, 4 }
 0x1dd   : > { %v4262_v45 = vunpack.c.l.b16 %v3971_v16  ;;  %v6553_v50 = vrot.slane %v4490_v24, 9 }
 0x1de   : > { %v2370_v53 = vadd.f32 %v2321_v27, %v2055_v43  ;;  %v3976_v27 = vshll.u32 %v3819_v58, 16  ;;  %v3975_v43 = vrot.slane %v3973_v52, 4  ;;  %v3989_v24 = vor.u32 %v3988_v1, %v3984_v33 }
 0x1df   : > { %v2324_v57 = vpop.f32.mrf.mxu3  ;;  %v4581_v22 = vsel %vm7549_vm5, %v6553_v50, %v4580_v10 }
 0x1e0   : > { %3706 = vmatmul.bf16.gmra.mxu2 %v6796_v14  ;;  %v8231_v20 = vadd.f32 %v3003_v34, %v2370_v53  ;;  %v3978_v14 = vrot.slane %v3976_v27, 5  ;;  %v3821_v53 = vld [vmem:[#allocation2 + $0x5c] sm:$0x1] }
 0x1e1   : > { %v3006_v4 = vpop.f32.mrf.mxu0  ;;  %v8243_v34 = vpop.f32.mrf.mxu1  ;;  %5127 = vperm.xlu2 %6982, %v4977_v42   ;;  %v3992_v42 = vshll.u32 %v3821_v53, 16 }
 0x1e2   : > { %8808 = vst [vmem:[#allocation14_spill] sm:$0xff] %v8231_v20 }
 0x1e3   : > { %8809 = vst [vmem:[#allocation15_spill] sm:$0xff] %v8243_v34  ;;  %v2009_v41 = vpop.f32.mrf.mxu2  ;;  %v4289_v34 = vpack.c.b16 %v4262_v45, %v4261_v54  ;;  %v8254_v54 = vld [vmem:[#allocation2 + $0x64] sm:$0xf]  ;;  %v3990_v45 = vrot.slane %v3989_v24, 4 }
 0x1e4   : > { %4814 = vmatmul.bf16.gmra.mxu0 %v4714_v48  ;;  %v2056_v12 = vadd.f32 %v2009_v41, %v7653_v47  ;;  %v4584_v47 = vsel %vm7549_vm5, %v4582_v2, %v4583_v56  ;;  %v3979_v48 = vor.u32 %v3978_v14, %v3975_v43  ;;  %v3822_v41 = vld [vmem:[#allocation2 + $0x60] sm:$0xf]  ;;  %v4587_v2 = vrot.slane %v8229_v9, 5 }
 0x1e5   : > { %v4688_v21 = vunpack.c.l.b16 %v4584_v47  ;;  %v4000_v43 = vshll.u32 %v3822_v41, 16  ;;  %v4006_v14 = vshll.u32 %v8254_v54, 16 }
 0x1e6   : > { %v2371_v46 = vadd.f32 %v2324_v57, %v2056_v12  ;;  %v3980_v10 = vrot.slane %v3979_v48, 4  ;;  %v3994_v12 = vrot.slane %v3992_v42, 5  ;;  %v4589_v47 = vrot.slane %v4587_v2, 4 }
 0x1e7   : > { %v2326_v58 = vpop.f32.mrf.mxu3  ;;  %v4590_v48 = vrot.slane %v3821_v53, 5 }
 0x1e8   : > { %v3053_v37 = vadd.f32 %v3006_v4, %v2371_v46  ;;  %v4687_v4 = vunpack.c.l.b16 %v4581_v22  ;;  %v3985_v22 = vsel %vm7241_vm2, %v3980_v10, %v3984_v33 }
 0x1e9   : > { %v3008_v16 = vpop.f32.mrf.mxu0  ;;  %v3437_v27 = vpop.f32.mrf.mxu1  ;;  %v4591_v53 = vsel %vm7549_vm5, %v4589_v47, %v4590_v48  ;;  %v6798_v48 = vld [vmem:[#allocation2 + $0x54] sm:$0xff] }
 0x1ea   : > { %v8251_v23 = vadd.f32 %v3432_v59, %v3053_v37  ;;  %v4491_v37 = vld [vmem:[#allocation2 + $0x54] sm:$0xe]  ;;  %v3997_v59 = vshrl.u32 %v3822_v41, 16  ;;  %v4715_v1 = vpack.c.b16 %v4688_v21, %v4687_v4  ;;  %v3824_v21 = vld [vmem:[#allocation2 + $0x68] sm:$0x1] }
 0x1eb   : > { %v2011_v52 = vpop.f32.mrf.mxu2  ;;  %v6554_v9 = vrot.slane %v4491_v37, 9 }
 0x1ec   : > { %8810 = vst [vmem:[#allocation16_spill] sm:$0xff] %v8251_v23  ;;  %v2057_v57 = vadd.f32 %v2011_v52, %v7661_v6  ;;  %4393 = vmatmul.bf16.gmra.mxu3 %v4289_v34  ;;  %v4010_v6 = vshrl.u32 %v8254_v54, 16  ;;  %v3999_v42 = vrot.slane %v3997_v59, 4  ;;  %v4002_v52 = vrot.slane %v4000_v43, 5 }
 0x1ed   : > { %v4588_v10 = vsel %vm7549_vm5, %v6554_v9, %v4587_v2  ;;  %v4016_v59 = vshll.u32 %v3824_v21, 16 }
 0x1ee   : > { %v2372_v50 = vadd.f32 %v2326_v58, %v2057_v57  ;;  %v3995_v58 = vsel %vm7241_vm2, %v3990_v45, %v3994_v12  ;;  %v4008_v57 = vrot.slane %v4006_v14, 5  ;;  %v4012_v41 = vrot.slane %v4010_v6, 4 }
 0x1ef   : > { %v2329_v56 = vpop.f32.mrf.mxu3  ;;  %v4264_v4 = vunpack.c.l.b16 %v3995_v58  ;;  %v4003_v12 = vor.u32 %v4002_v52, %v3999_v42  ;;  %v8278_v42 = vld [vmem:[#allocation2 + $0x70] sm:$0xf] }
 0x1f0   : > { %3711 = vmatmul.bf16.gmra.mxu2 %v6797_v8  ;;  %v8259_v34 = vadd.f32 %v3008_v16, %v2372_v50  ;;  %v4263_v8 = vunpack.c.l.b16 %v3985_v22  ;;  %v4013_v37 = vor.u32 %v4012_v41, %v4008_v57  ;;  %v4690_v22 = vunpack.c.l.b16 %v4591_v53  ;;  %v4492_v53 = vld [vmem:[#allocation2 + $0x60] sm:$0xe] }
 0x1f1   : > { %v3011_v46 = vpop.f32.mrf.mxu0  ;;  %v8266_v50 = vpop.f32.mrf.mxu1  ;;  %v4004_v2 = vrot.slane %v4003_v12, 4 }
 0x1f2   : > { %8811 = vst [vmem:[#allocation17_spill] sm:$0xff] %v8259_v34  ;;  %v4290_v14 = vpack.c.b16 %v4264_v4, %v4263_v8  ;;  %v4014_v9 = vrot.slane %v4013_v37, 4  ;;  %v4030_v37 = vshll.u32 %v8278_v42, 16 }
 0x1f3   : > { %v2014_v24 = vpop.f32.mrf.mxu2  ;;  %8812 = vst [vmem:[#allocation18_spill] sm:$0xff] %v8266_v50 }
 0x1f4   : > { %4819 = vmatmul.bf16.gmra.mxu0 %v4715_v1  ;;  %v2058_v16 = vadd.f32 %v2014_v24, %v7674_v17  ;;  %v6834_v17 = vld [vmem:[%s8789_s7 + $0x8] sm:$0xff]  ;;  %v4018_v24 = vrot.slane %v4016_v59, 5 }
 0x1f5   : > { %5592 = vmatpush.bf16.msra.mxu1 %v6834_v17 }
 0x1f6   : > { %v2373_v33 = vadd.f32 %v2329_v56, %v2058_v16  ;;  %v4689_v56 = vunpack.c.l.b16 %v4588_v10  ;;  %v4019_v4 = vsel %vm7241_vm2, %v4014_v9, %v4018_v24  ;;  %v3827_v24 = vld [vmem:[#allocation2 + $0x74] sm:$0x1] }
 0x1f7   : > { %v2331_v45 = vpop.f32.mrf.mxu3 }
 0x1f8   : > { %v3055_v43 = vadd.f32 %v3011_v46, %v2373_v33  ;;  %v3825_v46 = vld [vmem:[#allocation2 + $0x6c] sm:$0xf]  ;;  %v4716_v41 = vpack.c.b16 %v4690_v22, %v4689_v56  ;;  %v4594_v33 = vrot.slane %v8254_v54, 5  ;;  %v4597_v22 = vrot.slane %v3824_v21, 5 }
 0x1f9   : > { %v3013_v6 = vpop.f32.mrf.mxu0  ;;  %v3442_v8 = vpop.f32.mrf.mxu1  ;;  %v4021_v10 = vshrl.u32 %v3825_v46, 16  ;;  %v4024_v12 = vshll.u32 %v3825_v46, 16 }
 0x1fa   : > { %v8275_v1 = vadd.f32 %v3437_v27, %v3055_v43  ;;  %v4009_v27 = vsel %vm7241_vm2, %v4004_v2, %v4008_v57  ;;  %v6555_v57 = vrot.slane %v4492_v53, 9  ;;  %v4596_v56 = vrot.slane %v4594_v33, 4 }
 0x1fb   : > { %v2016_v58 = vpop.f32.mrf.mxu2  ;;  %v4265_v43 = vunpack.c.l.b16 %v4009_v27  ;;  %v4026_v2 = vrot.slane %v4024_v12, 5 }
 0x1fc   : > { %8813 = vst [vmem:[#allocation19_spill] sm:$0xff] %v8275_v1  ;;  %v2059_v47 = vadd.f32 %v2016_v58, %v7693_v51  ;;  %4398 = vmatmul.bf16.gmra.mxu3 %v4290_v14  ;;  %v4266_v14 = vunpack.c.l.b16 %v4019_v4  ;;  %v4023_v58 = vrot.slane %v4021_v10, 4  ;;  %v4598_v27 = vsel %vm7549_vm5, %v4596_v56, %v4597_v22  ;;  %v8299_v56 = vld [vmem:[#allocation2 + $0x7c] sm:$0xf] }
 0x1fd   : > { %v4040_v10 = vshll.u32 %v3827_v24, 16 }
 0x1fe   : > { %v2374_v52 = vadd.f32 %v2331_v45, %v2059_v47  ;;  %v4034_v45 = vshrl.u32 %v8278_v42, 16  ;;  %v4291_v46 = vpack.c.b16 %v4266_v14, %v4265_v43  ;;  %v4027_v53 = vor.u32 %v4026_v2, %v4023_v58  ;;  %v6799_v43 = vld [vmem:[#allocation2 + $0x60] sm:$0xff] }
 0x1ff   : > { %v2334_v16 = vpop.f32.mrf.mxu3  ;;  %v4601_v2 = vrot.slane %v8278_v42, 5 }
 0x200   : > { %3716 = vmatmul.bf16.gmra.mxu2 %v6798_v48  ;;  %v8285_v51 = vadd.f32 %v3013_v6, %v2374_v52  ;;  %v4032_v6 = vrot.slane %v4030_v37, 5  ;;  %v4036_v9 = vrot.slane %v4034_v45, 4  ;;  %v4595_v52 = vsel %vm7549_vm5, %v6555_v57, %v4594_v33 }
 0x201   : > { %v3016_v59 = vpop.f32.mrf.mxu0  ;;  %v8294_v50 = vpop.f32.mrf.mxu1  ;;  %v4691_v37 = vunpack.c.l.b16 %v4595_v52  ;;  %v4028_v33 = vrot.slane %v4027_v53, 4  ;;  %v4054_v52 = vshll.u32 %v8299_v56, 16 }
 0x202   : > { %8814 = vst [vmem:[#allocation20_spill] sm:$0xff] %v8285_v51  ;;  %v4037_v21 = vor.u32 %v4036_v9, %v4032_v6 }
 0x203   : > { %v2019_v17 = vpop.f32.mrf.mxu2  ;;  %8815 = vst [vmem:[#allocation21_spill] sm:$0xff] %v8294_v50 }
 0x204   : > { %4824 = vmatmul.bf16.gmra.mxu0 %v4716_v41  ;;  %v2060_v54 = vadd.f32 %v2019_v17, %v7706_v35  ;;  %v4038_v14 = vrot.slane %v4037_v21, 4  ;;  %v4042_v17 = vrot.slane %v4040_v10, 5 }
 0x206   : > { %v2375_v47 = vadd.f32 %v2334_v16, %v2060_v54  ;;  %v4692_v16 = vunpack.c.l.b16 %v4598_v27  ;;  %v4058_v27 = vshrl.u32 %v8299_v56, 16 }
 0x207   : > { %v2336_v48 = vpop.f32.mrf.mxu3 }
 0x208   : > { %v3057_v4 = vadd.f32 %v3016_v59, %v2375_v47  ;;  %v3828_v59 = vld [vmem:[#allocation2 + $0x78] sm:$0xf]  ;;  %v4717_v58 = vpack.c.b16 %v4692_v16, %v4691_v37  ;;  %v4493_v47 = vld [vmem:[#allocation2 + $0x6c] sm:$0xe]  ;;  %v4603_v37 = vrot.slane %v4601_v2, 4  ;;  %v4604_v16 = vrot.slane %v3827_v24, 5 }
 0x209   : > { %v3018_v41 = vpop.f32.mrf.mxu0  ;;  %v3447_v53 = vpop.f32.mrf.mxu1 }
 0x20a   : > { %v8296_v35 = vadd.f32 %v3442_v8, %v3057_v4  ;;  %v4033_v8 = vsel %vm7241_vm2, %v4028_v33, %v4032_v6  ;;  %v4060_v33 = vrot.slane %v4058_v27, 4 }
 0x20b   : > { %v2021_v12 = vpop.f32.mrf.mxu2  ;;  %v4267_v21 = vunpack.c.l.b16 %v4033_v8 }
 0x20c   : > { %8816 = vst [vmem:[#allocation22_spill] sm:$0xff] %v8296_v35  ;;  %v2061_v45 = vadd.f32 %v2021_v12, %v7715_v60  ;;  %4403 = vmatmul.bf16.gmra.mxu3 %v4291_v46  ;;  %v4043_v60 = vsel %vm7241_vm2, %v4038_v14, %v4042_v17  ;;  %v4045_v46 = vshrl.u32 %v3828_v59, 16  ;;  %v6556_v12 = vrot.slane %v4493_v47, 9  ;;  %v8311_v17 = vld [vmem:[#allocation2 + $0x80] sm:$0x1] }
 0x20d   : > { %v4268_v10 = vunpack.c.l.b16 %v4043_v60  ;;  %v4064_v24 = vshll.u32 %v8311_v17, 16 }
 0x20e   : > { %v2376_v57 = vadd.f32 %v2336_v48, %v2061_v45  ;;  %v4048_v48 = vshll.u32 %v3828_v59, 16  ;;  %v4047_v45 = vrot.slane %v4045_v46, 4  ;;  %v4602_v8 = vsel %vm7549_vm5, %v6556_v12, %v4601_v2 }
 0x20f   : > { %v2339_v22 = vpop.f32.mrf.mxu3  ;;  %v4292_v50 = vpack.c.b16 %v4268_v10, %v4267_v21  ;;  %v4693_v21 = vunpack.c.l.b16 %v4602_v8 }
 0x210   : > { %3721 = vmatmul.bf16.gmra.mxu2 %v6799_v43  ;;  %v8301_v54 = vadd.f32 %v3018_v41, %v2376_v57  ;;  %v8818_v41 = vld [vmem:[#allocation3_spill] sm:$0xff]  ;;  %v4050_v42 = vrot.slane %v4048_v48, 5  ;;  %v4056_v43 = vrot.slane %v4054_v52, 5  ;;  %v8820_v52 = vld [vmem:[#allocation4_spill] sm:$0xff] }
 0x211   : > { %v3021_v9 = vpop.f32.mrf.mxu0  ;;  %v8323_v2 = vpop.f32.mrf.mxu1 }
 0x212   : > { %8817 = vst [vmem:[#allocation23_spill] sm:$0xff] %v8301_v54  ;;  %v4051_v47 = vor.u32 %v4050_v42, %v4047_v45 }
 0x213   : > { %v2024_v4 = vpop.f32.mrf.mxu2  ;;  %8821 = vst [vmem:[#allocation4_spill] sm:$0xff] %v8323_v2 }
 0x214   : > { %4829 = vmatmul.bf16.gmra.mxu0 %v4717_v58  ;;  %v2062_v6 = vadd.f32 %v2024_v4, %v8818_v41  ;;  %v4605_v58 = vsel %vm7549_vm5, %v4603_v37, %v4604_v16  ;;  %v4061_v4 = vor.u32 %v4060_v33, %v4056_v43  ;;  %v8321_v41 = vld [vmem:[#allocation2 + $0x88] sm:$0xf]  ;;  %v4066_v37 = vrot.slane %v4064_v24, 5 }
 0x215   : > { %v4694_v10 = vunpack.c.l.b16 %v4605_v58  ;;  %v4078_v33 = vshll.u32 %v8321_v41, 16 }
 0x216   : > { %v2377_v14 = vadd.f32 %v2339_v22, %v2062_v6  ;;  %v3831_v22 = vld [vmem:[#allocation2 + $0x84] sm:$0xf]  ;;  %v4052_v6 = vrot.slane %v4051_v47, 4  ;;  %v4062_v12 = vrot.slane %v4061_v4, 4  ;;  %v4494_v4 = vld [vmem:[#allocation2 + $0x78] sm:$0xe] }
 0x217   : > { %v2341_v57 = vpop.f32.mrf.mxu3  ;;  %v4069_v45 = vshrl.u32 %v3831_v22, 16  ;;  %v4072_v42 = vshll.u32 %v3831_v22, 16  ;;  %v6557_v2 = vrot.slane %v4494_v4, 9 }
 0x218   : > { %v3059_v59 = vadd.f32 %v3021_v9, %v2377_v14  ;;  %v6800_v9 = vld [vmem:[#allocation2 + $0x6c] sm:$0xff]  ;;  %v4082_v14 = vshrl.u32 %v8321_v41, 16  ;;  %v4057_v58 = vsel %vm7241_vm2, %v4052_v6, %v4056_v43  ;;  %v4067_v47 = vsel %vm7241_vm2, %v4062_v12, %v4066_v37 }
 0x219   : > { %v3023_v60 = vpop.f32.mrf.mxu0  ;;  %v4071_v24 = vrot.slane %v4069_v45, 4  ;;  %v4611_v6 = vrot.slane %v8311_v17, 5 }
 0x21a   : > { %v8318_v46 = vadd.f32 %v3447_v53, %v3059_v59  ;;  %v4718_v59 = vpack.c.b16 %v4694_v10, %v4693_v21  ;;  %v4270_v21 = vunpack.c.l.b16 %v4067_v47  ;;  %v8335_v10 = vld [vmem:[#allocation2 + $0x8c] sm:$0x1] }
 0x21b   : > { %v2026_v48 = vpop.f32.mrf.mxu2 }
 0x21c   : > { %8819 = vst [vmem:[#allocation3_spill] sm:$0xff] %v8318_v46  ;;  %v2063_v27 = vadd.f32 %v2026_v48, %v8820_v52  ;;  %4408 = vmatmul.bf16.gmra.mxu3 %v4292_v50  ;;  %v4074_v48 = vrot.slane %v4072_v42, 5  ;;  %v4080_v52 = vrot.slane %v4078_v33, 5  ;;  %v4088_v42 = vshll.u32 %v8335_v10, 16 }
 0x21e   : > { %v2378_v16 = vadd.f32 %v2341_v57, %v2063_v27  ;;  %v4608_v57 = vrot.slane %v8299_v56, 5  ;;  %v4084_v27 = vrot.slane %v4082_v14, 4  ;;  %v4075_v37 = vor.u32 %v4074_v48, %v4071_v24 }
 0x21f   : > { %v2344_v53 = vpop.f32.mrf.mxu3 }
 0x220   : > { %3726 = vmatmul.bf16.gmra.mxu2 %v6800_v9  ;;  %v8327_v50 = vadd.f32 %v3023_v60, %v2378_v16  ;;  %v8823_v9 = vld [vmem:[#allocation5_spill] sm:$0xff]  ;;  %v4269_v16 = vunpack.c.l.b16 %v4057_v58  ;;  %v4610_v43 = vrot.slane %v4608_v57, 4  ;;  %v4085_v45 = vor.u32 %v4084_v27, %v4080_v52 }
 0x221   : > { %v3026_v8 = vpop.f32.mrf.mxu0  ;;  %v4609_v47 = vsel %vm7549_vm5, %v6557_v2, %v4608_v57  ;;  %v4076_v4 = vrot.slane %v4075_v37, 4 }
 0x222   : > { %8822 = vst [vmem:[#allocation24_spill] sm:$0xff] %v8327_v50  ;;  %v3452_v50 = vpop.f32.mrf.mxu1  ;;  %v4293_v14 = vpack.c.b16 %v4270_v21, %v4269_v16  ;;  %v4612_v17 = vsel %vm7549_vm5, %v4610_v43, %v4611_v6  ;;  %v4086_v48 = vrot.slane %v4085_v45, 4  ;;  %v3834_v21 = vld [vmem:[#allocation2 + $0x90] sm:$0xf]  ;;  %v4615_v6 = vrot.slane %v8321_v41, 5 }
 0x223   : > { %v2029_v22 = vpop.f32.mrf.mxu2  ;;  %v4696_v16 = vunpack.c.l.b16 %v4612_v17  ;;  %v4081_v57 = vsel %vm7241_vm2, %v4076_v4, %v4080_v52  ;;  %v4093_v37 = vshrl.u32 %v3834_v21, 16  ;;  %v4096_v45 = vshll.u32 %v3834_v21, 16 }
 0x224   : > { %4834 = vmatmul.bf16.gmra.mxu0 %v4718_v59  ;;  %v2064_v60 = vadd.f32 %v2029_v22, %v8823_v9  ;;  %v6833_v59 = vld [vmem:[%s8789_s7] sm:$0xff]  ;;  %v4090_v22 = vrot.slane %v4088_v42, 5  ;;  %v6801_v9 = vld [vmem:[#allocation2 + $0x78] sm:$0xff]  ;;  %v4271_v52 = vunpack.c.l.b16 %v4081_v57 }
 0x225   : > { %5593 = vmatpush.bf16.msra.mxu1 %v6833_v59  ;;  %v4098_v41 = vrot.slane %v4096_v45, 5 }
 0x226   : > { %v2379_v12 = vadd.f32 %v2344_v53, %v2064_v60  ;;  %v4695_v60 = vunpack.c.l.b16 %v4609_v47  ;;  %v4091_v43 = vsel %vm7241_vm2, %v4086_v48, %v4090_v22  ;;  %v4617_v48 = vrot.slane %v4615_v6, 4 }
 0x227   : > { %v2346_v56 = vpop.f32.mrf.mxu3  ;;  %v4272_v17 = vunpack.c.l.b16 %v4091_v43  ;;  %v4095_v22 = vrot.slane %v4093_v37, 4 }
 0x228   : > { %v3061_v33 = vadd.f32 %v3026_v8, %v2379_v12  ;;  %v8825_v8 = vld [vmem:[#allocation6_spill] sm:$0xff] }
 0x229   : > { %v3028_v58 = vpop.f32.mrf.mxu0  ;;  %v8349_v12 = vld [vmem:[#allocation2 + $0x94] sm:$0xf]  ;;  %v4294_v57 = vpack.c.b16 %v4272_v17, %v4271_v52  ;;  %v8376_v52 = vld [vmem:[%s8787_s5] ss:$0 sm:$0xff]  ;;  %v3837_v17 = vld [vmem:[#allocation2 + $0x9c] sm:$0xf] }
 0x22a   : > { %v8346_v53 = vadd.f32 %v3452_v50, %v3061_v33  ;;  %v4719_v33 = vpack.c.b16 %v4696_v16, %v4695_v60  ;;  %v4102_v59 = vshll.u32 %v8349_v12, 16  ;;  %v8362_v16 = vld [vmem:[#allocation2 + $0x98] sm:$0x1] }
 0x22b   : > { %v2031_v24 = vpop.f32.mrf.mxu2 }
 0x22c   : > { %8824 = vst [vmem:[#allocation5_spill] sm:$0xff] %v8346_v53  ;;  %v2065_v27 = vadd.f32 %v2031_v24, %v8825_v8  ;;  %4413 = vmatmul.bf16.gmra.mxu3 %v4293_v14  ;;  %v4495_v14 = vld [vmem:[#allocation2 + $0x84] sm:$0xe]  ;;  %v8827_v8 = vld [vmem:[#allocation7_spill] sm:$0xff] }
 0x22d   : > { %v6558_v24 = vrot.slane %v4495_v14, 9  ;;  %v4099_v14 = vor.u32 %v4098_v41, %v4095_v22  ;;  %v8828_v41 = vld [vmem:[#allocation8_spill] sm:$0xff] }
 0x22e   : > { %v2380_v2 = vadd.f32 %v2346_v56, %v2065_v27  ;;  %v4106_v56 = vshrl.u32 %v8349_v12, 16 }
 0x22f   : > { %v4374_v50 = vpop.f32.mrf.mxu3  ;;  %v4616_v43 = vsel %vm7549_vm5, %v6558_v24, %v4615_v6  ;;  %v8378_v6 = vld [vmem:[#allocation2 + $0xa0] sm:$0xf] }
 0x230   : > { %3731 = vmatmul.bf16.gmra.mxu2 %v6801_v9  ;;  %v8356_v42 = vadd.f32 %v3028_v58, %v2380_v2  ;;  %v4618_v58 = vrot.slane %v8335_v10, 5  ;;  %v4104_v9 = vrot.slane %v4102_v59, 5  ;;  %v4108_v60 = vrot.slane %v4106_v56, 4  ;;  %v8365_v2 = vld [vmem:[%s8147_s12] ss:$0 sm:$0xff]  ;;  %v4983_v59 = vpop.permute.xlu0 %4982 }
 0x231   : > { %v4800_v47 = vpop.f32.mrf.mxu0  ;;  %v4112_v10 = vshll.u32 %v8362_v16, 16  ;;  %v4126_v53 = vshll.u32 %v8378_v6, 16  ;;  %v4130_v46 = vshrl.u32 %v8378_v6, 16 }
 0x232   : > { %8826 = vst [vmem:[#allocation6_spill] sm:$0xff] %v8356_v42  ;;  %v4619_v45 = vsel %vm7549_vm5, %v4617_v48, %v4618_v58  ;;  %v4100_v48 = vrot.slane %v4099_v14, 4 }
 0x233   : > { %v3692_v4 = vpop.f32.mrf.mxu2  ;;  %v4698_v24 = vunpack.c.l.b16 %v4619_v45 }
 0x234   : > { %4839 = vmatmul.bf16.gmra.mxu0 %v4719_v33  ;;  %v3772_v27 = vadd.f32 %v3692_v4, %v8827_v8  ;;  %v4109_v33 = vor.u32 %v4108_v60, %v4104_v9  ;;  %v4697_v4 = vunpack.c.l.b16 %v4616_v43  ;;  %v4114_v60 = vrot.slane %v4112_v10, 5 }
 0x236   : > { %v4454_v21 = vadd.f32 %v4374_v50, %v3772_v27  ;;  %v6802_v27 = vld [vmem:[#allocation2 + $0x84] sm:$0xff]  ;;  %v4110_v58 = vrot.slane %v4109_v33, 4  ;;  %v5432_v33 = vld [vmem:[%s450_s30] sm:$0x1] }
 0x237   : > { %v4376_v42 = vpop.f32.mrf.mxu3 }
 0x238   : > { %v4880_v37 = vadd.f32 %v4800_v47, %v4454_v21  ;;  %v4117_v21 = vshrl.u32 %v3837_v17, 16 }
 0x239   : > { %v4802_v56 = vpop.f32.mrf.mxu0 }
 0x23a   : > { %v4916_v50 = vmul.f32 %v8365_v2, %v4880_v37  ;;  %v4120_v37 = vshll.u32 %v3837_v17, 16  ;;  %v4115_v17 = vsel %vm7241_vm2, %v4110_v58, %v4114_v60  ;;  %v4119_v35 = vrot.slane %v4117_v21, 4 }
 0x23b   : > { %v3694_v47 = vpop.f32.mrf.mxu2 }
 0x23c   : > { %v5140_v22 = vadd.f32 %v4983_v59, %v4916_v50  ;;  %v3773_v8 = vadd.f32 %v3694_v47, %v8828_v41  ;;  %4418 = vmatmul.bf16.gmra.mxu3 %v4294_v57  ;;  %v4720_v59 = vpack.c.b16 %v4698_v24, %v4697_v4  ;;  %v4622_v57 = vrot.slane %v8349_v12, 5  ;;  %v4496_v41 = vld [vmem:[#allocation2 + $0x90] sm:$0xe]  ;;  %v8397_v24 = vld [vmem:[#allocation2 + $0xa4] sm:$0x1] }
 0x23d   : > { %v4105_v47 = vsel %vm7241_vm2, %v4100_v48, %v4104_v9  ;;  %v6559_v58 = vrot.slane %v4496_v41, 9  ;;  %v4632_v23 = vrot.slane %v8397_v24, 5 }
 0x23e   : > { %v5176_v43 = vadd.f32 %v8376_v52, %v5140_v22  ;;  %v4455_v14 = vadd.f32 %v4376_v42, %v3773_v8  ;;  %v4122_v22 = vrot.slane %v4120_v37, 5  ;;  %v8393_v42 = vrot.slane %v4126_v53, 5  ;;  %v8829_v53 = vld [vmem:[#allocation9_spill] sm:$0xff] }
 0x23f   : > { %v4379_v45 = vpop.f32.mrf.mxu3  ;;  %v4132_v8 = vrot.slane %v4130_v46, 4  ;;  %v4273_v48 = vunpack.c.l.b16 %v4105_v47  ;;  %v4624_v60 = vrot.slane %v4622_v57, 4  ;;  %v4625_v46 = vrot.slane %v8362_v16, 5 }
 0x240   : > { %v5208_v10 = vmul.f32 0.2, %v5176_v43  ;;  %v4881_v50 = vadd.f32 %v4802_v56, %v4455_v14  ;;  %3736 = vmatmul.bf16.gmra.mxu2 %v6802_v27  ;;  %v5434_v56 = vpack.i.b16 %v5432_v33, %v5432_v33  ;;  %v4988_v27 = vpop.permute.xlu0 %4987  ;;  %v4274_v14 = vunpack.c.l.b16 %v4115_v17 }
 0x241   : > { %v4805_v54 = vpop.f32.mrf.mxu0  ;;  %v4133_v33 = vor.u32 %v4132_v8, %v8393_v42 }
 0x242   : > { %v5240_v12 = vmax.f32 %v5176_v43, %v5208_v10  ;;  %v4917_v4 = vmul.f32 %v8365_v2, %v4881_v50  ;;  %v4123_v43 = vor.u32 %v4122_v22, %v4119_v35  ;;  %v4136_v10 = vshll.u32 %v8397_v24, 16  ;;  %v4993_v22 = vpop.permute.xlu1 %4992 }
 0x243   : > { %v3697_v9 = vpop.f32.mrf.mxu2  ;;  %v4295_v41 = vpack.c.b16 %v4274_v14, %v4273_v48  ;;  %v4626_v35 = vsel %vm7549_vm5, %v4624_v60, %v4625_v46  ;;  %v8420_v46 = vld [vmem:[#allocation2 + $0xac] sm:$0xf] }
 0x244   : > { %v5272_v51 = vmul.f32 1.4142135, %v5240_v12  ;;  %v5141_v21 = vadd.f32 %v4988_v27, %v4917_v4  ;;  %4844 = vmatmul.bf16.gmra.mxu0 %v4720_v59  ;;  %v3774_v37 = vadd.f32 %v3697_v9, %v8829_v53  ;;  %v5436_v12 = vperm.slane %v5434_v56, 0 }
 0x245   : > { %v4623_v27 = vsel %vm7549_vm5, %v6559_v58, %v4622_v57  ;;  %v4124_v9 = vrot.slane %v4123_v43, 4  ;;  %v4134_v53 = vrot.slane %v4133_v33, 4  ;;  %v6803_v58 = vld [vmem:[#allocation2 + $0x90] sm:$0xff] }
 0x246   : > { %v6613_v50 = vclamps-f32 %v5272_v51, 256.0  ;;  %v5177_v47 = vadd.f32 %v8376_v52, %v5141_v21  ;;  %v4456_v59 = vadd.f32 %v4379_v45, %v3774_v37  ;;  %v4138_v51 = vrot.slane %v4136_v10, 5  ;;  %v3840_v21 = vld [vmem:[#allocation2 + $0xa8] sm:$0xf] }
 0x247   : > { %v4381_v17 = vpop.f32.mrf.mxu3  ;;  %v4699_v14 = vunpack.c.l.b16 %v4623_v27  ;;  %v4700_v37 = vunpack.c.l.b16 %v4626_v35  ;;  %v8418_v60 = vunpack.c.l.bf16 %v5436_v12  ;;  %v4129_v43 = vsel %vm7241_vm2, %v4124_v9, %v8393_v42 }
 0x248   : > { %5368 = vst [vmem:[%s8406_s20] sm:$0xff] %v6613_v50  ;;  %v5209_v16 = vmul.f32 0.2, %v5177_v47  ;;  %v4882_v4 = vadd.f32 %v4805_v54, %v4456_v59  ;;  %v5400_v48 = vpack.c.bf16 %v6613_v50, %v6613_v50  ;;  %v4139_v33 = vsel %vm7241_vm2, %v4134_v53, %v4138_v51 }
 0x249   : > { %v4807_v8 = vpop.f32.mrf.mxu0  ;;  %v4141_v10 = vshrl.u32 %v3840_v21, 16  ;;  %v4144_v50 = vshll.u32 %v3840_v21, 16  ;;  %v4629_v12 = vrot.slane %v8378_v6, 5  ;;  %v4150_v35 = vshll.u32 %v8420_v46, 16 }
 0x24a   : > { %v5241_v1 = vmax.f32 %v5177_v47, %v5209_v16  ;;  %v4918_v45 = vmul.f32 %v8365_v2, %v4882_v4  ;;  %v4721_v4 = vpack.c.b16 %v4700_v37, %v4699_v14  ;;  %v5437_v27 = vunpack.c.l.bf16 %v5400_v48  ;;  %v4998_v37 = vpop.permute.xlu1 %4997 }
 0x24b   : > { %v3699_v56 = vpop.f32.mrf.mxu2  ;;  %v4275_v51 = vunpack.c.l.b16 %v4129_v43  ;;  %v4276_v21 = vunpack.c.l.b16 %v4139_v33  ;;  %v4631_v14 = vrot.slane %v4629_v12, 4 }
 0x24c   : > { %v5273_v54 = vmul.f32 1.4142135, %v5241_v1  ;;  %v5142_v59 = vadd.f32 %v4993_v22, %v4918_v45  ;;  %v3775_v57 = vadd.f32 %v3699_v56, %v7837_v61  ;;  %4423 = vmatmul.bf16.gmra.mxu3 %v4295_v41  ;;  %v4497_v41 = vld [vmem:[#allocation2 + $0x9c] sm:$0xe]  ;;  %v4154_v22 = vshrl.u32 %v8420_v46, 16 }
 0x24d   : > { %v6560_v56 = vrot.slane %v4497_v41, 9  ;;  %v5470_v34 = vmul.f32 %v8418_v60, %v5437_v27 }
 0x24e   : > { %v6614_v1 = vclamps-f32 %v5273_v54, 256.0  ;;  %v5178_v47 = vadd.f32 %v8376_v52, %v5142_v59  ;;  %v4457_v61 = vadd.f32 %v4381_v17, %v3775_v57  ;;  %v4143_v17 = vrot.slane %v4141_v10, 4 }
 0x24f   : > { %v4384_v16 = vpop.f32.mrf.mxu3  ;;  %v4146_v54 = vrot.slane %v4144_v50, 5 }
 0x250   : > { %5369 = vst [vmem:[%s8406_s20 + $0x8] sm:$0xff] %v6614_v1  ;;  %v5210_v42 = vmul.f32 0.2, %v5178_v47  ;;  %v4883_v9 = vadd.f32 %v4807_v8, %v4457_v61  ;;  %3741 = vmatmul.bf16.gmra.mxu2 %v6803_v58  ;;  %v5401_v53 = vpack.c.bf16 %v6614_v1, %v6614_v1  ;;  %v8435_v8 = vrot.slane %v4150_v35, 5  ;;  %v8439_v1 = vld [vmem:[#allocation2 + $0xb0] sm:$0x1] }
 0x251   : > { %v4810_v45 = vpop.f32.mrf.mxu0  ;;  %v4156_v58 = vrot.slane %v4154_v22, 4  ;;  %v4147_v61 = vor.u32 %v4146_v54, %v4143_v17  ;;  %v3843_v22 = vld [vmem:[#allocation2 + $0xb4] sm:$0xf]  ;;  %v5003_v54 = vpop.permute.xlu2 %5002 }
 0x252   : > { %v4919_v6 = vmul.f32 %v8365_v2, %v4883_v9  ;;  %v5438_v59 = vunpack.c.l.bf16 %v5401_v53  ;;  %v5242_v48 = vmax.f32 %v5178_v47, %v5210_v42  ;;  %v4630_v47 = vsel %vm7549_vm5, %v6560_v56, %v4629_v12  ;;  %v8444_v42 = vld [vmem:[#allocation2 + $0xb8] sm:$0xf] }
 0x253   : > { %v3702_v57 = vpop.f32.mrf.mxu2  ;;  %v4633_v9 = vsel %vm7549_vm5, %v4631_v14, %v4632_v23  ;;  %v4157_v53 = vor.u32 %v4156_v58, %v8435_v8  ;;  %v4701_v56 = vunpack.c.l.b16 %v4630_v47  ;;  %v4178_v23 = vshrl.u32 %v8444_v42, 16 }
 0x254   : > { %v5143_v43 = vadd.f32 %v4998_v37, %v4919_v6  ;;  %4849 = vmatmul.bf16.gmra.mxu0 %v4721_v4  ;;  %v3776_v33 = vadd.f32 %v3702_v57, %v7869_v28  ;;  %v5471_v10 = vmul.f32 %v8418_v60, %v5438_v59  ;;  %v5274_v50 = vmul.f32 1.4142135, %v5242_v48 }
 0x255   : > { %v4296_v28 = vpack.c.b16 %v4276_v21, %v4275_v51  ;;  %v4160_v6 = vshll.u32 %v8439_v1, 16  ;;  %v4165_v48 = vshrl.u32 %v3843_v22, 16  ;;  %v4168_v37 = vshll.u32 %v3843_v22, 16 }
 0x256   : > { %v5179_v41 = vadd.f32 %v8376_v52, %v5143_v43  ;;  %v4458_v24 = vadd.f32 %v4384_v16, %v3776_v33  ;;  %v5502_v27 = vpack.c.bf16 %v5471_v10, %v5470_v34  ;;  %v6615_v35 = vclamps-f32 %v5274_v50, 256.0  ;;  %v4498_v16 = vld [vmem:[#allocation2 + $0xa8] sm:$0xe] }
 0x257   : > { %v4386_v4 = vpop.f32.mrf.mxu3  ;;  %v4636_v34 = vrot.slane %v8420_v46, 5  ;;  %v4174_v51 = vshll.u32 %v8444_v42, 16  ;;  %v4702_v14 = vunpack.c.l.b16 %v4633_v9  ;;  %v4158_v33 = vrot.slane %v4157_v53, 4 }
 0x258   : > { %v4884_v12 = vadd.f32 %v4810_v45, %v4458_v24  ;;  %5594 = vmatmul.bf16.vlgmr.msra.gmra.mxu1 %v5502_v27  ;;  %v5211_v17 = vmul.f32 0.2, %v5179_v41  ;;  %5370 = vst [vmem:[%s8406_s20 + $0x10] sm:$0xff] %v6615_v35  ;;  %v4148_v45 = vrot.slane %v4147_v61, 4  ;;  %v5402_v43 = vpack.c.bf16 %v6615_v35, %v6615_v35  ;;  %v6804_v24 = vld [vmem:[#allocation2 + $0x9c] sm:$0xff] }
 0x259   : > { %v4812_v59 = vpop.f32.mrf.mxu0  ;;  %v4162_v10 = vrot.slane %v4160_v6, 5  ;;  %v6561_v50 = vrot.slane %v4498_v16, 9  ;;  %v4638_v22 = vrot.slane %v4636_v34, 4  ;;  %v4167_v20 = vrot.slane %v4165_v48, 4  ;;  %v8460_v6 = vld [vmem:[#allocation2 + $0xbc] sm:$0x1] }
 0x25a   : > { %v4920_v21 = vmul.f32 %v8365_v2, %v4884_v12  ;;  %v5243_v57 = vmax.f32 %v5179_v41, %v5211_v17  ;;  %v4170_v63 = vrot.slane %v4168_v37, 5  ;;  %v8456_v26 = vrot.slane %v4174_v51, 5 }
 0x25b   : > { %v3704_v58 = vpop.f32.mrf.mxu2  ;;  %v4180_v9 = vrot.slane %v4178_v23, 4  ;;  %v4639_v53 = vrot.slane %v8439_v1, 5  ;;  %v4153_v17 = vsel %vm7241_vm2, %v4148_v45, %v8435_v8  ;;  %v4163_v16 = vsel %vm7241_vm2, %v4158_v33, %v4162_v10 }
 0x25c   : > { %v5144_v47 = vadd.f32 %v5003_v54, %v4920_v21  ;;  %v3777_v46 = vadd.f32 %v3704_v58, %v7885_v18  ;;  %4428 = vmatmul.bf16.gmra.mxu3 %v4296_v28  ;;  %v5275_v27 = vmul.f32 1.4142135, %v5243_v57  ;;  %v4722_v18 = vpack.c.b16 %v4702_v14, %v4701_v56  ;;  %v5008_v57 = vpop.permute.xlu2 %5007 }
 0x25d   : > { %v5439_v28 = vunpack.c.l.bf16 %v5402_v43  ;;  %v4637_v1 = vsel %vm7549_vm5, %v6561_v50, %v4636_v34  ;;  %v4171_v51 = vor.u32 %v4170_v63, %v4167_v20  ;;  %v4181_v56 = vor.u32 %v4180_v9, %v8456_v26 }
 0x25e   : > { %v5180_v61 = vadd.f32 %v8376_v52, %v5144_v47  ;;  %v4459_v41 = vadd.f32 %v4386_v4, %v3777_v46  ;;  %v6616_v35 = vclamps-f32 %v5275_v27, 256.0  ;;  %v4184_v23 = vshll.u32 %v8460_v6, 16  ;;  %v526_v47 = vld [vmem:[%s7140_s19 + $0xcc] sm:$0xff]  }
 0x25f   : > { %v4389_v12 = vpop.f32.mrf.mxu3  ;;  %v4640_v14 = vsel %vm7549_vm5, %v4638_v22, %v4639_v53  ;;  %v5472_v58 = vmul.f32 %v8418_v60, %v5439_v28  ;;  %v4277_v43 = vunpack.c.l.b16 %v4153_v17  ;;  %v4278_v34 = vunpack.c.l.b16 %v4163_v16  ;;  %v528_v53 = vld [vmem:[%s7140_s19 + $0xd4] sm:$0x1] }
 0x260   : > { %v5212_v54 = vmul.f32 0.2, %v5180_v61  ;;  %v4885_v48 = vadd.f32 %v4812_v59, %v4459_v41  ;;  %3746 = vmatmul.bf16.gmra.mxu2 %v6804_v24  ;;  %5371 = vst [vmem:[%s8406_s20 + $0x18] sm:$0xff] %v6616_v35  ;;  %v5403_v4 = vpack.c.bf16 %v6616_v35, %v6616_v35  ;;  %v4703_v63 = vunpack.c.l.b16 %v4637_v1 }
 0x261   : > { %v4815_v37 = vpop.f32.mrf.mxu0  ;;  %v4704_v46 = vunpack.c.l.b16 %v4640_v14  ;;  %v8479_v24 = vrot.slane %v4171_v51, 4  ;;  %v8481_v27 = vrot.slane %v4181_v56, 4  ;;  %v8483_v22 = vrot.slane %v4184_v23, 5 }
 0x262   : > { %v4921_v8 = vmul.f32 %v8365_v2, %v4885_v48  ;;  %v5440_v21 = vunpack.c.l.bf16 %v5403_v4  ;;  %v5244_v59 = vmax.f32 %v5180_v61, %v5212_v54  ;;  %v4297_v17 = vpack.c.b16 %v4278_v34, %v4277_v43  ;;  %v4499_v54 = vld [vmem:[#allocation2 + $0xb4] sm:$0xe] }
 0x263   : > { %v3707_v45 = vpop.f32.mrf.mxu2  ;;  %v586_v48 = vunpack.c.h.bf16 %v526_v47  ;;  %v4723_v1 = vpack.c.b16 %v4704_v46, %v4703_v63  ;;  %v4177_v51 = vsel %vm7241_vm2, %v8479_v24, %v8456_v26  ;;  %v587_v56 = vunpack.c.l.bf16 %v528_v53 }
 0x264   : > { %v5145_v20 = vadd.f32 %v5008_v57, %v4921_v8  ;;  %4854 = vmatmul.bf16.gmra.mxu0 %v4722_v18  ;;  %v3778_v33 = vadd.f32 %v3707_v45, %v7914_v39  ;;  %v5473_v10 = vmul.f32 %v8418_v60, %v5440_v21  ;;  %v5276_v50 = vmul.f32 1.4142135, %v5244_v59  ;;  %v8497_v21 = vld [vmem:[#allocation2 + $0xc4] sm:$0xf]  ;;  %v5013_v59 = vpop.permute.xlu0 %5012 }
 0x265   : > { %v585_v39 = vunpack.c.l.bf16 %v526_v47  ;;  %v4643_v26 = vrot.slane %v8444_v42, 5  ;;  %v641_v43 = vmul.f32 %v7155_v25, %v586_v48  ;;  %v4198_v47 = vshll.u32 %v8497_v21, 16 }
 0x266   : > { %v5181_v9 = vadd.f32 %v8376_v52, %v5145_v20  ;;  %v4460_v61 = vadd.f32 %v4389_v12, %v3778_v33  ;;  %v5503_v41 = vpack.c.bf16 %v5473_v10, %v5472_v58  ;;  %v6617_v35 = vclamps-f32 %v5276_v50, 256.0  ;;  %v3846_v12 = vld [vmem:[#allocation2 + $0xc0] sm:$0xf]  ;;  %v6805_v20 = vld [vmem:[#allocation2 + $0xa8] sm:$0xff] }
 0x267   : > { %v4391_v18 = vpop.f32.mrf.mxu3  ;;  %v640_v14 = vmul.f32 %v7155_v25, %v585_v39  ;;  %v6562_v58 = vrot.slane %v4499_v54, 9  ;;  %v4189_v10 = vshrl.u32 %v3846_v12, 16  ;;  %v4192_v50 = vshll.u32 %v3846_v12, 16 }
 0x268   : > { %v4886_v28 = vadd.f32 %v4815_v37, %v4460_v61  ;;  %5599 = vmatmul.bf16.gmra.mxu1 %v5503_v41  ;;  %v5213_v16 = vmul.f32 0.2, %v5181_v9  ;;  %5372 = vst [vmem:[%s8406_s20 + $0x20] sm:$0xff] %v6617_v35  ;;  %v4187_v37 = vsel %vm7241_vm2, %v8481_v27, %v8483_v22  ;;  %v5404_v45 = vpack.c.bf16 %v6617_v35, %v6617_v35 }
 0x269   : > { %v4817_v4 = vpop.f32.mrf.mxu0  ;;  %v4202_v46 = vshrl.u32 %v8497_v21, 16  ;;  %v642_v24 = vmul.f32 %v7155_v25, %v587_v56  ;;  %v4646_v35 = vrot.slane %v8460_v6, 5  ;;  %v695_v53 = vpack.c.bf16 %v641_v43, %v641_v43  ;;  %v5018_v6 = vpop.permute.xlu1 %5017 }
 0x26a   : > { %v4922_v23 = vmul.f32 %v8365_v2, %v4886_v28  ;;  %v5245_v8 = vmax.f32 %v5181_v9, %v5213_v16  ;;  %v694_v9 = vpack.c.bf16 %v640_v14, %v640_v14  ;;  %v5441_v41 = vunpack.c.l.bf16 %v5404_v45  ;;  %v8512_v14 = vld [vmem:[#allocation2 + $0xc8] sm:$0x1] }
 0x26b   : > { %v3709_v57 = vpop.f32.mrf.mxu2  ;;  %v4191_v16 = vrot.slane %v4189_v10, 4  ;;  %v4194_v48 = vrot.slane %v4192_v50, 5  ;;  %v8509_v25 = vrot.slane %v4198_v47, 5  ;;  %v4204_v12 = vrot.slane %v4202_v46, 4  ;;  %749 = vst [vmem:[#allocation2 + $0xd0] sm:$0xf] %v695_v53 }
 0x26c   : > { %v5146_v34 = vadd.f32 %v5013_v59, %v4922_v23  ;;  %v3779_v63 = vadd.f32 %v3709_v57, %v7941_v13  ;;  %4433 = vmatmul.bf16.gmra.mxu3 %v4297_v17  ;;  %v5277_v33 = vmul.f32 1.4142135, %v5245_v8  ;;  %v4645_v13 = vrot.slane %v4643_v26, 4  ;;  %748 = vst [vmem:[#allocation2 + $0xcc] sm:$0xf] %v694_v9 }
 0x26d   : > { %v5474_v59 = vmul.f32 %v8418_v60, %v5441_v41  ;;  %v4279_v57 = vunpack.c.l.b16 %v4177_v51  ;;  %v4280_v45 = vunpack.c.l.b16 %v4187_v37  ;;  %v4644_v43 = vsel %vm7549_vm5, %v6562_v58, %v4643_v26 }
 0x26e   : > { %v5182_v27 = vadd.f32 %v8376_v52, %v5146_v34  ;;  %v4461_v42 = vadd.f32 %v4391_v18, %v3779_v63  ;;  %v6618_v22 = vclamps-f32 %v5277_v33, 256.0  ;;  %v696_v18 = vpack.c.bf16 %v642_v24, %v642_v24 }
 0x26f   : > { %v4394_v61 = vpop.f32.mrf.mxu3  ;;  %v4647_v10 = vsel %vm7549_vm5, %v4645_v13, %v4646_v35  ;;  %v4195_v50 = vor.u32 %v4194_v48, %v4191_v16  ;;  %v4205_v47 = vor.u32 %v4204_v12, %v8509_v25  ;;  %v4208_v51 = vshll.u32 %v8512_v14, 16 }
 0x270   : > { %v5214_v39 = vmul.f32 0.2, %v5182_v27  ;;  %v4887_v28 = vadd.f32 %v4817_v4, %v4461_v42  ;;  %3751 = vmatmul.bf16.gmra.mxu2 %v6805_v20  ;;  %5373 = vst [vmem:[%s8406_s20 + $0x28] sm:$0xff] %v6618_v22  ;;  %v5405_v17 = vpack.c.bf16 %v6618_v22, %v6618_v22  ;;  %v4706_v9 = vunpack.c.l.b16 %v4647_v10 }
 0x271   : > { %v4820_v54 = vpop.f32.mrf.mxu0  ;;  %750 = vst [vmem:[#allocation2 + $0xd4] sm:$0x1] %v696_v18  ;;  %v4196_v41 = vrot.slane %v4195_v50, 4  ;;  %v4206_v13 = vrot.slane %v4205_v47, 4  ;;  %v4210_v35 = vrot.slane %v4208_v51, 5  ;;  %v3466_v53 = vadd.f32 %v7943_v62, %v7984_v7  ;;  %v6806_v18 = vld [vmem:[#allocation2 + $0xb4] sm:$0xff] }
 0x272   : > { %v4923_v56 = vmul.f32 %v8365_v2, %v4887_v28  ;;  %v5442_v23 = vunpack.c.l.bf16 %v5405_v17  ;;  %v5246_v8 = vmax.f32 %v5182_v27, %v5214_v39  ;;  %v4705_v27 = vunpack.c.l.b16 %v4644_v43  ;;  %v5023_v28 = vpop.permute.xlu2 %5022 }
 0x273   : > { %v3712_v4 = vpop.f32.mrf.mxu2  ;;  %v4211_v62 = vsel %vm7241_vm2, %v4206_v13, %v4210_v35  ;;  %v4650_v7 = vrot.slane %v8497_v21, 5 }
 0x274   : > { %v5147_v34 = vadd.f32 %v5018_v6, %v4923_v56  ;;  %4859 = vmatmul.bf16.gmra.mxu0 %v4723_v1  ;;  %v3780_v63 = vadd.f32 %v3712_v4, %v7973_v36  ;;  %v5475_v20 = vmul.f32 %v8418_v60, %v5442_v23  ;;  %v5278_v33 = vmul.f32 1.4142135, %v5246_v8  ;;  %v8528_v23 = vld [vmem:[#allocation2 + $0xd0] sm:$0xf] }
 0x275   : > { %v4298_v36 = vpack.c.b16 %v4280_v45, %v4279_v57  ;;  %v4724_v8 = vpack.c.b16 %v4706_v9, %v4705_v27  ;;  %v4201_v6 = vsel %vm7241_vm2, %v4196_v41, %v8509_v25  ;;  %v4500_v45 = vld [vmem:[#allocation2 + $0xc0] sm:$0xe]  ;;  %v4226_v10 = vshrl.u32 %v8528_v23, 16 }
 0x276   : > { %v5183_v37 = vadd.f32 %v8376_v52, %v5147_v34  ;;  %v4462_v58 = vadd.f32 %v4394_v61, %v3780_v63  ;;  %v5504_v26 = vpack.c.bf16 %v5475_v20, %v5474_v59  ;;  %v6619_v46 = vclamps-f32 %v5278_v33, 256.0 }
 0x277   : > { %v4396_v1 = vpop.f32.mrf.mxu3  ;;  %v4222_v33 = vshll.u32 %v8528_v23, 16  ;;  %v4281_v51 = vunpack.c.l.b16 %v4201_v6  ;;  %v4228_v35 = vrot.slane %v4226_v10, 4 }
 0x278   : > { %v4888_v24 = vadd.f32 %v4820_v54, %v4462_v58  ;;  %5604 = vmatmul.bf16.gmra.mxu1 %v5504_v26  ;;  %v5215_v42 = vmul.f32 0.2, %v5183_v37  ;;  %5374 = vst [vmem:[%s8406_s20 + $0x30] sm:$0xff] %v6619_v46  ;;  %v5406_v16 = vpack.c.bf16 %v6619_v46, %v6619_v46  ;;  %v3849_v54 = vld [vmem:[#allocation2 + $0xcc] sm:$0xf]  ;;  %v6563_v58 = vrot.slane %v4500_v45, 9 }
 0x279   : > { %v4822_v22 = vpop.f32.mrf.mxu0  ;;  %v4213_v43 = vshrl.u32 %v3849_v54, 16  ;;  %v4216_v20 = vshll.u32 %v3849_v54, 16  ;;  %v4652_v26 = vrot.slane %v4650_v7, 4  ;;  %v4653_v46 = vrot.slane %v8512_v14, 5  ;;  %v8830_v45 = vld [vmem:[#allocation10_spill] sm:$0xff] }
 0x27a   : > { %v4924_v39 = vmul.f32 %v8365_v2, %v4888_v24  ;;  %v5247_v61 = vmax.f32 %v5183_v37, %v5215_v42  ;;  %v5443_v63 = vunpack.c.l.bf16 %v5406_v16  ;;  %v4282_v37 = vunpack.c.l.b16 %v4211_v62  ;;  %v5028_v42 = vpop.permute.xlu0 %5027 }
 0x27b   : > { %v3714_v17 = vpop.f32.mrf.mxu2  ;;  %v4215_v27 = vrot.slane %v4213_v43, 4  ;;  %v4224_v13 = vrot.slane %v4222_v33, 5  ;;  %v3468_v43 = vadd.f32 %v8830_v45, %v8033_v30 }
 0x27c   : > { %v5148_v48 = vadd.f32 %v5023_v28, %v4924_v39  ;;  %v3781_v12 = vadd.f32 %v3714_v17, %v3466_v53  ;;  %4438 = vmatmul.bf16.gmra.mxu3 %v4298_v36  ;;  %v5279_v56 = vmul.f32 1.4142135, %v5247_v61  ;;  %v5476_v41 = vmul.f32 %v8418_v60, %v5443_v63  ;;  %v8545_v28 = vld [vmem:[#allocation2 + $0xd4] sm:$0x1] }
 0x27e   : > { %v5184_v4 = vadd.f32 %v8376_v52, %v5148_v48  ;;  %v4463_v59 = vadd.f32 %v4396_v1, %v3781_v12  ;;  %v6620_v57 = vclamps-f32 %v5279_v56, 256.0  ;;  %v4651_v56 = vsel %vm7549_vm5, %v6563_v58, %v4650_v7  ;;  %v5033_v7 = vpop.permute.xlu1 %5032 }
 0x27f   : > { %v4399_v34 = vpop.f32.mrf.mxu3  ;;  %v4707_v63 = vunpack.c.l.b16 %v4651_v56 }
 0x280   : > { %v5216_v25 = vmul.f32 0.2, %v5184_v4  ;;  %v4889_v50 = vadd.f32 %v4822_v22, %v4463_v59  ;;  %3756 = vmatmul.bf16.gmra.mxu2 %v6806_v18  ;;  %5375 = vst [vmem:[%s8406_s20 + $0x38] sm:$0xff] %v6620_v57  ;;  %v5407_v47 = vpack.c.bf16 %v6620_v57, %v6620_v57  ;;  %v4218_v22 = vrot.slane %v4216_v20, 5 }
 0x281   : > { %v4825_v21 = vpop.f32.mrf.mxu0  ;;  %v4299_v18 = vpack.c.b16 %v4282_v37, %v4281_v51  ;;  %v4229_v59 = vor.u32 %v4228_v35, %v4224_v13  ;;  %v6807_v37 = vld [vmem:[#allocation2 + $0xc0] sm:$0xff] }
 0x282   : > { %v4925_v1 = vmul.f32 %v8365_v2, %v4889_v50  ;;  %v5444_v24 = vunpack.c.l.bf16 %v5407_v47  ;;  %v5248_v36 = vmax.f32 %v5184_v4, %v5216_v25  ;;  %v4219_v6 = vor.u32 %v4218_v22, %v4215_v27 }
 0x283   : > { %v3717_v9 = vpop.f32.mrf.mxu2  ;;  %v4654_v4 = vsel %vm7549_vm5, %v4652_v26, %v4653_v46  ;;  %v4230_v26 = vrot.slane %v4229_v59, 4 }
 0x284   : > { %v5149_v53 = vadd.f32 %v5028_v42, %v4925_v1  ;;  %4864 = vmatmul.bf16.gmra.mxu0 %v4724_v8  ;;  %v3782_v39 = vadd.f32 %v3717_v9, %v8020_v29  ;;  %v5477_v61 = vmul.f32 %v8418_v60, %v5444_v24  ;;  %v5280_v14 = vmul.f32 1.4142135, %v5248_v36 }
 0x285   : > { %v4232_v8 = vshll.u32 %v8545_v28, 16  ;;  %v4708_v10 = vunpack.c.l.b16 %v4654_v4  ;;  %v4220_v50 = vrot.slane %v4219_v6, 4 }
 0x286   : > { %v5185_v17 = vadd.f32 %v8376_v52, %v5149_v53  ;;  %v4464_v16 = vadd.f32 %v4399_v34, %v3782_v39  ;;  %v5505_v54 = vpack.c.bf16 %v5477_v61, %v5476_v41  ;;  %v6621_v48 = vclamps-f32 %v5280_v14, 256.0  ;;  %v4501_v53 = vld [vmem:[#allocation2 + $0xcc] sm:$0xe] }
 0x287   : > { %v4401_v12 = vpop.f32.mrf.mxu3  ;;  %v4234_v47 = vrot.slane %v4232_v8, 5  ;;  %v4725_v36 = vpack.c.b16 %v4708_v10, %v4707_v63  ;;  %v4225_v42 = vsel %vm7241_vm2, %v4220_v50, %v4224_v13  ;;  %v4657_v61 = vrot.slane %v8528_v23, 5  ;;  %v5043_v50 = vpop.permute.xlu0 %5042 }
 0x288   : > { %v5217_v29 = vmul.f32 0.2, %v5185_v17  ;;  %v4890_v62 = vadd.f32 %v4825_v21, %v4464_v16  ;;  %5609 = vmatmul.bf16.gmra.mxu1 %v5505_v54  ;;  %5376 = vst [vmem:[%s8406_s20 + $0x40] sm:$0xff] %v6621_v48  ;;  %v5408_v25 = vpack.c.bf16 %v6621_v48, %v6621_v48  ;;  %v5038_v54 = vpop.permute.xlu2 %5037  ;;  %v6564_v56 = vrot.slane %v4501_v53, 9 }
 0x289   : > { %v4827_v57 = vpop.f32.mrf.mxu0  ;;  %v4235_v35 = vsel %vm7241_vm2, %v4230_v26, %v4234_v47  ;;  %v4659_v23 = vrot.slane %v4657_v61, 4  ;;  %v6808_v26 = vld [vmem:[#allocation2 + $0xcc] sm:$0xff] }
 0x28a   : > { %v4926_v34 = vmul.f32 %v8365_v2, %v4890_v62  ;;  %v5249_v20 = vmax.f32 %v5185_v17, %v5217_v29  ;;  %v5445_v27 = vunpack.c.l.bf16 %v5408_v25  ;;  %v4660_v62 = vrot.slane %v8545_v28, 5 }
 0x28b   : > { %v3719_v33 = vpop.f32.mrf.mxu2  ;;  %v3470_v28 = vadd.f32 %v8041_v38, %v8085_v3 }
 0x28c   : > { %v5150_v51 = vadd.f32 %v5033_v7, %v4926_v34  ;;  %v3783_v21 = vadd.f32 %v3719_v33, %v3468_v43  ;;  %4443 = vmatmul.bf16.gmra.mxu3 %v4299_v18  ;;  %v5281_v58 = vmul.f32 1.4142135, %v5249_v20  ;;  %v5478_v13 = vmul.f32 %v8418_v60, %v5445_v27 }
 0x28d   : > { %v4284_v18 = vunpack.c.l.b16 %v4235_v35  ;;  %v4658_v7 = vsel %vm7549_vm5, %v6564_v56, %v4657_v61  ;;  %v4661_v33 = vsel %vm7549_vm5, %v4659_v23, %v4660_v62  ;;  %v3472_v23 = vadd.f32 %v8098_v44, %v8124_v5 }
 0x28e   : > { %v5186_v46 = vadd.f32 %v8376_v52, %v5150_v51  ;;  %v4465_v30 = vadd.f32 %v4401_v12, %v3783_v21  ;;  %v6622_v1 = vclamps-f32 %v5281_v58, 256.0  ;;  %v4283_v12 = vunpack.c.l.b16 %v4225_v42 }
 0x28f   : > { %v4404_v24 = vpop.f32.mrf.mxu3  ;;  %v4709_v51 = vunpack.c.l.b16 %v4658_v7 }
 0x290   : > { %v5218_v9 = vmul.f32 0.2, %v5186_v46  ;;  %v4891_v41 = vadd.f32 %v4827_v57, %v4465_v30  ;;  %3761 = vmatmul.bf16.gmra.mxu2 %v6807_v37  ;;  %5377 = vst [vmem:[%s8406_s20 + $0x48] sm:$0xff] %v6622_v1  ;;  %v5409_v22 = vpack.c.bf16 %v6622_v1, %v6622_v1  ;;  %v4300_v20 = vpack.c.b16 %v4284_v18, %v4283_v12 }
 0x291   : > { %v4830_v39 = vpop.f32.mrf.mxu0 }
 0x292   : > { %v4927_v14 = vmul.f32 %v8365_v2, %v4891_v41  ;;  %v5446_v17 = vunpack.c.l.bf16 %v5409_v22  ;;  %v5250_v16 = vmax.f32 %v5186_v46, %v5218_v9  ;;  %v4710_v46 = vunpack.c.l.b16 %v4661_v33 }
 0x293   : > { %v3722_v48 = vpop.f32.mrf.mxu2 }
 0x294   : > { %v5151_v6 = vadd.f32 %v5038_v54, %v4927_v14  ;;  %4869 = vmatmul.bf16.gmra.mxu0 %v4725_v36  ;;  %v3784_v49 = vadd.f32 %v3722_v48, %v8070_v19  ;;  %v5479_v8 = vmul.f32 %v8418_v60, %v5446_v17  ;;  %v5282_v29 = vmul.f32 1.4142135, %v5250_v16 }
 0x295   : > { %v4726_v42 = vpack.c.b16 %v4710_v46, %v4709_v51  ;;  %v5058_v51 = vpop.permute.xlu0 %5057 }
 0x296   : > { %v5187_v4 = vadd.f32 %v8376_v52, %v5151_v6  ;;  %v4466_v59 = vadd.f32 %v4404_v24, %v3784_v49  ;;  %v5506_v57 = vpack.c.bf16 %v5479_v8, %v5478_v13  ;;  %v6623_v45 = vclamps-f32 %v5282_v29, 256.0 }
 0x297   : > { %v4406_v43 = vpop.f32.mrf.mxu3 }
 0x298   : > { %v5219_v34 = vmul.f32 0.2, %v5187_v4  ;;  %v4892_v63 = vadd.f32 %v4830_v39, %v4466_v59  ;;  %5614 = vmatmul.bf16.gmra.mxu1 %v5506_v57  ;;  %5378 = vst [vmem:[%s8406_s20 + $0x50] sm:$0xff] %v6623_v45  ;;  %v5410_v21 = vpack.c.bf16 %v6623_v45, %v6623_v45  ;;  %v5048_v39 = vpop.permute.xlu1 %5047 }
 0x299   : > { %v4832_v19 = vpop.f32.mrf.mxu0 }
 0x29a   : > { %v4928_v10 = vmul.f32 %v8365_v2, %v4892_v63  ;;  %v5251_v25 = vmax.f32 %v5187_v4, %v5219_v34  ;;  %v5447_v38 = vunpack.c.l.bf16 %v5410_v21  ;;  %v5053_v4 = vpop.permute.xlu2 %5052 }
 0x29b   : > { %v3724_v47 = vpop.f32.mrf.mxu2 }
 0x29c   : > { %v5152_v37 = vadd.f32 %v5043_v50, %v4928_v10  ;;  %v3785_v58 = vadd.f32 %v3724_v47, %v3470_v28  ;;  %4448 = vmatmul.bf16.gmra.mxu3 %v4300_v20  ;;  %v5283_v30 = vmul.f32 1.4142135, %v5251_v25  ;;  %v5480_v14 = vmul.f32 %v8418_v60, %v5447_v38 }
 0x29e   : > { %v5188_v0 = vadd.f32 %v8376_v52, %v5152_v37  ;;  %v4467_v1 = vadd.f32 %v4406_v43, %v3785_v58  ;;  %v6624_v24 = vclamps-f32 %v5283_v30, 256.0  ;;  %v8601_v30 = vld [vmem:[%s8787_s5] ss:$0 sm:$0xff] }
 0x29f   : > { %v4409_v36 = vpop.f32.mrf.mxu3 }
 0x2a0   : > { %v5220_v3 = vmul.f32 0.2, %v5188_v0  ;;  %v4893_v27 = vadd.f32 %v4832_v19, %v4467_v1  ;;  %3766 = vmatmul.bf16.gmra.mxu2 %v6808_v26  ;;  %5379 = vst [vmem:[%s8406_s20 + $0x58] sm:$0xff] %v6624_v24  ;;  %v5411_v9 = vpack.c.bf16 %v6624_v24, %v6624_v24 }
 0x2a1   : > { %v4835_v41 = vpop.f32.mrf.mxu0 }
 0x2a2   : > { %v4929_v22 = vmul.f32 %v8365_v2, %v4893_v27  ;;  %v5448_v35 = vunpack.c.l.bf16 %v5411_v9  ;;  %v5252_v53 = vmax.f32 %v5188_v0, %v5220_v3 }
 0x2a3   : > { %v3727_v61 = vpop.f32.mrf.mxu2 }
 0x2a4   : > { %v5153_v17 = vadd.f32 %v5048_v39, %v4929_v22  ;;  %4874 = vmatmul.bf16.gmra.mxu0 %v4726_v42  ;;  %v3786_v16 = vadd.f32 %v3727_v61, %v8119_v40  ;;  %v5481_v54 = vmul.f32 %v8418_v60, %v5448_v35  ;;  %v5284_v48 = vmul.f32 1.4142135, %v5252_v53  ;;  %v5063_v22 = vpop.permute.xlu1 %5062 }
 0x2a6   : > { %v5189_v13 = vadd.f32 %v8376_v52, %v5153_v17  ;;  %v4468_v12 = vadd.f32 %v4409_v36, %v3786_v16  ;;  %v5507_v18 = vpack.c.bf16 %v5481_v54, %v5480_v14  ;;  %v6625_v56 = vclamps-f32 %v5284_v48, 256.0 }
 0x2a7   : > { %v4411_v6 = vpop.f32.mrf.mxu3 }
 0x2a8   : > { %v5221_v49 = vmul.f32 0.2, %v5189_v13  ;;  %v4894_v8 = vadd.f32 %v4835_v41, %v4468_v12  ;;  %5619 = vmatmul.bf16.gmra.mxu1 %v5507_v18  ;;  %5380 = vst [vmem:[%s8406_s20 + $0x60] sm:$0xff] %v6625_v56  ;;  %v5412_v57 = vpack.c.bf16 %v6625_v56, %v6625_v56 }
 0x2a9   : > { %v4837_v29 = vpop.f32.mrf.mxu0 }
 0x2aa   : > { %v4930_v40 = vmul.f32 %v8365_v2, %v4894_v8  ;;  %v5253_v62 = vmax.f32 %v5189_v13, %v5221_v49  ;;  %v5449_v33 = vunpack.c.l.bf16 %v5412_v57  ;;  %v8592_v2 = vld [vmem:[%s8147_s12] ss:$0 sm:$0xff]  ;;  %v5068_v8 = vpop.permute.xlu2 %5067 }
 0x2ab   : > { %v3729_v59 = vpop.f32.mrf.mxu2 }
 0x2ac   : > { %v5154_v45 = vadd.f32 %v5053_v4, %v4930_v40  ;;  %v3787_v43 = vadd.f32 %v3729_v59, %v3472_v23  ;;  %v5285_v34 = vmul.f32 1.4142135, %v5253_v62 }
 0x2ae   : > { %v5190_v63 = vadd.f32 %v8376_v52, %v5154_v45  ;;  %v4469_v20 = vadd.f32 %v4411_v6, %v3787_v43  ;;  %v6626_v7 = vclamps-f32 %v5285_v34, 256.0  ;;  %v5482_v52 = vmul.f32 %v8418_v60, %v5449_v33  ;;  %v8831_v33 = vld [vmem:[#allocation11_spill] sm:$0xff] }
 0x2af   : > { %v4414_v19 = vpop.f32.mrf.mxu3 }
 0x2b0   : > { %v5222_v28 = vmul.f32 0.2, %v5190_v63  ;;  %v4895_v10 = vadd.f32 %v4837_v29, %v4469_v20  ;;  %5381 = vst [vmem:[%s8406_s20 + $0x68] sm:$0xff] %v6626_v7  ;;  %v5413_v44 = vpack.c.bf16 %v6626_v7, %v6626_v7 }
 0x2b1   : > { %v4840_v5 = vpop.f32.mrf.mxu0 }
 0x2b2   : > { %v4931_v25 = vmul.f32 %v8592_v2, %v4895_v10  ;;  %v5450_v50 = vunpack.c.l.bf16 %v5413_v44  ;;  %v5254_v47 = vmax.f32 %v5190_v63, %v5222_v28  ;;  %v3476_v28 = vadd.f32 %v8831_v33, %v8203_v31  ;;  %v5073_v44 = vpop.permute.xlu0 %5072 }
 0x2b3   : > { %v3732_v21 = vpop.f32.mrf.mxu2 }
 0x2b4   : > { %v5155_v37 = vadd.f32 %v5058_v51, %v4931_v25  ;;  %v3788_v58 = vadd.f32 %v3732_v21, %v8165_v55  ;;  %v5483_v26 = vmul.f32 %v8418_v60, %v5450_v50  ;;  %v5286_v46 = vmul.f32 1.4142135, %v5254_v47  ;;  %v8619_v21 = vpop.f32.mrf.mxu1 }
 0x2b5   : > { %v3474_v55 = vadd.f32 %v8139_v32, %v8173_v11 }
 0x2b6   : > { %v5191_v0 = vadd.f32 %v8601_v30, %v5155_v37  ;;  %v4470_v1 = vadd.f32 %v4414_v19, %v3788_v58  ;;  %v5508_v24 = vpack.c.bf16 %v5483_v26, %v5482_v52  ;;  %v6627_v36 = vclamps-f32 %v5286_v46, 256.0 }
 0x2b7   : > { %v4416_v38 = vpop.f32.mrf.mxu3 }
 0x2b8   : > { %v5223_v3 = vmul.f32 0.2, %v5191_v0  ;;  %v4896_v27 = vadd.f32 %v4840_v5, %v4470_v1  ;;  %5624 = vmatmul.bf16.gmra.mxu1 %v5508_v24  ;;  %5382 = vst [vmem:[%s8406_s20 + $0x70] sm:$0xff] %v6627_v36  ;;  %v5414_v53 = vpack.c.bf16 %v6627_v36, %v6627_v36 }
 0x2b9   : > { %v4842_v42 = vpop.f32.mrf.mxu0 }
 0x2ba   : > { %v4932_v9 = vmul.f32 %v8592_v2, %v4896_v27  ;;  %v5255_v41 = vmax.f32 %v5191_v0, %v5223_v3  ;;  %v5451_v13 = vunpack.c.l.bf16 %v5414_v53 }
 0x2bb   : > { %v3734_v35 = vpop.f32.mrf.mxu2 }
 0x2bc   : > { %v5156_v39 = vadd.f32 %v5063_v22, %v4932_v9  ;;  %v3789_v61 = vadd.f32 %v3734_v35, %v3474_v55  ;;  %v5287_v14 = vmul.f32 1.4142135, %v5255_v41  ;;  %v5484_v23 = vmul.f32 %v8418_v60, %v5451_v13  ;;  %v8832_v22 = vld [vmem:[#allocation13_spill] sm:$0xff] }
 0x2be   : > { %v5192_v17 = vadd.f32 %v8601_v30, %v5156_v39  ;;  %v4471_v16 = vadd.f32 %v4416_v38, %v3789_v61  ;;  %v6628_v54 = vclamps-f32 %v5287_v14, 256.0  ;;  %v8627_v38 = vld [vmem:[%s8790_s8] ss:$0 sm:$0xff] }
 0x2bf   : > { %v4419_v48 = vpop.f32.mrf.mxu3 }
 0x2c0   : > { %v5224_v12 = vmul.f32 0.2, %v5192_v17  ;;  %v4897_v18 = vadd.f32 %v4842_v42, %v4471_v16  ;;  %5383 = vst [vmem:[%s8406_s20 + $0x78] sm:$0xff] %v6628_v54  ;;  %v5415_v32 = vpack.c.bf16 %v6628_v54, %v6628_v54  ;;  %v5078_v42 = vpop.permute.xlu1 %5077 }
 0x2c1   : > { %v4845_v11 = vpop.f32.mrf.mxu0 }
 0x2c2   : > { %v4933_v56 = vmul.f32 %v8592_v2, %v4897_v18  ;;  %v5452_v6 = vunpack.c.l.bf16 %v5415_v32  ;;  %v5256_v49 = vmax.f32 %v5192_v17, %v5224_v12 }
 0x2c3   : > { %v3737_v29 = vpop.f32.mrf.mxu2 }
 0x2c4   : > { %v5157_v40 = vadd.f32 %v5068_v8, %v4933_v56  ;;  %v3790_v62 = vadd.f32 %v3737_v29, %v8193_v15  ;;  %v5485_v4 = vmul.f32 %v8418_v60, %v5452_v6  ;;  %v5288_v59 = vmul.f32 1.4142135, %v5256_v49  ;;  %v8833_v56 = vld [vmem:[#allocation14_spill] sm:$0xff]  ;;  %v8834_v6 = vld [vmem:[#allocation12_spill] sm:$0xff] }
 0x2c5   : > { %v3478_v49 = vadd.f32 %v8834_v6, %v8833_v56 }
 0x2c6   : > { %v5193_v57 = vadd.f32 %v8601_v30, %v5157_v40  ;;  %v4472_v45 = vadd.f32 %v4419_v48, %v3790_v62  ;;  %v5509_v43 = vpack.c.bf16 %v5485_v4, %v5484_v23  ;;  %v6629_v34 = vclamps-f32 %v5288_v59, 256.0  ;;  %v5083_v23 = vpop.permute.xlu2 %5082 }
 0x2c7   : > { %v4421_v63 = vpop.f32.mrf.mxu3 }
 0x2c8   : > { %v5225_v20 = vmul.f32 0.2, %v5193_v57  ;;  %v4898_v7 = vadd.f32 %v4845_v11, %v4472_v45  ;;  %5629 = vmatmul.bf16.gmra.mxu1 %v5509_v43  ;;  %5384 = vst [vmem:[%s8406_s20 + $0x80] sm:$0xff] %v6629_v34  ;;  %v5416_v25 = vpack.c.bf16 %v6629_v34, %v6629_v34 }
 0x2c9   : > { %v4847_v19 = vpop.f32.mrf.mxu0 }
 0x2ca   : > { %v4934_v10 = vmul.f32 %v8592_v2, %v4898_v7  ;;  %v5257_v15 = vmax.f32 %v5193_v57, %v5225_v20  ;;  %v5453_v46 = vunpack.c.l.bf16 %v5416_v25 }
 0x2cb   : > { %v3739_v5 = vpop.f32.mrf.mxu2 }
 0x2cc   : > { %v5158_v50 = vadd.f32 %v5073_v44, %v4934_v10  ;;  %v3791_v47 = vadd.f32 %v3739_v5, %v3476_v28  ;;  %v5289_v51 = vmul.f32 1.4142135, %v5257_v15  ;;  %v5486_v9 = vmul.f32 %v8418_v60, %v5453_v46 }
 0x2ce   : > { %v5194_v52 = vadd.f32 %v8601_v30, %v5158_v50  ;;  %v4473_v37 = vadd.f32 %v4421_v63, %v3791_v47  ;;  %v6630_v58 = vclamps-f32 %v5289_v51, 256.0  ;;  %v5088_v47 = vpop.permute.xlu0 %5087 }
 0x2cf   : > { %v4424_v26 = vpop.f32.mrf.mxu3 }
 0x2d0   : > { %v5226_v0 = vmul.f32 0.2, %v5194_v52  ;;  %v4899_v31 = vadd.f32 %v4847_v19, %v4473_v37  ;;  %5385 = vst [vmem:[%s8406_s20 + $0x88] sm:$0xff] %v6630_v58  ;;  %v5417_v1 = vpack.c.bf16 %v6630_v58, %v6630_v58  ;;  %v8835_v58 = vld [vmem:[#allocation16_spill] sm:$0xff] }
 0x2d1   : > { %v4850_v24 = vpop.f32.mrf.mxu0 }
 0x2d2   : > { %v4935_v36 = vmul.f32 %v8592_v2, %v4899_v31  ;;  %v5454_v3 = vunpack.c.l.bf16 %v5417_v1  ;;  %v5258_v27 = vmax.f32 %v5194_v52, %v5226_v0 }
 0x2d3   : > { %v3742_v55 = vpop.f32.mrf.mxu2 }
 0x2d4   : > { %v5159_v41 = vadd.f32 %v5078_v42, %v4935_v36  ;;  %v3792_v35 = vadd.f32 %v3742_v55, %v8832_v22  ;;  %v5487_v53 = vmul.f32 %v8418_v60, %v5454_v3  ;;  %v5290_v39 = vmul.f32 1.4142135, %v5258_v27 }
 0x2d5   : > { %v5595_v61 = vpop.f32.mrf.mxu1 }
 0x2d6   : > { %v5195_v14 = vadd.f32 %v8601_v30, %v5159_v41  ;;  %v4474_v17 = vadd.f32 %v4424_v26, %v3792_v35  ;;  %v5596_v16 = vadd.f32 %v8627_v38, %v5595_v61  ;;  %v5510_v54 = vpack.c.bf16 %v5487_v53, %v5486_v9  ;;  %v8836_v35 = vld [vmem:[#allocation17_spill] sm:$0xff]  ;;  %v8837_v53 = vld [vmem:[#allocation15_spill] sm:$0xff] }
 0x2d7   : > { %v4426_v48 = vpop.f32.mrf.mxu3  ;;  %v6631_v13 = vclamps-f32 %v5290_v39, 256.0  ;;  %v3480_v39 = vadd.f32 %v8837_v53, %v8836_v35 }
 0x2d8   : > { %v5227_v12 = vmul.f32 0.2, %v5195_v14  ;;  %v4900_v18 = vadd.f32 %v4850_v24, %v4474_v17  ;;  %v6677_v32 = vclamps-f32 %v5596_v16, 256.0  ;;  %5634 = vmatmul.bf16.gmra.mxu1 %v5510_v54  ;;  %v5093_v17 = vpop.permute.xlu1 %5092 }
 0x2d9   : > { %v4852_v11 = vpop.f32.mrf.mxu0  ;;  %5386 = vst [vmem:[%s8406_s20 + $0x90] sm:$0xff] %v6631_v13  ;;  %v5418_v62 = vpack.c.bf16 %v6631_v13, %v6631_v13 }
 0x2da   : > { %v4936_v8 = vmul.f32 %v8592_v2, %v4900_v18  ;;  %5739 = vst [vmem:[%s8639_s25] sm:$0xff] %v6677_v32  ;;  %v5259_v29 = vmax.f32 %v5195_v14, %v5227_v12 }
 0x2db   : > { %v3744_v40 = vpop.f32.mrf.mxu2  ;;  %v5455_v19 = vunpack.c.l.bf16 %v5418_v62 }
 0x2dc   : > { %v5160_v4 = vadd.f32 %v5083_v23, %v4936_v8  ;;  %v3793_v59 = vadd.f32 %v3744_v40, %v3478_v49  ;;  %v5291_v57 = vmul.f32 1.4142135, %v5259_v29 }
 0x2dd   : > { %v5597_v45 = vpop.f32.mrf.mxu1  ;;  %v5488_v52 = vmul.f32 %v8418_v60, %v5455_v19 }
 0x2de   : > { %v5196_v43 = vadd.f32 %v8601_v30, %v5160_v4  ;;  %v4475_v34 = vadd.f32 %v4426_v48, %v3793_v59  ;;  %v5598_v63 = vadd.f32 %v8627_v38, %v5597_v45  ;;  %v6632_v20 = vclamps-f32 %v5291_v57, 256.0 }
 0x2df   : > { %v4429_v7 = vpop.f32.mrf.mxu3 }
 0x2e0   : > { %v5228_v33 = vmul.f32 0.2, %v5196_v43  ;;  %v4901_v28 = vadd.f32 %v4852_v11, %v4475_v34  ;;  %v6678_v10 = vclamps-f32 %v5598_v63, 256.0  ;;  %5387 = vst [vmem:[%s8406_s20 + $0x98] sm:$0xff] %v6632_v20  ;;  %v5419_v15 = vpack.c.bf16 %v6632_v20, %v6632_v20 }
 0x2e1   : > { %v4855_v44 = vpop.f32.mrf.mxu0 }
 0x2e2   : > { %v4937_v5 = vmul.f32 %v8592_v2, %v4901_v28  ;;  %5740 = vst [vmem:[%s8639_s25 + $0x8] sm:$0xff] %v6678_v10  ;;  %v5456_v25 = vunpack.c.l.bf16 %v5419_v15  ;;  %v5260_v50 = vmax.f32 %v5196_v43, %v5228_v33  ;;  %v5098_v43 = vpop.permute.xlu2 %5097 }
 0x2e3   : > { %v3747_v51 = vpop.f32.mrf.mxu2 }
 0x2e4   : > { %v5161_v37 = vadd.f32 %v5088_v47, %v4937_v5  ;;  %v3794_v26 = vadd.f32 %v3747_v51, %v8835_v58  ;;  %v5489_v46 = vmul.f32 %v8418_v60, %v5456_v25  ;;  %v5292_v0 = vmul.f32 1.4142135, %v5260_v50 }
 0x2e5   : > { %v5600_v31 = vpop.f32.mrf.mxu1 }
 0x2e6   : > { %v5197_v1 = vadd.f32 %v8601_v30, %v5161_v37  ;;  %v4476_v24 = vadd.f32 %v4429_v7, %v3794_v26  ;;  %v5601_v36 = vadd.f32 %v8627_v38, %v5600_v31  ;;  %v5511_v3 = vpack.c.bf16 %v5489_v46, %v5488_v52  ;;  %v8838_v7 = vld [vmem:[#allocation19_spill] sm:$0xff]  ;;  %v8839_v26 = vld [vmem:[#allocation20_spill] sm:$0xff]  ;;  %v8840_v46 = vld [vmem:[#allocation18_spill] sm:$0xff] }
 0x2e7   : > { %v4431_v27 = vpop.f32.mrf.mxu3  ;;  %v6633_v42 = vclamps-f32 %v5292_v0, 256.0  ;;  %v3482_v0 = vadd.f32 %v8840_v46, %v8839_v26 }
 0x2e8   : > { %v5229_v55 = vmul.f32 0.2, %v5197_v1  ;;  %v4902_v9 = vadd.f32 %v4855_v44, %v4476_v24  ;;  %v6679_v41 = vclamps-f32 %v5601_v36, 256.0  ;;  %5639 = vmatmul.bf16.gmra.mxu1 %v5511_v3  ;;  %v5103_v24 = vpop.permute.xlu0 %5102 }
 0x2e9   : > { %v4857_v22 = vpop.f32.mrf.mxu0  ;;  %5388 = vst [vmem:[%s8406_s20 + $0xa0] sm:$0xff] %v6633_v42  ;;  %v5420_v54 = vpack.c.bf16 %v6633_v42, %v6633_v42 }
 0x2ea   : > { %v4938_v61 = vmul.f32 %v8592_v2, %v4902_v9  ;;  %5741 = vst [vmem:[%s8639_s25 + $0x10] sm:$0xff] %v6679_v41  ;;  %v5261_v14 = vmax.f32 %v5197_v1, %v5229_v55 }
 0x2eb   : > { %v3749_v16 = vpop.f32.mrf.mxu2  ;;  %v5457_v8 = vunpack.c.l.bf16 %v5420_v54 }
 0x2ec   : > { %v5162_v48 = vadd.f32 %v5093_v17, %v4938_v61  ;;  %v3795_v13 = vadd.f32 %v3749_v16, %v3480_v39  ;;  %v5293_v12 = vmul.f32 1.4142135, %v5261_v14 }
 0x2ed   : > { %v5602_v18 = vpop.f32.mrf.mxu1  ;;  %v5490_v63 = vmul.f32 %v8418_v60, %v5457_v8 }
 0x2ee   : > { %v5198_v32 = vadd.f32 %v8601_v30, %v5162_v48  ;;  %v4477_v11 = vadd.f32 %v4431_v27, %v3795_v13  ;;  %v5603_v56 = vadd.f32 %v8627_v38, %v5602_v18  ;;  %v6634_v6 = vclamps-f32 %v5293_v12, 256.0 }
 0x2ef   : > { %v4434_v49 = vpop.f32.mrf.mxu3 }
 0x2f0   : > { %v5230_v29 = vmul.f32 0.2, %v5198_v32  ;;  %v4903_v23 = vadd.f32 %v4857_v22, %v4477_v11  ;;  %v6680_v40 = vclamps-f32 %v5603_v56, 256.0  ;;  %5389 = vst [vmem:[%s8406_s20 + $0xa8] sm:$0xff] %v6634_v6  ;;  %v5421_v62 = vpack.c.bf16 %v6634_v6, %v6634_v6 }
 0x2f1   : > { %v4860_v4 = vpop.f32.mrf.mxu0 }
 0x2f2   : > { %v4939_v59 = vmul.f32 %v8592_v2, %v4903_v23  ;;  %5742 = vst [vmem:[%s8639_s25 + $0x18] sm:$0xff] %v6680_v40  ;;  %v5458_v57 = vunpack.c.l.bf16 %v5421_v62  ;;  %v5262_v45 = vmax.f32 %v5198_v32, %v5230_v29  ;;  %v5108_v32 = vpop.permute.xlu1 %5107 }
 0x2f3   : > { %v3752_v34 = vpop.f32.mrf.mxu2 }
 0x2f4   : > { %v5163_v20 = vadd.f32 %v5098_v43, %v4939_v59  ;;  %v3796_v19 = vadd.f32 %v3752_v34, %v8838_v7  ;;  %v5491_v33 = vmul.f32 %v8418_v60, %v5458_v57  ;;  %v5294_v28 = vmul.f32 1.4142135, %v5262_v45 }
 0x2f5   : > { %v5605_v10 = vpop.f32.mrf.mxu1 }
 0x2f6   : > { %v5199_v15 = vadd.f32 %v8601_v30, %v5163_v20  ;;  %v4478_v44 = vadd.f32 %v4434_v49, %v3796_v19  ;;  %v5606_v5 = vadd.f32 %v8627_v38, %v5605_v10  ;;  %v5512_v25 = vpack.c.bf16 %v5491_v33, %v5490_v63  ;;  %v8841_v49 = vld [vmem:[#allocation22_spill] sm:$0xff]  ;;  %v8842_v19 = vld [vmem:[#allocation23_spill] sm:$0xff]  ;;  %v8843_v33 = vld [vmem:[#allocation21_spill] sm:$0xff] }
 0x2f7   : > { %v4436_v50 = vpop.f32.mrf.mxu3  ;;  %v6635_v47 = vclamps-f32 %v5294_v28, 256.0  ;;  %v3484_v28 = vadd.f32 %v8843_v33, %v8842_v19 }
 0x2f8   : > { %v5231_v51 = vmul.f32 0.2, %v5199_v15  ;;  %v4904_v52 = vadd.f32 %v4860_v4, %v4478_v44  ;;  %v6681_v37 = vclamps-f32 %v5606_v5, 256.0  ;;  %5644 = vmatmul.bf16.gmra.mxu1 %v5512_v25  ;;  %v5113_v44 = vpop.permute.xlu2 %5112 }
 0x2f9   : > { %v4862_v58 = vpop.f32.mrf.mxu0  ;;  %5390 = vst [vmem:[%s8406_s20 + $0xb0] sm:$0xff] %v6635_v47  ;;  %v5422_v3 = vpack.c.bf16 %v6635_v47, %v6635_v47 }
 0x2fa   : > { %v4940_v31 = vmul.f32 %v8592_v2, %v4904_v52  ;;  %5743 = vst [vmem:[%s8639_s25 + $0x20] sm:$0xff] %v6681_v37  ;;  %v5263_v1 = vmax.f32 %v5199_v15, %v5231_v51 }
 0x2fb   : > { %v3754_v36 = vpop.f32.mrf.mxu2  ;;  %v5459_v61 = vunpack.c.l.bf16 %v5422_v3 }
 0x2fc   : > { %v5164_v27 = vadd.f32 %v5103_v24, %v4940_v31  ;;  %v3797_v42 = vadd.f32 %v3754_v36, %v3482_v0  ;;  %v5295_v55 = vmul.f32 1.4142135, %v5263_v1 }
 0x2fd   : > { %v5607_v9 = vpop.f32.mrf.mxu1  ;;  %v5492_v56 = vmul.f32 %v8418_v60, %v5459_v61 }
 0x2fe   : > { %v5200_v41 = vadd.f32 %v8601_v30, %v5164_v27  ;;  %v4479_v22 = vadd.f32 %v4436_v50, %v3797_v42  ;;  %v5608_v35 = vadd.f32 %v8627_v38, %v5607_v9  ;;  %v6636_v53 = vclamps-f32 %v5295_v55, 256.0 }
 0x2ff   : > { %v4439_v39 = vpop.f32.mrf.mxu3 }
 0x300   : > { %v5232_v14 = vmul.f32 0.2, %v5200_v41  ;;  %v4905_v17 = vadd.f32 %v4862_v58, %v4479_v22  ;;  %v6682_v16 = vclamps-f32 %v5608_v35, 256.0  ;;  %5391 = vst [vmem:[%s8406_s20 + $0xb8] sm:$0xff] %v6636_v53  ;;  %v5423_v54 = vpack.c.bf16 %v6636_v53, %v6636_v53 }
 0x301   : > { %v4865_v48 = vpop.f32.mrf.mxu0 }
 0x302   : > { %v4941_v13 = vmul.f32 %v8592_v2, %v4905_v17  ;;  %5744 = vst [vmem:[%s8639_s25 + $0x28] sm:$0xff] %v6682_v16  ;;  %v5460_v12 = vunpack.c.l.bf16 %v5423_v54  ;;  %v5264_v18 = vmax.f32 %v5200_v41, %v5232_v14  ;;  %v5118_v41 = vpop.permute.xlu0 %5117 }
 0x303   : > { %v3757_v11 = vpop.f32.mrf.mxu2 }
 0x304   : > { %v5165_v6 = vadd.f32 %v5108_v32, %v4941_v13  ;;  %v3798_v8 = vadd.f32 %v3757_v11, %v8841_v49  ;;  %v5493_v29 = vmul.f32 %v8418_v60, %v5460_v12  ;;  %v5296_v23 = vmul.f32 1.4142135, %v5264_v18  ;;  %v8845_v49 = vld [vmem:[#allocation24_spill] sm:$0xff] }
 0x305   : > { %v5610_v40 = vpop.f32.mrf.mxu1 }
 0x306   : > { %v5201_v62 = vadd.f32 %v8601_v30, %v5165_v6  ;;  %v4480_v4 = vadd.f32 %v4439_v39, %v3798_v8  ;;  %v5611_v59 = vadd.f32 %v8627_v38, %v5610_v40  ;;  %v5513_v57 = vpack.c.bf16 %v5493_v29, %v5492_v56  ;;  %v8844_v39 = vld [vmem:[#allocation3_spill] sm:$0xff]  ;;  %v8846_v8 = vld [vmem:[#allocation4_spill] sm:$0xff] }
 0x307   : > { %v4441_v45 = vpop.f32.mrf.mxu3  ;;  %v6637_v43 = vclamps-f32 %v5296_v23, 256.0  ;;  %v3486_v29 = vadd.f32 %v8846_v8, %v8845_v49  ;;  %v5123_v23 = vpop.permute.xlu1 %5122 }
 0x308   : > { %v5233_v34 = vmul.f32 0.2, %v5201_v62  ;;  %v4906_v63 = vadd.f32 %v4865_v48, %v4480_v4  ;;  %v6683_v20 = vclamps-f32 %v5611_v59, 256.0  ;;  %5649 = vmatmul.bf16.gmra.mxu1 %v5513_v57 }
 0x309   : > { %v4867_v7 = vpop.f32.mrf.mxu0  ;;  %5392 = vst [vmem:[%s8406_s20 + $0xc0] sm:$0xff] %v6637_v43  ;;  %v5424_v25 = vpack.c.bf16 %v6637_v43, %v6637_v43 }
 0x30a   : > { %v4942_v10 = vmul.f32 %v8592_v2, %v4906_v63  ;;  %5745 = vst [vmem:[%s8639_s25 + $0x30] sm:$0xff] %v6683_v20  ;;  %v5265_v15 = vmax.f32 %v5201_v62, %v5233_v34 }
 0x30b   : > { %v3759_v5 = vpop.f32.mrf.mxu2  ;;  %v5461_v31 = vunpack.c.l.bf16 %v5424_v25  ;;  %v5128_v25 = vpop.permute.xlu2 %5127 }
 0x30c   : > { %v5166_v50 = vadd.f32 %v5113_v44, %v4942_v10  ;;  %v3799_v47 = vadd.f32 %v3759_v5, %v3484_v28  ;;  %v5297_v51 = vmul.f32 1.4142135, %v5265_v15 }
 0x30d   : > { %v5612_v52 = vpop.f32.mrf.mxu1  ;;  %v5494_v35 = vmul.f32 %v8418_v60, %v5461_v31 }
 0x30e   : > { %v5202_v37 = vadd.f32 %v8601_v30, %v5166_v50  ;;  %v4481_v58 = vadd.f32 %v4441_v45, %v3799_v47  ;;  %v5613_v26 = vadd.f32 %v8627_v38, %v5612_v52  ;;  %v6638_v46 = vclamps-f32 %v5297_v51, 256.0 }
 0x30f   : > { %v4444_v0 = vpop.f32.mrf.mxu3 }
 0x310   : > { %v5234_v1 = vmul.f32 0.2, %v5202_v37  ;;  %v4907_v24 = vadd.f32 %v4867_v7, %v4481_v58  ;;  %v6684_v36 = vclamps-f32 %v5613_v26, 256.0  ;;  %5393 = vst [vmem:[%s8406_s20 + $0xc8] sm:$0xff] %v6638_v46  ;;  %v5425_v3 = vpack.c.bf16 %v6638_v46, %v6638_v46  ;;  %v8847_v46 = vld [vmem:[#allocation5_spill] sm:$0xff] }
 0x311   : > { %v4870_v27 = vpop.f32.mrf.mxu0 }
 0x312   : > { %v4943_v42 = vmul.f32 %v8592_v2, %v4907_v24  ;;  %5746 = vst [vmem:[%s8639_s25 + $0x38] sm:$0xff] %v6684_v36  ;;  %v5462_v55 = vunpack.c.l.bf16 %v5425_v3  ;;  %v5266_v9 = vmax.f32 %v5202_v37, %v5234_v1 }
 0x313   : > { %v3762_v22 = vpop.f32.mrf.mxu2 }
 0x314   : > { %v5167_v53 = vadd.f32 %v5118_v41, %v4943_v42  ;;  %v3800_v61 = vadd.f32 %v3762_v22, %v8844_v39  ;;  %v5495_v14 = vmul.f32 %v8418_v60, %v5462_v55  ;;  %v5298_v17 = vmul.f32 1.4142135, %v5266_v9 }
 0x315   : > { %v5615_v16 = vpop.f32.mrf.mxu1 }
 0x316   : > { %v5203_v54 = vadd.f32 %v8601_v30, %v5167_v53  ;;  %v4482_v48 = vadd.f32 %v4444_v0, %v3800_v61  ;;  %v5616_v13 = vadd.f32 %v8627_v38, %v5615_v16  ;;  %v5514_v12 = vpack.c.bf16 %v5495_v14, %v5494_v35  ;;  %v8848_v53 = vld [vmem:[#allocation6_spill] sm:$0xff] }
 0x317   : > { %v6639_v18 = vclamps-f32 %v5298_v17, 256.0  ;;  %v4446_v6 = vpop.f32.mrf.mxu3  ;;  %v3488_v39 = vadd.f32 %v8619_v21, %v8848_v53  ;;  %v5133_v17 = vpop.permute.xlu0 %5132 }
 0x318   : > { %v5235_v32 = vmul.f32 0.2, %v5203_v54  ;;  %v4908_v11 = vadd.f32 %v4870_v27, %v4482_v48  ;;  %v6685_v56 = vclamps-f32 %v5616_v13, 256.0  ;;  %5654 = vmatmul.bf16.gmra.mxu1 %v5514_v12 }
 0x319   : > { %5394 = vst [vmem:[%s8406_s20 + $0xd0] sm:$0xff] %v6639_v18  ;;  %v4872_v4 = vpop.f32.mrf.mxu0  ;;  %v5426_v57 = vpack.c.bf16 %v6639_v18, %v6639_v18 }
 0x31a   : > { %v4944_v40 = vmul.f32 %v8592_v2, %v4908_v11  ;;  %5747 = vst [vmem:[%s8639_s25 + $0x40] sm:$0xff] %v6685_v56  ;;  %v5267_v62 = vmax.f32 %v5203_v54, %v5235_v32 }
 0x31b   : > { %v3764_v59 = vpop.f32.mrf.mxu2  ;;  %v5463_v28 = vunpack.c.l.bf16 %v5426_v57 }
 0x31c   : > { %v5168_v45 = vadd.f32 %v5123_v23, %v4944_v40  ;;  %v3801_v43 = vadd.f32 %v3764_v59, %v3486_v29  ;;  %v5299_v34 = vmul.f32 1.4142135, %v5267_v62 }
 0x31d   : > { %v5617_v63 = vpop.f32.mrf.mxu1  ;;  %v5496_v58 = vmul.f32 %v8418_v60, %v5463_v28 }
 0x31e   : > { %v5204_v20 = vadd.f32 %v8601_v30, %v5168_v45  ;;  %v4483_v7 = vadd.f32 %v4446_v6, %v3801_v43  ;;  %v5618_v19 = vadd.f32 %v8627_v38, %v5617_v63  ;;  %v6640_v33 = vclamps-f32 %v5299_v34, 256.0  ;;  %v5138_v45 = vpop.permute.xlu1 %5137 }
 0x31f   : > { %v4449_v52 = vpop.f32.mrf.mxu3 }
 0x320   : > { %v5236_v10 = vmul.f32 0.2, %v5204_v20  ;;  %v4909_v15 = vadd.f32 %v4872_v4, %v4483_v7  ;;  %v6686_v44 = vclamps-f32 %v5618_v19, 256.0  ;;  %5395 = vst [vmem:[%s8406_s20 + $0xd8] sm:$0xff] %v6640_v33  ;;  %v5427_v5 = vpack.c.bf16 %v6640_v33, %v6640_v33 }
 0x321   : > { %v4875_v24 = vpop.f32.mrf.mxu0 }
 0x322   : > { %v4945_v50 = vmul.f32 %v8592_v2, %v4909_v15  ;;  %5748 = vst [vmem:[%s8639_s25 + $0x48] sm:$0xff] %v6686_v44  ;;  %v5464_v47 = vunpack.c.l.bf16 %v5427_v5  ;;  %v5268_v51 = vmax.f32 %v5204_v20, %v5236_v10 }
 0x323   : > { %v3767_v37 = vpop.f32.mrf.mxu2 }
 0x324   : > { %v5169_v26 = vadd.f32 %v5128_v25, %v4945_v50  ;;  %v3802_v0 = vadd.f32 %v3767_v37, %v8847_v46  ;;  %v5497_v31 = vmul.f32 %v8418_v60, %v5464_v47  ;;  %v5300_v1 = vmul.f32 1.4142135, %v5268_v51 }
 0x325   : > { %v5620_v36 = vpop.f32.mrf.mxu1 }
 0x326   : > { %v5205_v3 = vadd.f32 %v8601_v30, %v5169_v26  ;;  %v4484_v27 = vadd.f32 %v4449_v52, %v3802_v0  ;;  %v5621_v42 = vadd.f32 %v8627_v38, %v5620_v36  ;;  %v5515_v55 = vpack.c.bf16 %v5497_v31, %v5496_v58 }
 0x327   : > { %v6641_v9 = vclamps-f32 %v5300_v1, 256.0  ;;  %v4451_v18 = vpop.f32.mrf.mxu3 }
 0x328   : > { %v5237_v41 = vmul.f32 0.2, %v5205_v3  ;;  %v4910_v22 = vadd.f32 %v4875_v24, %v4484_v27  ;;  %v6687_v35 = vclamps-f32 %v5621_v42, 256.0  ;;  %5659 = vmatmul.bf16.gmra.mxu1 %v5515_v55 }
 0x329   : > { %5396 = vst [vmem:[%s8406_s20 + $0xe0] sm:$0xff] %v6641_v9  ;;  %v5428_v54 = vpack.c.bf16 %v6641_v9, %v6641_v9  ;;  %v4877_v49 = vpop.f32.mrf.mxu0 }
 0x32a   : > { %v4946_v61 = vmul.f32 %v8592_v2, %v4910_v22  ;;  %5749 = vst [vmem:[%s8639_s25 + $0x50] sm:$0xff] %v6687_v35  ;;  %v5269_v14 = vmax.f32 %v5205_v3, %v5237_v41 }
 0x32b   : > { %v3769_v16 = vpop.f32.mrf.mxu2  ;;  %v5465_v8 = vunpack.c.l.bf16 %v5428_v54 }
 0x32c   : > { %v5170_v48 = vadd.f32 %v5133_v17, %v4946_v61  ;;  %v3803_v13 = vadd.f32 %v3769_v16, %v3488_v39  ;;  %v5301_v12 = vmul.f32 1.4142135, %v5269_v14 }
 0x32d   : > { %v5622_v32 = vpop.f32.mrf.mxu1  ;;  %v5498_v34 = vmul.f32 %v8418_v60, %v5465_v8 }
 0x32e   : > { %v5206_v11 = vadd.f32 %v8601_v30, %v5170_v48  ;;  %v4485_v56 = vadd.f32 %v4451_v18, %v3803_v13  ;;  %v5623_v6 = vadd.f32 %v8627_v38, %v5622_v32  ;;  %v6642_v21 = vclamps-f32 %v5301_v12, 256.0 }
 0x330   : > { %v5238_v29 = vmul.f32 0.2, %v5206_v11  ;;  %v4911_v23 = vadd.f32 %v4877_v49, %v4485_v56  ;;  %v6688_v40 = vclamps-f32 %v5623_v6, 256.0  ;;  %5397 = vst [vmem:[%s8406_s20 + $0xe8] sm:$0xff] %v6642_v21  ;;  %v5429_v62 = vpack.c.bf16 %v6642_v21, %v6642_v21 }
 0x332   : > { %v4947_v4 = vmul.f32 %v8592_v2, %v4911_v23  ;;  %5750 = vst [vmem:[%s8639_s25 + $0x58] sm:$0xff] %v6688_v40  ;;  %v5466_v59 = vunpack.c.l.bf16 %v5429_v62  ;;  %v5270_v57 = vmax.f32 %v5206_v11, %v5238_v29 }
 0x334   : > { %v5171_v43 = vadd.f32 %v5138_v45, %v4947_v4  ;;  %v5499_v63 = vmul.f32 %v8418_v60, %v5466_v59  ;;  %v5302_v20 = vmul.f32 1.4142135, %v5270_v57 }
 0x335   : > { %v5625_v7 = vpop.f32.mrf.mxu1 }
 0x336   : > { %v5207_v19 = vadd.f32 %v8601_v30, %v5171_v43  ;;  %v5626_v33 = vadd.f32 %v8627_v38, %v5625_v7  ;;  %v5516_v28 = vpack.c.bf16 %v5499_v63, %v5498_v34  ;;  %v6643_v2 = vclamps-f32 %v5302_v20, 256.0 }
 0x338   : > { %v5239_v10 = vmul.f32 0.2, %v5207_v19  ;;  %v6689_v15 = vclamps-f32 %v5626_v33, 256.0  ;;  %5664 = vmatmul.bf16.gmra.mxu1 %v5516_v28  ;;  %5398 = vst [vmem:[%s8406_s20 + $0xf0] sm:$0xff] %v6643_v2  ;;  %v5430_v25 = vpack.c.bf16 %v6643_v2, %v6643_v2 }
 0x33a   : > { %5751 = vst [vmem:[%s8639_s25 + $0x60] sm:$0xff] %v6689_v15  ;;  %v5271_v44 = vmax.f32 %v5207_v19, %v5239_v10  ;;  %v5467_v37 = vunpack.c.l.bf16 %v5430_v25 }
 0x33c   : > { %v5303_v5 = vmul.f32 1.4142135, %v5271_v44  ;;  %v5500_v26 = vmul.f32 %v8418_v60, %v5467_v37 }
 0x33d   : > { %v5627_v50 = vpop.f32.mrf.mxu1 }
 0x33e   : > { %v5628_v47 = vadd.f32 %v8627_v38, %v5627_v50  ;;  %v6644_v51 = vclamps-f32 %v5303_v5, 256.0 }
 0x340   : > { %v6690_v30 = vclamps-f32 %v5628_v47, 256.0  ;;  %5399 = vst [vmem:[%s8406_s20 + $0xf8] sm:$0xff] %v6644_v51  ;;  %v5431_v52 = vpack.c.bf16 %v6644_v51, %v6644_v51 }
 0x342   : > { %5752 = vst [vmem:[%s8639_s25 + $0x68] sm:$0xff] %v6690_v30  ;;  %v5468_v58 = vunpack.c.l.bf16 %v5431_v52 }
 0x344   : > { %v5501_v46 = vmul.f32 %v8418_v60, %v5468_v58 }
 0x345   : > { %v5630_v0 = vpop.f32.mrf.mxu1 }
 0x346   : > { %v5631_v31 = vadd.f32 %v8627_v38, %v5630_v0  ;;  %v5517_v1 = vpack.c.bf16 %v5501_v46, %v5500_v26 }
 0x348   : > { %v6691_v24 = vclamps-f32 %v5631_v31, 256.0  ;;  %5669 = vmatmul.bf16.gmra.mxu1 %v5517_v1 }
 0x34a   : > { %5753 = vst [vmem:[%s8639_s25 + $0x70] sm:$0xff] %v6691_v24 }
 0x34d   : > { %v5632_v36 = vpop.f32.mrf.mxu1 }
 0x34e   : > { %v5633_v3 = vadd.f32 %v8627_v38, %v5632_v36 }
 0x350   : > { %v6692_v27 = vclamps-f32 %v5633_v3, 256.0 }
 0x352   : > { %5754 = vst [vmem:[%s8639_s25 + $0x78] sm:$0xff] %v6692_v27 }
 0x355   : > { %v5635_v42 = vpop.f32.mrf.mxu1 }
 0x356   : > { %v5636_v55 = vadd.f32 %v8627_v38, %v5635_v42 }
 0x358   : > { %v6693_v9 = vclamps-f32 %v5636_v55, 256.0 }
 0x35a   : > { %5755 = vst [vmem:[%s8639_s25 + $0x80] sm:$0xff] %v6693_v9 }
 0x35d   : > { %v5637_v60 = vpop.f32.mrf.mxu1 }
 0x35e   : > { %v5638_v41 = vadd.f32 %v8627_v38, %v5637_v60 }
 0x360   : > { %v6694_v22 = vclamps-f32 %v5638_v41, 256.0 }
 0x362   : > { %5756 = vst [vmem:[%s8639_s25 + $0x88] sm:$0xff] %v6694_v22 }
 0x365   : > { %v5640_v35 = vpop.f32.mrf.mxu1 }
 0x366   : > { %v5641_v53 = vadd.f32 %v8627_v38, %v5640_v35 }
 0x368   : > { %v6695_v39 = vclamps-f32 %v5641_v53, 256.0 }
 0x36a   : > { %5757 = vst [vmem:[%s8639_s25 + $0x90] sm:$0xff] %v6695_v39 }
 0x36d   : > { %v5642_v61 = vpop.f32.mrf.mxu1 }
 0x36e   : > { %v5643_v14 = vadd.f32 %v8627_v38, %v5642_v61 }
 0x370   : > { %v6696_v17 = vclamps-f32 %v5643_v14, 256.0 }
 0x372   : > { %5758 = vst [vmem:[%s8639_s25 + $0x98] sm:$0xff] %v6696_v17 }
 0x375   : > { %v5645_v16 = vpop.f32.mrf.mxu1 }
 0x376   : > { %v5646_v54 = vadd.f32 %v8627_v38, %v5645_v16 }
 0x378   : > { %v6697_v48 = vclamps-f32 %v5646_v54, 256.0 }
 0x37a   : > { %5759 = vst [vmem:[%s8639_s25 + $0xa0] sm:$0xff] %v6697_v48 }
 0x37d   : > { %v5647_v13 = vpop.f32.mrf.mxu1 }
 0x37e   : > { %v5648_v12 = vadd.f32 %v8627_v38, %v5647_v13 }
 0x380   : > { %v6698_v18 = vclamps-f32 %v5648_v12, 256.0 }
 0x382   : > { %5760 = vst [vmem:[%s8639_s25 + $0xa8] sm:$0xff] %v6698_v18 }
 0x385   : > { %v5650_v32 = vpop.f32.mrf.mxu1 }
 0x386   : > { %v5651_v11 = vadd.f32 %v8627_v38, %v5650_v32 }
 0x388   : > { %v6699_v56 = vclamps-f32 %v5651_v11, 256.0 }
 0x38a   : > { %5761 = vst [vmem:[%s8639_s25 + $0xb0] sm:$0xff] %v6699_v56 }
 0x38d   : > { %v5652_v6 = vpop.f32.mrf.mxu1 }
 0x38e   : > { %v5653_v21 = vadd.f32 %v8627_v38, %v5652_v6 }
 0x390   : > { %v6700_v49 = vclamps-f32 %v5653_v21, 256.0 }
 0x392   : > { %5762 = vst [vmem:[%s8639_s25 + $0xb8] sm:$0xff] %v6700_v49 }
 0x395   : > { %v5655_v8 = vpop.f32.mrf.mxu1 }
 0x396   : > { %v5656_v29 = vadd.f32 %v8627_v38, %v5655_v8 }
 0x398   : > { %v6701_v23 = vclamps-f32 %v5656_v29, 256.0 }
 0x39a   : > { %5763 = vst [vmem:[%s8639_s25 + $0xc0] sm:$0xff] %v6701_v23 }
 0x39d   : > { %v5657_v40 = vpop.f32.mrf.mxu1 }
 0x39e   : > { %v5658_v62 = vadd.f32 %v8627_v38, %v5657_v40 }
 0x3a0   : > { %v6702_v4 = vclamps-f32 %v5658_v62, 256.0 }
 0x3a2   : > { %5764 = vst [vmem:[%s8639_s25 + $0xc8] sm:$0xff] %v6702_v4 }
 0x3a5   : > { %v5660_v59 = vpop.f32.mrf.mxu1 }
 0x3a6   : > { %v5661_v57 = vadd.f32 %v8627_v38, %v5660_v59 }
 0x3a8   : > { %v6703_v45 = vclamps-f32 %v5661_v57, 256.0 }
 0x3aa   : > { %5765 = vst [vmem:[%s8639_s25 + $0xd0] sm:$0xff] %v6703_v45 }
 0x3ad   : > { %v5662_v43 = vpop.f32.mrf.mxu1 }
 0x3ae   : > { %v5663_v34 = vadd.f32 %v8627_v38, %v5662_v43 }
 0x3b0   : > { %v6704_v63 = vclamps-f32 %v5663_v34, 256.0 }
 0x3b2   : > { %5766 = vst [vmem:[%s8639_s25 + $0xd8] sm:$0xff] %v6704_v63 }
 0x3b5   : > { %v5665_v20 = vpop.f32.mrf.mxu1 }
 0x3b6   : > { %v5666_v7 = vadd.f32 %v8627_v38, %v5665_v20 }
 0x3b8   : > { %v6705_v19 = vclamps-f32 %v5666_v7, 256.0 }
 0x3ba   : > { %5767 = vst [vmem:[%s8639_s25 + $0xe0] sm:$0xff] %v6705_v19 }
 0x3bd   : > { %v5667_v33 = vpop.f32.mrf.mxu1 }
 0x3be   : > { %v5668_v28 = vadd.f32 %v8627_v38, %v5667_v33 }
 0x3c0   : > { %v6706_v2 = vclamps-f32 %v5668_v28, 256.0 }
 0x3c2   : > { %5768 = vst [vmem:[%s8639_s25 + $0xe8] sm:$0xff] %v6706_v2 }
 0x3c5   : > { %v5670_v10 = vpop.f32.mrf.mxu1 }
 0x3c6   : > { %v5671_v15 = vadd.f32 %v8627_v38, %v5670_v10 }
 0x3c8   : > { %v6707_v44 = vclamps-f32 %v5671_v15, 256.0 }
 0x3ca   : > { %5769 = vst [vmem:[%s8639_s25 + $0xf0] sm:$0xff] %v6707_v44 }
 0x3cd   : > { %v5672_v5 = vpop.f32.mrf.mxu1 }
 0x3ce   : > { %v5673_v25 = vadd.f32 %v8627_v38, %v5672_v5 }
 0x3d0   : > { %v6708_v50 = vclamps-f32 %v5673_v25, 256.0 }
 0x3d2   : > { %5770 = vst [vmem:[%s8639_s25 + $0xf8] sm:$0xff] %v6708_v50 }
 0x3d3 PF: > { %s21_s15 = sadd.s32 1, %s7036_s15   ;;  %s8849_s13 = smov %s7032_s14 }
 0x3d4   : > { %p18_p5 = scmp.ge.s32.totalorder %s21_s15, 4   ;;  %s8850_s14 = smov %s8852_s16 }
 0x3d6   :  { %20 = sbr.rel (!%p18_p5) target bundleno = 2 (0x2), region = 121 }

</bundles_post_ra>
